<compile_context>
chip_gen: v5e
topology: v5e:2x2
jax: 0.10.0
libtpu: 0.0.40
codegen_flags: <defaults>
</compile_context>

<pallas_src>
import numpy as np
import jax
import jax.numpy as jnp
from jax.experimental import pallas as pl
from jax.experimental.pallas import tpu as pltpu

EPS = float(jnp.finfo(jnp.float32).eps)  # torch nn.RMSNorm(eps=None) on fp32


def _rms(v, g):
    ms = jnp.mean(v * v, axis=-1, keepdims=True)
    return v * jax.lax.rsqrt(ms + EPS) * g


# ------------------------------ Pallas kernel ------------------------------ #

def fused_forward_kernel(x_ref, wts_ref, bts_ref, gns_ref,
                         w1s_ref, b1s_ref, w2s_ref, b2s_ref,
                         gf_ref, wo_ref, o_ref):
    BB, T, E = x_ref.shape                   # batch block, seq, embed
    L = wts_ref.shape[0]                     # number of layers
    V = wo_ref.shape[1]                      # vocab (output lanes, mult of 128)
    R = BB * T                               # flattened rows fed to the MXU

    h = x_ref[...].reshape(R, E)             # f32 residual stream

    # TODO(synk): switch to lax.fori_loop with dynamic wts_ref[l] indexing (or
    # a grid axis) if n_layer grows -- static unroll does not bound live ranges.
    for l in range(L):                       # static unroll over layers (L small)
        gn = gns_ref[l]                      # (2, E): [rmsnorm1_w; rmsnorm2_w]
        wt = wts_ref[l]                      # (T, T) lower-tri Toeplitz, bf16
        bt = bts_ref[l]                      # (T, 1) f32 bias column

        # --- mixer branch: RMSNorm1 -> causal Toeplitz mix -> residual ---
        # One batched dot_general over the BB samples (no per-sample Python
        # list, no concatenate copy):  mix[b,t,e] = sum_i wt[t,i] * n1[b,i,e].
        n1 = _rms(h, gn[0:1]).astype(jnp.bfloat16).reshape(BB, T, E)
        wt_b = jnp.broadcast_to(wt, (BB, T, T))
        mix = jax.lax.dot_general(
            wt_b, n1,
            dimension_numbers=(((2,), (1,)), ((0,), (0,))),
            preferred_element_type=jnp.float32)          # (BB, T, E) f32
        mix = mix + bt[None, :, :]                       # + bias[t]
        h = h + mix.reshape(R, E)

        # --- MLP branch: RMSNorm2 -> fc1 -> SiLU -> fc2 -> residual ---
        n2 = _rms(h, gn[1:2]).astype(jnp.bfloat16)
        a = jnp.dot(n2, w1s_ref[l],
                    preferred_element_type=jnp.float32) + b1s_ref[l]
        # exact SiLU via tanh-form sigmoid: one EUP op per element
        a = a * (0.5 * (jnp.tanh(0.5 * a) + 1.0))
        y = jnp.dot(a.astype(jnp.bfloat16), w2s_ref[l],
                    preferred_element_type=jnp.float32) + b2s_ref[l]
        h = h + y

    # --- head: final RMSNorm -> output projection (lane-dense V store) ---
    n = _rms(h, gf_ref[...]).astype(jnp.bfloat16)
    logits = jnp.dot(n, wo_ref[...], preferred_element_type=jnp.float32)
    o_ref[...] = logits.reshape(BB, T, V).astype(o_ref.dtype)


# ------------------------------ JAX wrapper -------------------------------- #

def _weight_spec(a):
    # Constant index map -> DMA'd once; Buffered(1) -> single-buffered so the
    # resident weight stack occupies VMEM only once (halves weight footprint,
    # matters most on v7x's 64 MiB VMEM).
    n = a.ndim
    return pl.BlockSpec(a.shape, lambda i: (0,) * n,
                        pipeline_mode=pl.Buffered(1))


def _auto_batch_block(B):
    # Grid of length 2 with "parallel" semantics shards the batch across both
    # v7x TensorCores; on v5e/v6e (single TC, serial grid) two large steps cost
    # only ~0.7 us of step overhead while keeping BB*T rows per MXU dot high.
    return B // 2 if (B % 2 == 0 and B >= 2) else B


def toeplitz_mixer_forward(tokens, params, kernel_params=None, *, batch_block=None):
    if kernel_params is None:
        kernel_params = pack_params(params)
    kp = kernel_params

    h = jnp.take(params["emb"], tokens, axis=0).astype(jnp.float32)  # (B,T,E) glue
    B, T, E = h.shape
    V = kp["wo"].shape[1]
    M = kp["w1s"].shape[-1]

    BB = _auto_batch_block(B) if batch_block is None else batch_block
    assert B % BB == 0, "batch must be divisible by batch_block"
    R = BB * T

    # Explicit VMEM budget: single-buffered weights + double-buffered activation
    # blocks + a rough in-kernel live set, floored at 32 MiB, capped at 64 MiB.
    weight_keys = ("wts", "bts", "gns", "w1s", "b1s", "w2s", "b2s", "gf", "wo")
    weight_bytes = sum(kp[k].size * kp[k].dtype.itemsize for k in weight_keys)
    act_bytes = 2 * (BB * T * E * 4) + 2 * (BB * T * V * 4)
    live_bytes = R * (6 * E * 4 + 3 * M * 4 + 2 * V * 4)
    need = weight_bytes + act_bytes + live_bytes
    vmem_limit = int(min(64 * 1024 * 1024, max(32 * 1024 * 1024, 2 * need)))

    return pl.pallas_call(
        fused_forward_kernel,
        out_shape=jax.ShapeDtypeStruct((B, T, V), jnp.float32),
        grid=(B // BB,),
        in_specs=[
            pl.BlockSpec((BB, T, E), lambda i: (i, 0, 0)),   # activations
            _weight_spec(kp["wts"]),                          # (L,T,T) bf16
            _weight_spec(kp["bts"]),                          # (L,T,1)
            _weight_spec(kp["gns"]),                          # (L,2,E)
            _weight_spec(kp["w1s"]),                          # (L,E,M) bf16
            _weight_spec(kp["b1s"]),                          # (L,1,M)
            _weight_spec(kp["w2s"]),                          # (L,M,E) bf16
            _weight_spec(kp["b2s"]),                          # (L,1,E)
            _weight_spec(kp["gf"]),                           # (1,E)
            _weight_spec(kp["wo"]),                           # (E,V) bf16
        ],
        out_specs=pl.BlockSpec((BB, T, V), lambda i: (i, 0, 0)),
        compiler_params=pltpu.CompilerParams(
            dimension_semantics=("parallel",),
            vmem_limit_bytes=vmem_limit),
    )(h, kp["wts"], kp["bts"], kp["gns"], kp["w1s"], kp["b1s"],
      kp["w2s"], kp["b2s"], kp["gf"], kp["wo"])


def toeplitz_matrix(w, T):
    # Wl[t, i] = w[t - i] for i <= t else 0.  Left-multiplying n1 (T, E) by this
    # lower-triangular matrix equals torch's (B*E, T) @ upper-tri formulation.
    assert T <= w.shape[0], "seq_len must be <= block_size"
    d = jnp.arange(T)[:, None] - jnp.arange(T)[None, :]
    return jnp.where(d >= 0, w[jnp.clip(d, 0, w.shape[0] - 1)], 0.0).astype(jnp.float32)


def pack_params(params):
    """Stack per-layer f32 params along a layer axis; cast matmul weights to bf16."""
    Ls = params["layers"]
    st = lambda k: jnp.stack([p[k] for p in Ls])
    return {
        "wts": st("Wt").astype(jnp.bfloat16),                               # (L,T,T)
        "bts": st("bt")[:, :, None].astype(jnp.float32),                    # (L,T,1)
        "gns": jnp.stack([jnp.stack([p["g1"], p["g2"]]) for p in Ls]),      # (L,2,E)
        "w1s": st("w1").astype(jnp.bfloat16),                               # (L,E,M)
        "b1s": st("b1")[:, None, :],                                        # (L,1,M)
        "w2s": st("w2").astype(jnp.bfloat16),                               # (L,M,E)
        "b2s": st("b2")[:, None, :],                                        # (L,1,E)
        "gf": params["g_final"][None, :],                                   # (1,E)
        "wo": params["wo"].astype(jnp.bfloat16),                            # (E,V)
    }


# --------------------------- pure-JAX reference ---------------------------- #

def reference_forward(tokens, params):
    h = jnp.take(params["emb"], tokens, axis=0)
    for p in params["layers"]:
        n1 = _rms(h, p["g1"])
        mix = jnp.einsum("ti,bie->bte", p["Wt"], n1) + p["bt"][None, :, None]
        h = h + mix
        n2 = _rms(h, p["g2"])
        a = n2 @ p["w1"] + p["b1"]
        a = a * jax.nn.sigmoid(a)
        h = h + a @ p["w2"] + p["b2"]
    n = _rms(h, params["g_final"])
    return n @ params["wo"]


# ------------------------------- parameters -------------------------------- #

def init_params(key, vocab, block_size, E, M, n_layer, T):
    # Deterministic synthetic init. Linear/Embedding ~ N(0, 0.02) like the torch
    # module; RMSNorm weights ones; Toeplitz weight/bias use small random values
    # (torch inits them to zero, which would make the mixer a trivial no-op).
    ks = jax.random.split(key, 4 * n_layer + 2)
    layers = []
    for l in range(n_layer):
        k1, k2, k3, k4 = ks[4 * l: 4 * l + 4]
        tw = 0.1 * jax.random.normal(k1, (block_size,), jnp.float32)
        tb = 0.1 * jax.random.normal(k2, (block_size,), jnp.float32)
        fc1_w = 0.02 * jax.random.normal(k3, (M, E), jnp.float32)   # torch layout
        fc2_w = 0.02 * jax.random.normal(k4, (E, M), jnp.float32)   # torch layout
        layers.append({
            "g1": jnp.ones((E,), jnp.float32),
            "g2": jnp.ones((E,), jnp.float32),
            "Wt": toeplitz_matrix(tw, T),               # (T, T) lower-tri
            "bt": tb[:T],                               # (T,)
            "w1": fc1_w.T,                              # (E, M)
            "b1": jnp.zeros((M,), jnp.float32),
            "w2": fc2_w.T,                              # (M, E)
            "b2": jnp.zeros((E,), jnp.float32),
        })
    return {
        "layers": layers,
        "emb": 0.02 * jax.random.normal(ks[-2], (vocab, E), jnp.float32),
        "g_final": jnp.ones((E,), jnp.float32),
        "wo": (0.02 * jax.random.normal(ks[-1], (vocab, E), jnp.float32)).T,  # (E, V)
    }


# ---------------------------------- main ----------------------------------- #

if __name__ == "__main__":
    # Small config consistent with the module: vocab=128, block_size=16,
    # embed_dim=32, mlp_dim=128, n_layer=2.  batch=32 so the auto batch_block
    # (B//2 = 16) gives a grid of 2 "parallel" steps and R = 256 rows per dot.
    VOCAB, BLOCK_SIZE, EMBED, MLP_DIM, N_LAYER = 128, 16, 32, 128, 2
    B, T = 32, 16

    key = jax.random.PRNGKey(0)
    k_params, k_tok = jax.random.split(key)
    params = init_params(k_params, VOCAB, BLOCK_SIZE, EMBED, MLP_DIM, N_LAYER, T)
    kparams = pack_params(params)
    tokens = jax.random.randint(k_tok, (B, T), 0, VOCAB, dtype=jnp.int32)

    logits = toeplitz_mixer_forward(tokens, params, kparams)
    logits = jax.block_until_ready(logits)

    ref = reference_forward(tokens, params)
    np.testing.assert_allclose(np.asarray(logits), np.asarray(ref),
                               atol=1e-2, rtol=2e-2)   # bf16-matmul / f32-acc tolerance
    assert logits.shape == (B, T, VOCAB)
    print("KERNEL_OK")
</pallas_src>

<mosaic_0001>
module attributes {stable_mosaic.version = 11 : i64} {
  func.func @fused_forward_kernel(%arg0: i32, %arg1: memref<16x16x32xf32, #tpu.memory_space<vmem>>, %arg2: memref<2x16x16xbf16, #tpu.memory_space<vmem>>, %arg3: memref<2x16x1xf32, #tpu.memory_space<vmem>>, %arg4: memref<2x2x32xf32, #tpu.memory_space<vmem>>, %arg5: memref<2x32x128xbf16, #tpu.memory_space<vmem>>, %arg6: memref<2x1x128xf32, #tpu.memory_space<vmem>>, %arg7: memref<2x128x32xbf16, #tpu.memory_space<vmem>>, %arg8: memref<2x1x32xf32, #tpu.memory_space<vmem>>, %arg9: memref<1x32xf32, #tpu.memory_space<vmem>>, %arg10: memref<32x128xbf16, #tpu.memory_space<vmem>>, %arg11: memref<16x16x128xf32, #tpu.memory_space<vmem>>) attributes {dimension_semantics = [#tpu.dimension_semantics<parallel>], iteration_bounds = array<i64: 2>, scalar_prefetch = 0 : i64, scratch_operands = 0 : i64, tpu.core_type = #tpu.core_type<tc>, window_params = [{transform_indices = @transform_0, window_bounds = array<i64: 16, 16, 32>}, {pipeline_mode = #tpu.pipeline_mode<synchronous>, transform_indices = @transform_1, window_bounds = array<i64: 2, 16, 16>}, {pipeline_mode = #tpu.pipeline_mode<synchronous>, transform_indices = @transform_2, window_bounds = array<i64: 2, 16, 1>}, {pipeline_mode = #tpu.pipeline_mode<synchronous>, transform_indices = @transform_3, window_bounds = array<i64: 2, 2, 32>}, {pipeline_mode = #tpu.pipeline_mode<synchronous>, transform_indices = @transform_4, window_bounds = array<i64: 2, 32, 128>}, {pipeline_mode = #tpu.pipeline_mode<synchronous>, transform_indices = @transform_5, window_bounds = array<i64: 2, 1, 128>}, {pipeline_mode = #tpu.pipeline_mode<synchronous>, transform_indices = @transform_6, window_bounds = array<i64: 2, 128, 32>}, {pipeline_mode = #tpu.pipeline_mode<synchronous>, transform_indices = @transform_7, window_bounds = array<i64: 2, 1, 32>}, {pipeline_mode = #tpu.pipeline_mode<synchronous>, transform_indices = @transform_8, window_bounds = array<i64: 1, 32>}, {pipeline_mode = #tpu.pipeline_mode<synchronous>, transform_indices = @transform_9, window_bounds = array<i64: 32, 128>}, {transform_indices = @transform_10, window_bounds = array<i64: 16, 16, 128>}]} {
    %c0 = arith.constant 0 : index
    %c0_0 = arith.constant 0 : index
    %c0_1 = arith.constant 0 : index
    %0 = vector.load %arg1[%c0, %c0_0, %c0_1] : memref<16x16x32xf32, #tpu.memory_space<vmem>>, vector<16x16x32xf32>
    %1 = vector.shape_cast %0 : vector<16x16x32xf32> to vector<256x32xf32>
    %c0_2 = arith.constant 0 : index
    %c0_3 = arith.constant 0 : index
    %c0_4 = arith.constant 0 : index
    %2 = vector.load %arg4[%c0_2, %c0_3, %c0_4] : memref<2x2x32xf32, #tpu.memory_space<vmem>>, vector<1x2x32xf32>
    %3 = vector.shape_cast %2 : vector<1x2x32xf32> to vector<2x32xf32>
    %c0_5 = arith.constant 0 : index
    %c0_6 = arith.constant 0 : index
    %c0_7 = arith.constant 0 : index
    %4 = vector.load %arg2[%c0_5, %c0_6, %c0_7] : memref<2x16x16xbf16, #tpu.memory_space<vmem>>, vector<1x16x16xbf16>
    %5 = vector.shape_cast %4 : vector<1x16x16xbf16> to vector<16x16xbf16>
    %c0_8 = arith.constant 0 : index
    %c0_9 = arith.constant 0 : index
    %c0_10 = arith.constant 0 : index
    %6 = vector.load %arg3[%c0_8, %c0_9, %c0_10] : memref<2x16x1xf32, #tpu.memory_space<vmem>>, vector<1x16x1xf32>
    %7 = vector.shape_cast %6 : vector<1x16x1xf32> to vector<16x1xf32>
    %8 = vector.extract_strided_slice %3 {offsets = [0, 0], sizes = [1, 32], strides = [1, 1]} : vector<2x32xf32> to vector<1x32xf32>
    %9 = arith.mulf %1, %1 : vector<256x32xf32>
    %cst = arith.constant dense<0.000000e+00> : vector<256xf32>
    %10 = vector.multi_reduction <add>, %9, %cst [1] : vector<256x32xf32> to vector<256xf32>
    %11 = vector.shape_cast %10 : vector<256xf32> to vector<256x1xf32>
    %cst_11 = arith.constant 3.200000e+01 : f32
    %12 = vector.broadcast %cst_11 : f32 to vector<256x1xf32>
    %13 = arith.divf %11, %12 : vector<256x1xf32>
    %cst_12 = arith.constant 1.1920929E-7 : f32
    %14 = vector.broadcast %cst_12 : f32 to vector<256x1xf32>
    %15 = arith.addf %13, %14 : vector<256x1xf32>
    %16 = math.rsqrt %15 : vector<256x1xf32>
    %17 = vector.broadcast %16 : vector<256x1xf32> to vector<256x32xf32>
    %18 = arith.mulf %1, %17 : vector<256x32xf32>
    %19 = vector.broadcast %8 : vector<1x32xf32> to vector<256x32xf32>
    %20 = arith.mulf %18, %19 : vector<256x32xf32>
    %21 = arith.truncf %20 : vector<256x32xf32> to vector<256x32xbf16>
    %22 = vector.shape_cast %21 : vector<256x32xbf16> to vector<16x16x32xbf16>
    %23 = vector.shape_cast %5 : vector<16x16xbf16> to vector<1x16x16xbf16>
    %24 = vector.broadcast %23 : vector<1x16x16xbf16> to vector<16x16x16xbf16>
    %cst_13 = arith.constant dense<0.000000e+00> : vector<16x16x32xf32>
    %25 = tpu.matmul %24, %22, %cst_13 {dimension_numbers = #tpu.dot_dimension_numbers<[2], [1], [1], [2], [0, 0, 0, 1, 1, 2], [0], [0]>} : vector<16x16x16xbf16>, vector<16x16x32xbf16>, vector<16x16x32xf32> -> vector<16x16x32xf32>
    %26 = vector.shape_cast %7 : vector<16x1xf32> to vector<1x16x1xf32>
    %27 = vector.broadcast %26 : vector<1x16x1xf32> to vector<16x16x32xf32>
    %28 = arith.addf %25, %27 : vector<16x16x32xf32>
    %29 = vector.shape_cast %28 : vector<16x16x32xf32> to vector<256x32xf32>
    %30 = arith.addf %1, %29 : vector<256x32xf32>
    %31 = vector.extract_strided_slice %3 {offsets = [1, 0], sizes = [1, 32], strides = [1, 1]} : vector<2x32xf32> to vector<1x32xf32>
    %32 = arith.mulf %30, %30 : vector<256x32xf32>
    %cst_14 = arith.constant dense<0.000000e+00> : vector<256xf32>
    %33 = vector.multi_reduction <add>, %32, %cst_14 [1] : vector<256x32xf32> to vector<256xf32>
    %34 = vector.shape_cast %33 : vector<256xf32> to vector<256x1xf32>
    %cst_15 = arith.constant 3.200000e+01 : f32
    %35 = vector.broadcast %cst_15 : f32 to vector<256x1xf32>
    %36 = arith.divf %34, %35 : vector<256x1xf32>
    %cst_16 = arith.constant 1.1920929E-7 : f32
    %37 = vector.broadcast %cst_16 : f32 to vector<256x1xf32>
    %38 = arith.addf %36, %37 : vector<256x1xf32>
    %39 = math.rsqrt %38 : vector<256x1xf32>
    %40 = vector.broadcast %39 : vector<256x1xf32> to vector<256x32xf32>
    %41 = arith.mulf %30, %40 : vector<256x32xf32>
    %42 = vector.broadcast %31 : vector<1x32xf32> to vector<256x32xf32>
    %43 = arith.mulf %41, %42 : vector<256x32xf32>
    %44 = arith.truncf %43 : vector<256x32xf32> to vector<256x32xbf16>
    %c0_17 = arith.constant 0 : index
    %c0_18 = arith.constant 0 : index
    %c0_19 = arith.constant 0 : index
    %45 = vector.load %arg5[%c0_17, %c0_18, %c0_19] : memref<2x32x128xbf16, #tpu.memory_space<vmem>>, vector<1x32x128xbf16>
    %46 = vector.shape_cast %45 : vector<1x32x128xbf16> to vector<32x128xbf16>
    %cst_20 = arith.constant dense<0.000000e+00> : vector<256x128xf32>
    %47 = tpu.matmul %44, %46, %cst_20 {dimension_numbers = #tpu.dot_dimension_numbers<[1], [0], [0], [1], [0, 0, 1, 1], [], []>} : vector<256x32xbf16>, vector<32x128xbf16>, vector<256x128xf32> -> vector<256x128xf32>
    %c0_21 = arith.constant 0 : index
    %c0_22 = arith.constant 0 : index
    %c0_23 = arith.constant 0 : index
    %48 = vector.load %arg6[%c0_21, %c0_22, %c0_23] : memref<2x1x128xf32, #tpu.memory_space<vmem>>, vector<1x1x128xf32>
    %49 = vector.shape_cast %48 : vector<1x1x128xf32> to vector<1x128xf32>
    %50 = vector.broadcast %49 : vector<1x128xf32> to vector<256x128xf32>
    %51 = arith.addf %47, %50 : vector<256x128xf32>
    %cst_24 = arith.constant 5.000000e-01 : f32
    %52 = vector.broadcast %cst_24 : f32 to vector<256x128xf32>
    %53 = arith.mulf %52, %51 : vector<256x128xf32>
    %54 = math.tanh %53 : vector<256x128xf32>
    %cst_25 = arith.constant 1.000000e+00 : f32
    %55 = vector.broadcast %cst_25 : f32 to vector<256x128xf32>
    %56 = arith.addf %54, %55 : vector<256x128xf32>
    %cst_26 = arith.constant 5.000000e-01 : f32
    %57 = vector.broadcast %cst_26 : f32 to vector<256x128xf32>
    %58 = arith.mulf %57, %56 : vector<256x128xf32>
    %59 = arith.mulf %51, %58 : vector<256x128xf32>
    %60 = arith.truncf %59 : vector<256x128xf32> to vector<256x128xbf16>
    %c0_27 = arith.constant 0 : index
    %c0_28 = arith.constant 0 : index
    %c0_29 = arith.constant 0 : index
    %61 = vector.load %arg7[%c0_27, %c0_28, %c0_29] : memref<2x128x32xbf16, #tpu.memory_space<vmem>>, vector<1x128x32xbf16>
    %62 = vector.shape_cast %61 : vector<1x128x32xbf16> to vector<128x32xbf16>
    %cst_30 = arith.constant dense<0.000000e+00> : vector<256x32xf32>
    %63 = tpu.matmul %60, %62, %cst_30 {dimension_numbers = #tpu.dot_dimension_numbers<[1], [0], [0], [1], [0, 0, 1, 1], [], []>} : vector<256x128xbf16>, vector<128x32xbf16>, vector<256x32xf32> -> vector<256x32xf32>
    %c0_31 = arith.constant 0 : index
    %c0_32 = arith.constant 0 : index
    %c0_33 = arith.constant 0 : index
    %64 = vector.load %arg8[%c0_31, %c0_32, %c0_33] : memref<2x1x32xf32, #tpu.memory_space<vmem>>, vector<1x1x32xf32>
    %65 = vector.shape_cast %64 : vector<1x1x32xf32> to vector<1x32xf32>
    %66 = vector.broadcast %65 : vector<1x32xf32> to vector<256x32xf32>
    %67 = arith.addf %63, %66 : vector<256x32xf32>
    %68 = arith.addf %30, %67 : vector<256x32xf32>
    %c1 = arith.constant 1 : index
    %c0_34 = arith.constant 0 : index
    %c0_35 = arith.constant 0 : index
    %69 = vector.load %arg4[%c1, %c0_34, %c0_35] : memref<2x2x32xf32, #tpu.memory_space<vmem>>, vector<1x2x32xf32>
    %70 = vector.shape_cast %69 : vector<1x2x32xf32> to vector<2x32xf32>
    %c1_36 = arith.constant 1 : index
    %c0_37 = arith.constant 0 : index
    %c0_38 = arith.constant 0 : index
    %71 = vector.load %arg2[%c1_36, %c0_37, %c0_38] : memref<2x16x16xbf16, #tpu.memory_space<vmem>>, vector<1x16x16xbf16>
    %72 = vector.shape_cast %71 : vector<1x16x16xbf16> to vector<16x16xbf16>
    %c1_39 = arith.constant 1 : index
    %c0_40 = arith.constant 0 : index
    %c0_41 = arith.constant 0 : index
    %73 = vector.load %arg3[%c1_39, %c0_40, %c0_41] : memref<2x16x1xf32, #tpu.memory_space<vmem>>, vector<1x16x1xf32>
    %74 = vector.shape_cast %73 : vector<1x16x1xf32> to vector<16x1xf32>
    %75 = vector.extract_strided_slice %70 {offsets = [0, 0], sizes = [1, 32], strides = [1, 1]} : vector<2x32xf32> to vector<1x32xf32>
    %76 = arith.mulf %68, %68 : vector<256x32xf32>
    %cst_42 = arith.constant dense<0.000000e+00> : vector<256xf32>
    %77 = vector.multi_reduction <add>, %76, %cst_42 [1] : vector<256x32xf32> to vector<256xf32>
    %78 = vector.shape_cast %77 : vector<256xf32> to vector<256x1xf32>
    %cst_43 = arith.constant 3.200000e+01 : f32
    %79 = vector.broadcast %cst_43 : f32 to vector<256x1xf32>
    %80 = arith.divf %78, %79 : vector<256x1xf32>
    %cst_44 = arith.constant 1.1920929E-7 : f32
    %81 = vector.broadcast %cst_44 : f32 to vector<256x1xf32>
    %82 = arith.addf %80, %81 : vector<256x1xf32>
    %83 = math.rsqrt %82 : vector<256x1xf32>
    %84 = vector.broadcast %83 : vector<256x1xf32> to vector<256x32xf32>
    %85 = arith.mulf %68, %84 : vector<256x32xf32>
    %86 = vector.broadcast %75 : vector<1x32xf32> to vector<256x32xf32>
    %87 = arith.mulf %85, %86 : vector<256x32xf32>
    %88 = arith.truncf %87 : vector<256x32xf32> to vector<256x32xbf16>
    %89 = vector.shape_cast %88 : vector<256x32xbf16> to vector<16x16x32xbf16>
    %90 = vector.shape_cast %72 : vector<16x16xbf16> to vector<1x16x16xbf16>
    %91 = vector.broadcast %90 : vector<1x16x16xbf16> to vector<16x16x16xbf16>
    %cst_45 = arith.constant dense<0.000000e+00> : vector<16x16x32xf32>
    %92 = tpu.matmul %91, %89, %cst_45 {dimension_numbers = #tpu.dot_dimension_numbers<[2], [1], [1], [2], [0, 0, 0, 1, 1, 2], [0], [0]>} : vector<16x16x16xbf16>, vector<16x16x32xbf16>, vector<16x16x32xf32> -> vector<16x16x32xf32>
    %93 = vector.shape_cast %74 : vector<16x1xf32> to vector<1x16x1xf32>
    %94 = vector.broadcast %93 : vector<1x16x1xf32> to vector<16x16x32xf32>
    %95 = arith.addf %92, %94 : vector<16x16x32xf32>
    %96 = vector.shape_cast %95 : vector<16x16x32xf32> to vector<256x32xf32>
    %97 = arith.addf %68, %96 : vector<256x32xf32>
    %98 = vector.extract_strided_slice %70 {offsets = [1, 0], sizes = [1, 32], strides = [1, 1]} : vector<2x32xf32> to vector<1x32xf32>
    %99 = arith.mulf %97, %97 : vector<256x32xf32>
    %cst_46 = arith.constant dense<0.000000e+00> : vector<256xf32>
    %100 = vector.multi_reduction <add>, %99, %cst_46 [1] : vector<256x32xf32> to vector<256xf32>
    %101 = vector.shape_cast %100 : vector<256xf32> to vector<256x1xf32>
    %cst_47 = arith.constant 3.200000e+01 : f32
    %102 = vector.broadcast %cst_47 : f32 to vector<256x1xf32>
    %103 = arith.divf %101, %102 : vector<256x1xf32>
    %cst_48 = arith.constant 1.1920929E-7 : f32
    %104 = vector.broadcast %cst_48 : f32 to vector<256x1xf32>
    %105 = arith.addf %103, %104 : vector<256x1xf32>
    %106 = math.rsqrt %105 : vector<256x1xf32>
    %107 = vector.broadcast %106 : vector<256x1xf32> to vector<256x32xf32>
    %108 = arith.mulf %97, %107 : vector<256x32xf32>
    %109 = vector.broadcast %98 : vector<1x32xf32> to vector<256x32xf32>
    %110 = arith.mulf %108, %109 : vector<256x32xf32>
    %111 = arith.truncf %110 : vector<256x32xf32> to vector<256x32xbf16>
    %c1_49 = arith.constant 1 : index
    %c0_50 = arith.constant 0 : index
    %c0_51 = arith.constant 0 : index
    %112 = vector.load %arg5[%c1_49, %c0_50, %c0_51] : memref<2x32x128xbf16, #tpu.memory_space<vmem>>, vector<1x32x128xbf16>
    %113 = vector.shape_cast %112 : vector<1x32x128xbf16> to vector<32x128xbf16>
    %cst_52 = arith.constant dense<0.000000e+00> : vector<256x128xf32>
    %114 = tpu.matmul %111, %113, %cst_52 {dimension_numbers = #tpu.dot_dimension_numbers<[1], [0], [0], [1], [0, 0, 1, 1], [], []>} : vector<256x32xbf16>, vector<32x128xbf16>, vector<256x128xf32> -> vector<256x128xf32>
    %c1_53 = arith.constant 1 : index
    %c0_54 = arith.constant 0 : index
    %c0_55 = arith.constant 0 : index
    %115 = vector.load %arg6[%c1_53, %c0_54, %c0_55] : memref<2x1x128xf32, #tpu.memory_space<vmem>>, vector<1x1x128xf32>
    %116 = vector.shape_cast %115 : vector<1x1x128xf32> to vector<1x128xf32>
    %117 = vector.broadcast %116 : vector<1x128xf32> to vector<256x128xf32>
    %118 = arith.addf %114, %117 : vector<256x128xf32>
    %cst_56 = arith.constant 5.000000e-01 : f32
    %119 = vector.broadcast %cst_56 : f32 to vector<256x128xf32>
    %120 = arith.mulf %119, %118 : vector<256x128xf32>
    %121 = math.tanh %120 : vector<256x128xf32>
    %cst_57 = arith.constant 1.000000e+00 : f32
    %122 = vector.broadcast %cst_57 : f32 to vector<256x128xf32>
    %123 = arith.addf %121, %122 : vector<256x128xf32>
    %cst_58 = arith.constant 5.000000e-01 : f32
    %124 = vector.broadcast %cst_58 : f32 to vector<256x128xf32>
    %125 = arith.mulf %124, %123 : vector<256x128xf32>
    %126 = arith.mulf %118, %125 : vector<256x128xf32>
    %127 = arith.truncf %126 : vector<256x128xf32> to vector<256x128xbf16>
    %c1_59 = arith.constant 1 : index
    %c0_60 = arith.constant 0 : index
    %c0_61 = arith.constant 0 : index
    %128 = vector.load %arg7[%c1_59, %c0_60, %c0_61] : memref<2x128x32xbf16, #tpu.memory_space<vmem>>, vector<1x128x32xbf16>
    %129 = vector.shape_cast %128 : vector<1x128x32xbf16> to vector<128x32xbf16>
    %cst_62 = arith.constant dense<0.000000e+00> : vector<256x32xf32>
    %130 = tpu.matmul %127, %129, %cst_62 {dimension_numbers = #tpu.dot_dimension_numbers<[1], [0], [0], [1], [0, 0, 1, 1], [], []>} : vector<256x128xbf16>, vector<128x32xbf16>, vector<256x32xf32> -> vector<256x32xf32>
    %c1_63 = arith.constant 1 : index
    %c0_64 = arith.constant 0 : index
    %c0_65 = arith.constant 0 : index
    %131 = vector.load %arg8[%c1_63, %c0_64, %c0_65] : memref<2x1x32xf32, #tpu.memory_space<vmem>>, vector<1x1x32xf32>
    %132 = vector.shape_cast %131 : vector<1x1x32xf32> to vector<1x32xf32>
    %133 = vector.broadcast %132 : vector<1x32xf32> to vector<256x32xf32>
    %134 = arith.addf %130, %133 : vector<256x32xf32>
    %135 = arith.addf %97, %134 : vector<256x32xf32>
    %c0_66 = arith.constant 0 : index
    %c0_67 = arith.constant 0 : index
    %136 = vector.load %arg9[%c0_66, %c0_67] : memref<1x32xf32, #tpu.memory_space<vmem>>, vector<1x32xf32>
    %137 = arith.mulf %135, %135 : vector<256x32xf32>
    %cst_68 = arith.constant dense<0.000000e+00> : vector<256xf32>
    %138 = vector.multi_reduction <add>, %137, %cst_68 [1] : vector<256x32xf32> to vector<256xf32>
    %139 = vector.shape_cast %138 : vector<256xf32> to vector<256x1xf32>
    %cst_69 = arith.constant 3.200000e+01 : f32
    %140 = vector.broadcast %cst_69 : f32 to vector<256x1xf32>
    %141 = arith.divf %139, %140 : vector<256x1xf32>
    %cst_70 = arith.constant 1.1920929E-7 : f32
    %142 = vector.broadcast %cst_70 : f32 to vector<256x1xf32>
    %143 = arith.addf %141, %142 : vector<256x1xf32>
    %144 = math.rsqrt %143 : vector<256x1xf32>
    %145 = vector.broadcast %144 : vector<256x1xf32> to vector<256x32xf32>
    %146 = arith.mulf %135, %145 : vector<256x32xf32>
    %147 = vector.broadcast %136 : vector<1x32xf32> to vector<256x32xf32>
    %148 = arith.mulf %146, %147 : vector<256x32xf32>
    %149 = arith.truncf %148 : vector<256x32xf32> to vector<256x32xbf16>
    %c0_71 = arith.constant 0 : index
    %c0_72 = arith.constant 0 : index
    %150 = vector.load %arg10[%c0_71, %c0_72] : memref<32x128xbf16, #tpu.memory_space<vmem>>, vector<32x128xbf16>
    %cst_73 = arith.constant dense<0.000000e+00> : vector<256x128xf32>
    %151 = tpu.matmul %149, %150, %cst_73 {dimension_numbers = #tpu.dot_dimension_numbers<[1], [0], [0], [1], [0, 0, 1, 1], [], []>} : vector<256x32xbf16>, vector<32x128xbf16>, vector<256x128xf32> -> vector<256x128xf32>
    %152 = vector.shape_cast %151 : vector<256x128xf32> to vector<16x16x128xf32>
    %c0_74 = arith.constant 0 : index
    %c0_75 = arith.constant 0 : index
    %c0_76 = arith.constant 0 : index
    %153 = vector.load %arg11[%c0_74, %c0_75, %c0_76] : memref<16x16x128xf32, #tpu.memory_space<vmem>>, vector<16x16x128xf32>
    tpu.vector_store %arg11[%c0_74, %c0_75, %c0_76], %152 {strides = array<i32>} : memref<16x16x128xf32, #tpu.memory_space<vmem>>, vector<16x16x128xf32>,
    return
  }
  func.func @transform_0(%arg0: i32) -> (i32, i32, i32) {
    %c0_i32 = arith.constant 0 : i32
    %c0_i32_0 = arith.constant 0 : i32
    %c0_i32_1 = arith.constant 0 : i32
    return %arg0, %c0_i32, %c0_i32_0 : i32, i32, i32
  }
  func.func @transform_1(%arg0: i32) -> (i32, i32, i32) {
    %c0_i32 = arith.constant 0 : i32
    %c0_i32_0 = arith.constant 0 : i32
    %c0_i32_1 = arith.constant 0 : i32
    %c0_i32_2 = arith.constant 0 : i32
    return %c0_i32, %c0_i32_0, %c0_i32_1 : i32, i32, i32
  }
  func.func @transform_2(%arg0: i32) -> (i32, i32, i32) {
    %c0_i32 = arith.constant 0 : i32
    %c0_i32_0 = arith.constant 0 : i32
    %c0_i32_1 = arith.constant 0 : i32
    %c0_i32_2 = arith.constant 0 : i32
    return %c0_i32, %c0_i32_0, %c0_i32_1 : i32, i32, i32
  }
  func.func @transform_3(%arg0: i32) -> (i32, i32, i32) {
    %c0_i32 = arith.constant 0 : i32
    %c0_i32_0 = arith.constant 0 : i32
    %c0_i32_1 = arith.constant 0 : i32
    %c0_i32_2 = arith.constant 0 : i32
    return %c0_i32, %c0_i32_0, %c0_i32_1 : i32, i32, i32
  }
  func.func @transform_4(%arg0: i32) -> (i32, i32, i32) {
    %c0_i32 = arith.constant 0 : i32
    %c0_i32_0 = arith.constant 0 : i32
    %c0_i32_1 = arith.constant 0 : i32
    %c0_i32_2 = arith.constant 0 : i32
    return %c0_i32, %c0_i32_0, %c0_i32_1 : i32, i32, i32
  }
  func.func @transform_5(%arg0: i32) -> (i32, i32, i32) {
    %c0_i32 = arith.constant 0 : i32
    %c0_i32_0 = arith.constant 0 : i32
    %c0_i32_1 = arith.constant 0 : i32
    %c0_i32_2 = arith.constant 0 : i32
    return %c0_i32, %c0_i32_0, %c0_i32_1 : i32, i32, i32
  }
  func.func @transform_6(%arg0: i32) -> (i32, i32, i32) {
    %c0_i32 = arith.constant 0 : i32
    %c0_i32_0 = arith.constant 0 : i32
    %c0_i32_1 = arith.constant 0 : i32
    %c0_i32_2 = arith.constant 0 : i32
    return %c0_i32, %c0_i32_0, %c0_i32_1 : i32, i32, i32
  }
  func.func @transform_7(%arg0: i32) -> (i32, i32, i32) {
    %c0_i32 = arith.constant 0 : i32
    %c0_i32_0 = arith.constant 0 : i32
    %c0_i32_1 = arith.constant 0 : i32
    %c0_i32_2 = arith.constant 0 : i32
    return %c0_i32, %c0_i32_0, %c0_i32_1 : i32, i32, i32
  }
  func.func @transform_8(%arg0: i32) -> (i32, i32) {
    %c0_i32 = arith.constant 0 : i32
    %c0_i32_0 = arith.constant 0 : i32
    %c0_i32_1 = arith.constant 0 : i32
    return %c0_i32, %c0_i32_0 : i32, i32
  }
  func.func @transform_9(%arg0: i32) -> (i32, i32) {
    %c0_i32 = arith.constant 0 : i32
    %c0_i32_0 = arith.constant 0 : i32
    %c0_i32_1 = arith.constant 0 : i32
    return %c0_i32, %c0_i32_0 : i32, i32
  }
  func.func @transform_10(%arg0: i32) -> (i32, i32, i32) {
    %c0_i32 = arith.constant 0 : i32
    %c0_i32_0 = arith.constant 0 : i32
    %c0_i32_1 = arith.constant 0 : i32
    return %arg0, %c0_i32, %c0_i32_0 : i32, i32, i32
  }
}

</mosaic_0001>

<bundles_post_ra>
// kernel: tpu_custom_call.1
= control target key start
LH: loop header
LB: loop body
LE: loop exit
PB: predicated region body
PF: predicated region fallthrough
CT: control target
= control target key end

     0   :  { %15 = vsyncpa [#allocation3], 0  ;;  %s10138_s0 = inlined_call_operand.hbm [shape: f32[32,16,32], index: 0, kind: input, shape index: {}]   ;;  %s10139_s1 = inlined_call_operand.vmem [shape: bf16[2,16,16], index: 1, kind: input, shape index: {}]   ;;  %s10140_s2 = inlined_call_operand.vmem [shape: f32[2,16,1], index: 2, kind: input, shape index: {}]   ;;  %s10141_s3 = inlined_call_operand.vmem [shape: f32[2,2,32], index: 3, kind: input, shape index: {}]   ;;  %s10142_s4 = inlined_call_operand.vmem [shape: bf16[2,32,128], index: 4, kind: input, shape index: {}]   ;;  %s10143_s5 = inlined_call_operand.vmem [shape: f32[2,1,128], index: 5, kind: input, shape index: {}]   ;;  %s10144_s6 = inlined_call_operand.vmem [shape: bf16[2,128,32], index: 6, kind: input, shape index: {}]   ;;  %s10145_s7 = inlined_call_operand.vmem [shape: f32[2,1,32], index: 7, kind: input, shape index: {}]   ;;  %s10146_s8 = inlined_call_operand.vmem [shape: f32[1,32], index: 8, kind: input, shape index: {}]   ;;  %s10147_s9 = inlined_call_operand.vmem [shape: bf16[32,128], index: 9, kind: input, shape index: {}]   ;;  %s10148_s10 = inlined_call_operand.hbm [shape: f32[32,16,128], index: 10, kind: output, shape index: {}]  }
   0x1   :  { %17 = vsyncpa [#allocation3 + $0x1], 0 }
   0x2   :  { %18 = vsyncpa [#allocation4], 0 }
   0x3   :  { %20 = vsyncpa [#allocation4 + $0x1], 0  ;;  %s6458_s13 = smov 0   ;;  %s6460_s14 = smov 0  }
   0x4   :  { %s6462_s15 = smov 0   ;;  %s6464_s16 = smov 0  }
   0x5 LB: > { %10164 = sst [smem:[#allocation8_spill]] %s6391_s15  ;;  %s6479_s17 = sadd.s32 4294967295, %s6395_s16   ;;  %s6395_s16 = sphi %s6464_s16, %s10471_s16   ;;  %s6391_s15 = sphi %s6462_s15, %s10473_s15   ;;  %s6387_s14 = sphi %s6460_s14, %s10475_s14   ;;  %s6383_s13 = sphi %s6458_s13, %s10474_s13  }
   0x6   : > { %s5501_s18 = sadd.s32 4294967294, %s6395_s16   ;;  %s6483_s19 = sadd.s32 1, %s6395_s16  }
   0x7   : > { %10165 = sst [smem:[#allocation9_spill]] %s6483_s19  ;;  %s33_s20 = sadd.s32 1, %s6391_s15 }
   0x8   : > { %s30_s21 = ssub.s32 %s6395_s16, %s6483_s19  ;;  %p40_p0 = scmp.ne.s32.totalorder %s6391_s15, %s6387_s14 }
   0x9   : > { %p31_p1 = scmp.eq.s32.totalorder %s30_s21, 0  ;;  %p41_p2 = scmp.eq.s32.totalorder %s6395_s16, 0 }
   0xa   : > { %p46_p3 = scmp.ne.s32.totalorder %s6387_s14, %s6383_s13  ;;  %p47_p4 = scmp.eq.s32.totalorder %s6479_s17, 0 }
   0xb   : > { %s6495_s22 = scalar_select %p31_p1, %s6391_s15, %s33_s20  }
   0xc   : > { %p6497_p5 = por %p41_p2, %p40_p0  ;;  %p6501_p6 = por %p47_p4, %p46_p3 }
   0xd   : > { %10166 = sst [smem:[#allocation10_spill]] %s6495_s22  ;;  %p259_p7 = scmp.eq.s32.totalorder %s6479_s17, 1 }
   0xe   : > { %p265_p8 = scmp.eq.s32.totalorder %s5501_s18, 1  ;;  %p5762_p10 = scmp.lt.s32.totalorder %s6395_s16, 2 }
   0xf   : > { %p6508_p11 = por %p259_p7, %p40_p0  ;;  %s312_s27 = sand.u32 1, %s6391_s15  }
  0x10   : > { %p6512_p12 = por %p265_p8, %p46_p3  ;;  %s5721_s28 = sshll.u32 %s6395_s16, 8 }
  0x11   : > { %s5504_s29 = sshll.u32 %s312_s27, 8  ;;  %s322_s12 = scalar_lea.hbm %s10138_s0, %s5721_s28 }
  0x12   : > { %s10170_s26 = scalar_select %p6512_p12, 1, 0 }
  0x13   : > { %s323_s20 = sshll.u32 %s322_s12, 4  ;;  %s316_s18 = scalar_lea.vmem [#allocation2], %s5504_s29  ;;  %s324_s20 = int_to_ptr.hbm [resolvable:$true] %s323_s20 }
  0x14   : > { %10171 = sst [smem:[#allocation11_spill]] %s10170_s26  ;;  %s325_s21 = sshll.u32 %s316_s18, 4  ;;  %s326_s21 = int_to_ptr.vmem [resolvable:$true] %s325_s21 }
  0x15   : > { %p6523_p13 = pnand %p5762_p10, %p6497_p5  ;;  %p5508_p0 = scmp.ge.s32.totalorder %s6395_s16, 1 }
  0x16   : > { %p333_p1 = scmp.lt.s32.totalorder %s6395_s16, 3  ;;  %s313_s15 = scalar_lea.sflag [#allocation3], %s312_s27 }
  0x17   : > { %s6299_s19 = sshra.s32 %s324_s20, 4  ;;  %p6303_p3 = pneg %p6523_p13  ;;  %s6300_s19 = int_to_ptr.hbm [resolvable:$true] %s6299_s19 }
  0x18   : > { %s6301_s26 = scalar_lea.hbm %s6300_s19, 256  ;;  %s6306_s23 = scalar_lea.hbm %s10138_s0, 512 }
  0x19   : > { %p6302_p2 = scmp.ne.s32.totalorder %s6300_s19, %s6301_s26  ;;  %p6307_p5 = scmp.lt.s32.totalorder %s6300_s19, %s10138_s0 }
  0x1a   : > { %p6308_p8 = scmp.lt.s32.totalorder %s6306_s23, %s6301_s26 }
  0x1b   : > { %p6304_p4 = pnand %p6303_p3, %p6302_p2 }
  0x1c   : > { %p6309_p10 = por %p6308_p8, %p6307_p5 }
  0x1d   : > { %p6305_p7 = pneg %p6304_p4 }
  0x1f   : > { %p6310_p9 = pnand %p6309_p10, %p6305_p7 }
  0x21   : > { %6313 = shalt.err (!%p6310_p9)
}
  0x22   : > { %s6397_s27 = smov 128   ;;  %s6398_s12 = smov 8  }
  0x23   : > { %5757 = dma.hbm_to_vmem [thread:$0]  (!%p6523_p13), %s324_s20, 4096, %s326_s21, %s313_s15, %s6397_s27, %s6397_s27, %s6398_s12  }
  0x24   : > { %p334_p2 = pnand %p5508_p0, %p333_p1 }
  0x26   : > { %337 = sbr.rel (%p334_p2) target bundleno = 2188 (0x88c), region = 60 }
  0x2b   : > { %s6544_s18 = sand.u32 1, %s6387_s14  }
  0x2c   : > { %s5509_s19 = sshll.u32 %s6544_s18, 8  ;;  %s340_s26 = scalar_lea.sflag [#allocation3], %s6544_s18 }
  0x2d   : > { %s6550_s28 = scalar_lea.vmem [#allocation2], %s5509_s19 }
  0x2e   : > { %6374 = dma.done.wait (%p6501_p6), %s340_s26, 4096  }
  0x2f   : > { %6376 = vsyncadd (%p6501_p6), %s340_s26, 4294963200  ;;  %v6557_v0 = vld [vmem:[%s6550_s28 + $0x20] sm:$0xff]  ;;  %vm10155_vm0 = vcmask 261120   ;;  %v6560_v1 = vld [vmem:[%s6550_s28 + $0x10] sm:$0xff]  ;;  %s10004_s21 = scalar_lea.vmem [#allocation5], %s5509_s19  ;;  %s5747_s23 = sshll.u32 %s6479_s17, 8 }
  0x30   : > { %v6563_v2 = vld [vmem:[%s6550_s28] sm:$0xff]  ;;  %v425_v3 = vmul.f32 %v6557_v0, %v6557_v0  ;;  %v423_v4 = vmul.f32 %v6560_v1, %v6560_v1  ;;  %v6572_v6 = vld [vmem:[%s6550_s28 + $0x28] sm:$0xff]  ;;  %v6575_v7 = vld [vmem:[%s6550_s28 + $0x18] sm:$0xff]  ;;  %s5424_s27 = scalar_lea.hbm %s10148_s10, %s5747_s23  ;;  %s5425_s12 = sshll.u32 %s10004_s21, 4  ;;  %s5426_s12 = int_to_ptr.vmem [resolvable:$true] %s5425_s12 }
  0x31   : > { %v421_v5 = vmul.f32 %v6563_v2, %v6563_v2  ;;  %v6581_v11 = vld [vmem:[%s6550_s28 + $0x8] sm:$0xff]  ;;  %v426_v12 = vmul.f32 %v6572_v6, %v6572_v6  ;;  %v424_v13 = vmul.f32 %v6575_v7, %v6575_v7  ;;  %v6593_v18 = vld [vmem:[%s6550_s28 + $0x30] sm:$0xff]  ;;  %v6596_v19 = vld [vmem:[%s6550_s28 + $0x58] sm:$0xff]  ;;  %s5427_s26 = sshll.u32 %s5424_s27, 4  ;;  %s6349_s20 = scalar_lea.hbm %s10148_s10, 512  ;;  %s5428_s26 = int_to_ptr.hbm [resolvable:$true] %s5427_s26 }
  0x32   : > { %v466_v8 = vsel %vm10155_vm0, %v425_v3, 0.0  ;;  %v460_v9 = vsel %vm10155_vm0, %v423_v4, 0.0  ;;  %v422_v14 = vmul.f32 %v6581_v11, %v6581_v11  ;;  %v6599_v20 = vld [vmem:[%s6550_s28 + $0x50] sm:$0xff]  ;;  %v427_v21 = vmul.f32 %v6593_v18, %v6593_v18  ;;  %v6611_v27 = vld [vmem:[%s6550_s28 + $0x68] sm:$0xff]  ;;  %v6614_v28 = vld [vmem:[%s6550_s28 + $0x60] sm:$0xff]  ;;  %s6343_s15 = sshra.s32 %s5428_s26, 4  ;;  %s6344_s15 = int_to_ptr.hbm [resolvable:$true] %s6343_s15 }
  0x33   : > { %v454_v10 = vsel %vm10155_vm0, %v421_v5, 0.0  ;;  %467 = vadd.xlane.f32.xlu2 %v466_v8  ;;  %461 = vadd.xlane.f32.xlu1 %v460_v9  ;;  %v469_v15 = vsel %vm10155_vm0, %v426_v12, 0.0  ;;  %v463_v16 = vsel %vm10155_vm0, %v424_v13, 0.0  ;;  %v432_v22 = vmul.f32 %v6596_v19, %v6596_v19  ;;  %v6617_v29 = vld [vmem:[%s6550_s28 + $0x38] sm:$0xff]  ;;  %v398_v36 = vld [vmem:[%s6550_s28 + $0x70] sm:$0xff]  ;;  %v6643_v45 = vld [vmem:[%s6550_s28 + $0xa8] sm:$0xff]  ;;  %p6350_p0 = scmp.lt.s32.totalorder %s6344_s15, %s10148_s10 }
  0x34   : > { %455 = vadd.xlane.f32.xlu0 %v454_v10  ;;  %v457_v17 = vsel %vm10155_vm0, %v422_v14, 0.0  ;;  %v431_v23 = vmul.f32 %v6599_v20, %v6599_v20  ;;  %v472_v24 = vsel %vm10155_vm0, %v427_v21, 0.0  ;;  %v434_v30 = vmul.f32 %v6611_v27, %v6611_v27  ;;  %v6630_v37 = vld [vmem:[%s6550_s28 + $0x98] sm:$0xff]  ;;  %v6633_v38 = vld [vmem:[%s6550_s28 + $0x90] sm:$0xff]  ;;  %v6646_v46 = vld [vmem:[%s6550_s28 + $0xa0] sm:$0xff]  ;;  %s6345_s22 = scalar_lea.hbm %s6344_s15, 256 }
  0x35   : > { %v487_v25 = vsel %vm10155_vm0, %v432_v22, 0.0  ;;  %v433_v31 = vmul.f32 %v6614_v28, %v6614_v28  ;;  %v428_v32 = vmul.f32 %v6617_v29, %v6617_v29  ;;  %v435_v39 = vmul.f32 %v398_v36, %v398_v36  ;;  %v6649_v47 = vld [vmem:[%s6550_s28 + $0x78] sm:$0xff]  ;;  %v6661_v54 = vld [vmem:[%s6550_s28 + $0xb0] sm:$0xff]  ;;  %v393_v55 = vld [vmem:[%s6550_s28 + $0x48] sm:$0xff]  ;;  %p6346_p6 = scmp.ne.s32.totalorder %s6344_s15, %s6345_s22  ;;  %p6351_p1 = scmp.lt.s32.totalorder %s6349_s20, %s6345_s22 }
  0x36   : > { %v484_v26 = vsel %vm10155_vm0, %v431_v23, 0.0  ;;  %v493_v33 = vsel %vm10155_vm0, %v434_v30, 0.0  ;;  %v440_v40 = vmul.f32 %v6630_v37, %v6630_v37  ;;  %v439_v41 = vmul.f32 %v6633_v38, %v6633_v38  ;;  %10173 = vst [vmem:[#allocation12_spill] sm:$0xff] %v6649_v47  ;;  %v392_v56 = vld [vmem:[%s6550_s28 + $0x40] sm:$0xff]  ;;  %v401_v63 = vld [vmem:[%s6550_s28 + $0x88] sm:$0xff]  ;;  %v407_v4 = vld [vmem:[%s6550_s28 + $0xb8] sm:$0xff] }
  0x37   : > { %v490_v34 = vsel %vm10155_vm0, %v433_v31, 0.0  ;;  %v475_v35 = vsel %vm10155_vm0, %v428_v32, 0.0  ;;  %v496_v42 = vsel %vm10155_vm0, %v435_v39, 0.0  ;;  %v442_v48 = vmul.f32 %v6643_v45, %v6643_v45  ;;  %10174 = vst [vmem:[#allocation13_spill] sm:$0xff] %v6661_v54  ;;  %v400_v3 = vld [vmem:[%s6550_s28 + $0x80] sm:$0xff]  ;;  %v410_v14 = vld [vmem:[%s6550_s28 + $0xd0] sm:$0xff]  ;;  %p6347_p9 = pnand %p6346_p6, %p6508_p11  ;;  %p6352_p3 = por %p6351_p1, %p6350_p0 }
  0x38   : > { %v511_v43 = vsel %vm10155_vm0, %v440_v40, 0.0  ;;  %v508_v44 = vsel %vm10155_vm0, %v439_v41, 0.0  ;;  %v441_v49 = vmul.f32 %v6646_v46, %v6646_v46  ;;  %v436_v50 = vmul.f32 %v6649_v47, %v6649_v47  ;;  %v412_v30 = vld [vmem:[%s6550_s28 + $0xe0] sm:$0xff]  ;;  %v411_v31 = vld [vmem:[%s6550_s28 + $0xd8] sm:$0xff]  ;;  %v414_v41 = vld [vmem:[%s6550_s28 + $0xf0] sm:$0xff] }
  0x39   : > { %v517_v51 = vsel %vm10155_vm0, %v442_v48, 0.0  ;;  %v443_v57 = vmul.f32 %v6661_v54, %v6661_v54  ;;  %v430_v58 = vmul.f32 %v393_v55, %v393_v55  ;;  %v429_v59 = vmul.f32 %v392_v56, %v392_v56  ;;  %v415_v40 = vld [vmem:[%s6550_s28 + $0xf8] sm:$0xff]  ;;  %p6348_p13 = pneg %p6347_p9 }
  0x3a   : > { %v514_v52 = vsel %vm10155_vm0, %v441_v49, 0.0  ;;  %v499_v53 = vsel %vm10155_vm0, %v436_v50, 0.0  ;;  %v438_v5 = vmul.f32 %v401_v63, %v401_v63  ;;  %v437_v8 = vmul.f32 %v400_v3, %v400_v3 }
  0x3b   : > { %470 = vadd.xlane.f32.xlu2 %v469_v15  ;;  %464 = vadd.xlane.f32.xlu1 %v463_v16  ;;  %v520_v60 = vsel %vm10155_vm0, %v443_v57, 0.0  ;;  %v481_v61 = vsel %vm10155_vm0, %v430_v58, 0.0  ;;  %v478_v62 = vsel %vm10155_vm0, %v429_v59, 0.0  ;;  %v444_v9 = vmul.f32 %v407_v4, %v407_v4  ;;  %v409_v15 = vld [vmem:[%s6550_s28 + $0xc8] sm:$0xff]  ;;  %v408_v16 = vld [vmem:[%s6550_s28 + $0xc0] sm:$0xff]  ;;  %p6353_p4 = pnand %p6352_p3, %p6348_p13 }
  0x3c   : > { %458 = vadd.xlane.f32.xlu0 %v457_v17  ;;  %v505_v10 = vsel %vm10155_vm0, %v438_v5, 0.0  ;;  %v502_v12 = vsel %vm10155_vm0, %v437_v8, 0.0  ;;  %v447_v17 = vmul.f32 %v410_v14, %v410_v14  ;;  %v446_v21 = vmul.f32 %v409_v15, %v409_v15 }
  0x3d   : > { %v523_v13 = vsel %vm10155_vm0, %v444_v9, 0.0  ;;  %v445_v22 = vmul.f32 %v408_v16, %v408_v16  ;;  %v6399_v49 = vmov 32.0  }
  0x3e   : > { %v532_v23 = vsel %vm10155_vm0, %v447_v17, 0.0  ;;  %5810 = vrcp.f32 %v6399_v49 }
  0x43   : > { %473 = vadd.xlane.f32.xlu2 %v472_v24  ;;  %488 = vadd.xlane.f32.xlu1 %v487_v25  ;;  %v529_v24 = vsel %vm10155_vm0, %v446_v21, 0.0  ;;  %v526_v25 = vsel %vm10155_vm0, %v445_v22, 0.0 }
  0x44   : > { %485 = vadd.xlane.f32.xlu0 %v484_v26  ;;  %v413_v26 = vld [vmem:[%s6550_s28 + $0xe8] sm:$0xff]  ;;  %v5811_v50 = vpop.eup %5810 }
  0x45   : > { %v450_v32 = vmul.f32 %v413_v26, %v413_v26  ;;  %vm555_vm1 = vweird.f32 %v5811_v50 }
  0x4b   : > { %494 = vadd.xlane.f32.xlu2 %v493_v33  ;;  %491 = vadd.xlane.f32.xlu1 %v490_v34  ;;  %v449_v33 = vmul.f32 %v412_v30, %v412_v30  ;;  %v448_v34 = vmul.f32 %v411_v31, %v411_v31 }
  0x4c   : > { %476 = vadd.xlane.f32.xlu0 %v475_v35  ;;  %v541_v35 = vsel %vm10155_vm0, %v450_v32, 0.0 }
  0x4d   : > { %v538_v36 = vsel %vm10155_vm0, %v449_v33, 0.0  ;;  %v535_v39 = vsel %vm10155_vm0, %v448_v34, 0.0 }
  0x53   : > { %497 = vadd.xlane.f32.xlu2 %v496_v42  ;;  %512 = vadd.xlane.f32.xlu1 %v511_v43  ;;  %v452_v42 = vmul.f32 %v415_v40, %v415_v40  ;;  %v451_v43 = vmul.f32 %v414_v41, %v414_v41 }
  0x54   : > { %509 = vadd.xlane.f32.xlu0 %v508_v44 }
  0x55   : > { %v547_v44 = vsel %vm10155_vm0, %v452_v42, 0.0  ;;  %v544_v48 = vsel %vm10155_vm0, %v451_v43, 0.0 }
  0x5b   : > { %518 = vadd.xlane.f32.xlu2 %v517_v51  ;;  %515 = vadd.xlane.f32.xlu1 %v514_v52  ;;  %v551_v51 = vmul.f32 32.0, %v5811_v50 }
  0x5c   : > { %500 = vadd.xlane.f32.xlu0 %v499_v53 }
  0x5d   : > { %v552_v52 = vsub.f32 1.0, %v551_v51 }
  0x5f   : > { %v553_v53 = vmul.f32 %v5811_v50, %v552_v52 }
  0x61   : > { %v554_v55 = vadd.f32 %v5811_v50, %v553_v53 }
  0x63   : > { %521 = vadd.xlane.f32.xlu2 %v520_v60  ;;  %482 = vadd.xlane.f32.xlu1 %v481_v61  ;;  %v6692_v56 = vsel %vm555_vm1, %v5811_v50, %v554_v55 }
  0x64   : > { %479 = vadd.xlane.f32.xlu0 %v478_v62 }
  0x6b   : > { %506 = vadd.xlane.f32.xlu2 %v505_v10  ;;  %503 = vadd.xlane.f32.xlu1 %v502_v12 }
  0x6c   : > { %524 = vadd.xlane.f32.xlu0 %v523_v13 }
  0x73   : > { %533 = vadd.xlane.f32.xlu2 %v532_v23  ;;  %530 = vadd.xlane.f32.xlu1 %v529_v24 }
  0x74   : > { %527 = vadd.xlane.f32.xlu0 %v526_v25 }
  0x7b   : > { %542 = vadd.xlane.f32.xlu2 %v541_v35  ;;  %539 = vadd.xlane.f32.xlu1 %v538_v36 }
  0x7c   : > { %536 = vadd.xlane.f32.xlu0 %v535_v39 }
  0x83   : > { %548 = vadd.xlane.f32.xlu1 %v547_v44 }
  0x84   : > { %545 = vadd.xlane.f32.xlu0 %v544_v48 }
  0xa6   : > { %v468_v57 = vpop.xlane.xlu2 %467  ;;  %v462_v58 = vpop.xlane.xlu1 %461 }
  0xa7   : > { %v456_v59 = vpop.xlane.xlu0 %455  ;;  %v559_v61 = vmul.f32 %v6692_v56, %v462_v58  ;;  %v561_v63 = vmul.f32 %v6692_v56, %v468_v57  ;;  %v416_v57 = vld [vmem:[%s10141_s3] sm:$0x3] }
  0xa8   : > { %v557_v60 = vmul.f32 %v6692_v56, %v456_v59 }
  0xa9   : > { %v6699_v3 = vadd.f32 1.1920929e-07, %v559_v61  ;;  %v6702_v9 = vadd.f32 1.1920929e-07, %v561_v63 }
  0xaa   : > { %v6696_v62 = vadd.f32 1.1920929e-07, %v557_v60 }
  0xab   : > { %vm667_vm4 = vweird.f32 %v6702_v9  ;;  %vm647_vm8 = vweird.f32 %v6699_v3 }
  0xac   : > { %5812 = vrsqrt.f32 %v6696_v62  ;;  %vm627_vm2 = vweird.f32 %v6696_v62 }
  0xad   : > { %5814 = vrsqrt.f32 %v6699_v3 }
  0xae   : > { %v471_v4 = vpop.xlane.xlu2 %470  ;;  %v465_v5 = vpop.xlane.xlu1 %464  ;;  %5816 = vrsqrt.f32 %v6702_v9 }
  0xaf   : > { %v459_v8 = vpop.xlane.xlu0 %458  ;;  %v562_v12 = vmul.f32 %v6692_v56, %v471_v4  ;;  %v560_v14 = vmul.f32 %v6692_v56, %v465_v5 }
  0xb0   : > { %v558_v10 = vmul.f32 %v6692_v56, %v459_v8 }
  0xb1   : > { %v6713_v16 = vadd.f32 1.1920929e-07, %v562_v12  ;;  %v6718_v23 = vadd.f32 1.1920929e-07, %v560_v14  ;;  %v6770_v12 = vperm.slane %v416_v57, 0 }
  0xb2   : > { %v6707_v13 = vadd.f32 1.1920929e-07, %v558_v10  ;;  %v6711_v15 = vpop.eup %5812 }
  0xb3   : > { %v6716_v22 = vpop.eup %5814  ;;  %v622_v30 = vmul.f32 %v6711_v15, %v6696_v62  ;;  %vm628_vm3 = vweird.f32 %v6711_v15  ;;  %vm677_vm12 = vweird.f32 %v6713_v16  ;;  %vm657_vm1 = vweird.f32 %v6718_v23 }
  0xb4   : > { %5818 = vrsqrt.f32 %v6707_v13  ;;  %v6728_v33 = vpop.eup %5816  ;;  %v642_v34 = vmul.f32 %v6716_v22, %v6699_v3  ;;  %vm637_vm7 = vweird.f32 %v6707_v13  ;;  %vm648_vm9 = vweird.f32 %v6716_v22  ;;  %vm6819_vm10 = vmor %vm627_vm2, %vm628_vm3 }
  0xb5   : > { %5820 = vrsqrt.f32 %v6713_v16  ;;  %v623_v40 = vmul.f32 %v6711_v15, %v622_v30  ;;  %v662_v42 = vmul.f32 %v6728_v33, %v6702_v9  ;;  %vm668_vm6 = vweird.f32 %v6728_v33 }
  0xb6   : > { %v474_v17 = vpop.xlane.xlu2 %473  ;;  %v489_v21 = vpop.xlane.xlu1 %488  ;;  %5822 = vrsqrt.f32 %v6718_v23  ;;  %v643_v43 = vmul.f32 %v6716_v22, %v642_v34 }
  0xb7   : > { %v563_v24 = vmul.f32 %v6692_v56, %v474_v17  ;;  %v568_v25 = vmul.f32 %v6692_v56, %v489_v21  ;;  %v486_v26 = vpop.xlane.xlu0 %485  ;;  %v624_v55 = vmul.f32 0.5, %v623_v40  ;;  %v663_v4 = vmul.f32 %v6728_v33, %v662_v42 }
  0xb8   : > { %v567_v31 = vmul.f32 %v6692_v56, %v486_v26  ;;  %v644_v5 = vmul.f32 0.5, %v643_v43 }
  0xb9   : > { %v6726_v32 = vadd.f32 1.1920929e-07, %v568_v25  ;;  %v6737_v39 = vadd.f32 1.1920929e-07, %v563_v24  ;;  %v625_v17 = vsub.f32 1.5, %v624_v55  ;;  %v664_v34 = vmul.f32 0.5, %v663_v4 }
  0xba   : > { %v6732_v35 = vadd.f32 1.1920929e-07, %v567_v31  ;;  %v6734_v36 = vpop.eup %5818  ;;  %v645_v40 = vsub.f32 1.5, %v644_v5 }
  0xbb   : > { %v632_v41 = vmul.f32 %v6734_v36, %v6707_v13  ;;  %5824 = vrsqrt.f32 %v6726_v32  ;;  %v6748_v50 = vpop.eup %5820  ;;  %vm638_vm5 = vweird.f32 %v6734_v36  ;;  %vm737_vm11 = vweird.f32 %v6726_v32 }
  0xbc   : > { %5826 = vrsqrt.f32 %v6732_v35  ;;  %v6756_v58 = vpop.eup %5822  ;;  %v672_v8 = vmul.f32 %v6748_v50, %v6713_v16  ;;  %vm678_vm13 = vweird.f32 %v6748_v50  ;;  %vm6830_vm14 = vmor %vm637_vm7, %vm638_vm5  ;;  %vm727_vm15 = vweird.f32 %v6732_v35 }
  0xbd   : > { %v633_v44 = vmul.f32 %v6734_v36, %v632_v41  ;;  %5828 = vrsqrt.f32 %v6737_v39  ;;  %v652_v21 = vmul.f32 %v6756_v58, %v6718_v23  ;;  %vm658_vm2 = vweird.f32 %v6756_v58  ;;  %vm6866_vm7 = vmor %vm667_vm4, %vm668_vm6 }
  0xbe   : > { %v495_v48 = vpop.xlane.xlu2 %494  ;;  %v492_v49 = vpop.xlane.xlu1 %491  ;;  %v673_v41 = vmul.f32 %v6748_v50, %v672_v8  ;;  %vm6925_vm6 = vmor %vm647_vm8, %vm648_vm9  ;;  %vm687_vm9 = vweird.f32 %v6737_v39 }
  0xbf   : > { %v570_v51 = vmul.f32 %v6692_v56, %v495_v48  ;;  %v569_v52 = vmul.f32 %v6692_v56, %v492_v49  ;;  %v477_v53 = vpop.xlane.xlu0 %476  ;;  %v634_v59 = vmul.f32 0.5, %v633_v44  ;;  %vm6948_vm8 = vmor %vm657_vm1, %vm658_vm2 }
  0xc0   : > { %v564_v63 = vmul.f32 %v6692_v56, %v477_v53  ;;  %v653_v53 = vmul.f32 %v6756_v58, %v652_v21 }
  0xc1   : > { %v6758_v60 = vadd.f32 1.1920929e-07, %v570_v51  ;;  %v6760_v61 = vadd.f32 1.1920929e-07, %v569_v52  ;;  %v6766_v10 = vpop.eup %5824  ;;  %v635_v26 = vsub.f32 1.5, %v634_v59  ;;  %v626_v59 = vmul.f32 %v6711_v15, %v625_v17 }
  0xc2   : > { %v6772_v14 = vpop.eup %5826  ;;  %v732_v24 = vmul.f32 %v6766_v10, %v6726_v32  ;;  %v6784_v31 = vadd.f32 1.1920929e-07, %v564_v63  ;;  %v6811_v17 = vmul.f32 %v6716_v22, %v645_v40  ;;  %v654_v40 = vmul.f32 0.5, %v653_v53 }
  0xc3   : > { %5830 = vrsqrt.f32 %v6758_v60  ;;  %v6779_v25 = vpop.eup %5828  ;;  %v722_v30 = vmul.f32 %v6772_v14, %v6732_v35  ;;  %v636_v5 = vmul.f32 %v6734_v36, %v635_v26  ;;  %vm738_vm3 = vweird.f32 %v6766_v10 }
  0xc4   : > { %5832 = vrsqrt.f32 %v6760_v61  ;;  %v733_v42 = vmul.f32 %v6766_v10, %v732_v24  ;;  %v682_v55 = vmul.f32 %v6779_v25, %v6737_v39  ;;  %v665_v24 = vsub.f32 1.5, %v664_v34 }
  0xc5   : > { %v723_v48 = vmul.f32 %v6772_v14, %v722_v30  ;;  %5834 = vrsqrt.f32 %v6784_v31  ;;  %vm728_vm5 = vweird.f32 %v6772_v14  ;;  %vm697_vm2 = vweird.f32 %v6784_v31 }
  0xc6   : > { %v498_v43 = vpop.xlane.xlu2 %497  ;;  %v513_v44 = vpop.xlane.xlu1 %512  ;;  %v734_v63 = vmul.f32 0.5, %v733_v42  ;;  %v683_v62 = vmul.f32 %v6779_v25, %v682_v55  ;;  %v666_v53 = vmul.f32 %v6728_v33, %v665_v24  ;;  %vm6902_vm4 = vmor %vm727_vm15, %vm728_vm5 }
  0xc7   : > { %v571_v49 = vmul.f32 %v6692_v56, %v498_v43  ;;  %v576_v51 = vmul.f32 %v6692_v56, %v513_v44  ;;  %v510_v52 = vpop.xlane.xlu0 %509  ;;  %v724_v13 = vmul.f32 0.5, %v723_v48  ;;  %v630_v43 = vsel %vm6819_vm10, %v6711_v15, %v626_v59  ;;  %vm6879_vm10 = vmor %vm737_vm11, %vm738_vm3 }
  0xc8   : > { %v575_v57 = vmul.f32 %v6692_v56, %v510_v52  ;;  %v6839_v44 = vmul.f32 0.5, %v673_v41  ;;  %v735_v48 = vsub.f32 1.5, %v734_v63  ;;  %v941_v59 = vmul.f32 %v630_v43, %v6563_v2  ;;  %vm6936_vm11 = vmor %vm677_vm12, %vm678_vm13 }
  0xc9   : > { %v6799_v4 = vadd.f32 1.1920929e-07, %v576_v51  ;;  %v6802_v8 = vpop.eup %5830  ;;  %v6806_v21 = vadd.f32 1.1920929e-07, %v571_v49  ;;  %v640_v49 = vsel %vm6830_vm14, %v6734_v36, %v636_v5  ;;  %v655_v63 = vsub.f32 1.5, %v654_v40 }
  0xca   : > { %v6808_v30 = vpop.eup %5832  ;;  %v6824_v34 = vadd.f32 1.1920929e-07, %v575_v57  ;;  %v752_v51 = vmul.f32 %v6802_v8, %v6758_v60  ;;  %v725_v57 = vsub.f32 1.5, %v724_v13  ;;  %v6858_v5 = vmul.f32 0.5, %v683_v62 }
  0xcb   : > { %5836 = vrsqrt.f32 %v6799_v4  ;;  %v742_v52 = vmul.f32 %v6808_v30, %v6760_v61  ;;  %v6853_v55 = vpop.eup %5834  ;;  %v942_v26 = vmul.f32 %v640_v49, %v6581_v11  ;;  %v736_v13 = vmul.f32 %v6766_v10, %v735_v48 }
  0xcc   : > { %5838 = vrsqrt.f32 %v6806_v21  ;;  %v675_v62 = vsub.f32 1.5, %v6839_v44  ;;  %v753_v9 = vmul.f32 %v6802_v8, %v752_v51  ;;  %v692_v48 = vmul.f32 %v6853_v55, %v6784_v31 }
  0xcd   : > { %5840 = vrsqrt.f32 %v6824_v34  ;;  %v743_v43 = vmul.f32 %v6808_v30, %v742_v52  ;;  %v974_v32 = vmul.f32 %v6770_v12, %v941_v59  ;;  %v656_v47 = vmul.f32 %v6756_v58, %v655_v63 }
  0xce   : > { %v519_v15 = vpop.xlane.xlu2 %518  ;;  %v516_v41 = vpop.xlane.xlu1 %515  ;;  %v740_v63 = vsel %vm6879_vm10, %v6766_v10, %v736_v13  ;;  %v670_v35 = vsel %vm6866_vm7, %v6728_v33, %v666_v53  ;;  %v693_v54 = vmul.f32 %v6853_v55, %v692_v48  ;;  %v676_v48 = vmul.f32 %v6748_v50, %v675_v62 }
  0xcf   : > { %v501_v36 = vpop.xlane.xlu0 %500  ;;  %v578_v42 = vmul.f32 %v6692_v56, %v519_v15  ;;  %v577_v2 = vmul.f32 %v6692_v56, %v516_v41  ;;  %v726_v15 = vmul.f32 %v6772_v14, %v725_v57  ;;  %v1006_v53 = vpack.c.bf16 %v974_v32, %v974_v32 }
  0xd0   : > { %v572_v40 = vmul.f32 %v6692_v56, %v501_v36  ;;  %v6959_v51 = vmul.f32 0.5, %v693_v54  ;;  %vm688_vm12 = vweird.f32 %v6779_v25  ;;  %v660_v54 = vsel %vm6948_vm8, %v6756_v58, %v656_v47 }
  0xd1   : > { %v6887_v49 = vpop.eup %5836  ;;  %v6890_v44 = vadd.f32 1.1920929e-07, %v578_v42  ;;  %v6892_v41 = vadd.f32 1.1920929e-07, %v577_v2  ;;  %v975_v42 = vmul.f32 %v6770_v12, %v942_v26  ;;  %v744_v2 = vmul.f32 0.5, %v743_v43  ;;  %vm7041_vm0 = vmor %vm687_vm9, %vm688_vm12 }
  0xd2   : > { %v6895_v36 = vpop.eup %5838  ;;  %v812_v52 = vmul.f32 %v6887_v49, %v6799_v4  ;;  %v6908_v57 = vadd.f32 1.1920929e-07, %v572_v40  ;;  %v754_v40 = vmul.f32 0.5, %v753_v9  ;;  %v730_v3 = vsel %vm6902_vm4, %v6772_v14, %v726_v15 }
  0xd3   : > { %v6911_v59 = vpop.eup %5840  ;;  %5842 = vrsqrt.f32 %v6890_v44  ;;  %v1007_v24 = vpack.c.bf16 %v975_v42, %v975_v42  ;;  %v762_v16 = vmul.f32 %v6895_v36, %v6806_v21  ;;  %v1055_v14 = vunpack.c.l.b16 %v1006_v53 }
  0xd4   : > { %v802_v10 = vmul.f32 %v6911_v59, %v6824_v34  ;;  %5844 = vrsqrt.f32 %v6892_v41  ;;  %v813_v11 = vmul.f32 %v6887_v49, %v812_v52  ;;  %v945_v15 = vmul.f32 %v670_v35, %v6557_v0 }
  0xd5   : > { %5846 = vrsqrt.f32 %v6908_v57  ;;  %v1056_v43 = vunpack.c.l.b16 %v1007_v24  ;;  %v755_v23 = vsub.f32 1.5, %v754_v40  ;;  %v745_v32 = vsub.f32 1.5, %v744_v2 }
  0xd6   : > { %v803_v9 = vmul.f32 %v6911_v59, %v802_v10  ;;  %v650_v42 = vsel %vm6925_vm6, %v6716_v22, %v6811_v17  ;;  %v680_v0 = vsel %vm6936_vm11, %v6748_v50, %v676_v48  ;;  %v978_v62 = vmul.f32 %v6770_v12, %v945_v15  ;;  %v483_v35 = vpop.xlane.xlu1 %482  ;;  %v522_v13 = vpop.xlane.xlu2 %521 }
  0xd7   : > { %v1057_v10 = vpack.c.b16 %v1056_v43, %v1055_v14  ;;  %v6977_v2 = vmul.f32 %v740_v63, %v6596_v19  ;;  %v6980_v22 = vmul.f32 %v730_v3, %v6599_v20  ;;  %vm747_vm13 = vweird.f32 %v6760_v61  ;;  %v6987_v26 = vpop.xlane.xlu0 %479  ;;  %v7019_v14 = vld [vmem:[%s10139_s1] sm:$0xff] }
  0xd8   : > { %vm748_vm14 = vweird.f32 %v6808_v30  ;;  %v763_v17 = vmul.f32 %v6895_v36, %v762_v16  ;;  %v814_v47 = vmul.f32 0.5, %v813_v11  ;;  %vm817_vm15 = vweird.f32 %v6799_v4 }
  0xd9   : > { %v6965_v52 = vpop.eup %5842  ;;  %v804_v19 = vmul.f32 0.5, %v803_v9  ;;  %1070 = vmatpush.bf16.msra.mxu1 %v1057_v10  ;;  %v946_v20 = vmul.f32 %v680_v0, %v6572_v6  ;;  %v943_v58 = vmul.f32 %v650_v42, %v6560_v1  ;;  %vm807_vm1 = vweird.f32 %v6824_v34  ;;  %vm7050_vm6 = vmor %vm747_vm13, %vm748_vm14 }
  0xda   : > { %v832_v50 = vmul.f32 %v6965_v52, %v6890_v44  ;;  %v6989_v40 = vpop.eup %5844  ;;  %v1010_v53 = vpack.c.bf16 %v978_v62, %v978_v62  ;;  %v944_v24 = vmul.f32 %v660_v54, %v6575_v7  ;;  %v7002_v16 = vmul.f32 %v6802_v8, %v755_v23 }
  0xdb   : > { %v6994_v63 = vpop.eup %5846  ;;  %v822_v3 = vmul.f32 %v6989_v40, %v6892_v41  ;;  %v7005_v6 = vmul.f32 %v6808_v30, %v745_v32  ;;  %v695_v1 = vsub.f32 1.5, %v6959_v51  ;;  %vm698_vm3 = vweird.f32 %v6853_v55 }
  0xdc   : > { %v833_v33 = vmul.f32 %v6965_v52, %v832_v50  ;;  %v772_v11 = vmul.f32 %v6994_v63, %v6908_v57  ;;  %vm818_vm5 = vweird.f32 %v6887_v49  ;;  %vm837_vm7 = vweird.f32 %v6890_v44 }
  0xdd   : > { %v823_v7 = vmul.f32 %v6989_v40, %v822_v3  ;;  %v979_v9 = vmul.f32 %v6770_v12, %v946_v20  ;;  %vm757_vm10 = vweird.f32 %v6758_v60  ;;  %vm758_vm4 = vweird.f32 %v6802_v8  ;;  %vm7063_vm12 = vmor %vm817_vm15, %vm818_vm5 }
  0xde   : > { %v7023_v43 = vmul.f32 0.5, %v763_v17  ;;  %v815_v48 = vsub.f32 1.5, %v814_v47  ;;  %v834_v15 = vmul.f32 0.5, %v833_v33  ;;  %v976_v23 = vmul.f32 %v6770_v12, %v943_v58 }
  0xdf   : > { %v805_v32 = vsub.f32 1.5, %v804_v19  ;;  %v1011_v42 = vpack.c.bf16 %v979_v9, %v979_v9  ;;  %v1099_v10 = vunpack.c.l.b16 %v1010_v53  ;;  %v977_v0 = vmul.f32 %v6770_v12, %v944_v24  ;;  %v504_v9 = vpop.xlane.xlu1 %503 }
  0xe0   : > { %v773_v62 = vmul.f32 %v6994_v63, %v772_v11  ;;  %v1008_v54 = vpack.c.bf16 %v976_v23, %v976_v23  ;;  %vm1059_vm11 = vcmask 130048   ;;  %v579_v50 = vmul.f32 %v6692_v56, %v522_v13 }
  0xe1   : > { %vm808_vm8 = vweird.f32 %v6911_v59  ;;  %v824_v17 = vmul.f32 0.5, %v823_v7  ;;  %v1100_v47 = vunpack.c.l.b16 %v1011_v42  ;;  %v1009_v20 = vpack.c.bf16 %v977_v0, %v977_v0  ;;  %5515 = vmatmul.msk.bf16.vlgmr.msra.gmra.mxu1 %vm1059_vm11, %v7019_v14 }
  0xe2   : > { %v765_v19 = vsub.f32 1.5, %v7023_v43  ;;  %v835_v58 = vsub.f32 1.5, %v834_v15  ;;  %v7034_v33 = vadd.f32 1.1920929e-07, %v579_v50  ;;  %v566_v3 = vmul.f32 %v6692_v56, %v483_v35  ;;  %v525_v43 = vpop.xlane.xlu0 %524  ;;  %vm7075_vm13 = vmor %vm807_vm1, %vm808_vm8 }
  0xe3   : > { %v816_v24 = vmul.f32 %v6887_v49, %v815_v48  ;;  %v1101_v13 = vpack.c.b16 %v1100_v47, %v1099_v10  ;;  %v1079_v11 = vunpack.c.l.b16 %v1008_v54  ;;  %v1080_v7 = vunpack.c.l.b16 %v1009_v20  ;;  %v507_v10 = vpop.xlane.xlu2 %506  ;;  %vm7102_vm1 = vmor %vm697_vm2, %vm698_vm3 }
  0xe4   : > { %v806_v39 = vmul.f32 %v6911_v59, %v805_v32  ;;  %vm838_vm9 = vweird.f32 %v6965_v52  ;;  %v7056_v15 = vmul.f32 0.5, %v773_v62  ;;  %5848 = vrsqrt.f32 %v7034_v33  ;;  %vm7121_vm2 = vmor %vm757_vm10, %vm758_vm4 }
  0xe5   : > { %v825_v61 = vsub.f32 1.5, %v824_v17  ;;  %1110 = vmatpush.bf16.msra.mxu2 %v1101_v13  ;;  %v1081_v23 = vpack.c.b16 %v1080_v7, %v1079_v11  ;;  %v7067_v42 = vadd.f32 1.1920929e-07, %v566_v3  ;;  %v565_v32 = vmul.f32 %v6692_v56, %v6987_v26  ;;  %vm7087_vm14 = vmor %vm837_vm7, %vm838_vm9 }
  0xe6   : > { %v836_v4 = vmul.f32 %v6965_v52, %v835_v58  ;;  %v574_v62 = vmul.f32 %v6692_v56, %v507_v10  ;;  %v573_v54 = vmul.f32 %v6692_v56, %v504_v9  ;;  %v580_v50 = vmul.f32 %v6692_v56, %v525_v43 }
  0xe7   : > { %vm828_vm15 = vweird.f32 %v6989_v40  ;;  %1090 = vmatpush.bf16.msrb.mxu1 %v1081_v23  ;;  %5850 = vrsqrt.f32 %v7067_v42  ;;  %v7093_v34 = vadd.f32 1.1920929e-07, %v565_v32  ;;  %v10201_v17 = vsub.f32 1.5, %v6858_v5 }
  0xe8   : > { %5517 = vmatmul.msk.bf16.vlgmr.msra.gmra.mxu2 %vm1059_vm11, %v7019_v14  ;;  %v7108_v20 = vadd.f32 1.1920929e-07, %v574_v62  ;;  %v7110_v58 = vadd.f32 1.1920929e-07, %v573_v54  ;;  %v7112_v3 = vadd.f32 1.1920929e-07, %v580_v50  ;;  %v696_v5 = vmul.f32 %v6853_v55, %v695_v1 }
  0xe9   : > { %v686_v47 = vmul.f32 %v6779_v25, %v10201_v17  ;;  %v820_v13 = vsel %vm7063_vm12, %v6887_v49, %v816_v24  ;;  %v826_v11 = vmul.f32 %v6989_v40, %v825_v61  ;;  %5852 = vrsqrt.f32 %v7093_v34 }
  0xea   : > { %v7133_v1 = vpop.eup %5848  ;;  %v810_v60 = vsel %vm7075_vm13, %v6911_v59, %v806_v39  ;;  %v840_v7 = vsel %vm7087_vm14, %v6965_v52, %v836_v4  ;;  %vm10206_vm3 = vweird.f32 %v6892_v41  ;;  %5854 = vrsqrt.f32 %v7108_v20 }
  0xeb   : > { %v690_v51 = vsel %vm7041_vm0, %v6779_v25, %v686_v47  ;;  %vm7145_vm5 = vmor %vm10206_vm3, %vm828_vm15  ;;  %v775_v25 = vsub.f32 1.5, %v7056_v15  ;;  %v842_v53 = vmul.f32 %v7133_v1, %v7034_v33  ;;  %5856 = vrsqrt.f32 %v7110_v58  ;;  %v534_v61 = vpop.xlane.xlu2 %533 }
  0xec   : > { %v700_v59 = vsel %vm7102_vm1, %v6853_v55, %v696_v5  ;;  %v750_v41 = vsel %vm7050_vm6, %v6808_v30, %v7005_v6  ;;  %5858 = vrsqrt.f32 %v7112_v3  ;;  %v947_v52 = vmul.f32 %v690_v51, %v6593_v18 }
  0xed   : > { %v948_v24 = vmul.f32 %v700_v59, %v6617_v29  ;;  %v760_v9 = vsel %vm7121_vm2, %v6802_v8, %v7002_v16  ;;  %v7168_v43 = vpop.eup %5850  ;;  %v7171_v55 = vmul.f32 %v6895_v36, %v765_v19  ;;  %v7174_v39 = vmul.f32 %v820_v13, %v6630_v37  ;;  %v7180_v29 = vpop.xlane.xlu1 %530 }
  0xee   : > { %v830_v30 = vsel %vm7145_vm5, %v6989_v40, %v826_v11  ;;  %v843_v18 = vmul.f32 %v7133_v1, %v842_v53  ;;  %v712_v6 = vmul.f32 %v7168_v43, %v7067_v42  ;;  %v980_v8 = vmul.f32 %v6770_v12, %v947_v52 }
  0xef   : > { %v981_v16 = vmul.f32 %v6770_v12, %v948_v24  ;;  %v953_v19 = vmul.f32 %v750_v41, %v6614_v28  ;;  %v7187_v35 = vpop.eup %5852  ;;  %v7190_v37 = vmul.f32 %v810_v60, %v6633_v38  ;;  %v7193_v40 = vmul.f32 %v840_v7, %v6643_v45  ;;  %v528_v38 = vpop.xlane.xlu0 %527 }
  0xf0   : > { %v844_v15 = vmul.f32 0.5, %v843_v18  ;;  %v954_v48 = vmul.f32 %v760_v9, %v6611_v27  ;;  %v7196_v23 = vpop.eup %5854  ;;  %v7199_v32 = vmul.f32 %v6994_v63, %v775_v25  ;;  %vm847_vm0 = vweird.f32 %v7034_v33 }
  0xf1   : > { %v702_v28 = vmul.f32 %v7187_v35, %v7093_v34  ;;  %v1012_v10 = vpack.c.bf16 %v980_v8, %v980_v8  ;;  %v7204_v0 = vpop.eup %5856  ;;  %vm767_vm7 = vweird.f32 %v6806_v21  ;;  %vm768_vm10 = vweird.f32 %v6895_v36  ;;  %5516 = vmatmul.msk.bf16.vlgmr.msrb.gmra.mxu1 %vm1059_vm11, %v7019_v14  ;;  %v420_v8 = vld [vmem:[%s10140_s2 + $0x8] sm:$0xff] }
  0xf2   : > { %v7209_v27 = vmul.f32 %v830_v30, %v6646_v46  ;;  %v845_v45 = vsub.f32 1.5, %v844_v15  ;;  %v792_v4 = vmul.f32 %v7196_v23, %v7108_v20  ;;  %v1013_v62 = vpack.c.bf16 %v981_v16, %v981_v16  ;;  %v7215_v54 = vpop.eup %5858  ;;  %vm7270_vm14 = vmor %vm767_vm7, %vm768_vm10 }
  0xf3   : > { %vm848_vm4 = vweird.f32 %v7133_v1  ;;  %v713_v50 = vmul.f32 %v7168_v43, %v712_v6  ;;  %v782_v26 = vmul.f32 %v7204_v0, %v7110_v58  ;;  %v986_v46 = vmul.f32 %v6770_v12, %v953_v19 }
  0xf4   : > { %vm777_vm6 = vweird.f32 %v6908_v57  ;;  %vm778_vm8 = vweird.f32 %v6994_v63  ;;  %v703_v17 = vmul.f32 %v7187_v35, %v702_v28  ;;  %v793_v47 = vmul.f32 %v7196_v23, %v792_v4  ;;  %vm7236_vm9 = vmor %vm847_vm0, %vm848_vm4  ;;  %v419_v28 = vld [vmem:[%s10140_s2] sm:$0xff] }
  0xf5   : > { %v852_v44 = vmul.f32 %v7215_v54, %v7112_v3  ;;  %v987_v5 = vmul.f32 %v6770_v12, %v954_v48  ;;  %v846_v31 = vmul.f32 %v7133_v1, %v845_v45  ;;  %v1119_v13 = vunpack.c.l.b16 %v1012_v10  ;;  %v540_v24 = vpop.xlane.xlu1 %539  ;;  %v543_v48 = vpop.xlane.xlu2 %542  ;;  %vm7298_vm1 = vmor %vm777_vm6, %vm778_vm8 }
  0xf6   : > { %v984_v11 = vmul.f32 %v6770_v12, %v6980_v22  ;;  %v985_v51 = vmul.f32 %v6770_v12, %v6977_v2  ;;  %v783_v7 = vmul.f32 %v7204_v0, %v782_v26  ;;  %vm857_vm12 = vweird.f32 %v7112_v3  ;;  %v10217_v3 = vld [vmem:[#allocation13_spill] sm:$0xff] }
  0xf7   : > { %v853_v49 = vmul.f32 %v7215_v54, %v852_v44  ;;  %v1120_v25 = vunpack.c.l.b16 %v1013_v62  ;;  %v7243_v53 = vmul.f32 0.5, %v713_v50  ;;  %v794_v59 = vmul.f32 0.5, %v793_v47  ;;  %v537_v50 = vpop.xlane.xlu0 %536 }
  0xf8   : > { %vm858_vm13 = vweird.f32 %v7215_v54  ;;  %v1018_v22 = vpack.c.bf16 %v986_v46, %v986_v46  ;;  %v7246_v2 = vmul.f32 0.5, %v703_v17  ;;  %v1019_v52 = vpack.c.bf16 %v987_v5, %v987_v5 }
  0xf9   : > { %v854_v33 = vmul.f32 0.5, %v853_v49  ;;  %v1121_v41 = vpack.c.b16 %v1120_v25, %v1119_v13  ;;  %v850_v9 = vsel %vm7236_vm9, %v7133_v1, %v846_v31  ;;  %v1016_v18 = vpack.c.bf16 %v984_v11, %v984_v11  ;;  %vm7285_vm15 = vmor %vm857_vm12, %vm858_vm13 }
  0xfa   : > { %v1179_v30 = vunpack.c.l.b16 %v1018_v22  ;;  %v1017_v6 = vpack.c.bf16 %v985_v51, %v985_v51  ;;  %v7254_v16 = vmul.f32 0.5, %v783_v7  ;;  %v1180_v15 = vunpack.c.l.b16 %v1019_v52 }
  0xfb   : > { %v855_v19 = vsub.f32 1.5, %v854_v33  ;;  %1130 = vmatpush.bf16.msra.mxu3 %v1121_v41  ;;  %v795_v10 = vsub.f32 1.5, %v794_v59  ;;  %v1159_v45 = vunpack.c.l.b16 %v1016_v18  ;;  %v6400_v4 = vmov 0  }
  0xfc   : > { %v1160_v1 = vunpack.c.l.b16 %v1017_v6  ;;  %5803 = vset.pattern.permute.xlu0 %v6400_v4  ;;  %v583_v62 = vmul.f32 %v6692_v56, %v534_v61  ;;  %5802 = vset.pattern.permute.xlu2 %v6400_v4  ;;  %v1181_v46 = vpack.c.b16 %v1180_v15, %v1179_v30  ;;  %v582_v17 = vmul.f32 %v6692_v56, %v7180_v29 }
  0xfd   : > { %v7261_v26 = vmul.f32 %v7215_v54, %v855_v19  ;;  %1045 = vperm.xlu0 %5803, %v420_v8   ;;  %v581_v47 = vmul.f32 %v6692_v56, %v528_v38  ;;  %v586_v31 = vmul.f32 %v6692_v56, %v543_v48  ;;  %v585_v29 = vmul.f32 %v6692_v56, %v540_v24  ;;  %v549_v18 = vpop.xlane.xlu1 %548 }
  0xfe   : > { %v1161_v61 = vpack.c.b16 %v1160_v1, %v1159_v45  ;;  %5518 = vmatmul.msk.bf16.vlgmr.msra.gmra.mxu3 %vm1059_vm11, %v7019_v14  ;;  %v7276_v5 = vadd.f32 1.1920929e-07, %v583_v62  ;;  %1040 = vperm.xlu2 %5802, %v419_v28   ;;  %v715_v38 = vsub.f32 1.5, %v7243_v53  ;;  %v7289_v13 = vadd.f32 1.1920929e-07, %v582_v17 }
  0xff   : > { %1190 = vmatpush.bf16.msrb.mxu2 %v1181_v46  ;;  %v7291_v11 = vadd.f32 1.1920929e-07, %v581_v47  ;;  %v584_v51 = vmul.f32 %v6692_v56, %v537_v50  ;;  %5804 = vset.pattern.permute.xlu1 %v6400_v4  ;;  %v7303_v7 = vmul.f32 %v850_v9, %v10217_v3  ;;  %v705_v49 = vsub.f32 1.5, %v7246_v2  ;;  %v7336_v9 = vld [vmem:[%s6550_s28 + $0x70] sm:$0xff] }
 0x100   : > { %1170 = vmatpush.bf16.msra.mxu1 %v1161_v61  ;;  %5860 = vrsqrt.f32 %v7276_v5  ;;  %v7307_v25 = vadd.f32 1.1920929e-07, %v586_v31  ;;  %v7310_v59 = vmul.f32 %v7196_v23, %v795_v10  ;;  %v785_v57 = vsub.f32 1.5, %v7254_v16  ;;  %v546_v16 = vpop.xlane.xlu0 %545 }
 0x101   : > { %5862 = vrsqrt.f32 %v7289_v13  ;;  %v7314_v22 = vadd.f32 1.1920929e-07, %v585_v29  ;;  %v860_v33 = vsel %vm7285_vm15, %v7215_v54, %v7261_v26  ;;  %v7323_v41 = vadd.f32 1.1920929e-07, %v584_v51  ;;  %v7499_v26 = vld [vmem:[%s6550_s28 + $0xd0] sm:$0xff] }
 0x102   : > { %5521 = vmatmul.msk.bf16.vlgmr.msrb.gmra.mxu2 %vm1059_vm11, %v7019_v14  ;;  %5864 = vrsqrt.f32 %v7291_v11  ;;  %v770_v52 = vsel %vm7270_vm14, %v6895_v36, %v7171_v55  ;;  %vm887_vm2 = vweird.f32 %v7276_v5  ;;  %v780_v24 = vsel %vm7298_vm1, %v6994_v63, %v7199_v32  ;;  %v10218_v36 = vld [vmem:[#allocation12_spill] sm:$0xff] }
 0x103   : > { %5866 = vrsqrt.f32 %v7307_v25  ;;  %v955_v30 = vmul.f32 %v7336_v9, %v770_v52  ;;  %5520 = vmatmul.msk.bf16.vlgmr.msra.gmra.mxu1 %vm1059_vm11, %v7019_v14  ;;  %vm877_vm3 = vweird.f32 %v7289_v13  ;;  %v956_v55 = vmul.f32 %v780_v24, %v10218_v36 }
 0x104   : > { %5868 = vrsqrt.f32 %v7314_v22  ;;  %v994_v6 = vmul.f32 %v6770_v12, %v7209_v27  ;;  %vm867_vm5 = vweird.f32 %v7291_v11  ;;  %v995_v32 = vmul.f32 %v6770_v12, %v7193_v40 }
 0x105   : > { %5870 = vrsqrt.f32 %v7323_v41  ;;  %v988_v63 = vmul.f32 %v6770_v12, %v955_v30  ;;  %v7353_v8 = vmul.f32 %v6770_v12, %v7190_v37  ;;  %vm917_vm0 = vweird.f32 %v7307_v25 }
 0x106   : > { %v7355_v19 = vpop.eup %5860  ;;  %v989_v15 = vmul.f32 %v6770_v12, %v956_v55  ;;  %v1026_v27 = vpack.c.bf16 %v994_v6, %v994_v6  ;;  %v7361_v48 = vmul.f32 %v6770_v12, %v7174_v39  ;;  %v7364_v28 = vmul.f32 %v6692_v56, %v549_v18 }
 0x107   : > { %v7366_v10 = vpop.eup %5862  ;;  %v882_v37 = vmul.f32 %v7355_v19, %v7276_v5  ;;  %vm888_vm7 = vweird.f32 %v7355_v19  ;;  %vm907_vm10 = vweird.f32 %v7314_v22  ;;  %v1020_v40 = vpack.c.bf16 %v988_v63, %v988_v63 }
 0x108   : > { %v1027_v45 = vpack.c.bf16 %v995_v32, %v995_v32  ;;  %v7372_v1 = vpop.eup %5864  ;;  %v872_v39 = vmul.f32 %v7366_v10, %v7289_v13  ;;  %vm878_vm4 = vweird.f32 %v7366_v10  ;;  %v1021_v4 = vpack.c.bf16 %v989_v15, %v989_v15  ;;  %vm7413_vm14 = vmor %vm887_vm2, %vm888_vm7 }
 0x109   : > { %v1259_v62 = vunpack.c.l.b16 %v1026_v27  ;;  %v7378_v50 = vpop.eup %5866  ;;  %v883_v46 = vmul.f32 %v7355_v19, %v882_v37  ;;  %v862_v17 = vmul.f32 %v7372_v1, %v7291_v11  ;;  %vm868_vm12 = vweird.f32 %v7372_v1  ;;  %vm7423_vm6 = vmor %vm877_vm3, %vm878_vm4 }
 0x10a   : > { %v1199_v47 = vunpack.c.l.b16 %v1020_v40  ;;  %v7386_v44 = vpop.eup %5868  ;;  %v873_v61 = vmul.f32 %v7366_v10, %v872_v39  ;;  %v912_v31 = vmul.f32 %v7378_v50, %v7307_v25  ;;  %vm918_vm1 = vweird.f32 %v7378_v50  ;;  %vm7434_vm2 = vmor %vm867_vm5, %vm868_vm12 }
 0x10b   : > { %v1200_v29 = vunpack.c.l.b16 %v1021_v4  ;;  %v7394_v51 = vpop.eup %5870  ;;  %vm788_vm9 = vweird.f32 %v7204_v0  ;;  %v884_v60 = vmul.f32 0.5, %v883_v46  ;;  %v863_v3 = vmul.f32 %v7372_v1, %v862_v17  ;;  %vm7446_vm3 = vmor %vm917_vm0, %vm918_vm1 }
 0x10c   : > { %v902_v52 = vmul.f32 %v7386_v44, %v7314_v22  ;;  %vm908_vm13 = vweird.f32 %v7386_v44  ;;  %v874_v24 = vmul.f32 0.5, %v873_v61  ;;  %v913_v30 = vmul.f32 %v7378_v50, %v912_v31 }
 0x10d   : > { %v892_v18 = vmul.f32 %v7394_v51, %v7323_v41  ;;  %vm898_vm8 = vweird.f32 %v7394_v51  ;;  %v885_v36 = vsub.f32 1.5, %v884_v60  ;;  %v864_v55 = vmul.f32 0.5, %v863_v3  ;;  %vm7463_vm5 = vmor %vm907_vm10, %vm908_vm13 }
 0x10e   : > { %v903_v6 = vmul.f32 %v7386_v44, %v902_v52  ;;  %v1201_v63 = vpack.c.b16 %v1200_v29, %v1199_v47  ;;  %v875_v15 = vsub.f32 1.5, %v874_v24  ;;  %v914_v27 = vmul.f32 0.5, %v913_v30 }
 0x10f   : > { %v893_v37 = vmul.f32 %v7394_v51, %v892_v18  ;;  %v1260_v40 = vunpack.c.l.b16 %v1027_v45  ;;  %v886_v39 = vmul.f32 %v7355_v19, %v885_v36  ;;  %v865_v5 = vsub.f32 1.5, %v864_v55  ;;  %v7515_v36 = vld [vmem:[%s6550_s28 + $0xc8] sm:$0xff] }
 0x110   : > { %v904_v46 = vmul.f32 0.5, %v903_v6  ;;  %1210 = vmatpush.bf16.msrb.mxu3 %v1201_v63  ;;  %v1024_v17 = vpack.c.bf16 %v7353_v8, %v7353_v8  ;;  %v876_v47 = vmul.f32 %v7366_v10, %v875_v15  ;;  %v915_v13 = vsub.f32 1.5, %v914_v27  ;;  %v7521_v6 = vld [vmem:[%s6550_s28 + $0xc0] sm:$0xff] }
 0x111   : > { %v894_v61 = vmul.f32 0.5, %v893_v37  ;;  %v1261_v31 = vpack.c.b16 %v1260_v40, %v1259_v62  ;;  %v890_v29 = vsel %vm7413_vm14, %v7355_v19, %v886_v39  ;;  %v866_v8 = vmul.f32 %v7372_v1, %v865_v5 }
 0x112   : > { %v905_v60 = vsub.f32 1.5, %v904_v46  ;;  %v1025_v3 = vpack.c.bf16 %v7361_v48, %v7361_v48  ;;  %v786_v62 = vmul.f32 %v7204_v0, %v785_v57  ;;  %v880_v19 = vsel %vm7423_vm6, %v7366_v10, %v876_v47  ;;  %v7470_v57 = vld [vmem:[%s6550_s28 + $0xb8] sm:$0xff]  ;;  %v7580_v46 = vld [vmem:[%s6550_s28 + $0xe0] sm:$0xff] }
 0x113   : > { %v916_v52 = vmul.f32 %v7378_v50, %v915_v13  ;;  %v895_v48 = vsub.f32 1.5, %v894_v61  ;;  %1270 = vmatpush.bf16.msra.mxu2 %v1261_v31  ;;  %5522 = vmatmul.msk.bf16.vlgmr.msrb.gmra.mxu3 %vm1059_vm11, %v7019_v14  ;;  %v964_v22 = vmul.f32 %v7470_v57, %v860_v33  ;;  %v870_v10 = vsel %vm7434_vm2, %v7372_v1, %v866_v8  ;;  %v7585_v47 = vld [vmem:[%s6550_s28 + $0x40] sm:$0xff]  ;;  %v7600_v61 = vld [vmem:[%s6550_s28 + $0x48] sm:$0xff] }
 0x114   : > { %v906_v24 = vmul.f32 %v7386_v44, %v905_v60  ;;  %vm10229_vm0 = vweird.f32 %v7323_v41  ;;  %v1239_v21 = vunpack.c.l.b16 %v1024_v17  ;;  %vm10232_vm10 = vweird.f32 %v7168_v43  ;;  %v7611_v8 = vld [vmem:[%s6550_s28 + $0x88] sm:$0xff] }
 0x115   : > { %vm7486_vm7 = vmor %vm10229_vm0, %vm898_vm8  ;;  %vm10233_vm15 = vweird.f32 %v7067_v42  ;;  %v967_v33 = vmul.f32 %v7499_v26, %v890_v29  ;;  %v920_v41 = vsel %vm7446_vm3, %v7378_v50, %v916_v52  ;;  %v896_v1 = vmul.f32 %v7394_v51, %v895_v48 }
 0x116   : > { %vm7494_vm4 = vmor %vm10233_vm15, %vm10232_vm10  ;;  %v1240_v18 = vunpack.c.l.b16 %v1025_v3  ;;  %vm10236_vm6 = vweird.f32 %v7187_v35  ;;  %vm10237_vm8 = vweird.f32 %v7093_v34  ;;  %v7518_v55 = vmul.f32 %v7515_v36, %v880_v19  ;;  %5525 = vmatmul.msk.bf16.vlgmr.msra.gmra.mxu2 %vm1059_vm11, %v7019_v14 }
 0x117   : > { %vm7510_vm12 = vmor %vm10237_vm8, %vm10236_vm6  ;;  %v7524_v50 = vmul.f32 %v7521_v6, %v870_v10  ;;  %v7529_v34 = vadd.f32 1.1920929e-07, %v7364_v28  ;;  %v587_v63 = vmul.f32 %v6692_v56, %v546_v16  ;;  %vm10240_vm13 = vweird.f32 %v7110_v58 }
 0x118   : > { %vm7536_vm14 = vmor %vm10240_vm13, %vm788_vm9  ;;  %v910_v15 = vsel %vm7463_vm5, %v7386_v44, %v906_v24  ;;  %v900_v28 = vsel %vm7486_vm7, %v7394_v51, %v896_v1  ;;  %v1241_v27 = vpack.c.b16 %v1240_v18, %v1239_v21  ;;  %v706_v37 = vmul.f32 %v7187_v35, %v705_v49  ;;  %v7558_v44 = vld [vmem:[%s6550_s28 + $0xe8] sm:$0xff]  ;;  %v7564_v51 = vld [vmem:[%s6550_s28 + $0xd8] sm:$0xff] }
 0x119   : > { %vm10243_vm1 = vweird.f32 %v7196_v23  ;;  %vm10244_vm9 = vweird.f32 %v7108_v20  ;;  %v7561_v40 = vmul.f32 %v7558_v44, %v920_v41  ;;  %v968_v2 = vmul.f32 %v7564_v51, %v900_v28 }
 0x11a   : > { %vm7553_vm2 = vmor %vm10244_vm9, %vm10243_vm1  ;;  %5872 = vrsqrt.f32 %v7529_v34  ;;  %v7568_v49 = vadd.f32 1.1920929e-07, %v587_v63  ;;  %1250 = vmatpush.bf16.msrb.mxu1 %v1241_v27  ;;  %v710_v20 = vsel %vm7510_vm12, %v7187_v35, %v706_v37  ;;  %v716_v39 = vmul.f32 %v7168_v43, %v715_v38 }
 0x11b   : > { %v996_v4 = vmul.f32 %v6770_v12, %v7303_v7  ;;  %v997_v5 = vmul.f32 %v6770_v12, %v964_v22  ;;  %v969_v17 = vmul.f32 %v7580_v46, %v910_v15  ;;  %v949_v35 = vmul.f32 %v7585_v47, %v710_v20 }
 0x11c   : > { %5874 = vrsqrt.f32 %v7568_v49  ;;  %v790_v53 = vsel %vm7536_vm14, %v7204_v0, %v786_v62  ;;  %vm937_vm3 = vweird.f32 %v7529_v34  ;;  %v720_v38 = vsel %vm7494_vm4, %v7168_v43, %v716_v39  ;;  %v7607_v0 = vld [vmem:[%s6550_s28 + $0x80] sm:$0xff] }
 0x11d   : > { %v1028_v7 = vpack.c.bf16 %v996_v4, %v996_v4  ;;  %v1029_v45 = vpack.c.bf16 %v997_v5, %v997_v5  ;;  %v800_v13 = vsel %vm7553_vm2, %v7196_v23, %v7310_v59  ;;  %v950_v31 = vmul.f32 %v7600_v61, %v720_v38  ;;  %5524 = vmatmul.msk.bf16.vlgmr.msrb.gmra.mxu1 %vm1059_vm11, %v7019_v14 }
 0x11e   : > { %v982_v29 = vmul.f32 %v6770_v12, %v949_v35  ;;  %v957_v43 = vmul.f32 %v7607_v0, %v790_v53  ;;  %v958_v11 = vmul.f32 %v7611_v8, %v800_v13  ;;  %vm927_vm5 = vweird.f32 %v7568_v49 }
 0x11f   : > { %v1279_v23 = vunpack.c.l.b16 %v1028_v7  ;;  %v1280_v59 = vunpack.c.l.b16 %v1029_v45  ;;  %v1000_v60 = vmul.f32 %v6770_v12, %v967_v33  ;;  %v1001_v3 = vmul.f32 %v6770_v12, %v968_v2 }
 0x120   : > { %v5873_v62 = vpop.eup %5872  ;;  %v983_v19 = vmul.f32 %v6770_v12, %v950_v31  ;;  %v1014_v52 = vpack.c.bf16 %v982_v29, %v982_v29  ;;  %v990_v25 = vmul.f32 %v6770_v12, %v957_v43  ;;  %v991_v48 = vmul.f32 %v6770_v12, %v958_v11 }
 0x121   : > { %v932_v16 = vmul.f32 %v5873_v62, %v7529_v34  ;;  %vm938_vm0 = vweird.f32 %v5873_v62  ;;  %v1281_v22 = vpack.c.b16 %v1280_v59, %v1279_v23  ;;  %v1032_v10 = vpack.c.bf16 %v1000_v60, %v1000_v60 }
 0x122   : > { %v5875_v24 = vpop.eup %5874  ;;  %v1015_v30 = vpack.c.bf16 %v983_v19, %v983_v19  ;;  %v1139_v21 = vunpack.c.l.b16 %v1014_v52  ;;  %v1022_v54 = vpack.c.bf16 %v990_v25, %v990_v25  ;;  %v1023_v33 = vpack.c.bf16 %v991_v48, %v991_v48  ;;  %vm7632_vm10 = vmor %vm937_vm3, %vm938_vm0  ;;  %v7650_v52 = vld [vmem:[%s6550_s28 + $0xf0] sm:$0xff] }
 0x123   : > { %v933_v41 = vmul.f32 %v5873_v62, %v932_v16  ;;  %v922_v1 = vmul.f32 %v5875_v24, %v7568_v49  ;;  %vm928_vm7 = vweird.f32 %v5875_v24  ;;  %1290 = vmatpush.bf16.msra.mxu3 %v1281_v22  ;;  %v1033_v18 = vpack.c.bf16 %v1001_v3, %v1001_v3 }
 0x124   : > { %v1140_v42 = vunpack.c.l.b16 %v1015_v30  ;;  %v1219_v63 = vunpack.c.l.b16 %v1022_v54  ;;  %v1220_v32 = vunpack.c.l.b16 %v1023_v33  ;;  %v1319_v15 = vunpack.c.l.b16 %v1032_v10  ;;  %vm929_vm15 = vmor %vm927_vm5, %vm928_vm7  ;;  %v6274_v33 = vld [vmem:[%s6550_s28] sm:$0xff] }
 0x125   : > { %v934_v28 = vmul.f32 0.5, %v933_v41  ;;  %v923_v27 = vmul.f32 %v5875_v24, %v922_v1  ;;  %v1320_v37 = vunpack.c.l.b16 %v1033_v18  ;;  %v1002_v58 = vmul.f32 %v6770_v12, %v969_v17  ;;  %v6277_v17 = vld [vmem:[%s6550_s28 + $0x18] sm:$0xff] }
 0x126   : > { %v1141_v2 = vpack.c.b16 %v1140_v42, %v1139_v21  ;;  %5526 = vmatmul.msk.bf16.vlgmr.msra.gmra.mxu3 %vm1059_vm11, %v7019_v14  ;;  %v1221_v20 = vpack.c.b16 %v1220_v32, %v1219_v63  ;;  %v1003_v39 = vmul.f32 %v6770_v12, %v7561_v40  ;;  %v998_v4 = vmul.f32 %v6770_v12, %v7524_v50 }
 0x127   : > { %v935_v5 = vsub.f32 1.5, %v934_v28  ;;  %v924_v35 = vmul.f32 0.5, %v923_v27  ;;  %v1321_v53 = vpack.c.b16 %v1320_v37, %v1319_v15  ;;  %v1034_v38 = vpack.c.bf16 %v1002_v58, %v1002_v58  ;;  %v6275_v27 = vld [vmem:[%s6550_s28 + $0x8] sm:$0xff]  ;;  %v6276_v58 = vld [vmem:[%s6550_s28 + $0x10] sm:$0xff] }
 0x128   : > { %1150 = vmatpush.bf16.msra.mxu0 %v1141_v2  ;;  %v1035_v7 = vpack.c.bf16 %v1003_v39, %v1003_v39  ;;  %v999_v40 = vmul.f32 %v6770_v12, %v7518_v55  ;;  %v1030_v45 = vpack.c.bf16 %v998_v4, %v998_v4  ;;  %v7646_v55 = vld [vmem:[%s6550_s28 + $0xf8] sm:$0xff]  ;;  %vm10249_vm4 = vcmask 261120  }
 0x129   : > { %v936_v13 = vmul.f32 %v5873_v62, %v935_v5  ;;  %v925_v50 = vsub.f32 1.5, %v924_v35  ;;  %1330 = vmatpush.bf16.msra.mxu1 %v1321_v53  ;;  %v1339_v31 = vunpack.c.l.b16 %v1034_v38  ;;  %vm10250_vm6 = vmmov %vm10249_vm4 }
 0x12a   : > { %v1340_v34 = vunpack.c.l.b16 %v1035_v7  ;;  %v1031_v29 = vpack.c.bf16 %v999_v40, %v999_v40  ;;  %v1299_v43 = vunpack.c.l.b16 %v1030_v45  ;;  %vm10251_vm8 = vmmov %vm10249_vm4 }
 0x12b   : > { %v940_v11 = vsel %vm7632_vm10, %v5873_v62, %v936_v13  ;;  %v926_v23 = vmul.f32 %v5875_v24, %v925_v50  ;;  %5519 = vmatmul.msk.bf16.vlgmr.msra.gmra.mxu0 %vm1059_vm11, %v7019_v14  ;;  %v6278_v13 = vld [vmem:[%s6550_s28 + $0x20] sm:$0xff]  ;;  %vm10252_vm12 = vmmov %vm10249_vm4 }
 0x12c   : > { %1230 = vmatpush.bf16.msrb.mxu0 %v1221_v20  ;;  %v972_v59 = vmul.f32 %v7646_v55, %v940_v11  ;;  %v1341_v60 = vpack.c.b16 %v1340_v34, %v1339_v31  ;;  %v1300_v3 = vunpack.c.l.b16 %v1031_v29  ;;  %vm10253_vm13 = vmmov %vm10249_vm4 }
 0x12d   : > { %v930_v19 = vsel %vm929_vm15, %v5875_v24, %v926_v23  ;;  %5528 = vmatmul.msk.bf16.vlgmr.msra.gmra.mxu1 %vm1059_vm11, %v7019_v14  ;;  %vm10254_vm14 = vmmov %vm10249_vm4 }
 0x12e   : > { %v971_v49 = vmul.f32 %v7650_v52, %v930_v19  ;;  %1350 = vmatpush.bf16.msrb.mxu2 %v1341_v60  ;;  %v1301_v62 = vpack.c.b16 %v1300_v3, %v1299_v43  ;;  %v1005_v25 = vmul.f32 %v6770_v12, %v972_v59  ;;  %v6279_v59 = vld [vmem:[%s6550_s28 + $0x28] sm:$0xff]  ;;  %vm10255_vm1 = vmmov %vm10249_vm4 }
 0x12f   : > { %vm10258_vm9 = vmmov %vm10255_vm1 }
 0x130   : > { %1310 = vmatpush.bf16.msra.mxu0 %v1301_v62  ;;  %v1004_v48 = vmul.f32 %v6770_v12, %v971_v49  ;;  %v1037_v16 = vpack.c.bf16 %v1005_v25, %v1005_v25  ;;  %v6280_v25 = vld [vmem:[%s6550_s28 + $0x30] sm:$0xff]  ;;  %vm10259_vm2 = vmmov %vm10255_vm1 }
 0x131   : > { %5529 = vmatmul.msk.bf16.vlgmr.msrb.gmra.mxu2 %vm1059_vm11, %v7019_v14  ;;  %vm10261_vm3 = vmmov %vm10255_vm1 }
 0x132   : > { %v1036_v22 = vpack.c.bf16 %v1004_v48, %v1004_v48  ;;  %v1360_v10 = vunpack.c.l.b16 %v1037_v16  ;;  %vm10262_vm5 = vmmov %vm10255_vm1 }
 0x133   : > { %vm10264_vm0 = vmmov %vm10255_vm1 }
 0x134   : > { %v1359_v24 = vunpack.c.l.b16 %v1036_v22  ;;  %vm10266_vm7 = vmmov %vm10264_vm0 }
 0x135   : > { %vm10267_vm10 = vmmov %vm10264_vm0 }
 0x136   : > { %v1361_v30 = vpack.c.b16 %v1360_v10, %v1359_v24  ;;  %vm10268_vm15 = vmmov %vm10264_vm0 }
 0x138   : > { %1370 = vmatpush.bf16.msrb.mxu3 %v1361_v30 }
 0x13b   : > { %5523 = vmatmul.msk.bf16.vlgmr.msrb.gmra.mxu0 %vm1059_vm11, %v7019_v14  ;;  %5530 = vmatmul.msk.bf16.vlgmr.msrb.gmra.mxu3 %vm1059_vm11, %v7019_v14 }
 0x14b   : > { %5527 = vmatmul.msk.bf16.vlgmr.msra.gmra.mxu0 %vm1059_vm11, %v7019_v14 }
 0x158   : > { %v7665_v12 = vpop.permute.xlu2 %1040 }
 0x15e   : > { %v1072_v21 = vpop.f32.mrf.mxu1 }
 0x15f   : > { %v1073_v54 = vadd.f32 %v1072_v21, %v7665_v12 }
 0x161   : > { %v7669_v41 = vadd.f32 %v6274_v33, %v1073_v54 }
 0x163   : > { %v1409_v1 = vmul.f32 %v7669_v41, %v7669_v41 }
 0x165   : > { %v1441_v18 = vsel %vm10249_vm4, %v1409_v1, 0.0  ;;  %vm10269_vm4 = vmmov %vm10264_vm0 }
 0x166   : > { %v1074_v42 = vpop.f32.mrf.mxu1  ;;  %1442 = vadd.xlane.f32.xlu1 %v1441_v18 }
 0x16b   : > { %v1112_v15 = vpop.f32.mrf.mxu2 }
 0x16c   : > { %v1113_v53 = vadd.f32 %v1112_v15, %v7665_v12  ;;  %v6282_v15 = vld [vmem:[%s6550_s28 + $0x90] sm:$0xff] }
 0x16e   : > { %v1092_v32 = vpop.f32.mrf.mxu1  ;;  %v7698_v50 = vadd.f32 %v6278_v13, %v1113_v53 }
 0x16f   : > { %v7674_v63 = vpop.permute.xlu0 %1045  ;;  %v1093_v28 = vadd.f32 %v1092_v32, %v7665_v12 }
 0x170   : > { %v1075_v14 = vadd.f32 %v1074_v42, %v7674_v63  ;;  %v1413_v43 = vmul.f32 %v7698_v50, %v7698_v50  ;;  %v6281_v42 = vld [vmem:[%s6550_s28 + $0xa0] sm:$0xff] }
 0x171   : > { %v7682_v2 = vadd.f32 %v6276_v58, %v1093_v28 }
 0x172   : > { %v7679_v37 = vadd.f32 %v6275_v27, %v1075_v14  ;;  %v1453_v3 = vsel %vm10253_vm13, %v1413_v43, 0.0  ;;  %v6285_v43 = vld [vmem:[%s6550_s28 + $0x60] sm:$0xff]  ;;  %vm10274_vm13 = vmmov %vm10264_vm0 }
 0x173   : > { %v1411_v5 = vmul.f32 %v7682_v2, %v7682_v2  ;;  %v1114_v38 = vpop.f32.mrf.mxu2 }
 0x174   : > { %v1410_v20 = vmul.f32 %v7679_v37, %v7679_v37  ;;  %v1115_v29 = vadd.f32 %v1114_v38, %v7674_v63 }
 0x175   : > { %v1447_v40 = vsel %vm10251_vm8, %v1411_v5, 0.0  ;;  %vm10271_vm8 = vmmov %vm10264_vm0 }
 0x176   : > { %v1444_v39 = vsel %vm10250_vm6, %v1410_v20, 0.0  ;;  %v1094_v4 = vpop.f32.mrf.mxu1  ;;  %v7707_v60 = vadd.f32 %v6279_v59, %v1115_v29  ;;  %vm10270_vm6 = vmmov %vm10264_vm0 }
 0x177   : > { %1445 = vadd.xlane.f32.xlu1 %v1444_v39  ;;  %v1095_v35 = vadd.f32 %v1094_v4, %v7674_v63  ;;  %v6283_v39 = vld [vmem:[%s6550_s28 + $0x58] sm:$0xff] }
 0x178   : > { %v1414_v49 = vmul.f32 %v7707_v60, %v7707_v60 }
 0x179   : > { %v7692_v7 = vadd.f32 %v6277_v17, %v1095_v35 }
 0x17a   : > { %v1456_v10 = vsel %vm10254_vm14, %v1414_v49, 0.0  ;;  %vm10275_vm14 = vmmov %vm10264_vm0 }
 0x17b   : > { %v1412_v45 = vmul.f32 %v7692_v7, %v7692_v7 }
 0x17d   : > { %v1450_v31 = vsel %vm10252_vm12, %v1412_v45, 0.0  ;;  %v6284_v45 = vld [vmem:[%s6550_s28 + $0x98] sm:$0xff]  ;;  %vm10273_vm12 = vmmov %vm10264_vm0 }
 0x17e   : > { %1451 = vadd.xlane.f32.xlu2 %v1450_v31 }
 0x17f   : > { %1448 = vadd.xlane.f32.xlu1 %v1447_v40 }
 0x180   : > { %v7704_v11 = vpop.f32.mrf.mxu1 }
 0x181   : > { %v1132_v34 = vpop.f32.mrf.mxu3 }
 0x182   : > { %v1133_v19 = vadd.f32 %v1132_v34, %v7665_v12 }
 0x184   : > { %v7714_v48 = vadd.f32 %v6280_v25, %v1133_v19 }
 0x185   : > { %v1192_v23 = vpop.f32.mrf.mxu2 }
 0x186   : > { %v1415_v24 = vmul.f32 %v7714_v48, %v7714_v48  ;;  %v1193_v17 = vadd.f32 %v1192_v23, %v7665_v12  ;;  %v6286_v23 = vld [vmem:[%s6550_s28 + $0x38] sm:$0xff] }
 0x187   : > { %1454 = vadd.xlane.f32.xlu1 %v1453_v3 }
 0x188   : > { %v1174_v22 = vpop.f32.mrf.mxu1  ;;  %v1459_v21 = vsel %vm10255_vm1, %v1415_v24, 0.0  ;;  %v7755_v59 = vadd.f32 %v6285_v43, %v1193_v17  ;;  %vm10276_vm1 = vmmov %vm10264_vm0 }
 0x189   : > { %v1134_v62 = vpop.f32.mrf.mxu3  ;;  %v1175_v14 = vadd.f32 %v1174_v22, %v7674_v63 }
 0x18a   : > { %v1135_v40 = vadd.f32 %v1134_v62, %v7674_v63 }
 0x18b   : > { %v7740_v4 = vadd.f32 %v6283_v39, %v1175_v14 }
 0x18c   : > { %v7759_v49 = vadd.f32 %v6286_v23, %v1135_v40 }
 0x18d   : > { %v7716_v16 = vpop.f32.mrf.mxu2  ;;  %v1420_v31 = vmul.f32 %v7740_v4, %v7740_v4 }
 0x18f   : > { %1457 = vadd.xlane.f32.xlu1 %v1456_v10  ;;  %v1474_v25 = vsel %vm10261_vm3, %v1420_v31, 0.0  ;;  %vm10279_vm3 = vmmov %vm10264_vm0 }
 0x196   : > { %v7721_v30 = vpop.f32.mrf.mxu3 }
 0x197   : > { %1460 = vadd.xlane.f32.xlu1 %v1459_v21 }
 0x199   : > { %v1272_v54 = vpop.f32.mrf.mxu2 }
 0x19a   : > { %v1252_v33 = vpop.f32.mrf.mxu1  ;;  %v1273_v1 = vadd.f32 %v1272_v54, %v7665_v12  ;;  %v6287_v54 = vld [vmem:[%s6550_s28 + $0xb0] sm:$0xff] }
 0x19b   : > { %v1253_v18 = vadd.f32 %v1252_v33, %v7665_v12 }
 0x19c   : > { %v7727_v32 = vadd.f32 %v6281_v42, %v1273_v1  ;;  %v1421_v42 = vmul.f32 %v7755_v59, %v7755_v59 }
 0x19d   : > { %v7731_v28 = vadd.f32 %v6282_v15, %v1253_v18 }
 0x19e   : > { %10256 = vst [vmem:[#allocation13_spill] sm:$0xff] %v7727_v32  ;;  %v7733_v27 = vpop.f32.mrf.mxu3  ;;  %v1429_v58 = vmul.f32 %v7727_v32, %v7727_v32 }
 0x19f   : > { %10257 = vst [vmem:[#allocation12_spill] sm:$0xff] %v7731_v28  ;;  %v1427_v20 = vmul.f32 %v7731_v28, %v7731_v28 }
 0x1a0   : > { %v1501_v5 = vsel %vm10258_vm9, %v1429_v58, 0.0  ;;  %vm10277_vm9 = vmmov %vm10264_vm0 }
 0x1a1   : > { %v1495_v35 = vsel %vm10259_vm2, %v1427_v20, 0.0  ;;  %1502 = vadd.xlane.f32.xlu2 %v1501_v5  ;;  %v1274_v24 = vpop.f32.mrf.mxu2  ;;  %v6288_v20 = vld [vmem:[%s6550_s28 + $0xa8] sm:$0xff]  ;;  %v1477_v5 = vsel %vm10266_vm7, %v1421_v42, 0.0  ;;  %vm10278_vm2 = vmmov %vm10264_vm0 }
 0x1a2   : > { %v1254_v53 = vpop.f32.mrf.mxu1  ;;  %1496 = vadd.xlane.f32.xlu0 %v1495_v35  ;;  %v1275_v18 = vadd.f32 %v1274_v24, %v7674_v63  ;;  %vm10281_vm7 = vmmov %vm10264_vm0 }
 0x1a3   : > { %v1255_v38 = vadd.f32 %v1254_v53, %v7674_v63  ;;  %v1173_v53 = vadd.f32 %v7704_v11, %v7665_v12 }
 0x1a4   : > { %v7783_v39 = vadd.f32 %v6288_v20, %v1275_v18 }
 0x1a5   : > { %v7748_v13 = vadd.f32 %v6284_v45, %v1255_v38 }
 0x1a6   : > { %10265 = vst [vmem:[#allocation16_spill] sm:$0xff] %v7783_v39  ;;  %v1430_v43 = vmul.f32 %v7783_v39, %v7783_v39 }
 0x1a7   : > { %10260 = vst [vmem:[#allocation14_spill] sm:$0xff] %v7748_v13  ;;  %v1428_v29 = vmul.f32 %v7748_v13, %v7748_v13 }
 0x1a8   : > { %v1152_v34 = vpop.f32.mrf.mxu0 }
 0x1a9   : > { %v1153_v3 = vadd.f32 %v1152_v34, %v7665_v12  ;;  %v1292_v19 = vpop.f32.mrf.mxu3  ;;  %v1498_v22 = vsel %vm10262_vm5, %v1428_v29, 0.0  ;;  %vm10280_vm5 = vmmov %vm10264_vm0 }
 0x1aa   : > { %v1293_v62 = vadd.f32 %v1292_v19, %v7665_v12  ;;  %v7767_v21 = vpop.f32.mrf.mxu1  ;;  %1475 = vadd.xlane.f32.xlu0 %v1474_v25  ;;  %1499 = vadd.xlane.f32.xlu1 %v1498_v22  ;;  %v1504_v22 = vsel %vm10270_vm6, %v1430_v43, 0.0  ;;  %v6290_v43 = vld [vmem:[%s6550_s28 + $0x68] sm:$0xff]  ;;  %vm10285_vm6 = vmmov %vm10264_vm0 }
 0x1ab   : > { %v7765_v10 = vadd.f32 %v7585_v47, %v1153_v3  ;;  %v1416_v47 = vmul.f32 %v7759_v49, %v7759_v49  ;;  %v6289_v3 = vld [vmem:[%s6550_s28 + $0x50] sm:$0xff] }
 0x1ac   : > { %v7770_v33 = vadd.f32 %v6287_v54, %v1293_v62  ;;  %v7799_v11 = vadd.f32 %v6289_v3, %v1173_v53 }
 0x1ad   : > { %v1417_v1 = vmul.f32 %v7765_v10, %v7765_v10  ;;  %v1462_v35 = vsel %vm10267_vm10, %v1416_v47, 0.0  ;;  %vm10282_vm10 = vmmov %vm10264_vm0 }
 0x1ae   : > { %10263 = vst [vmem:[#allocation15_spill] sm:$0xff] %v7770_v33  ;;  %v1431_v58 = vmul.f32 %v7770_v33, %v7770_v33  ;;  %v1419_v54 = vmul.f32 %v7799_v11, %v7799_v11 }
 0x1af   : > { %v1465_v14 = vsel %vm10264_vm0, %v1417_v1, 0.0 }
 0x1b0   : > { %v1154_v15 = vpop.f32.mrf.mxu0  ;;  %1466 = vadd.xlane.f32.xlu2 %v1465_v14  ;;  %v1507_v45 = vsel %vm10268_vm15, %v1431_v58, 0.0  ;;  %vm10283_vm15 = vmmov %vm10264_vm0 }
 0x1b1   : > { %v1155_v31 = vadd.f32 %v1154_v15, %v7674_v63  ;;  %v1294_v24 = vpop.f32.mrf.mxu3 }
 0x1b2   : > { %v1334_v38 = vpop.f32.mrf.mxu1  ;;  %1478 = vadd.xlane.f32.xlu0 %v1477_v5  ;;  %1463 = vadd.xlane.f32.xlu1 %v1462_v35  ;;  %v1295_v1 = vadd.f32 %v1294_v24, %v7674_v63 }
 0x1b3   : > { %v1335_v40 = vadd.f32 %v1334_v38, %v7674_v63  ;;  %v7806_v62 = vadd.f32 %v7600_v61, %v1155_v31 }
 0x1b4   : > { %v1352_v17 = vpop.f32.mrf.mxu2  ;;  %v7823_v14 = vadd.f32 %v7470_v57, %v1295_v1 }
 0x1b5   : > { %v1353_v34 = vadd.f32 %v1352_v17, %v7665_v12  ;;  %v7794_v29 = vadd.f32 %v7564_v51, %v1335_v40  ;;  %v1418_v61 = vmul.f32 %v7806_v62, %v7806_v62 }
 0x1b6   : > { %10272 = vst [vmem:[#allocation17_spill] sm:$0xff] %v7823_v14  ;;  %v1432_v35 = vmul.f32 %v7823_v14, %v7823_v14 }
 0x1b7   : > { %v1436_v23 = vmul.f32 %v7794_v29, %v7794_v29  ;;  %v7809_v25 = vadd.f32 %v7580_v46, %v1353_v34  ;;  %v1471_v46 = vsel %vm10271_vm8, %v1419_v54, 0.0  ;;  %v1468_v58 = vsel %vm10274_vm13, %v1418_v61, 0.0 }
 0x1b8   : > { %v7801_v19 = vpop.f32.mrf.mxu0  ;;  %1508 = vadd.xlane.f32.xlu2 %v1507_v45  ;;  %v1510_v17 = vsel %vm10276_vm1, %v1432_v35, 0.0 }
 0x1b9   : > { %v1522_v51 = vsel %vm10269_vm4, %v1436_v23, 0.0  ;;  %v1437_v18 = vmul.f32 %v7809_v25, %v7809_v25  ;;  %vm10284_vm4 = vmmov %vm10264_vm0 }
 0x1ba   : > { %1523 = vadd.xlane.f32.xlu0 %v1522_v51  ;;  %1505 = vadd.xlane.f32.xlu1 %v1504_v22  ;;  %v1213_v22 = vadd.f32 %v7721_v30, %v7665_v12 }
 0x1bb   : > { %v1525_v15 = vsel %vm10273_vm12, %v1437_v18, 0.0  ;;  %v1215_v18 = vadd.f32 %v7733_v27, %v7674_v63 }
 0x1bc   : > { %v1354_v61 = vpop.f32.mrf.mxu2 }
 0x1c0   : > { %v1234_v42 = vpop.f32.mrf.mxu0  ;;  %1472 = vadd.xlane.f32.xlu2 %v1471_v46  ;;  %v1355_v46 = vadd.f32 %v1354_v61, %v7674_v63 }
 0x1c1   : > { %v1235_v47 = vadd.f32 %v1234_v42, %v7674_v63 }
 0x1c2   : > { %1526 = vadd.xlane.f32.xlu0 %v1525_v15  ;;  %1469 = vadd.xlane.f32.xlu1 %v1468_v58  ;;  %v6291_v15 = vld [vmem:[%s6550_s28 + $0x78] sm:$0xff]  ;;  %v7881_v35 = vadd.f32 %v7558_v44, %v1355_v46  ;;  %s5412_s28 = scalar_lea.sflag [#allocation4], %s6544_s18 }
 0x1c3   : > { %v7828_v20 = vadd.f32 %v7611_v8, %v1235_v47  ;;  %v1195_v8 = vadd.f32 %v7716_v16, %v7674_v63 }
 0x1c5   : > { %v1426_v5 = vmul.f32 %v7828_v20, %v7828_v20  ;;  %v7846_v3 = vadd.f32 %v6290_v43, %v1195_v8  ;;  %v1438_v8 = vmul.f32 %v7881_v35, %v7881_v35 }
 0x1c7   : > { %v1492_v38 = vsel %vm10275_vm14, %v1426_v5, 0.0  ;;  %v1422_v24 = vmul.f32 %v7846_v3, %v7846_v3  ;;  %v1528_v43 = vsel %vm10282_vm10, %v1438_v8, 0.0  ;;  %v5723_v8 = vld [vmem:[%s10142_s4] sm:$0xff] }
 0x1c8   : > { %v1312_v53 = vpop.f32.mrf.mxu0 }
 0x1c9   : > { %v1313_v57 = vadd.f32 %v1312_v53, %v7665_v12 }
 0x1ca   : > { %1493 = vadd.xlane.f32.xlu0 %v1492_v38  ;;  %1511 = vadd.xlane.f32.xlu1 %v1510_v17 }
 0x1cb   : > { %v7838_v40 = vadd.f32 %v7521_v6, %v1313_v57  ;;  %v1333_v6 = vadd.f32 %v7767_v21, %v7665_v12  ;;  %v1480_v21 = vsel %vm10279_vm3, %v1422_v24, 0.0  ;;  %v1233_v57 = vadd.f32 %v7801_v19, %v7665_v12 }
 0x1cd   : > { %v1433_v45 = vmul.f32 %v7838_v40, %v7838_v40  ;;  %v7861_v54 = vadd.f32 %v7499_v26, %v1333_v6  ;;  %v1372_v26 = vpop.f32.mrf.mxu3 }
 0x1ce   : > { %v1373_v17 = vadd.f32 %v1372_v26, %v7665_v12 }
 0x1cf   : > { %v1513_v23 = vsel %vm10277_vm9, %v1433_v45, 0.0  ;;  %v1435_v30 = vmul.f32 %v7861_v54, %v7861_v54  ;;  %v7892_v45 = vadd.f32 %v7607_v0, %v1233_v57 }
 0x1d0   : > { %v1314_v31 = vpop.f32.mrf.mxu0  ;;  %v7896_v19 = vadd.f32 %v7650_v52, %v1373_v17 }
 0x1d1   : > { %v1315_v34 = vadd.f32 %v1314_v31, %v7674_v63  ;;  %v1519_v58 = vsel %vm10280_vm5, %v1435_v30, 0.0  ;;  %v1425_v12 = vmul.f32 %v7892_v45, %v7892_v45  ;;  %v5724_v30 = vld [vmem:[%s10142_s4 + $0x8] sm:$0xff] }
 0x1d2   : > { %1514 = vadd.xlane.f32.xlu1 %v1513_v23  ;;  %2076 = vmatpush.bf16.msrb.mxu0 %v5724_v30 }
 0x1d3   : > { %v7852_v51 = vadd.f32 %v7515_v36, %v1315_v34  ;;  %v7865_v36 = vadd.f32 %v7336_v9, %v1213_v22  ;;  %v7876_v9 = vadd.f32 %v6291_v15, %v1215_v18  ;;  %v1439_v22 = vmul.f32 %v7896_v19, %v7896_v19  ;;  %5748 = vmatpush.bf16.msrb.mxu1 %v5724_v30 }
 0x1d4   : > { %v1489_v52 = vsel %vm10283_vm15, %v1425_v12, 0.0 }
 0x1d5   : > { %v1434_v16 = vmul.f32 %v7852_v51, %v7852_v51  ;;  %v1423_v42 = vmul.f32 %v7865_v36, %v7865_v36  ;;  %v1424_v38 = vmul.f32 %v7876_v9, %v7876_v9  ;;  %v1374_v31 = vpop.f32.mrf.mxu3 }
 0x1d6   : > { %v1375_v23 = vadd.f32 %v1374_v31, %v7674_v63  ;;  %v1531_v63 = vsel %vm10284_vm4, %v1439_v22, 0.0  ;;  %2077 = vmatpush.bf16.msrb.mxu0 %v5723_v8 }
 0x1d7   : > { %v1516_v1 = vsel %vm10278_vm2, %v1434_v16, 0.0  ;;  %v1483_v53 = vsel %vm10264_vm0, %v1423_v42, 0.0  ;;  %v1486_v44 = vsel %vm10281_vm7, %v1424_v38, 0.0  ;;  %5749 = vmatpush.bf16.msrb.mxu1 %v5723_v8 }
 0x1d8   : > { %1517 = vadd.xlane.f32.xlu2 %v1516_v1  ;;  %v7906_v24 = vadd.f32 %v7646_v55, %v1375_v23 }
 0x1d9   : > { %v1443_v47 = vpop.xlane.xlu1 %1442 }
 0x1da   : > { %1481 = vadd.xlane.f32.xlu1 %v1480_v21  ;;  %v1537_v5 = vmul.f32 %v1443_v47, %v6692_v56  ;;  %v1440_v18 = vmul.f32 %v7906_v24, %v7906_v24 }
 0x1dc   : > { %v1569_v27 = vadd.f32 1.1920929e-07, %v1537_v5  ;;  %v1534_v42 = vsel %vm10285_vm6, %v1440_v18, 0.0  ;;  %vm10286_vm6 = vmmov %vm10264_vm0 }
 0x1de   : > { %5876 = vrsqrt.f32 %v1569_v27  ;;  %vm1607_vm12 = vweird.f32 %v1569_v27 }
 0x1e0   : > { %1520 = vadd.xlane.f32.xlu2 %v1519_v58 }
 0x1e2   : > { %1484 = vadd.xlane.f32.xlu1 %v1483_v53 }
 0x1e4   : > { %v5877_v34 = vpop.eup %5876 }
 0x1e5   : > { %v1602_v6 = vmul.f32 %v5877_v34, %v1569_v27  ;;  %vm1608_vm8 = vweird.f32 %v5877_v34  ;;  %v6292_v27 = vld [vmem:[%s10141_s3] sm:$0x3] }
 0x1e6   : > { %vm1609_vm13 = vmor %vm1607_vm12, %vm1608_vm8 }
 0x1e7   : > { %v1603_v1 = vmul.f32 %v5877_v34, %v1602_v6 }
 0x1e8   : > { %1487 = vadd.xlane.f32.xlu2 %v1486_v44 }
 0x1e9   : > { %v1604_v61 = vmul.f32 0.5, %v1603_v1  ;;  %v7927_v1 = vperm.slane %v6292_v27, 1 }
 0x1ea   : > { %1529 = vadd.xlane.f32.xlu1 %v1528_v43  ;;  %v1446_v16 = vpop.xlane.xlu1 %1445 }
 0x1eb   : > { %v1538_v0 = vmul.f32 %v1446_v16, %v6692_v56  ;;  %v1605_v47 = vsub.f32 1.5, %v1604_v61 }
 0x1ed   : > { %v1570_v21 = vadd.f32 1.1920929e-07, %v1538_v0  ;;  %v1606_v38 = vmul.f32 %v5877_v34, %v1605_v47 }
 0x1ef   : > { %5878 = vrsqrt.f32 %v1570_v21  ;;  %v1610_v23 = vsel %vm1609_vm13, %v5877_v34, %v1606_v38  ;;  %vm1617_vm1 = vweird.f32 %v1570_v21 }
 0x1f0   : > { %1490 = vadd.xlane.f32.xlu2 %v1489_v52 }
 0x1f1   : > { %v1452_v26 = vpop.xlane.xlu2 %1451 }
 0x1f2   : > { %1532 = vadd.xlane.f32.xlu1 %v1531_v63  ;;  %v1449_v46 = vpop.xlane.xlu1 %1448  ;;  %v1540_v15 = vmul.f32 %v1452_v26, %v6692_v56  ;;  %v1921_v63 = vmul.f32 %v1610_v23, %v7669_v41 }
 0x1f3   : > { %v1539_v55 = vmul.f32 %v1449_v46, %v6692_v56 }
 0x1f4   : > { %v1572_v57 = vadd.f32 1.1920929e-07, %v1540_v15  ;;  %v1954_v26 = vmul.f32 %v7927_v1, %v1921_v63 }
 0x1f5   : > { %v5879_v58 = vpop.eup %5878  ;;  %v1571_v5 = vadd.f32 1.1920929e-07, %v1539_v55 }
 0x1f6   : > { %v1612_v53 = vmul.f32 %v5879_v58, %v1570_v21  ;;  %vm1618_vm14 = vweird.f32 %v5879_v58  ;;  %vm1637_vm5 = vweird.f32 %v1572_v57 }
 0x1f7   : > { %5880 = vrsqrt.f32 %v1571_v5  ;;  %vm1619_vm9 = vmor %vm1617_vm1, %vm1618_vm14  ;;  %vm1627_vm7 = vweird.f32 %v1571_v5 }
 0x1f8   : > { %1535 = vadd.xlane.f32.xlu2 %v1534_v42  ;;  %v1613_v17 = vmul.f32 %v5879_v58, %v1612_v53  ;;  %5882 = vrsqrt.f32 %v1572_v57 }
 0x1fa   : > { %v1614_v44 = vmul.f32 0.5, %v1613_v17  ;;  %v1455_v31 = vpop.xlane.xlu1 %1454 }
 0x1fb   : > { %v1541_v43 = vmul.f32 %v1455_v31, %v6692_v56 }
 0x1fc   : > { %v1615_v12 = vsub.f32 1.5, %v1614_v44 }
 0x1fd   : > { %v5881_v6 = vpop.eup %5880  ;;  %v7922_v16 = vadd.f32 1.1920929e-07, %v1541_v43 }
 0x1fe   : > { %v5883_v0 = vpop.eup %5882  ;;  %v1616_v22 = vmul.f32 %v5879_v58, %v1615_v12  ;;  %v1622_v52 = vmul.f32 %v5881_v6, %v1571_v5  ;;  %vm1628_vm3 = vweird.f32 %v5881_v6 }
 0x1ff   : > { %v1632_v18 = vmul.f32 %v5883_v0, %v1572_v57  ;;  %5884 = vrsqrt.f32 %v7922_v16  ;;  %vm1638_vm2 = vweird.f32 %v5883_v0  ;;  %vm1629_vm15 = vmor %vm1627_vm7, %vm1628_vm3  ;;  %vm1647_vm14 = vweird.f32 %v7922_v16 }
 0x200   : > { %v1620_v34 = vsel %vm1619_vm9, %v5879_v58, %v1616_v22  ;;  %v1623_v61 = vmul.f32 %v5881_v6, %v1622_v52  ;;  %vm1639_vm10 = vmor %vm1637_vm5, %vm1638_vm2 }
 0x201   : > { %v1922_v30 = vmul.f32 %v1620_v34, %v7679_v37  ;;  %v1633_v46 = vmul.f32 %v5883_v0, %v1632_v18  ;;  %vm10287_vm9 = vmmov %vm10264_vm0 }
 0x202   : > { %v1624_v55 = vmul.f32 0.5, %v1623_v61  ;;  %v1458_v21 = vpop.xlane.xlu1 %1457 }
 0x203   : > { %v1955_v42 = vmul.f32 %v7927_v1, %v1922_v30  ;;  %v1634_v47 = vmul.f32 0.5, %v1633_v46  ;;  %v1542_v15 = vmul.f32 %v1458_v21, %v6692_v56 }
 0x204   : > { %v1625_v53 = vsub.f32 1.5, %v1624_v55 }
 0x205   : > { %v5885_v38 = vpop.eup %5884  ;;  %v1635_v17 = vsub.f32 1.5, %v1634_v47  ;;  %v1574_v8 = vadd.f32 1.1920929e-07, %v1542_v15  ;;  %v1986_v44 = vpack.c.bf16 %v1955_v42, %v1954_v26 }
 0x206   : > { %v1626_v58 = vmul.f32 %v5881_v6, %v1625_v53  ;;  %v1642_v43 = vmul.f32 %v5885_v38, %v7922_v16  ;;  %vm1648_vm8 = vweird.f32 %v5885_v38 }
 0x207   : > { %v1636_v31 = vmul.f32 %v5883_v0, %v1635_v17  ;;  %5886 = vrsqrt.f32 %v1574_v8  ;;  %5539 = vmatmul.msk.bf16.vlgmr.msrb.gmra.mxu0 %vm10264_vm0, %v1986_v44  ;;  %vm1657_vm12 = vweird.f32 %v1574_v8  ;;  %vm1649_vm1 = vmor %vm1647_vm14, %vm1648_vm8 }
 0x208   : > { %v1630_v12 = vsel %vm1629_vm15, %v5881_v6, %v1626_v58  ;;  %v1643_v52 = vmul.f32 %v5885_v38, %v1642_v43 }
 0x209   : > { %v1640_v23 = vsel %vm1639_vm10, %v5883_v0, %v1636_v31  ;;  %v1923_v63 = vmul.f32 %v1630_v12, %v7682_v2 }
 0x20a   : > { %v1924_v22 = vmul.f32 %v1640_v23, %v7692_v7  ;;  %v1644_v57 = vmul.f32 0.5, %v1643_v52  ;;  %v1461_v30 = vpop.xlane.xlu1 %1460 }
 0x20b   : > { %v1956_v5 = vmul.f32 %v7927_v1, %v1923_v63  ;;  %v1543_v55 = vmul.f32 %v1461_v30, %v6692_v56 }
 0x20c   : > { %v1957_v34 = vmul.f32 %v7927_v1, %v1924_v22  ;;  %v1645_v6 = vsub.f32 1.5, %v1644_v57 }
 0x20d   : > { %v5887_v27 = vpop.eup %5886  ;;  %v7943_v53 = vadd.f32 1.1920929e-07, %v1543_v55 }
 0x20e   : > { %v1652_v18 = vmul.f32 %v5887_v27, %v1574_v8  ;;  %v1987_v0 = vpack.c.bf16 %v1957_v34, %v1956_v5  ;;  %vm1658_vm4 = vweird.f32 %v5887_v27  ;;  %v1646_v44 = vmul.f32 %v5885_v38, %v1645_v6 }
 0x20f   : > { %vm1659_vm13 = vmor %vm1657_vm12, %vm1658_vm4 }
 0x210   : > { %v1653_v61 = vmul.f32 %v5887_v27, %v1652_v18  ;;  %v1650_v23 = vsel %vm1649_vm1, %v5885_v38, %v1646_v44  ;;  %vm10292_vm1 = vmmov %vm10287_vm9 }
 0x211   : > { %v1925_v18 = vmul.f32 %v1650_v23, %v7698_v50 }
 0x212   : > { %v1654_v46 = vmul.f32 0.5, %v1653_v61 }
 0x213   : > { %v1958_v5 = vmul.f32 %v7927_v1, %v1925_v18 }
 0x214   : > { %v1655_v26 = vsub.f32 1.5, %v1654_v46  ;;  %v1503_v15 = vpop.xlane.xlu2 %1502 }
 0x215   : > { %v1497_v21 = vpop.xlane.xlu0 %1496  ;;  %v1557_v58 = vmul.f32 %v1503_v15, %v6692_v56 }
 0x216   : > { %v1555_v42 = vmul.f32 %v1497_v21, %v6692_v56  ;;  %v1656_v47 = vmul.f32 %v5887_v27, %v1655_v26 }
 0x217   : > { %5540 = vmatmul.msk.bf16.gmra.mxu0 %vm10286_vm6, %v1987_v0  ;;  %v7950_v22 = vadd.f32 1.1920929e-07, %v1557_v58  ;;  %vm1667_vm6 = vweird.f32 %v7943_v53 }
 0x218   : > { %v1587_v17 = vadd.f32 1.1920929e-07, %v1555_v42  ;;  %v1660_v31 = vsel %vm1659_vm13, %v5887_v27, %v1656_v47 }
 0x219   : > { %v1926_v52 = vmul.f32 %v1660_v31, %v7707_v60  ;;  %vm1807_vm14 = vweird.f32 %v7950_v22 }
 0x21a   : > { %5888 = vrsqrt.f32 %v1587_v17  ;;  %vm1787_vm3 = vweird.f32 %v1587_v17 }
 0x21b   : > { %5890 = vrsqrt.f32 %v7943_v53  ;;  %v1959_v27 = vmul.f32 %v7927_v1, %v1926_v52 }
 0x21d   : > { %v1500_v43 = vpop.xlane.xlu1 %1499  ;;  %v1988_v0 = vpack.c.bf16 %v1959_v27, %v1958_v5  ;;  %v1476_v58 = vpop.xlane.xlu0 %1475 }
 0x21e   : > { %v1556_v12 = vmul.f32 %v1500_v43, %v6692_v56  ;;  %v1548_v52 = vmul.f32 %v1476_v58, %v6692_v56 }
 0x220   : > { %v1588_v63 = vadd.f32 1.1920929e-07, %v1556_v12  ;;  %v5889_v8 = vpop.eup %5888 }
 0x221   : > { %v1782_v57 = vmul.f32 %v5889_v8, %v1587_v17  ;;  %v7954_v16 = vpop.eup %5890  ;;  %vm1788_vm2 = vweird.f32 %v5889_v8 }
 0x222   : > { %5892 = vrsqrt.f32 %v1588_v63  ;;  %v1662_v46 = vmul.f32 %v7954_v16, %v7943_v53  ;;  %vm1789_vm0 = vmor %vm1787_vm3, %vm1788_vm2  ;;  %vm1797_vm7 = vweird.f32 %v1588_v63  ;;  %vm1668_vm15 = vweird.f32 %v7954_v16 }
 0x223   : > { %v1467_v34 = vpop.xlane.xlu2 %1466  ;;  %5894 = vrsqrt.f32 %v7950_v22  ;;  %v1783_v38 = vmul.f32 %v5889_v8, %v1782_v57  ;;  %vm8010_vm8 = vmor %vm1667_vm6, %vm1668_vm15 }
 0x224   : > { %v1545_v61 = vmul.f32 %v1467_v34, %v6692_v56  ;;  %v1663_v31 = vmul.f32 %v7954_v16, %v1662_v46  ;;  %vm10295_vm15 = vmmov %vm10292_vm1 }
 0x225   : > { %v1464_v30 = vpop.xlane.xlu1 %1463  ;;  %v1784_v55 = vmul.f32 0.5, %v1783_v38 }
 0x226   : > { %v1544_v21 = vmul.f32 %v1464_v30, %v6692_v56  ;;  %v7967_v47 = vadd.f32 1.1920929e-07, %v1545_v61  ;;  %v1664_v27 = vmul.f32 0.5, %v1663_v31 }
 0x227   : > { %v1785_v15 = vsub.f32 1.5, %v1784_v55  ;;  %5541 = vmatmul.msk.bf16.gmra.mxu0 %vm10287_vm9, %v1988_v0  ;;  %v7981_v55 = vadd.f32 1.1920929e-07, %v1548_v52 }
 0x228   : > { %v5893_v6 = vpop.eup %5892  ;;  %v7963_v26 = vadd.f32 1.1920929e-07, %v1544_v21  ;;  %v1665_v58 = vsub.f32 1.5, %v1664_v27 }
 0x229   : > { %v7965_v42 = vpop.eup %5894  ;;  %v1792_v44 = vmul.f32 %v5893_v6, %v1588_v63  ;;  %v1786_v18 = vmul.f32 %v5889_v8, %v1785_v15  ;;  %vm1798_vm5 = vweird.f32 %v5893_v6 }
 0x22a   : > { %5896 = vrsqrt.f32 %v7963_v26  ;;  %v1802_v12 = vmul.f32 %v7965_v42, %v7950_v22  ;;  %vm1799_vm10 = vmor %vm1797_vm7, %vm1798_vm5  ;;  %v1666_v27 = vmul.f32 %v7954_v16, %v1665_v58  ;;  %vm1677_vm12 = vweird.f32 %v7963_v26 }
 0x22b   : > { %v1509_v43 = vpop.xlane.xlu2 %1508  ;;  %v1793_v23 = vmul.f32 %v5893_v6, %v1792_v44  ;;  %5898 = vrsqrt.f32 %v7967_v47  ;;  %v1790_v0 = vsel %vm1789_vm0, %v5889_v8, %v1786_v18  ;;  %vm1808_vm9 = vweird.f32 %v7965_v42 }
 0x22c   : > { %v1559_v38 = vmul.f32 %v1509_v43, %v6692_v56  ;;  %v1803_v46 = vmul.f32 %v7965_v42, %v1802_v12  ;;  %v1939_v52 = vmul.f32 %v1790_v0, %v7731_v28  ;;  %v1670_v53 = vsel %vm8010_vm8, %v7954_v16, %v1666_v27  ;;  %vm8050_vm3 = vmor %vm1807_vm14, %vm1808_vm9 }
 0x22d   : > { %v1794_v34 = vmul.f32 0.5, %v1793_v23  ;;  %v1506_v57 = vpop.xlane.xlu1 %1505  ;;  %vm1687_vm7 = vweird.f32 %v7967_v47  ;;  %vm10298_vm8 = vmmov %vm10292_vm1 }
 0x22e   : > { %v1558_v61 = vmul.f32 %v1506_v57, %v6692_v56  ;;  %v7987_v31 = vadd.f32 1.1920929e-07, %v1559_v38  ;;  %v1804_v18 = vmul.f32 0.5, %v1803_v46  ;;  %v1972_v46 = vmul.f32 %v7927_v1, %v1939_v52 }
 0x22f   : > { %v1795_v30 = vsub.f32 1.5, %v1794_v34 }
 0x230   : > { %v7978_v5 = vpop.eup %5896  ;;  %v7983_v21 = vadd.f32 1.1920929e-07, %v1558_v61  ;;  %vm1827_vm9 = vweird.f32 %v7987_v31 }
 0x231   : > { %v1796_v15 = vmul.f32 %v5893_v6, %v1795_v30  ;;  %v1672_v44 = vmul.f32 %v7978_v5, %v7963_v26  ;;  %v7990_v43 = vpop.eup %5898  ;;  %vm1678_vm4 = vweird.f32 %v7978_v5 }
 0x232   : > { %5900 = vrsqrt.f32 %v7983_v21  ;;  %vm8021_vm13 = vmor %vm1677_vm12, %vm1678_vm4  ;;  %vm1817_vm5 = vweird.f32 %v7983_v21 }
 0x233   : > { %v1473_v17 = vpop.xlane.xlu2 %1472  ;;  %v1800_v23 = vsel %vm1799_vm10, %v5893_v6, %v1796_v15  ;;  %v1673_v12 = vmul.f32 %v7978_v5, %v1672_v44  ;;  %5902 = vrsqrt.f32 %v7981_v55  ;;  %v1682_v6 = vmul.f32 %v7990_v43, %v7967_v47 }
 0x234   : > { %v1940_v8 = vmul.f32 %v1800_v23, %v7748_v13  ;;  %v1547_v63 = vmul.f32 %v1473_v17, %v6692_v56  ;;  %5904 = vrsqrt.f32 %v7987_v31  ;;  %v1805_v15 = vsub.f32 1.5, %v1804_v18  ;;  %v1479_v18 = vpop.xlane.xlu0 %1478 }
 0x235   : > { %v1674_v34 = vmul.f32 0.5, %v1673_v12  ;;  %v1470_v57 = vpop.xlane.xlu1 %1469  ;;  %v1683_v23 = vmul.f32 %v7990_v43, %v1682_v6  ;;  %vm1688_vm10 = vweird.f32 %v7990_v43 }
 0x236   : > { %v1973_v38 = vmul.f32 %v7927_v1, %v1940_v8  ;;  %v8006_v0 = vadd.f32 1.1920929e-07, %v1547_v63  ;;  %v1546_v52 = vmul.f32 %v1470_v57, %v6692_v56  ;;  %v1806_v57 = vmul.f32 %v7965_v42, %v1805_v15  ;;  %vm8084_vm4 = vmor %vm1687_vm7, %vm1688_vm10 }
 0x237   : > { %v1675_v61 = vsub.f32 1.5, %v1674_v34 }
 0x238   : > { %v5901_v30 = vpop.eup %5900  ;;  %v1995_v8 = vpack.c.bf16 %v1973_v38, %v1972_v46  ;;  %5906 = vrsqrt.f32 %v8006_v0  ;;  %v8035_v16 = vadd.f32 1.1920929e-07, %v1546_v52  ;;  %v1684_v38 = vmul.f32 0.5, %v1683_v23 }
 0x239   : > { %v1676_v58 = vmul.f32 %v7978_v5, %v1675_v61  ;;  %v1812_v17 = vmul.f32 %v5901_v30, %v7983_v21  ;;  %v8026_v63 = vpop.eup %5902  ;;  %v1549_v46 = vmul.f32 %v1479_v18, %v6692_v56  ;;  %vm1818_vm2 = vweird.f32 %v5901_v30 }
 0x23a   : > { %v8031_v61 = vpop.eup %5904  ;;  %5548 = vmatmul.msk.bf16.vlgmr.msrb.gmra.mxu1 %vm10292_vm1, %v1995_v8  ;;  %5908 = vrsqrt.f32 %v8035_v16  ;;  %vm1819_vm0 = vmor %vm1817_vm5, %vm1818_vm2  ;;  %vm1697_vm12 = vweird.f32 %v8035_v16  ;;  %vm1707_vm10 = vweird.f32 %v8006_v0 }
 0x23b   : > { %v1680_v26 = vsel %vm8021_vm13, %v7978_v5, %v1676_v58  ;;  %v1813_v34 = vmul.f32 %v5901_v30, %v1812_v17  ;;  %v1927_v5 = vmul.f32 %v1670_v53, %v7714_v48  ;;  %v1822_v58 = vmul.f32 %v8031_v61, %v7987_v31 }
 0x23c   : > { %v1928_v44 = vmul.f32 %v1680_v26, %v7759_v49  ;;  %v1712_v17 = vmul.f32 %v8026_v63, %v7981_v55  ;;  %v1810_v53 = vsel %vm8050_vm3, %v7965_v42, %v1806_v57  ;;  %v1685_v26 = vsub.f32 1.5, %v1684_v38  ;;  %v1524_v13 = vpop.xlane.xlu0 %1523 }
 0x23d   : > { %v1814_v27 = vmul.f32 0.5, %v1813_v34  ;;  %v1512_v6 = vpop.xlane.xlu1 %1511  ;;  %v8061_v18 = vadd.f32 1.1920929e-07, %v1549_v46  ;;  %v1960_v22 = vmul.f32 %v7927_v1, %v1927_v5  ;;  %vm1718_vm13 = vweird.f32 %v8026_v63 }
 0x23e   : > { %v1560_v52 = vmul.f32 %v1512_v6, %v6692_v56  ;;  %v8059_v8 = vpop.eup %5906  ;;  %v1961_v34 = vmul.f32 %v7927_v1, %v1928_v44  ;;  %v1713_v12 = vmul.f32 %v8026_v63, %v1712_v17  ;;  %v1941_v6 = vmul.f32 %v1810_v53, %v7727_v32 }
 0x23f   : > { %v1815_v15 = vsub.f32 1.5, %v1814_v27  ;;  %v1823_v27 = vmul.f32 %v8031_v61, %v1822_v58  ;;  %v1702_v46 = vmul.f32 %v8059_v8, %v8006_v0  ;;  %v1686_v58 = vmul.f32 %v7990_v43, %v1685_v26 }
 0x240   : > { %v8067_v57 = vadd.f32 1.1920929e-07, %v1560_v52  ;;  %v5909_v21 = vpop.eup %5908  ;;  %v1714_v17 = vmul.f32 0.5, %v1713_v12  ;;  %vm1828_vm1 = vweird.f32 %v8031_v61  ;;  %vm1708_vm5 = vweird.f32 %v8059_v8 }
 0x241   : > { %v1816_v23 = vmul.f32 %v5901_v30, %v1815_v15  ;;  %v1989_v15 = vpack.c.bf16 %v1961_v34, %v1960_v22  ;;  %v1692_v5 = vmul.f32 %v5909_v21, %v8035_v16  ;;  %v1974_v22 = vmul.f32 %v7927_v1, %v1941_v6  ;;  %vm8130_vm2 = vmor %vm1827_vm9, %vm1828_vm1 }
 0x242   : > { %5910 = vrsqrt.f32 %v8067_v57  ;;  %v1703_v47 = vmul.f32 %v8059_v8, %v1702_v46  ;;  %vm1698_vm6 = vweird.f32 %v5909_v21 }
 0x243   : > { %v1820_v42 = vsel %vm1819_vm0, %v5901_v30, %v1816_v23  ;;  %5542 = vmatmul.msk.bf16.gmra.mxu0 %vm10295_vm15, %v1989_v15  ;;  %v1824_v30 = vmul.f32 0.5, %v1823_v27  ;;  %5912 = vrsqrt.f32 %v8061_v18  ;;  %v1693_v53 = vmul.f32 %v5909_v21, %v1692_v5  ;;  %vm1699_vm14 = vmor %vm1697_vm12, %vm1698_vm6 }
 0x244   : > { %v1942_v38 = vmul.f32 %v1820_v42, %v7783_v39  ;;  %v1564_v23 = vmul.f32 %v1524_v13, %v6692_v56  ;;  %v1690_v27 = vsel %vm8084_vm4, %v7990_v43, %v1686_v58  ;;  %v1715_v39 = vsub.f32 1.5, %v1714_v17  ;;  %vm10303_vm15 = vmmov %vm10298_vm8 }
 0x245   : > { %v1515_v44 = vpop.xlane.xlu1 %1514  ;;  %v1694_v42 = vmul.f32 0.5, %v1693_v53  ;;  %v1825_v6 = vsub.f32 1.5, %v1824_v30  ;;  %v1704_v58 = vmul.f32 0.5, %v1703_v47  ;;  %vm1837_vm0 = vweird.f32 %v8067_v57  ;;  %vm8178_vm6 = vmor %vm1707_vm10, %vm1708_vm5 }
 0x246   : > { %v1561_v52 = vmul.f32 %v1515_v44, %v6692_v56  ;;  %v1975_v34 = vmul.f32 %v7927_v1, %v1942_v38  ;;  %v8097_v32 = vadd.f32 1.1920929e-07, %v1564_v23  ;;  %vm1717_vm4 = vweird.f32 %v7981_v55 }
 0x247   : > { %v1695_v44 = vsub.f32 1.5, %v1694_v42  ;;  %v5732_v42 = vld [vmem:[%s10144_s6 + $0x38] sm:$0xff] }
 0x248   : > { %v8092_v15 = vadd.f32 1.1920929e-07, %v1561_v52  ;;  %v1996_v13 = vpack.c.bf16 %v1975_v34, %v1974_v22  ;;  %v8094_v5 = vpop.eup %5910  ;;  %v1929_v22 = vmul.f32 %v1690_v27, %v7765_v10  ;;  %v1826_v34 = vmul.f32 %v8031_v61, %v1825_v6  ;;  %2403 = vmatpush.bf16.msra.mxu1 %v5732_v42 }
 0x249   : > { %v1832_v46 = vmul.f32 %v8094_v5, %v8067_v57  ;;  %v8103_v43 = vpop.eup %5912  ;;  %v1696_v30 = vmul.f32 %v5909_v21, %v1695_v44  ;;  %v8125_v27 = vmul.f32 %v8026_v63, %v1715_v39  ;;  %v1705_v6 = vsub.f32 1.5, %v1704_v58 }
 0x24a   : > { %5914 = vrsqrt.f32 %v8092_v15  ;;  %5549 = vmatmul.msk.bf16.gmra.mxu1 %vm10298_vm8, %v1996_v13  ;;  %v1722_v16 = vmul.f32 %v8103_v43, %v8061_v18  ;;  %vm1838_vm3 = vweird.f32 %v8094_v5  ;;  %v1962_v31 = vmul.f32 %v7927_v1, %v1929_v22  ;;  %vm8186_vm8 = vmor %vm1717_vm4, %vm1718_vm13 }
 0x24b   : > { %v1518_v12 = vpop.xlane.xlu2 %1517  ;;  %v1833_v17 = vmul.f32 %v8094_v5, %v1832_v46  ;;  %v1700_v26 = vsel %vm1699_vm14, %v5909_v21, %v1696_v30  ;;  %v1830_v39 = vsel %vm8130_vm2, %v8031_v61, %v1826_v34  ;;  %v1706_v61 = vmul.f32 %v8059_v8, %v1705_v6  ;;  %vm8155_vm7 = vmor %vm1837_vm0, %vm1838_vm3 }
 0x24c   : > { %v1562_v38 = vmul.f32 %v1518_v12, %v6692_v56  ;;  %v1930_v13 = vmul.f32 %v1700_v26, %v7806_v62  ;;  %vm10308_vm13 = vmmov %vm10303_vm15  ;;  %vm1847_vm1 = vweird.f32 %v8092_v15  ;;  %vm1728_vm0 = vweird.f32 %v8103_v43 }
 0x24d   : > { %v1482_v52 = vpop.xlane.xlu1 %1481  ;;  %v1834_v47 = vmul.f32 0.5, %v1833_v17  ;;  %v1723_v17 = vmul.f32 %v8103_v43, %v1722_v16  ;;  %v1710_v55 = vsel %vm8178_vm6, %v8059_v8, %v1706_v61 }
 0x24e   : > { %v8105_v53 = vadd.f32 1.1920929e-07, %v1562_v38  ;;  %v1550_v23 = vmul.f32 %v1482_v52, %v6692_v56  ;;  %v1963_v52 = vmul.f32 %v7927_v1, %v1930_v13  ;;  %v1943_v38 = vmul.f32 %v1830_v39, %v7770_v33 }
 0x24f   : > { %v1835_v46 = vsub.f32 1.5, %v1834_v47 }
 0x250   : > { %5916 = vrsqrt.f32 %v8105_v53  ;;  %v8120_v12 = vadd.f32 1.1920929e-07, %v1550_v23  ;;  %v8128_v21 = vpop.eup %5914  ;;  %v1527_v23 = vpop.xlane.xlu0 %1526  ;;  %v1990_v16 = vpack.c.bf16 %v1963_v52, %v1962_v31  ;;  %vm1857_vm2 = vweird.f32 %v8105_v53 }
 0x251   : > { %5918 = vrsqrt.f32 %v8097_v32  ;;  %v1842_v30 = vmul.f32 %v8128_v21, %v8092_v15  ;;  %v1836_v26 = vmul.f32 %v8094_v5, %v1835_v46  ;;  %v1565_v46 = vmul.f32 %v1527_v23, %v6692_v56 }
 0x252   : > { %5920 = vrsqrt.f32 %v8120_v12  ;;  %vm1848_vm12 = vweird.f32 %v8128_v21  ;;  %vm1737_vm10 = vweird.f32 %v8120_v12 }
 0x253   : > { %v1521_v44 = vpop.xlane.xlu2 %1520  ;;  %v1843_v42 = vmul.f32 %v8128_v21, %v1842_v30  ;;  %v1840_v6 = vsel %vm8155_vm7, %v8094_v5, %v1836_v26  ;;  %5543 = vmatmul.msk.bf16.gmra.mxu0 %vm10303_vm15, %v1990_v16  ;;  %v8203_v5 = vadd.f32 1.1920929e-07, %v1565_v46  ;;  %vm8227_vm9 = vmor %vm1847_vm1, %vm1848_vm12  ;;  %vm1727_vm15 = vweird.f32 %v8061_v18 }
 0x254   : > { %v1563_v58 = vmul.f32 %v1521_v44, %v6692_v56  ;;  %v1944_v30 = vmul.f32 %v1840_v6, %v7823_v14  ;;  %v1724_v14 = vmul.f32 0.5, %v1723_v17  ;;  %vm10313_vm7 = vmmov %vm10308_vm13  ;;  %vm1877_vm1 = vweird.f32 %v8097_v32 }
 0x255   : > { %v1485_v13 = vpop.xlane.xlu1 %1484  ;;  %vm8292_vm6 = vmor %vm1727_vm15, %vm1728_vm0 }
 0x256   : > { %v8148_v22 = vpop.eup %5916  ;;  %v8151_v34 = vadd.f32 1.1920929e-07, %v1563_v58  ;;  %v1844_v58 = vmul.f32 0.5, %v1843_v42  ;;  %v1551_v0 = vmul.f32 %v1485_v13, %v6692_v56  ;;  %v1720_v42 = vsel %vm8186_vm8, %v8026_v63, %v8125_v27 }
 0x257   : > { %v1852_v57 = vmul.f32 %v8148_v22, %v8105_v53  ;;  %v8167_v44 = vpop.eup %5918  ;;  %v1977_v6 = vmul.f32 %v7927_v1, %v1944_v30  ;;  %v1931_v63 = vmul.f32 %v1710_v55, %v7799_v11  ;;  %v1932_v55 = vmul.f32 %v1720_v42, %v7740_v4  ;;  %v5730_v53 = vld [vmem:[%s10144_s6 + $0x28] sm:$0xff] }
 0x258   : > { %5922 = vrsqrt.f32 %v8151_v34  ;;  %v8173_v31 = vpop.eup %5920  ;;  %v1845_v23 = vsub.f32 1.5, %v1844_v58  ;;  %v8195_v47 = vadd.f32 1.1920929e-07, %v1551_v0  ;;  %v1872_v58 = vmul.f32 %v8167_v44, %v8097_v32 }
 0x259   : > { %v1853_v39 = vmul.f32 %v8148_v22, %v1852_v57  ;;  %v1732_v26 = vmul.f32 %v8173_v31, %v8120_v12  ;;  %v1976_v57 = vmul.f32 %v7927_v1, %v1943_v38  ;;  %vm1858_vm14 = vweird.f32 %v8148_v22 }
 0x25a   : > { %v1846_v38 = vmul.f32 %v8128_v21, %v1845_v23  ;;  %5924 = vrsqrt.f32 %v8195_v47  ;;  %v1873_v23 = vmul.f32 %v8167_v44, %v1872_v58  ;;  %vm8242_vm3 = vmor %vm1857_vm2, %vm1858_vm14  ;;  %vm1738_vm5 = vweird.f32 %v8173_v31 }
 0x25b   : > { %v1854_v16 = vmul.f32 0.5, %v1853_v39  ;;  %v1488_v13 = vpop.xlane.xlu2 %1487  ;;  %v1733_v61 = vmul.f32 %v8173_v31, %v1732_v26  ;;  %v1997_v33 = vpack.c.bf16 %v1977_v6, %v1976_v57  ;;  %v1494_v57 = vpop.xlane.xlu0 %1493  ;;  %v1964_v6 = vmul.f32 %v7927_v1, %v1931_v63  ;;  %vm8286_vm4 = vmor %vm1737_vm10, %vm1738_vm5 }
 0x25c   : > { %v1552_v8 = vmul.f32 %v1488_v13, %v6692_v56  ;;  %v1850_v15 = vsel %vm8227_vm9, %v8128_v21, %v1846_v38  ;;  %v1965_v63 = vmul.f32 %v7927_v1, %v1932_v55  ;;  %v1554_v38 = vmul.f32 %v1494_v57, %v6692_v56  ;;  %vm10323_vm5 = vmmov %vm10313_vm7 }
 0x25d   : > { %v1855_v0 = vsub.f32 1.5, %v1854_v16  ;;  %v1530_v17 = vpop.xlane.xlu1 %1529  ;;  %v1734_v30 = vmul.f32 0.5, %v1733_v61  ;;  %5550 = vmatmul.msk.bf16.gmra.mxu1 %vm10308_vm13, %v1997_v33  ;;  %v5731_v33 = vld [vmem:[%s10144_s6 + $0x30] sm:$0xff]  ;;  %vm1878_vm8 = vweird.f32 %v8167_v44  ;;  %vm10318_vm13 = vmmov %vm10313_vm7  ;;  %vm1867_vm14 = vweird.f32 %v8151_v34 }
 0x25e   : > { %v8210_v27 = vpop.eup %5922  ;;  %v8212_v39 = vadd.f32 1.1920929e-07, %v1552_v8  ;;  %v1566_v52 = vmul.f32 %v1530_v17, %v6692_v56  ;;  %2404 = vmatpush.bf16.msra.mxu1 %v5731_v33  ;;  %v1725_v17 = vsub.f32 1.5, %v1724_v14  ;;  %v1991_v28 = vpack.c.bf16 %v1965_v63, %v1964_v6  ;;  %vm8335_vm2 = vmor %vm1877_vm1, %vm1878_vm8 }
 0x25f   : > { %v1862_v46 = vmul.f32 %v8210_v27, %v8151_v34  ;;  %v1856_v26 = vmul.f32 %v8148_v22, %v1855_v0  ;;  %v1735_v58 = vsub.f32 1.5, %v1734_v30  ;;  %v8280_v8 = vadd.f32 1.1920929e-07, %v1554_v38 }
 0x260   : > { %5926 = vrsqrt.f32 %v8212_v39  ;;  %v8234_v13 = vadd.f32 1.1920929e-07, %v1566_v52  ;;  %v8250_v0 = vpop.eup %5924  ;;  %v1874_v52 = vmul.f32 0.5, %v1873_v23  ;;  %v1726_v23 = vmul.f32 %v8103_v43, %v1725_v17 }
 0x261   : > { %v1863_v42 = vmul.f32 %v8210_v27, %v1862_v46  ;;  %5928 = vrsqrt.f32 %v8203_v5  ;;  %v1860_v21 = vsel %vm8242_vm3, %v8148_v22, %v1856_v26  ;;  %v1945_v46 = vmul.f32 %v1850_v15, %v7838_v40  ;;  %v5729_v26 = vld [vmem:[%s10144_s6 + $0x20] sm:$0xff] }
 0x262   : > { %5930 = vrsqrt.f32 %v8234_v13  ;;  %v1736_v14 = vmul.f32 %v8173_v31, %v1735_v58  ;;  %v1742_v22 = vmul.f32 %v8250_v0, %v8195_v47  ;;  %2405 = vmatpush.bf16.msra.mxu1 %v5730_v53  ;;  %v1946_v55 = vmul.f32 %v1860_v21, %v7852_v51 }
 0x263   : > { %v1491_v61 = vpop.xlane.xlu2 %1490  ;;  %v1864_v16 = vmul.f32 0.5, %v1863_v42  ;;  %5544 = vmatmul.msk.bf16.gmra.mxu0 %vm10313_vm7, %v1991_v28  ;;  %v1978_v15 = vmul.f32 %v7927_v1, %v1945_v46  ;;  %v1875_v17 = vsub.f32 1.5, %v1874_v52  ;;  %v1730_v38 = vsel %vm8292_vm6, %v8103_v43, %v1726_v23  ;;  %v5728_v52 = vld [vmem:[%s10144_s6 + $0x18] sm:$0xff] }
 0x264   : > { %v1553_v33 = vmul.f32 %v1491_v61, %v6692_v56  ;;  %v1740_v18 = vsel %vm8286_vm4, %v8173_v31, %v1736_v14  ;;  %v1743_v21 = vmul.f32 %v8250_v0, %v1742_v22  ;;  %v1979_v63 = vmul.f32 %v7927_v1, %v1946_v55 }
 0x265   : > { %v1865_v6 = vsub.f32 1.5, %v1864_v16  ;;  %v1533_v58 = vpop.xlane.xlu1 %1532  ;;  %vm1868_vm12 = vweird.f32 %v8210_v27  ;;  %v1934_v55 = vmul.f32 %v1740_v18, %v7846_v3  ;;  %vm1748_vm3 = vweird.f32 %v8250_v0 }
 0x266   : > { %v8259_v30 = vpop.eup %5926  ;;  %v8282_v61 = vadd.f32 1.1920929e-07, %v1553_v33  ;;  %2406 = vmatpush.bf16.msra.mxu1 %v5729_v26  ;;  %v1567_v33 = vmul.f32 %v1533_v58, %v6692_v56  ;;  %v1998_v14 = vpack.c.bf16 %v1979_v63, %v1978_v15  ;;  %v1876_v26 = vmul.f32 %v8167_v44, %v1875_v17  ;;  %vm8327_vm9 = vmor %vm1867_vm14, %vm1868_vm12 }
 0x267   : > { %v8273_v42 = vpop.eup %5928  ;;  %v1752_v57 = vmul.f32 %v8259_v30, %v8212_v39  ;;  %v1866_v22 = vmul.f32 %v8210_v27, %v1865_v6  ;;  %v1744_v28 = vmul.f32 0.5, %v1743_v21  ;;  %v1967_v18 = vmul.f32 %v7927_v1, %v1934_v55  ;;  %vm10324_vm12 = vmmov %vm10323_vm5 }
 0x268   : > { %v8290_v53 = vpop.eup %5930  ;;  %v1882_v46 = vmul.f32 %v8273_v42, %v8203_v5  ;;  %5932 = vrsqrt.f32 %v8282_v61  ;;  %v8331_v58 = vadd.f32 1.1920929e-07, %v1567_v33  ;;  %v1880_v21 = vsel %vm8335_vm2, %v8167_v44, %v1876_v26  ;;  %v5727_v26 = vld [vmem:[%s10144_s6 + $0x10] sm:$0xff] }
 0x269   : > { %v1753_v31 = vmul.f32 %v8259_v30, %v1752_v57  ;;  %v1892_v43 = vmul.f32 %v8290_v53, %v8234_v13  ;;  %5934 = vrsqrt.f32 %v8280_v8  ;;  %v1933_v57 = vmul.f32 %v1730_v38, %v7755_v59 }
 0x26a   : > { %2407 = vmatpush.bf16.msra.mxu1 %v5728_v52  ;;  %v1883_v34 = vmul.f32 %v8273_v42, %v1882_v46  ;;  %v1870_v32 = vsel %vm8327_vm9, %v8210_v27, %v1866_v22  ;;  %v1745_v38 = vsub.f32 1.5, %v1744_v28  ;;  %5936 = vrsqrt.f32 %v8331_v58 }
 0x26b   : > { %v1536_v16 = vpop.xlane.xlu2 %1535  ;;  %v1754_v6 = vmul.f32 0.5, %v1753_v31  ;;  %v1893_v17 = vmul.f32 %v8290_v53, %v1892_v43  ;;  %v1966_v52 = vmul.f32 %v7927_v1, %v1933_v57  ;;  %v1947_v27 = vmul.f32 %v1870_v32, %v7861_v54 }
 0x26c   : > { %v1568_v23 = vmul.f32 %v1536_v16, %v6692_v56  ;;  %v1884_v33 = vmul.f32 0.5, %v1883_v34  ;;  %v1948_v43 = vmul.f32 %v1880_v21, %v7794_v29  ;;  %v1746_v55 = vmul.f32 %v8250_v0, %v1745_v38 }
 0x26d   : > { %5551 = vmatmul.msk.bf16.gmra.mxu1 %vm10318_vm13, %v1998_v14  ;;  %v1755_v31 = vsub.f32 1.5, %v1754_v6  ;;  %v1894_v14 = vmul.f32 0.5, %v1893_v17  ;;  %v1992_v22 = vpack.c.bf16 %v1967_v18, %v1966_v52  ;;  %vm1758_vm0 = vweird.f32 %v8259_v30 }
 0x26e   : > { %v8348_v63 = vadd.f32 1.1920929e-07, %v1568_v23  ;;  %v8350_v16 = vpop.eup %5932  ;;  %vm1747_vm7 = vweird.f32 %v8195_v47  ;;  %v1980_v57 = vmul.f32 %v7927_v1, %v1947_v27  ;;  %2408 = vmatpush.bf16.msra.mxu1 %v5727_v26  ;;  %v1885_v15 = vsub.f32 1.5, %v1884_v33 }
 0x26f   : > { %v8353_v46 = vpop.eup %5934  ;;  %v1762_v44 = vmul.f32 %v8350_v16, %v8282_v61  ;;  %v1756_v28 = vmul.f32 %v8259_v30, %v1755_v31  ;;  %vm1749_vm10 = vmor %vm1747_vm7, %vm1748_vm3  ;;  %v1895_v6 = vsub.f32 1.5, %v1894_v14  ;;  %vm1757_vm15 = vweird.f32 %v8212_v39 }
 0x270   : > { %5938 = vrsqrt.f32 %v8348_v63  ;;  %v1772_v23 = vmul.f32 %v8353_v46, %v8280_v8  ;;  %v8373_v12 = vpop.eup %5936  ;;  %v1750_v32 = vsel %vm1749_vm10, %v8250_v0, %v1746_v55  ;;  %v1981_v17 = vmul.f32 %v7927_v1, %v1948_v43  ;;  %vm1759_vm4 = vmor %vm1757_vm15, %vm1758_vm0 }
 0x271   : > { %v1763_v34 = vmul.f32 %v8350_v16, %v1762_v44  ;;  %v1760_v21 = vsel %vm1759_vm4, %v8259_v30, %v1756_v28  ;;  %v1896_v52 = vmul.f32 %v8290_v53, %v1895_v6  ;;  %vm1898_vm6 = vweird.f32 %v8290_v53 }
 0x272   : > { %v1773_v18 = vmul.f32 %v8353_v46, %v1772_v23  ;;  %v1999_v38 = vpack.c.bf16 %v1981_v17, %v1980_v57  ;;  %v1902_v39 = vmul.f32 %v8373_v12, %v8331_v58  ;;  %v1935_v31 = vmul.f32 %v1750_v32, %v7865_v36 }
 0x273   : > { %5545 = vmatmul.msk.bf16.gmra.mxu0 %vm10323_vm5, %v1992_v22  ;;  %v1886_v0 = vmul.f32 %v8273_v42, %v1885_v15  ;;  %vm1888_vm8 = vweird.f32 %v8273_v42  ;;  %v1764_v27 = vmul.f32 0.5, %v1763_v34  ;;  %vm1897_vm13 = vweird.f32 %v8234_v13 }
 0x274   : > { %v1774_v33 = vmul.f32 0.5, %v1773_v18  ;;  %v1936_v14 = vmul.f32 %v1760_v21, %v7876_v9  ;;  %vm1899_vm14 = vmor %vm1897_vm13, %vm1898_vm6  ;;  %vm1887_vm1 = vweird.f32 %v8203_v5  ;;  %v1903_v43 = vmul.f32 %v8373_v12, %v1902_v39 }
 0x275   : > { %v1900_v22 = vsel %vm1899_vm14, %v8290_v53, %v1896_v52  ;;  %v1968_v44 = vmul.f32 %v7927_v1, %v1935_v31  ;;  %vm1889_vm9 = vmor %vm1887_vm1, %vm1888_vm8  ;;  %v1765_v55 = vsub.f32 1.5, %v1764_v27  ;;  %vm1768_vm2 = vweird.f32 %v8350_v16 }
 0x276   : > { %v8380_v47 = vpop.eup %5938  ;;  %v1890_v26 = vsel %vm1889_vm9, %v8273_v42, %v1886_v0  ;;  %v1775_v23 = vsub.f32 1.5, %v1774_v33  ;;  %v1969_v13 = vmul.f32 %v7927_v1, %v1936_v14  ;;  %v1950_v57 = vmul.f32 %v1900_v22, %v7881_v35  ;;  %v5726_v42 = vld [vmem:[%s10144_s6 + $0x8] sm:$0xff]  ;;  %vm10325_vm6 = vmmov %vm10323_vm5 }
 0x277   : > { %v1912_v30 = vmul.f32 %v8380_v47, %v8348_v63  ;;  %v1904_v15 = vmul.f32 0.5, %v1903_v43  ;;  %v1766_v5 = vmul.f32 %v8350_v16, %v1765_v55  ;;  %v1949_v34 = vmul.f32 %v1890_v26, %v7809_v25  ;;  %2409 = vmatpush.bf16.msra.mxu1 %v5726_v42  ;;  %vm10326_vm9 = vmmov %vm10323_vm5 }
 0x278   : > { %v1993_v6 = vpack.c.bf16 %v1969_v13, %v1968_v44  ;;  %v1776_v32 = vmul.f32 %v8353_v46, %v1775_v23  ;;  %vm1778_vm3 = vweird.f32 %v8353_v46  ;;  %vm1767_vm0 = vweird.f32 %v8282_v61  ;;  %v8423_v61 = vld [vmem:[%s10143_s5] ss:$0 sm:$0xff] }
 0x279   : > { %v1913_v28 = vmul.f32 %v8380_v47, %v1912_v30  ;;  %v1983_v18 = vmul.f32 %v7927_v1, %v1950_v57  ;;  %vm1777_vm7 = vweird.f32 %v8280_v8  ;;  %vm1769_vm10 = vmor %vm1767_vm0, %vm1768_vm2  ;;  %v1905_v21 = vsub.f32 1.5, %v1904_v15 }
 0x27a   : > { %vm1779_vm15 = vmor %vm1777_vm7, %vm1778_vm3  ;;  %v1982_v52 = vmul.f32 %v7927_v1, %v1949_v34  ;;  %vm1908_vm4 = vweird.f32 %v8373_v12  ;;  %vm1918_vm8 = vweird.f32 %v8380_v47  ;;  %vm1917_vm14 = vweird.f32 %v8348_v63  ;;  %v5725_v63 = vld [vmem:[%s10144_s6] sm:$0xff] }
 0x27b   : > { %v1914_v17 = vmul.f32 0.5, %v1913_v28  ;;  %v1780_v39 = vsel %vm1779_vm15, %v8353_v46, %v1776_v32  ;;  %v1906_v27 = vmul.f32 %v8373_v12, %v1905_v21  ;;  %vm1919_vm1 = vmor %vm1917_vm14, %vm1918_vm8  ;;  %2410 = vmatpush.bf16.msra.mxu1 %v5725_v63 }
 0x27c   : > { %v2000_v0 = vpack.c.bf16 %v1983_v18, %v1982_v52  ;;  %v1938_v33 = vmul.f32 %v1780_v39, %v7828_v20  ;;  %vm10327_vm2 = vmmov %vm10323_vm5 }
 0x27d   : > { %5552 = vmatmul.msk.bf16.gmra.mxu1 %vm10324_vm12, %v1999_v38  ;;  %v1770_v38 = vsel %vm1769_vm10, %v8350_v16, %v1766_v5  ;;  %v1915_v31 = vsub.f32 1.5, %v1914_v17  ;;  %vm1907_vm12 = vweird.f32 %v8331_v58  ;;  %vm10328_vm3 = vmmov %vm10327_vm2 }
 0x27e   : > { %v1937_v8 = vmul.f32 %v1770_v38, %v7892_v45  ;;  %vm1909_vm13 = vmor %vm1907_vm12, %vm1908_vm4  ;;  %v1971_v26 = vmul.f32 %v7927_v1, %v1938_v33 }
 0x27f   : > { %v1916_v46 = vmul.f32 %v8380_v47, %v1915_v31  ;;  %v1910_v14 = vsel %vm1909_vm13, %v8373_v12, %v1906_v27  ;;  %vm10331_vm0 = vmmov %vm10327_vm2 }
 0x280   : > { %v1970_v43 = vmul.f32 %v7927_v1, %v1937_v8  ;;  %v1951_v23 = vmul.f32 %v1910_v14, %v7896_v19  ;;  %vm10332_vm7 = vmmov %vm10331_vm0 }
 0x281   : > { %v1920_v44 = vsel %vm1919_vm1, %v8380_v47, %v1916_v46  ;;  %vm10334_vm10 = vmmov %vm10331_vm0 }
 0x282   : > { %v1994_v28 = vpack.c.bf16 %v1971_v26, %v1970_v43  ;;  %v1952_v57 = vmul.f32 %v1920_v44, %v7906_v24  ;;  %v1984_v12 = vmul.f32 %v7927_v1, %v1951_v23  ;;  %vm10335_vm15 = vmmov %vm10331_vm0 }
 0x283   : > { %5546 = vmatmul.msk.bf16.gmra.mxu0 %vm10323_vm5, %v1993_v6  ;;  %vm10329_vm5 = vmmov %vm10327_vm2 }
 0x284   : > { %v2079_v53 = vpop.f32.mrf.mxu0  ;;  %v1985_v47 = vmul.f32 %v7927_v1, %v1952_v57  ;;  %vm10337_vm4 = vmmov %vm10331_vm0 }
 0x285   : > { %v2080_v22 = vadd.f32 %v8423_v61, %v2079_v53  ;;  %vm10340_vm8 = vmmov %vm10331_vm0 }
 0x286   : > { %v2001_v15 = vpack.c.bf16 %v1985_v47, %v1984_v12  ;;  %vm10341_vm12 = vmmov %vm10331_vm0 }
 0x287   : > { %v2159_v58 = vmul.f32 0.5, %v2080_v22  ;;  %vm10343_vm13 = vmmov %vm10331_vm0 }
 0x288   : > { %vm10344_vm14 = vmmov %vm10331_vm0 }
 0x289   : > { %vm10345_vm1 = vmmov %vm10331_vm0 }
 0x28c   : > { %v2081_v16 = vpop.f32.mrf.mxu0 }
 0x28d   : > { %5553 = vmatmul.msk.bf16.gmra.mxu1 %vm10325_vm6, %v2000_v0  ;;  %v2082_v30 = vadd.f32 %v8423_v61, %v2081_v16  ;;  %vm10338_vm6 = vmmov %vm10331_vm0 }
 0x28f   : > { %v2160_v55 = vmul.f32 0.5, %v2082_v30 }
 0x291   : > { %5940 = vtanh.f32 %v2160_v55 }
 0x292   : > { %5942 = vtanh.f32 %v2159_v58 }
 0x293   : > { %5547 = vmatmul.msk.bf16.gmra.mxu0 %vm10326_vm9, %v1994_v28  ;;  %vm10346_vm9 = vmmov %vm10331_vm0 }
 0x294   : > { %v2084_v13 = vpop.f32.mrf.mxu0 }
 0x295   : > { %v2085_v32 = vadd.f32 %v8423_v61, %v2084_v13 }
 0x297   : > { %v5941_v6 = vpop.eup %5940  ;;  %v2161_v38 = vmul.f32 0.5, %v2085_v32 }
 0x298   : > { %v5943_v53 = vpop.eup %5942  ;;  %v2224_v42 = vadd.f32 1.0, %v5941_v6 }
 0x299   : > { %v2223_v17 = vadd.f32 1.0, %v5943_v53 }
 0x29a   : > { %v2256_v21 = vmul.f32 0.5, %v2224_v42 }
 0x29b   : > { %v2255_v52 = vmul.f32 0.5, %v2223_v17 }
 0x29c   : > { %v2086_v5 = vpop.f32.mrf.mxu0  ;;  %v2288_v31 = vmul.f32 %v2256_v21, %v2082_v30 }
 0x29d   : > { %5554 = vmatmul.msk.bf16.gmra.mxu1 %vm10327_vm2, %v2001_v15  ;;  %v2087_v34 = vadd.f32 %v8423_v61, %v2086_v5  ;;  %v2287_v1 = vmul.f32 %v2255_v52, %v2080_v22  ;;  %vm10347_vm2 = vmmov %vm10331_vm0 }
 0x29f   : > { %v2162_v18 = vmul.f32 0.5, %v2087_v34  ;;  %v2319_v0 = vpack.c.bf16 %v2288_v31, %v2287_v1 }
 0x2a1   : > { %5944 = vtanh.f32 %v2162_v18 }
 0x2a2   : > { %5946 = vtanh.f32 %v2161_v38 }
 0x2a4   : > { %v2089_v39 = vpop.f32.mrf.mxu0 }
 0x2a5   : > { %v2090_v14 = vadd.f32 %v8423_v61, %v2089_v39 }
 0x2a7   : > { %v5945_v27 = vpop.eup %5944  ;;  %v2163_v26 = vmul.f32 0.5, %v2090_v14 }
 0x2a8   : > { %v5947_v16 = vpop.eup %5946  ;;  %v2226_v46 = vadd.f32 1.0, %v5945_v27 }
 0x2a9   : > { %v2225_v43 = vadd.f32 1.0, %v5947_v16 }
 0x2aa   : > { %v2258_v55 = vmul.f32 0.5, %v2226_v46 }
 0x2ab   : > { %v2257_v23 = vmul.f32 0.5, %v2225_v43 }
 0x2ac   : > { %v2091_v8 = vpop.f32.mrf.mxu0  ;;  %v2290_v58 = vmul.f32 %v2258_v55, %v2087_v34 }
 0x2ad   : > { %2411 = vmatmul.bf16.vlgmr.msra.gmra.mxu1 %v2319_v0  ;;  %v2092_v33 = vadd.f32 %v8423_v61, %v2091_v8  ;;  %v2289_v22 = vmul.f32 %v2257_v23, %v2085_v32 }
 0x2af   : > { %v2164_v44 = vmul.f32 0.5, %v2092_v33  ;;  %v2320_v57 = vpack.c.bf16 %v2290_v58, %v2289_v22 }
 0x2b1   : > { %5948 = vtanh.f32 %v2164_v44 }
 0x2b2   : > { %5950 = vtanh.f32 %v2163_v26 }
 0x2b7   : > { %v2124_v30 = vpop.f32.mrf.mxu1  ;;  %v5949_v63 = vpop.eup %5948 }
 0x2b8   : > { %v2125_v28 = vadd.f32 %v8423_v61, %v2124_v30  ;;  %v5951_v12 = vpop.eup %5950  ;;  %v2228_v47 = vadd.f32 1.0, %v5949_v63 }
 0x2b9   : > { %v2227_v6 = vadd.f32 1.0, %v5951_v12 }
 0x2ba   : > { %v2177_v13 = vmul.f32 0.5, %v2125_v28  ;;  %v2260_v42 = vmul.f32 0.5, %v2228_v47 }
 0x2bb   : > { %v2259_v32 = vmul.f32 0.5, %v2227_v6 }
 0x2bc   : > { %5952 = vtanh.f32 %v2177_v13  ;;  %v2292_v38 = vmul.f32 %v2260_v42, %v2092_v33 }
 0x2bd   : > { %2416 = vmatmul.bf16.gmra.mxu1 %v2320_v57  ;;  %v2291_v31 = vmul.f32 %v2259_v32, %v2090_v14 }
 0x2bf   : > { %v2126_v15 = vpop.f32.mrf.mxu1  ;;  %v2321_v46 = vpack.c.bf16 %v2292_v38, %v2291_v31 }
 0x2c0   : > { %v2127_v5 = vadd.f32 %v8423_v61, %v2126_v15  ;;  %v2094_v53 = vpop.f32.mrf.mxu0 }
 0x2c1   : > { %v2095_v34 = vadd.f32 %v8423_v61, %v2094_v53 }
 0x2c2   : > { %v2178_v17 = vmul.f32 0.5, %v2127_v5  ;;  %v5953_v18 = vpop.eup %5952 }
 0x2c3   : > { %v2165_v21 = vmul.f32 0.5, %v2095_v34  ;;  %v2241_v52 = vadd.f32 1.0, %v5953_v18 }
 0x2c4   : > { %5954 = vtanh.f32 %v2178_v17 }
 0x2c5   : > { %5956 = vtanh.f32 %v2165_v21  ;;  %v2273_v43 = vmul.f32 0.5, %v2241_v52 }
 0x2c7   : > { %v2129_v39 = vpop.f32.mrf.mxu1  ;;  %v8456_v33 = vmul.f32 %v2273_v43, %v2125_v28 }
 0x2c8   : > { %v2130_v1 = vadd.f32 %v8423_v61, %v2129_v39  ;;  %v2096_v0 = vpop.f32.mrf.mxu0 }
 0x2c9   : > { %v2097_v8 = vadd.f32 %v8423_v61, %v2096_v0 }
 0x2ca   : > { %v5955_v27 = vpop.eup %5954  ;;  %v2179_v16 = vmul.f32 0.5, %v2130_v1 }
 0x2cb   : > { %v2242_v44 = vadd.f32 1.0, %v5955_v27  ;;  %v2166_v55 = vmul.f32 0.5, %v2097_v8  ;;  %v5957_v23 = vpop.eup %5956 }
 0x2cc   : > { %5958 = vtanh.f32 %v2179_v16  ;;  %v2229_v22 = vadd.f32 1.0, %v5957_v23 }
 0x2cd   : > { %2421 = vmatmul.bf16.gmra.mxu1 %v2321_v46  ;;  %v2274_v26 = vmul.f32 0.5, %v2242_v44  ;;  %5960 = vtanh.f32 %v2166_v55 }
 0x2ce   : > { %v2261_v6 = vmul.f32 0.5, %v2229_v22 }
 0x2cf   : > { %v8458_v14 = vmul.f32 %v2274_v26, %v2127_v5  ;;  %v2131_v58 = vpop.f32.mrf.mxu1 }
 0x2d0   : > { %v2132_v30 = vadd.f32 %v8423_v61, %v2131_v58  ;;  %v2099_v57 = vpop.f32.mrf.mxu0  ;;  %v2293_v17 = vmul.f32 %v2261_v6, %v2095_v34 }
 0x2d1   : > { %v2100_v47 = vadd.f32 %v8423_v61, %v2099_v57 }
 0x2d2   : > { %v2180_v63 = vmul.f32 0.5, %v2132_v30  ;;  %v5959_v12 = vpop.eup %5958 }
 0x2d3   : > { %v5961_v15 = vpop.eup %5960  ;;  %v2167_v28 = vmul.f32 0.5, %v2100_v47  ;;  %v2243_v5 = vadd.f32 1.0, %v5959_v12 }
 0x2d4   : > { %5962 = vtanh.f32 %v2180_v63  ;;  %v2230_v53 = vadd.f32 1.0, %v5961_v15 }
 0x2d5   : > { %5964 = vtanh.f32 %v2167_v28  ;;  %v2275_v39 = vmul.f32 0.5, %v2243_v5 }
 0x2d6   : > { %v2262_v42 = vmul.f32 0.5, %v2230_v53 }
 0x2d7   : > { %v8466_v55 = vmul.f32 %v2275_v39, %v2130_v1 }
 0x2d8   : > { %v2294_v18 = vmul.f32 %v2262_v42, %v2097_v8  ;;  %v2101_v38 = vpop.f32.mrf.mxu0 }
 0x2d9   : > { %v2102_v0 = vadd.f32 %v8423_v61, %v2101_v38 }
 0x2da   : > { %v2134_v32 = vpop.f32.mrf.mxu1  ;;  %v5963_v21 = vpop.eup %5962  ;;  %v2322_v27 = vpack.c.bf16 %v2294_v18, %v2293_v17 }
 0x2db   : > { %v2135_v52 = vadd.f32 %v8423_v61, %v2134_v32  ;;  %v2244_v31 = vadd.f32 1.0, %v5963_v21  ;;  %v2168_v43 = vmul.f32 0.5, %v2102_v0  ;;  %v5965_v44 = vpop.eup %5964 }
 0x2dc   : > { %v2231_v23 = vadd.f32 1.0, %v5965_v44 }
 0x2dd   : > { %v2181_v16 = vmul.f32 0.5, %v2135_v52  ;;  %v2276_v46 = vmul.f32 0.5, %v2244_v31  ;;  %2426 = vmatmul.bf16.gmra.mxu1 %v2322_v27  ;;  %5966 = vtanh.f32 %v2168_v43 }
 0x2de   : > { %v2263_v1 = vmul.f32 0.5, %v2231_v23 }
 0x2df   : > { %v8468_v34 = vmul.f32 %v2276_v46, %v2132_v30  ;;  %5968 = vtanh.f32 %v2181_v16 }
 0x2e0   : > { %v2104_v58 = vpop.f32.mrf.mxu0  ;;  %v2295_v5 = vmul.f32 %v2263_v1, %v2100_v47 }
 0x2e1   : > { %v2105_v57 = vadd.f32 %v8423_v61, %v2104_v58 }
 0x2e2   : > { %v2136_v8 = vpop.f32.mrf.mxu1 }
 0x2e3   : > { %v2137_v22 = vadd.f32 %v8423_v61, %v2136_v8  ;;  %v5967_v12 = vpop.eup %5966  ;;  %v2169_v15 = vmul.f32 0.5, %v2105_v57 }
 0x2e4   : > { %v2232_v53 = vadd.f32 1.0, %v5967_v12 }
 0x2e5   : > { %v2182_v63 = vmul.f32 0.5, %v2137_v22  ;;  %v5969_v6 = vpop.eup %5968 }
 0x2e6   : > { %v2264_v30 = vmul.f32 0.5, %v2232_v53  ;;  %v2245_v28 = vadd.f32 1.0, %v5969_v6 }
 0x2e7   : > { %5970 = vtanh.f32 %v2182_v63 }
 0x2e8   : > { %5972 = vtanh.f32 %v2169_v15  ;;  %v2296_v17 = vmul.f32 %v2264_v30, %v2102_v0  ;;  %v2106_v18 = vpop.f32.mrf.mxu0  ;;  %v2277_v27 = vmul.f32 0.5, %v2245_v28 }
 0x2e9   : > { %v2107_v21 = vadd.f32 %v8423_v61, %v2106_v18 }
 0x2ea   : > { %v2139_v42 = vpop.f32.mrf.mxu1  ;;  %v2323_v31 = vpack.c.bf16 %v2296_v17, %v2295_v5  ;;  %v8476_v8 = vmul.f32 %v2277_v27, %v2135_v52 }
 0x2eb   : > { %v2140_v32 = vadd.f32 %v8423_v61, %v2139_v42  ;;  %v2170_v46 = vmul.f32 0.5, %v2107_v21 }
 0x2ed   : > { %v5971_v38 = vpop.eup %5970  ;;  %v2183_v39 = vmul.f32 0.5, %v2140_v32  ;;  %2431 = vmatmul.bf16.gmra.mxu1 %v2323_v31  ;;  %5974 = vtanh.f32 %v2170_v46 }
 0x2ee   : > { %v2246_v16 = vadd.f32 1.0, %v5971_v38  ;;  %v5973_v43 = vpop.eup %5972 }
 0x2ef   : > { %5976 = vtanh.f32 %v2183_v39  ;;  %v2233_v23 = vadd.f32 1.0, %v5973_v43 }
 0x2f0   : > { %v2278_v44 = vmul.f32 0.5, %v2246_v16  ;;  %v2109_v58 = vpop.f32.mrf.mxu0 }
 0x2f1   : > { %v2110_v12 = vadd.f32 %v8423_v61, %v2109_v58  ;;  %v2265_v28 = vmul.f32 0.5, %v2233_v23 }
 0x2f2   : > { %v8478_v47 = vmul.f32 %v2278_v44, %v2137_v22  ;;  %v2141_v0 = vpop.f32.mrf.mxu1 }
 0x2f3   : > { %v2142_v63 = vadd.f32 %v8423_v61, %v2141_v0  ;;  %v5975_v1 = vpop.eup %5974  ;;  %v2171_v53 = vmul.f32 0.5, %v2110_v12  ;;  %v2297_v17 = vmul.f32 %v2265_v28, %v2105_v57 }
 0x2f4   : > { %v2234_v42 = vadd.f32 1.0, %v5975_v1 }
 0x2f5   : > { %v2184_v6 = vmul.f32 0.5, %v2142_v63  ;;  %v5977_v30 = vpop.eup %5976 }
 0x2f6   : > { %v2266_v52 = vmul.f32 0.5, %v2234_v42  ;;  %v2247_v22 = vadd.f32 1.0, %v5977_v30 }
 0x2f7   : > { %5978 = vtanh.f32 %v2184_v6 }
 0x2f8   : > { %5980 = vtanh.f32 %v2171_v53  ;;  %v2298_v18 = vmul.f32 %v2266_v52, %v2107_v21  ;;  %v2111_v38 = vpop.f32.mrf.mxu0  ;;  %v2279_v43 = vmul.f32 0.5, %v2247_v22 }
 0x2f9   : > { %v2112_v31 = vadd.f32 %v8423_v61, %v2111_v38 }
 0x2fa   : > { %v2144_v5 = vpop.f32.mrf.mxu1  ;;  %v2324_v46 = vpack.c.bf16 %v2298_v18, %v2297_v17  ;;  %v8486_v6 = vmul.f32 %v2279_v43, %v2140_v32 }
 0x2fb   : > { %v2145_v39 = vadd.f32 %v8423_v61, %v2144_v5  ;;  %v2172_v0 = vmul.f32 0.5, %v2112_v31 }
 0x2fd   : > { %v5979_v27 = vpop.eup %5978  ;;  %v2185_v16 = vmul.f32 0.5, %v2145_v39  ;;  %2436 = vmatmul.bf16.gmra.mxu1 %v2324_v46  ;;  %5982 = vtanh.f32 %v2172_v0 }
 0x2fe   : > { %v2248_v44 = vadd.f32 1.0, %v5979_v27  ;;  %v5981_v23 = vpop.eup %5980 }
 0x2ff   : > { %5984 = vtanh.f32 %v2185_v16  ;;  %v2235_v1 = vadd.f32 1.0, %v5981_v23 }
 0x300   : > { %v2280_v58 = vmul.f32 0.5, %v2248_v44  ;;  %v2114_v53 = vpop.f32.mrf.mxu0 }
 0x301   : > { %v2115_v28 = vadd.f32 %v8423_v61, %v2114_v53  ;;  %v2267_v18 = vmul.f32 0.5, %v2235_v1 }
 0x302   : > { %v8488_v57 = vmul.f32 %v2280_v58, %v2142_v63  ;;  %v2146_v21 = vpop.f32.mrf.mxu1 }
 0x303   : > { %v2147_v30 = vadd.f32 %v8423_v61, %v2146_v21  ;;  %v5983_v22 = vpop.eup %5982  ;;  %v2173_v5 = vmul.f32 0.5, %v2115_v28  ;;  %v2299_v16 = vmul.f32 %v2267_v18, %v2110_v12 }
 0x304   : > { %v2236_v38 = vadd.f32 1.0, %v5983_v22 }
 0x305   : > { %v2186_v52 = vmul.f32 0.5, %v2147_v30  ;;  %v5985_v17 = vpop.eup %5984 }
 0x306   : > { %v2268_v32 = vmul.f32 0.5, %v2236_v38  ;;  %v2249_v63 = vadd.f32 1.0, %v5985_v17 }
 0x307   : > { %5986 = vtanh.f32 %v2186_v52 }
 0x308   : > { %5988 = vtanh.f32 %v2173_v5  ;;  %v2300_v46 = vmul.f32 %v2268_v32, %v2112_v31  ;;  %v2116_v43 = vpop.f32.mrf.mxu0  ;;  %v2281_v53 = vmul.f32 0.5, %v2249_v63 }
 0x309   : > { %v2117_v0 = vadd.f32 %v8423_v61, %v2116_v43 }
 0x30a   : > { %v2149_v27 = vpop.f32.mrf.mxu1  ;;  %v2325_v21 = vpack.c.bf16 %v2300_v46, %v2299_v16  ;;  %v8496_v22 = vmul.f32 %v2281_v53, %v2145_v39 }
 0x30b   : > { %v2150_v44 = vadd.f32 %v8423_v61, %v2149_v27  ;;  %v2174_v15 = vmul.f32 0.5, %v2117_v0 }
 0x30d   : > { %v5987_v23 = vpop.eup %5986  ;;  %v2187_v58 = vmul.f32 0.5, %v2150_v44  ;;  %2441 = vmatmul.bf16.gmra.mxu1 %v2325_v21  ;;  %5990 = vtanh.f32 %v2174_v15 }
 0x30e   : > { %v2250_v42 = vadd.f32 1.0, %v5987_v23  ;;  %v5989_v1 = vpop.eup %5988 }
 0x30f   : > { %5992 = vtanh.f32 %v2187_v58  ;;  %v2237_v5 = vadd.f32 1.0, %v5989_v1 }
 0x310   : > { %v2282_v52 = vmul.f32 0.5, %v2250_v42  ;;  %v2119_v17 = vpop.f32.mrf.mxu0 }
 0x311   : > { %v2120_v38 = vadd.f32 %v8423_v61, %v2119_v17  ;;  %v2269_v15 = vmul.f32 0.5, %v2237_v5 }
 0x312   : > { %v8498_v12 = vmul.f32 %v2282_v52, %v2147_v30  ;;  %v2151_v31 = vpop.f32.mrf.mxu1 }
 0x313   : > { %v2152_v18 = vadd.f32 %v8423_v61, %v2151_v31  ;;  %v5991_v27 = vpop.eup %5990  ;;  %v2175_v16 = vmul.f32 0.5, %v2120_v38  ;;  %v2301_v23 = vmul.f32 %v2269_v15, %v2115_v28 }
 0x314   : > { %v2238_v46 = vadd.f32 1.0, %v5991_v27 }
 0x315   : > { %v2188_v63 = vmul.f32 0.5, %v2152_v18  ;;  %v5993_v42 = vpop.eup %5992 }
 0x316   : > { %v2270_v39 = vmul.f32 0.5, %v2238_v46  ;;  %v2251_v30 = vadd.f32 1.0, %v5993_v42 }
 0x317   : > { %5994 = vtanh.f32 %v2188_v63 }
 0x318   : > { %5996 = vtanh.f32 %v2175_v16  ;;  %v2302_v58 = vmul.f32 %v2270_v39, %v2117_v0  ;;  %v2121_v21 = vpop.f32.mrf.mxu0  ;;  %v2283_v32 = vmul.f32 0.5, %v2251_v30 }
 0x319   : > { %v2122_v1 = vadd.f32 %v8423_v61, %v2121_v21 }
 0x31a   : > { %v2154_v43 = vpop.f32.mrf.mxu1  ;;  %v2326_v17 = vpack.c.bf16 %v2302_v58, %v2301_v23  ;;  %v8506_v27 = vmul.f32 %v2283_v32, %v2150_v44 }
 0x31b   : > { %v2155_v53 = vadd.f32 %v8423_v61, %v2154_v43  ;;  %v2176_v13 = vmul.f32 0.5, %v2122_v1 }
 0x31d   : > { %v5995_v52 = vpop.eup %5994  ;;  %v2189_v31 = vmul.f32 0.5, %v2155_v53  ;;  %2446 = vmatmul.bf16.gmra.mxu1 %v2326_v17  ;;  %5998 = vtanh.f32 %v2176_v13  ;;  %v8516_v13 = vld [vmem:[%s10145_s7] ss:$0 sm:$0xff] }
 0x31e   : > { %v2252_v26 = vadd.f32 1.0, %v5995_v52  ;;  %v5997_v5 = vpop.eup %5996 }
 0x31f   : > { %6000 = vtanh.f32 %v2189_v31  ;;  %v2239_v16 = vadd.f32 1.0, %v5997_v5 }
 0x320   : > { %v2284_v63 = vmul.f32 0.5, %v2252_v26 }
 0x321   : > { %v2271_v43 = vmul.f32 0.5, %v2239_v16 }
 0x322   : > { %v8508_v28 = vmul.f32 %v2284_v63, %v2152_v18  ;;  %v2156_v0 = vpop.f32.mrf.mxu1 }
 0x323   : > { %v2157_v42 = vadd.f32 %v8423_v61, %v2156_v0  ;;  %v5999_v39 = vpop.eup %5998  ;;  %v2303_v32 = vmul.f32 %v2271_v43, %v2120_v38 }
 0x324   : > { %v2333_v15 = vpack.c.bf16 %v8508_v28, %v8506_v27  ;;  %v2240_v23 = vadd.f32 1.0, %v5999_v39 }
 0x325   : > { %v2190_v46 = vmul.f32 0.5, %v2157_v42  ;;  %v6001_v30 = vpop.eup %6000 }
 0x326   : > { %v2272_v26 = vmul.f32 0.5, %v2240_v23  ;;  %v2253_v44 = vadd.f32 1.0, %v6001_v30 }
 0x327   : > { %6002 = vtanh.f32 %v2190_v46 }
 0x328   : > { %v2304_v58 = vmul.f32 %v2272_v26, %v2122_v1  ;;  %v2285_v17 = vmul.f32 0.5, %v2253_v44  ;;  %v10330_v44 = vpack.c.bf16 %v8458_v14, %v8456_v33 }
 0x32a   : > { %v2412_v18 = vpop.f32.mrf.mxu1  ;;  %v2327_v31 = vpack.c.bf16 %v2304_v58, %v2303_v32  ;;  %v8525_v46 = vmul.f32 %v2285_v17, %v2155_v53  ;;  %v10333_v17 = vpack.c.bf16 %v8468_v34, %v8466_v55 }
 0x32b   : > { %v2413_v61 = vadd.f32 %v8516_v13, %v2412_v18 }
 0x32d   : > { %v6003_v21 = vpop.eup %6002  ;;  %v8520_v52 = vadd.f32 %v2413_v61, %v7669_v41  ;;  %2451 = vmatmul.bf16.gmra.mxu1 %v2327_v31 }
 0x32e   : > { %v2254_v5 = vadd.f32 1.0, %v6003_v21 }
 0x32f   : > { %v2532_v63 = vmul.f32 %v8520_v52, %v8520_v52 }
 0x330   : > { %v2286_v0 = vmul.f32 0.5, %v2254_v5 }
 0x331   : > { %v2564_v16 = vsel %vm10328_vm3, %v2532_v63, 0.0  ;;  %vm10348_vm3 = vmmov %vm10331_vm0 }
 0x332   : > { %v8527_v38 = vmul.f32 %v2286_v0, %v2157_v42  ;;  %v2414_v1 = vpop.f32.mrf.mxu1  ;;  %2565 = vadd.xlane.f32.xlu0 %v2564_v16 }
 0x333   : > { %v2415_v39 = vadd.f32 %v8516_v13, %v2414_v1 }
 0x334   : > { %v2334_v41 = vpack.c.bf16 %v8527_v38, %v8525_v46 }
 0x335   : > { %v8533_v30 = vadd.f32 %v2415_v39, %v7679_v37 }
 0x337   : > { %v2533_v43 = vmul.f32 %v8533_v30, %v8533_v30 }
 0x339   : > { %v2567_v23 = vsel %vm10329_vm5, %v2533_v43, 0.0  ;;  %v10336_v43 = vpack.c.bf16 %v8478_v47, %v8476_v8  ;;  %vm10349_vm5 = vmmov %vm10331_vm0 }
 0x33a   : > { %v2417_v26 = vpop.f32.mrf.mxu1  ;;  %2568 = vadd.xlane.f32.xlu1 %v2567_v23 }
 0x33b   : > { %v2418_v53 = vadd.f32 %v8516_v13, %v2417_v26 }
 0x33d   : > { %v8540_v42 = vadd.f32 %v2418_v53, %v7682_v2  ;;  %2456 = vmatmul.bf16.gmra.mxu1 %v10330_v44 }
 0x33f   : > { %v2534_v37 = vmul.f32 %v8540_v42, %v8540_v42 }
 0x341   : > { %v2570_v18 = vsel %vm10331_vm0, %v2534_v37, 0.0 }
 0x342   : > { %v2419_v32 = vpop.f32.mrf.mxu1  ;;  %2571 = vadd.xlane.f32.xlu2 %v2570_v18 }
 0x343   : > { %v2420_v58 = vadd.f32 %v8516_v13, %v2419_v32  ;;  %v10339_v32 = vpack.c.bf16 %v8488_v57, %v8486_v6 }
 0x345   : > { %v8550_v61 = vadd.f32 %v2420_v58, %v7692_v7 }
 0x347   : > { %v2535_v2 = vmul.f32 %v8550_v61, %v8550_v61 }
 0x349   : > { %v2573_v21 = vsel %vm10332_vm7, %v2535_v2, 0.0 }
 0x34a   : > { %v2422_v31 = vpop.f32.mrf.mxu1  ;;  %2574 = vadd.xlane.f32.xlu0 %v2573_v21 }
 0x34b   : > { %v2423_v33 = vadd.f32 %v8516_v13, %v2422_v31 }
 0x34d   : > { %v8557_v14 = vadd.f32 %v2423_v33, %v7698_v50  ;;  %2461 = vmatmul.bf16.gmra.mxu1 %v10333_v17 }
 0x34f   : > { %v2536_v7 = vmul.f32 %v8557_v14, %v8557_v14 }
 0x351   : > { %v2576_v5 = vsel %vm10334_vm10, %v2536_v7, 0.0  ;;  %v10342_v7 = vpack.c.bf16 %v8498_v12, %v8496_v22 }
 0x352   : > { %v2424_v63 = vpop.f32.mrf.mxu1  ;;  %2577 = vadd.xlane.f32.xlu1 %v2576_v5 }
 0x353   : > { %v2425_v0 = vadd.f32 %v8516_v13, %v2424_v63 }
 0x355   : > { %v8567_v16 = vadd.f32 %v2425_v0, %v7707_v60 }
 0x357   : > { %v2537_v50 = vmul.f32 %v8567_v16, %v8567_v16 }
 0x359   : > { %v2579_v1 = vsel %vm10335_vm15, %v2537_v50, 0.0  ;;  %vm10350_vm15 = vmmov %vm10345_vm1 }
 0x35a   : > { %2580 = vadd.xlane.f32.xlu2 %v2579_v1  ;;  %v2427_v55 = vpop.f32.mrf.mxu1 }
 0x35b   : > { %v2428_v34 = vadd.f32 %v8516_v13, %v2427_v55 }
 0x35d   : > { %v8574_v39 = vadd.f32 %v2428_v34, %v7714_v48  ;;  %2466 = vmatmul.bf16.gmra.mxu1 %v10336_v43 }
 0x35f   : > { %v2538_v60 = vmul.f32 %v8574_v39, %v8574_v39 }
 0x361   : > { %v2582_v23 = vsel %vm10337_vm4, %v2538_v60, 0.0 }
 0x362   : > { %v2429_v26 = vpop.f32.mrf.mxu1  ;;  %2583 = vadd.xlane.f32.xlu0 %v2582_v23 }
 0x363   : > { %v2430_v53 = vadd.f32 %v8516_v13, %v2429_v26 }
 0x365   : > { %v8584_v44 = vadd.f32 %v2430_v53, %v7759_v49 }
 0x367   : > { %v2539_v48 = vmul.f32 %v8584_v44, %v8584_v44 }
 0x369   : > { %v2585_v37 = vsel %vm10338_vm6, %v2539_v48, 0.0 }
 0x36a   : > { %2586 = vadd.xlane.f32.xlu1 %v2585_v37  ;;  %v2432_v8 = vpop.f32.mrf.mxu1 }
 0x36b   : > { %v2433_v47 = vadd.f32 %v8516_v13, %v2432_v8 }
 0x36d   : > { %v8591_v18 = vadd.f32 %v2433_v47, %v7765_v10  ;;  %2471 = vmatmul.bf16.gmra.mxu1 %v10339_v32 }
 0x36f   : > { %v2540_v49 = vmul.f32 %v8591_v18, %v8591_v18 }
 0x371   : > { %v2588_v58 = vsel %vm10340_vm8, %v2540_v49, 0.0 }
 0x372   : > { %v2434_v2 = vpop.f32.mrf.mxu1  ;;  %2589 = vadd.xlane.f32.xlu2 %v2588_v58 }
 0x373   : > { %v2435_v21 = vadd.f32 %v8516_v13, %v2434_v2 }
 0x375   : > { %v8601_v31 = vadd.f32 %v2435_v21, %v7806_v62 }
 0x377   : > { %v2541_v10 = vmul.f32 %v8601_v31, %v8601_v31 }
 0x379   : > { %v2591_v33 = vsel %vm10341_vm12, %v2541_v10, 0.0  ;;  %vm10352_vm12 = vmmov %vm10345_vm1 }
 0x37a   : > { %v2437_v17 = vpop.f32.mrf.mxu1  ;;  %2592 = vadd.xlane.f32.xlu0 %v2591_v33 }
 0x37b   : > { %v2438_v6 = vadd.f32 %v8516_v13, %v2437_v17 }
 0x37d   : > { %v8608_v57 = vadd.f32 %v2438_v6, %v7799_v11  ;;  %2476 = vmatmul.bf16.gmra.mxu1 %v10342_v7 }
 0x37f   : > { %v2542_v62 = vmul.f32 %v8608_v57, %v8608_v57 }
 0x381   : > { %v2594_v5 = vsel %vm10343_vm13, %v2542_v62, 0.0 }
 0x382   : > { %v2439_v63 = vpop.f32.mrf.mxu1  ;;  %2595 = vadd.xlane.f32.xlu1 %v2594_v5 }
 0x383   : > { %v2440_v0 = vadd.f32 %v8516_v13, %v2439_v63 }
 0x385   : > { %v8618_v50 = vadd.f32 %v2440_v0, %v7740_v4 }
 0x387   : > { %v2543_v11 = vmul.f32 %v8618_v50, %v8618_v50 }
 0x389   : > { %v2597_v1 = vsel %vm10344_vm14, %v2543_v11, 0.0 }
 0x38a   : > { %v2442_v55 = vpop.f32.mrf.mxu1  ;;  %2598 = vadd.xlane.f32.xlu2 %v2597_v1 }
 0x38b   : > { %v2443_v22 = vadd.f32 %v8516_v13, %v2442_v55 }
 0x38d   : > { %v8625_v12 = vadd.f32 %v2443_v22, %v7755_v59  ;;  %2481 = vmatmul.bf16.gmra.mxu1 %v2333_v15 }
 0x38f   : > { %v2544_v4 = vmul.f32 %v8625_v12, %v8625_v12 }
 0x391   : > { %v2600_v34 = vsel %vm10345_vm1, %v2544_v4, 0.0 }
 0x392   : > { %v2444_v43 = vpop.f32.mrf.mxu1  ;;  %2601 = vadd.xlane.f32.xlu0 %v2600_v34 }
 0x393   : > { %v2445_v60 = vadd.f32 %v8516_v13, %v2444_v43 }
 0x395   : > { %v8635_v23 = vadd.f32 %v2445_v60, %v7846_v3 }
 0x397   : > { %v2545_v59 = vmul.f32 %v8635_v23, %v8635_v23 }
 0x399   : > { %v2603_v26 = vsel %vm10346_vm9, %v2545_v59, 0.0  ;;  %vm10354_vm9 = vmmov %vm10347_vm2 }
 0x39a   : > { %v2447_v53 = vpop.f32.mrf.mxu1  ;;  %2604 = vadd.xlane.f32.xlu1 %v2603_v26 }
 0x39b   : > { %v2448_v27 = vadd.f32 %v8516_v13, %v2447_v53  ;;  %v5587_v53 = vld [vmem:[%s10141_s3 + $0x2] sm:$0x3] }
 0x39d   : > { %v8642_v28 = vadd.f32 %v2448_v27, %v7865_v36  ;;  %2486 = vmatmul.bf16.gmra.mxu1 %v2334_v41 }
 0x39f   : > { %v2546_v3 = vmul.f32 %v8642_v28, %v8642_v28 }
 0x3a1   : > { %v2606_v15 = vsel %vm10347_vm2, %v2546_v3, 0.0 }
 0x3a2   : > { %v2449_v48 = vpop.f32.mrf.mxu1  ;;  %2607 = vadd.xlane.f32.xlu2 %v2606_v15 }
 0x3a3   : > { %v2450_v37 = vadd.f32 %v8516_v13, %v2449_v48 }
 0x3a5   : > { %v2566_v8 = vpop.xlane.xlu0 %2565  ;;  %v8653_v32 = vadd.f32 %v2450_v37, %v7876_v9 }
 0x3a6   : > { %v2660_v47 = vmul.f32 %v2566_v8, %v6692_v56  ;;  %v8680_v8 = vperm.slane %v5587_v53, 0 }
 0x3a7   : > { %v2547_v46 = vmul.f32 %v8653_v32, %v8653_v32 }
 0x3a8   : > { %v2692_v36 = vadd.f32 1.1920929e-07, %v2660_v47 }
 0x3a9   : > { %v2609_v38 = vsel %vm10348_vm3, %v2547_v46, 0.0 }
 0x3aa   : > { %6004 = vrsqrt.f32 %v2692_v36  ;;  %2610 = vadd.xlane.f32.xlu0 %v2609_v38  ;;  %v2452_v41 = vpop.f32.mrf.mxu1  ;;  %vm2730_vm7 = vweird.f32 %v2692_v36 }
 0x3ab   : > { %v2453_v49 = vadd.f32 %v8516_v13, %v2452_v41 }
 0x3ad   : > { %v2569_v58 = vpop.xlane.xlu1 %2568  ;;  %v8661_v21 = vadd.f32 %v2453_v49, %v7892_v45 }
 0x3ae   : > { %v2661_v2 = vmul.f32 %v2569_v58, %v6692_v56 }
 0x3af   : > { %v2548_v17 = vmul.f32 %v8661_v21, %v8661_v21 }
 0x3b0   : > { %v6005_v10 = vpop.eup %6004  ;;  %v2693_v9 = vadd.f32 1.1920929e-07, %v2661_v2 }
 0x3b1   : > { %v2725_v33 = vmul.f32 %v6005_v10, %v2692_v36  ;;  %v2612_v7 = vsel %vm10349_vm5, %v2548_v17, 0.0  ;;  %vm2731_vm0 = vweird.f32 %v6005_v10  ;;  %v10351_v36 = vld [vmem:[#allocation12_spill] sm:$0xff] }
 0x3b2   : > { %6006 = vrsqrt.f32 %v2693_v9  ;;  %v2454_v62 = vpop.f32.mrf.mxu1  ;;  %2613 = vadd.xlane.f32.xlu1 %v2612_v7  ;;  %vm2732_vm10 = vmor %vm2730_vm7, %vm2731_vm0  ;;  %vm2740_vm6 = vweird.f32 %v2693_v9 }
 0x3b3   : > { %v2726_v6 = vmul.f32 %v6005_v10, %v2725_v33  ;;  %v2455_v63 = vadd.f32 %v8516_v13, %v2454_v62  ;;  %vm10356_vm0 = vmmov %vm10354_vm9 }
 0x3b5   : > { %v2727_v5 = vmul.f32 0.5, %v2726_v6  ;;  %v2572_v0 = vpop.xlane.xlu2 %2571  ;;  %v8669_v1 = vadd.f32 %v2455_v63, %v7828_v20 }
 0x3b6   : > { %v2662_v11 = vmul.f32 %v2572_v0, %v6692_v56 }
 0x3b7   : > { %v2728_v45 = vsub.f32 1.5, %v2727_v5  ;;  %v2549_v43 = vmul.f32 %v8669_v1, %v8669_v1 }
 0x3b8   : > { %v6007_v55 = vpop.eup %6006  ;;  %v2694_v22 = vadd.f32 1.1920929e-07, %v2662_v11 }
 0x3b9   : > { %v2729_v4 = vmul.f32 %v6005_v10, %v2728_v45  ;;  %v2735_v34 = vmul.f32 %v6007_v55, %v2693_v9  ;;  %v2615_v26 = vsel %vm10350_vm15, %v2549_v43, 0.0  ;;  %vm2741_vm4 = vweird.f32 %v6007_v55 }
 0x3ba   : > { %6008 = vrsqrt.f32 %v2694_v22  ;;  %v2457_v20 = vpop.f32.mrf.mxu1  ;;  %2616 = vadd.xlane.f32.xlu2 %v2615_v26  ;;  %vm2742_vm8 = vmor %vm2740_vm6, %vm2741_vm4  ;;  %vm2750_vm14 = vweird.f32 %v2694_v22 }
 0x3bb   : > { %v2733_v60 = vsel %vm2732_vm10, %v6005_v10, %v2729_v4  ;;  %v2736_v59 = vmul.f32 %v6007_v55, %v2735_v34  ;;  %v2458_v3 = vadd.f32 %v8516_v13, %v2457_v20  ;;  %v10353_v34 = vld [vmem:[#allocation14_spill] sm:$0xff]  ;;  %vm10358_vm4 = vmmov %vm10356_vm0 }
 0x3bc   : > { %v3044_v48 = vmul.f32 %v2733_v60, %v8520_v52 }
 0x3bd   : > { %v2737_v27 = vmul.f32 0.5, %v2736_v59  ;;  %v2575_v15 = vpop.xlane.xlu0 %2574  ;;  %v8683_v46 = vadd.f32 %v2458_v3, %v10351_v36 }
 0x3be   : > { %v2663_v37 = vmul.f32 %v2575_v15, %v6692_v56  ;;  %v3077_v10 = vmul.f32 %v8680_v8, %v3044_v48 }
 0x3bf   : > { %v2738_v47 = vsub.f32 1.5, %v2737_v27  ;;  %v2550_v2 = vmul.f32 %v8683_v46, %v8683_v46 }
 0x3c0   : > { %v6009_v38 = vpop.eup %6008  ;;  %v2695_v41 = vadd.f32 1.1920929e-07, %v2663_v37  ;;  %v3109_v45 = vpack.c.bf16 %v3077_v10, %v3077_v10 }
 0x3c1   : > { %v2739_v49 = vmul.f32 %v6007_v55, %v2738_v47  ;;  %v2745_v58 = vmul.f32 %v6009_v38, %v2694_v22  ;;  %v2618_v6 = vsel %vm10352_vm12, %v2550_v2, 0.0  ;;  %vm2751_vm13 = vweird.f32 %v6009_v38  ;;  %v8703_v22 = vld [vmem:[%s10139_s1 + $0x8] sm:$0xff] }
 0x3c2   : > { %6010 = vrsqrt.f32 %v2695_v41  ;;  %v2459_v62 = vpop.f32.mrf.mxu1  ;;  %2619 = vadd.xlane.f32.xlu0 %v2618_v6  ;;  %vm2752_vm1 = vmor %vm2750_vm14, %vm2751_vm13  ;;  %v3158_v27 = vunpack.c.l.b16 %v3109_v45  ;;  %vm2760_vm3 = vweird.f32 %v2695_v41 }
 0x3c3   : > { %v2743_v33 = vsel %vm2742_vm8, %v6007_v55, %v2739_v49  ;;  %v2746_v17 = vmul.f32 %v6009_v38, %v2745_v58  ;;  %v2460_v63 = vadd.f32 %v8516_v13, %v2459_v62  ;;  %vm10360_vm13 = vmmov %vm10356_vm0 }
 0x3c4   : > { %v3045_v7 = vmul.f32 %v2743_v33, %v8533_v30 }
 0x3c5   : > { %v2747_v5 = vmul.f32 0.5, %v2746_v17  ;;  %v2578_v9 = vpop.xlane.xlu1 %2577  ;;  %v8694_v55 = vadd.f32 %v2460_v63, %v10353_v34  ;;  %v10355_v17 = vld [vmem:[#allocation13_spill] sm:$0xff] }
 0x3c6   : > { %v2664_v0 = vmul.f32 %v2578_v9, %v6692_v56  ;;  %v3078_v11 = vmul.f32 %v8680_v8, %v3045_v7 }
 0x3c7   : > { %v2748_v4 = vsub.f32 1.5, %v2747_v5  ;;  %v2551_v20 = vmul.f32 %v8694_v55, %v8694_v55 }
 0x3c8   : > { %v6011_v43 = vpop.eup %6010  ;;  %v2696_v60 = vadd.f32 1.1920929e-07, %v2664_v0  ;;  %v3110_v59 = vpack.c.bf16 %v3078_v11, %v3078_v11 }
 0x3c9   : > { %v2749_v26 = vmul.f32 %v6009_v38, %v2748_v4  ;;  %v2755_v53 = vmul.f32 %v6011_v43, %v2695_v41  ;;  %v2621_v37 = vsel %vm10354_vm9, %v2551_v20, 0.0  ;;  %vm2761_vm2 = vweird.f32 %v6011_v43  ;;  %vm10362_vm9 = vmmov %vm10356_vm0 }
 0x3ca   : > { %6012 = vrsqrt.f32 %v2696_v60  ;;  %v3159_v3 = vunpack.c.l.b16 %v3110_v59  ;;  %v2462_v47 = vpop.f32.mrf.mxu1  ;;  %2622 = vadd.xlane.f32.xlu1 %v2621_v37  ;;  %vm2762_vm5 = vmor %vm2760_vm3, %vm2761_vm2  ;;  %vm2770_vm10 = vweird.f32 %v2696_v60 }
 0x3cb   : > { %v2753_v15 = vsel %vm2752_vm1, %v6009_v38, %v2749_v26  ;;  %v2756_v48 = vmul.f32 %v6011_v43, %v2755_v53  ;;  %v2463_v58 = vadd.f32 %v8516_v13, %v2462_v47 }
 0x3cc   : > { %v3160_v36 = vpack.c.b16 %v3159_v3, %v3158_v27  ;;  %v3046_v10 = vmul.f32 %v2753_v15, %v8540_v42  ;;  %v10357_v15 = vld [vmem:[#allocation16_spill] sm:$0xff] }
 0x3cd   : > { %v2757_v49 = vmul.f32 0.5, %v2756_v48  ;;  %v2581_v2 = vpop.xlane.xlu2 %2580  ;;  %v8708_v6 = vadd.f32 %v2463_v58, %v10355_v17 }
 0x3ce   : > { %v2665_v33 = vmul.f32 %v2581_v2, %v6692_v56  ;;  %3172 = vmatpush.bf16.msra.mxu2 %v3160_v36  ;;  %v3079_v0 = vmul.f32 %v8680_v8, %v3046_v10 }
 0x3cf   : > { %v2758_v38 = vsub.f32 1.5, %v2757_v49  ;;  %v2552_v9 = vmul.f32 %v8708_v6, %v8708_v6 }
 0x3d0   : > { %v6013_v7 = vpop.eup %6012  ;;  %v2697_v62 = vadd.f32 1.1920929e-07, %v2665_v33  ;;  %v3111_v27 = vpack.c.bf16 %v3079_v0, %v3079_v0 }
 0x3d1   : > { %v2759_v5 = vmul.f32 %v6011_v43, %v2758_v38  ;;  %v2765_v63 = vmul.f32 %v6013_v7, %v2696_v60  ;;  %5596 = vmatmul.msk.bf16.vlgmr.msra.gmra.mxu2 %vm1059_vm11, %v8703_v22  ;;  %v2624_v4 = vsel %vm10356_vm0, %v2552_v9, 0.0  ;;  %vm2771_vm7 = vweird.f32 %v6013_v7 }
 0x3d2   : > { %6014 = vrsqrt.f32 %v2697_v62  ;;  %v2464_v59 = vpop.f32.mrf.mxu1  ;;  %2625 = vadd.xlane.f32.xlu2 %v2624_v4  ;;  %v3181_v10 = vunpack.c.l.b16 %v3111_v27  ;;  %vm2772_vm15 = vmor %vm2770_vm10, %vm2771_vm7  ;;  %vm2780_vm8 = vweird.f32 %v2697_v62 }
 0x3d3   : > { %v2763_v11 = vsel %vm2762_vm5, %v6011_v43, %v2759_v5  ;;  %v2766_v45 = vmul.f32 %v6013_v7, %v2765_v63  ;;  %v2465_v26 = vadd.f32 %v8516_v13, %v2464_v59  ;;  %vm10363_vm7 = vmmov %vm10358_vm4 }
 0x3d4   : > { %v3047_v34 = vmul.f32 %v2763_v11, %v8550_v61 }
 0x3d5   : > { %v2767_v41 = vmul.f32 0.5, %v2766_v45  ;;  %v2584_v53 = vpop.xlane.xlu0 %2583  ;;  %v8720_v48 = vadd.f32 %v2465_v26, %v10357_v15 }
 0x3d6   : > { %v3080_v20 = vmul.f32 %v8680_v8, %v3047_v34  ;;  %v2666_v43 = vmul.f32 %v2584_v53, %v6692_v56  ;;  %v10359_v34 = vld [vmem:[#allocation15_spill] sm:$0xff] }
 0x3d7   : > { %v2768_v3 = vsub.f32 1.5, %v2767_v41  ;;  %v2553_v2 = vmul.f32 %v8720_v48, %v8720_v48 }
 0x3d8   : > { %v6015_v37 = vpop.eup %6014  ;;  %v3112_v47 = vpack.c.bf16 %v3080_v20, %v3080_v20  ;;  %v2698_v58 = vadd.f32 1.1920929e-07, %v2666_v43 }
 0x3d9   : > { %v2769_v36 = vmul.f32 %v6013_v7, %v2768_v3  ;;  %v2775_v49 = vmul.f32 %v6015_v37, %v2697_v62  ;;  %v2627_v63 = vsel %vm10358_vm4, %v2553_v2, 0.0  ;;  %vm2781_vm6 = vweird.f32 %v6015_v37 }
 0x3da   : > { %v3182_v33 = vunpack.c.l.b16 %v3112_v47  ;;  %6016 = vrsqrt.f32 %v2698_v58  ;;  %v2467_v5 = vpop.f32.mrf.mxu1  ;;  %2628 = vadd.xlane.f32.xlu0 %v2627_v63  ;;  %vm2782_vm12 = vmor %vm2780_vm8, %vm2781_vm6  ;;  %vm2790_vm1 = vweird.f32 %v2698_v58 }
 0x3db   : > { %v2776_v38 = vmul.f32 %v6015_v37, %v2775_v49  ;;  %v2773_v17 = vsel %vm2772_vm15, %v6013_v7, %v2769_v36  ;;  %v2468_v11 = vadd.f32 %v8516_v13, %v2467_v5 }
 0x3dc   : > { %v3183_v9 = vpack.c.b16 %v3182_v33, %v3181_v10  ;;  %v3048_v60 = vmul.f32 %v2773_v17, %v8557_v14  ;;  %v10361_v33 = vld [vmem:[#allocation17_spill] sm:$0xff] }
 0x3dd   : > { %v2777_v0 = vmul.f32 0.5, %v2776_v38  ;;  %v2587_v45 = vpop.xlane.xlu1 %2586  ;;  %v8729_v59 = vadd.f32 %v2468_v11, %v10359_v34 }
 0x3de   : > { %3192 = vmatpush.bf16.msra.mxu3 %v3183_v9  ;;  %v2667_v41 = vmul.f32 %v2587_v45, %v6692_v56  ;;  %v3081_v43 = vmul.f32 %v8680_v8, %v3048_v60 }
 0x3df   : > { %v2778_v4 = vsub.f32 1.5, %v2777_v0  ;;  %v2554_v20 = vmul.f32 %v8729_v59, %v8729_v59 }
 0x3e0   : > { %v6017_v7 = vpop.eup %6016  ;;  %v2699_v53 = vadd.f32 1.1920929e-07, %v2667_v41 }
 0x3e1   : > { %v2779_v26 = vmul.f32 %v6015_v37, %v2778_v4  ;;  %5597 = vmatmul.msk.bf16.vlgmr.msra.gmra.mxu3 %vm1059_vm11, %v8703_v22  ;;  %v2785_v27 = vmul.f32 %v6017_v7, %v2698_v58  ;;  %v2630_v15 = vsel %vm10360_vm13, %v2554_v20, 0.0  ;;  %vm2791_vm14 = vweird.f32 %v6017_v7 }
 0x3e2   : > { %6018 = vrsqrt.f32 %v2699_v53  ;;  %v2469_v49 = vpop.f32.mrf.mxu1  ;;  %2631 = vadd.xlane.f32.xlu1 %v2630_v15  ;;  %vm2792_vm2 = vmor %vm2790_vm1, %vm2791_vm14  ;;  %vm2800_vm5 = vweird.f32 %v2699_v53 }
 0x3e3   : > { %v2783_v3 = vsel %vm2782_vm12, %v6015_v37, %v2779_v26  ;;  %v2786_v36 = vmul.f32 %v6017_v7, %v2785_v27  ;;  %v2470_v62 = vadd.f32 %v8516_v13, %v2469_v49  ;;  %v3113_v37 = vpack.c.bf16 %v3081_v43, %v3081_v43 }
 0x3e4   : > { %v3049_v47 = vmul.f32 %v2783_v3, %v8567_v16 }
 0x3e5   : > { %v2787_v2 = vmul.f32 0.5, %v2786_v36  ;;  %v8742_v38 = vadd.f32 %v2470_v62, %v10361_v33  ;;  %v2590_v17 = vpop.xlane.xlu2 %2589  ;;  %v3201_v41 = vunpack.c.l.b16 %v3113_v37  ;;  %v5590_v36 = vld [vmem:[%s10140_s2 + $0x10] sm:$0xff] }
 0x3e6   : > { %v3082_v10 = vmul.f32 %v8680_v8, %v3049_v47  ;;  %v2668_v63 = vmul.f32 %v2590_v17, %v6692_v56 }
 0x3e7   : > { %v2788_v5 = vsub.f32 1.5, %v2787_v2  ;;  %v2555_v11 = vmul.f32 %v8742_v38, %v8742_v38 }
 0x3e8   : > { %v3114_v9 = vpack.c.bf16 %v3082_v10, %v3082_v10  ;;  %v6019_v0 = vpop.eup %6018  ;;  %v2700_v4 = vadd.f32 1.1920929e-07, %v2668_v63 }
 0x3e9   : > { %v2789_v45 = vmul.f32 %v6017_v7, %v2788_v5  ;;  %v2795_v60 = vmul.f32 %v6019_v0, %v2699_v53  ;;  %v2633_v34 = vsel %vm10362_vm9, %v2555_v11, 0.0  ;;  %vm2801_vm3 = vweird.f32 %v6019_v0 }
 0x3ea   : > { %v3202_v26 = vunpack.c.l.b16 %v3114_v9  ;;  %6020 = vrsqrt.f32 %v2700_v4  ;;  %v2472_v27 = vpop.f32.mrf.mxu1  ;;  %2634 = vadd.xlane.f32.xlu2 %v2633_v34  ;;  %vm2802_vm0 = vmor %vm2800_vm5, %vm2801_vm3  ;;  %vm2810_vm15 = vweird.f32 %v2700_v4 }
 0x3eb   : > { %v2796_v20 = vmul.f32 %v6019_v0, %v2795_v60  ;;  %v2793_v3 = vsel %vm2792_vm2, %v6017_v7, %v2789_v45  ;;  %v2473_v15 = vadd.f32 %v8516_v13, %v2472_v27 }
 0x3ec   : > { %v3203_v43 = vpack.c.b16 %v3202_v26, %v3201_v41  ;;  %v3050_v62 = vmul.f32 %v2793_v3, %v8574_v39 }
 0x3ed   : > { %v2797_v47 = vmul.f32 0.5, %v2796_v20  ;;  %v8753_v58 = vadd.f32 %v2473_v15, %v7838_v40  ;;  %v2593_v49 = vpop.xlane.xlu0 %2592 }
 0x3ee   : > { %3212 = vmatpush.bf16.msrb.mxu2 %v3203_v43  ;;  %v2669_v10 = vmul.f32 %v2593_v49, %v6692_v56  ;;  %3143 = vperm.xlu0 %5803, %v5590_v36   ;;  %v3083_v11 = vmul.f32 %v8680_v8, %v3050_v62  ;;  %v5591_v49 = vld [vmem:[%s10140_s2 + $0x18] sm:$0xff] }
 0x3ef   : > { %v2798_v2 = vsub.f32 1.5, %v2797_v47  ;;  %v2556_v7 = vmul.f32 %v8753_v58, %v8753_v58 }
 0x3f0   : > { %v6021_v33 = vpop.eup %6020  ;;  %v2701_v37 = vadd.f32 1.1920929e-07, %v2669_v10 }
 0x3f1   : > { %v2799_v17 = vmul.f32 %v6019_v0, %v2798_v2  ;;  %5598 = vmatmul.msk.bf16.vlgmr.msrb.gmra.mxu2 %vm1059_vm11, %v8703_v22  ;;  %v2805_v40 = vmul.f32 %v6021_v33, %v2700_v4  ;;  %v2636_v5 = vsel %vm10363_vm7, %v2556_v7, 0.0  ;;  %vm2811_vm10 = vweird.f32 %v6021_v33  ;;  %vm10364_vm7 = vmmov %vm10358_vm4 }
 0x3f2   : > { %6022 = vrsqrt.f32 %v2701_v37  ;;  %v2474_v9 = vpop.f32.mrf.mxu1  ;;  %2637 = vadd.xlane.f32.xlu2 %v2636_v5  ;;  %vm2812_vm6 = vmor %vm2810_vm15, %vm2811_vm10  ;;  %vm2820_vm12 = vweird.f32 %v2701_v37 }
 0x3f3   : > { %v2803_v63 = vsel %vm2802_vm0, %v6019_v0, %v2799_v17  ;;  %v2806_v60 = vmul.f32 %v6021_v33, %v2805_v40  ;;  %v2475_v34 = vadd.f32 %v8516_v13, %v2474_v9  ;;  %v3115_v0 = vpack.c.bf16 %v3083_v11, %v3083_v11  ;;  %vm10365_vm15 = vmmov %vm10358_vm4 }
 0x3f4   : > { %v3051_v45 = vmul.f32 %v2803_v63, %v8584_v44 }
 0x3f5   : > { %v2807_v53 = vmul.f32 0.5, %v2806_v60  ;;  %v8766_v41 = vadd.f32 %v2475_v34, %v7852_v51  ;;  %v2596_v26 = vpop.xlane.xlu1 %2595  ;;  %v3221_v7 = vunpack.c.l.b16 %v3115_v0 }
 0x3f6   : > { %v3084_v20 = vmul.f32 %v8680_v8, %v3051_v45  ;;  %v2670_v27 = vmul.f32 %v2596_v26, %v6692_v56 }
 0x3f7   : > { %v2808_v3 = vsub.f32 1.5, %v2807_v53  ;;  %v2557_v15 = vmul.f32 %v8766_v41, %v8766_v41 }
 0x3f8   : > { %v3116_v43 = vpack.c.bf16 %v3084_v20, %v3084_v20  ;;  %v6023_v47 = vpop.eup %6022  ;;  %v2702_v36 = vadd.f32 1.1920929e-07, %v2670_v27 }
 0x3f9   : > { %v2809_v51 = vmul.f32 %v6021_v33, %v2808_v3  ;;  %v2815_v62 = vmul.f32 %v6023_v47, %v2701_v37  ;;  %v2639_v2 = vsel %vm10358_vm4, %v2557_v15, 0.0  ;;  %vm2821_vm8 = vweird.f32 %v6023_v47 }
 0x3fa   : > { %6024 = vrsqrt.f32 %v2702_v36  ;;  %v8776_v10 = vpop.f32.mrf.mxu1  ;;  %2640 = vadd.xlane.f32.xlu2 %v2639_v2  ;;  %v3222_v17 = vunpack.c.l.b16 %v3116_v43  ;;  %vm2822_vm13 = vmor %vm2820_vm12, %vm2821_vm8  ;;  %vm2830_vm1 = vweird.f32 %v2702_v36 }
 0x3fb   : > { %v2813_v40 = vsel %vm2812_vm6, %v6021_v33, %v2809_v51  ;;  %v2816_v5 = vmul.f32 %v6023_v47, %v2815_v62  ;;  %3148 = vperm.xlu1 %5804, %v5591_v49   ;;  %vm10366_vm12 = vmmov %vm10364_vm7 }
 0x3fc   : > { %v3223_v63 = vpack.c.b16 %v3222_v17, %v3221_v7  ;;  %v3052_v45 = vmul.f32 %v2813_v40, %v8591_v18 }
 0x3fd   : > { %v2817_v9 = vmul.f32 0.5, %v2816_v5  ;;  %v2599_v11 = vpop.xlane.xlu2 %2598 }
 0x3fe   : > { %v2671_v4 = vmul.f32 %v2599_v11, %v6692_v56  ;;  %3232 = vmatpush.bf16.msrb.mxu3 %v3223_v63  ;;  %v3085_v27 = vmul.f32 %v8680_v8, %v3052_v45 }
 0x3ff   : > { %v2818_v60 = vsub.f32 1.5, %v2817_v9 }
 0x400   : > { %v6025_v34 = vpop.eup %6024  ;;  %v2703_v53 = vadd.f32 1.1920929e-07, %v2671_v4  ;;  %v3117_v37 = vpack.c.bf16 %v3085_v27, %v3085_v27 }
 0x401   : > { %v2819_v26 = vmul.f32 %v6023_v47, %v2818_v60  ;;  %v2825_v20 = vmul.f32 %v6025_v34, %v2702_v36  ;;  %5599 = vmatmul.msk.bf16.vlgmr.msrb.gmra.mxu3 %vm1059_vm11, %v8703_v22  ;;  %vm2831_vm14 = vweird.f32 %v6025_v34 }
 0x402   : > { %6026 = vrsqrt.f32 %v2703_v53  ;;  %v2479_v33 = vpop.f32.mrf.mxu1  ;;  %vm2832_vm9 = vmor %vm2830_vm1, %vm2831_vm14  ;;  %v3241_v9 = vunpack.c.l.b16 %v3117_v37  ;;  %vm2840_vm3 = vweird.f32 %v2703_v53 }
 0x403   : > { %v2823_v0 = vsel %vm2822_vm13, %v6023_v47, %v2819_v26  ;;  %v2826_v3 = vmul.f32 %v6025_v34, %v2825_v20  ;;  %vm10367_vm14 = vmmov %vm10364_vm7 }
 0x404   : > { %v3053_v15 = vmul.f32 %v2823_v0, %v8601_v31 }
 0x405   : > { %v2827_v43 = vmul.f32 0.5, %v2826_v3  ;;  %v2602_v49 = vpop.xlane.xlu0 %2601 }
 0x406   : > { %v2672_v51 = vmul.f32 %v2602_v49, %v6692_v56  ;;  %v3086_v62 = vmul.f32 %v8680_v8, %v3053_v15 }
 0x407   : > { %v2828_v2 = vsub.f32 1.5, %v2827_v43 }
 0x408   : > { %v6027_v7 = vpop.eup %6026  ;;  %v2704_v17 = vadd.f32 1.1920929e-07, %v2672_v51  ;;  %v3118_v40 = vpack.c.bf16 %v3086_v62, %v3086_v62 }
 0x409   : > { %v2829_v5 = vmul.f32 %v6025_v34, %v2828_v2  ;;  %v2835_v63 = vmul.f32 %v6027_v7, %v2703_v53  ;;  %vm2841_vm2 = vweird.f32 %v6027_v7 }
 0x40a   : > { %6028 = vrsqrt.f32 %v2704_v17  ;;  %v2482_v47 = vpop.f32.mrf.mxu1  ;;  %v3242_v11 = vunpack.c.l.b16 %v3118_v40  ;;  %vm2842_vm5 = vmor %vm2840_vm3, %vm2841_vm2  ;;  %vm2850_vm10 = vweird.f32 %v2704_v17 }
 0x40b   : > { %v2833_v45 = vsel %vm2832_vm9, %v6025_v34, %v2829_v5  ;;  %v2836_v4 = vmul.f32 %v6027_v7, %v2835_v63  ;;  %v2483_v60 = vadd.f32 %v8516_v13, %v2482_v47 }
 0x40c   : > { %v3243_v26 = vpack.c.b16 %v3242_v11, %v3241_v9  ;;  %v3054_v0 = vmul.f32 %v2833_v45, %v8608_v57 }
 0x40d   : > { %v2837_v20 = vmul.f32 0.5, %v2836_v4  ;;  %v2605_v27 = vpop.xlane.xlu1 %2604  ;;  %v8790_v43 = vadd.f32 %v2483_v60, %v7809_v25  ;;  %v2480_v25 = vadd.f32 %v8516_v13, %v2479_v33  ;;  %v2478_v60 = vadd.f32 %v8516_v13, %v8776_v10 }
 0x40e   : > { %v2673_v3 = vmul.f32 %v2605_v27, %v6692_v56  ;;  %3252 = vmatpush.bf16.msra.mxu2 %v3243_v26  ;;  %v3087_v37 = vmul.f32 %v8680_v8, %v3054_v0 }
 0x40f   : > { %v2838_v15 = vsub.f32 1.5, %v2837_v20  ;;  %v2560_v53 = vmul.f32 %v8790_v43, %v8790_v43  ;;  %v8810_v27 = vadd.f32 %v2480_v25, %v7794_v29  ;;  %v8815_v29 = vadd.f32 %v2478_v60, %v7861_v54 }
 0x410   : > { %v6029_v36 = vpop.eup %6028  ;;  %v2705_v49 = vadd.f32 1.1920929e-07, %v2673_v3 }
 0x411   : > { %v2839_v51 = vmul.f32 %v6027_v7, %v2838_v15  ;;  %v2845_v34 = vmul.f32 %v6029_v36, %v2704_v17  ;;  %5600 = vmatmul.msk.bf16.vlgmr.msra.gmra.mxu2 %vm1059_vm11, %v8703_v22  ;;  %vm2851_vm0 = vweird.f32 %v6029_v36  ;;  %v2648_v0 = vsel %vm10364_vm7, %v2560_v53, 0.0 }
 0x412   : > { %6030 = vrsqrt.f32 %v2705_v49  ;;  %v2484_v62 = vpop.f32.mrf.mxu1  ;;  %vm2852_vm4 = vmor %vm2850_vm10, %vm2851_vm0  ;;  %v2559_v17 = vmul.f32 %v8810_v27, %v8810_v27  ;;  %vm2860_vm8 = vweird.f32 %v2705_v49 }
 0x413   : > { %v2843_v2 = vsel %vm2842_vm5, %v6027_v7, %v2839_v51  ;;  %v2846_v40 = vmul.f32 %v6029_v36, %v2845_v34  ;;  %v2485_v5 = vadd.f32 %v8516_v13, %v2484_v62  ;;  %v3119_v7 = vpack.c.bf16 %v3087_v37, %v3087_v37 }
 0x414   : > { %v3055_v63 = vmul.f32 %v2843_v2, %v8618_v50 }
 0x415   : > { %v2847_v47 = vmul.f32 0.5, %v2846_v40  ;;  %v8801_v9 = vadd.f32 %v2485_v5, %v7881_v35  ;;  %v2608_v11 = vpop.xlane.xlu2 %2607  ;;  %v3261_v13 = vunpack.c.l.b16 %v3119_v7 }
 0x416   : > { %v2674_v45 = vmul.f32 %v2608_v11, %v6692_v56  ;;  %v3088_v4 = vmul.f32 %v8680_v8, %v3055_v63 }
 0x417   : > { %v2848_v26 = vsub.f32 1.5, %v2847_v47  ;;  %v2561_v33 = vmul.f32 %v8801_v9, %v8801_v9 }
 0x418   : > { %v6031_v20 = vpop.eup %6030  ;;  %v2706_v35 = vadd.f32 1.1920929e-07, %v2674_v45  ;;  %v3120_v3 = vpack.c.bf16 %v3088_v4, %v3088_v4  ;;  %2649 = vadd.xlane.f32.xlu0 %v2648_v0  ;;  %v2645_v4 = vsel %vm10366_vm12, %v2559_v17, 0.0 }
 0x419   : > { %v2849_v15 = vmul.f32 %v6029_v36, %v2848_v26  ;;  %v2855_v51 = vmul.f32 %v6031_v20, %v2705_v49  ;;  %v2651_v34 = vsel %vm10365_vm15, %v2561_v33, 0.0  ;;  %vm2861_vm6 = vweird.f32 %v6031_v20 }
 0x41a   : > { %6032 = vrsqrt.f32 %v2706_v35  ;;  %2652 = vadd.xlane.f32.xlu2 %v2651_v34  ;;  %v3262_v10 = vunpack.c.l.b16 %v3120_v3  ;;  %vm2862_vm13 = vmor %vm2860_vm8, %vm2861_vm6  ;;  %vm2870_vm9 = vweird.f32 %v2706_v35 }
 0x41b   : > { %v2853_v62 = vsel %vm2852_vm4, %v6029_v36, %v2849_v15  ;;  %v2856_v37 = vmul.f32 %v6031_v20, %v2855_v51  ;;  %v2558_v36 = vmul.f32 %v8815_v29, %v8815_v29 }
 0x41c   : > { %v3263_v2 = vpack.c.b16 %v3262_v10, %v3261_v13  ;;  %v3056_v63 = vmul.f32 %v2853_v62, %v8625_v12 }
 0x41d   : > { %v2857_v40 = vmul.f32 0.5, %v2856_v37  ;;  %v2611_v5 = vpop.xlane.xlu0 %2610  ;;  %v2642_v0 = vsel %vm10367_vm14, %v2558_v36, 0.0 }
 0x41e   : > { %v2675_v25 = vmul.f32 %v2611_v5, %v6692_v56  ;;  %3272 = vmatpush.bf16.msra.mxu3 %v3263_v2  ;;  %v3089_v7 = vmul.f32 %v8680_v8, %v3056_v63 }
 0x41f   : > { %v2858_v53 = vsub.f32 1.5, %v2857_v40 }
 0x420   : > { %v6033_v47 = vpop.eup %6032  ;;  %v2707_v11 = vadd.f32 1.1920929e-07, %v2675_v25  ;;  %v3121_v34 = vpack.c.bf16 %v3089_v7, %v3089_v7 }
 0x421   : > { %v2859_v54 = vmul.f32 %v6031_v20, %v2858_v53  ;;  %v2865_v45 = vmul.f32 %v6033_v47, %v2706_v35  ;;  %5601 = vmatmul.msk.bf16.vlgmr.msra.gmra.mxu3 %vm1059_vm11, %v8703_v22  ;;  %vm2871_vm1 = vweird.f32 %v6033_v47 }
 0x422   : > { %6034 = vrsqrt.f32 %v2707_v11  ;;  %2646 = vadd.xlane.f32.xlu2 %v2645_v4  ;;  %vm2872_vm2 = vmor %vm2870_vm9, %vm2871_vm1  ;;  %v3281_v40 = vunpack.c.l.b16 %v3121_v34  ;;  %vm2880_vm5 = vweird.f32 %v2707_v11 }
 0x423   : > { %v2863_v60 = vsel %vm2862_vm13, %v6031_v20, %v2859_v54  ;;  %v2866_v26 = vmul.f32 %v6033_v47, %v2865_v45 }
 0x424   : > { %v3057_v33 = vmul.f32 %v2863_v60, %v8635_v23 }
 0x425   : > { %v2867_v3 = vmul.f32 0.5, %v2866_v26  ;;  %2643 = vadd.xlane.f32.xlu1 %v2642_v0  ;;  %v2614_v49 = vpop.xlane.xlu1 %2613 }
 0x426   : > { %v2676_v15 = vmul.f32 %v2614_v49, %v6692_v56  ;;  %v3090_v51 = vmul.f32 %v8680_v8, %v3057_v33 }
 0x427   : > { %v2868_v13 = vsub.f32 1.5, %v2867_v3 }
 0x428   : > { %v6035_v10 = vpop.eup %6034  ;;  %v2708_v62 = vadd.f32 1.1920929e-07, %v2676_v15  ;;  %v3122_v37 = vpack.c.bf16 %v3090_v51, %v3090_v51 }
 0x429   : > { %v2869_v2 = vmul.f32 %v6033_v47, %v2868_v13  ;;  %v2875_v20 = vmul.f32 %v6035_v10, %v2707_v11  ;;  %vm2881_vm3 = vweird.f32 %v6035_v10 }
 0x42a   : > { %6036 = vrsqrt.f32 %v2708_v62  ;;  %v3282_v5 = vunpack.c.l.b16 %v3122_v37  ;;  %vm2882_vm0 = vmor %vm2880_vm5, %vm2881_vm3  ;;  %vm2890_vm10 = vweird.f32 %v2708_v62 }
 0x42b   : > { %v2873_v17 = vsel %vm2872_vm2, %v6033_v47, %v2869_v2  ;;  %v2876_v63 = vmul.f32 %v6035_v10, %v2875_v20 }
 0x42c   : > { %v3283_v25 = vpack.c.b16 %v3282_v5, %v3281_v40  ;;  %v3058_v54 = vmul.f32 %v2873_v17, %v8642_v28 }
 0x42d   : > { %v2877_v53 = vmul.f32 0.5, %v2876_v63  ;;  %v2617_v36 = vpop.xlane.xlu2 %2616 }
 0x42e   : > { %v2677_v45 = vmul.f32 %v2617_v36, %v6692_v56  ;;  %3292 = vmatpush.bf16.msrb.mxu2 %v3283_v25  ;;  %v3091_v47 = vmul.f32 %v8680_v8, %v3058_v54 }
 0x42f   : > { %v2878_v4 = vsub.f32 1.5, %v2877_v53 }
 0x430   : > { %v6037_v7 = vpop.eup %6036  ;;  %v2709_v60 = vadd.f32 1.1920929e-07, %v2677_v45  ;;  %v3123_v13 = vpack.c.bf16 %v3091_v47, %v3091_v47 }
 0x431   : > { %v2879_v35 = vmul.f32 %v6035_v10, %v2878_v4  ;;  %v2885_v26 = vmul.f32 %v6037_v7, %v2708_v62  ;;  %5602 = vmatmul.msk.bf16.vlgmr.msrb.gmra.mxu2 %vm1059_vm11, %v8703_v22  ;;  %vm2891_vm7 = vweird.f32 %v6037_v7 }
 0x432   : > { %6038 = vrsqrt.f32 %v2709_v60  ;;  %vm2892_vm15 = vmor %vm2890_vm10, %vm2891_vm7  ;;  %vm2900_vm6 = vweird.f32 %v2709_v60 }
 0x433   : > { %v2883_v33 = vsel %vm2882_vm0, %v6035_v10, %v2879_v35  ;;  %v2886_v0 = vmul.f32 %v6037_v7, %v2885_v26  ;;  %v3301_v10 = vunpack.c.l.b16 %v3123_v13 }
 0x434   : > { %v3059_v3 = vmul.f32 %v2883_v33, %v8653_v32 }
 0x435   : > { %v2887_v49 = vmul.f32 0.5, %v2886_v0  ;;  %v2620_v15 = vpop.xlane.xlu0 %2619 }
 0x436   : > { %v2678_v51 = vmul.f32 %v2620_v15, %v6692_v56  ;;  %v3092_v34 = vmul.f32 %v8680_v8, %v3059_v3 }
 0x437   : > { %v2888_v11 = vsub.f32 1.5, %v2887_v49 }
 0x438   : > { %v6039_v37 = vpop.eup %6038  ;;  %v2710_v2 = vadd.f32 1.1920929e-07, %v2678_v51  ;;  %v3124_v20 = vpack.c.bf16 %v3092_v34, %v3092_v34 }
 0x439   : > { %v2889_v40 = vmul.f32 %v6037_v7, %v2888_v11  ;;  %v2895_v5 = vmul.f32 %v6039_v37, %v2709_v60  ;;  %vm2901_vm4 = vweird.f32 %v6039_v37 }
 0x43a   : > { %6040 = vrsqrt.f32 %v2710_v2  ;;  %v3302_v17 = vunpack.c.l.b16 %v3124_v20  ;;  %vm2902_vm8 = vmor %vm2900_vm6, %vm2901_vm4  ;;  %vm2910_vm13 = vweird.f32 %v2710_v2  ;;  %vm10369_vm6 = vcmask 261120  }
 0x43b   : > { %v2893_v63 = vsel %vm2892_vm15, %v6037_v7, %v2889_v40  ;;  %v2896_v25 = vmul.f32 %v6039_v37, %v2895_v5 }
 0x43c   : > { %v3303_v53 = vpack.c.b16 %v3302_v17, %v3301_v10  ;;  %v3060_v45 = vmul.f32 %v2893_v63, %v8661_v21 }
 0x43d   : > { %v2897_v36 = vmul.f32 0.5, %v2896_v25  ;;  %v2623_v54 = vpop.xlane.xlu1 %2622 }
 0x43e   : > { %v2679_v4 = vmul.f32 %v2623_v54, %v6692_v56  ;;  %3312 = vmatpush.bf16.msrb.mxu3 %v3303_v53  ;;  %v3093_v7 = vmul.f32 %v8680_v8, %v3060_v45 }
 0x43f   : > { %v2898_v35 = vsub.f32 1.5, %v2897_v36 }
 0x440   : > { %v6041_v26 = vpop.eup %6040  ;;  %v2711_v47 = vadd.f32 1.1920929e-07, %v2679_v4  ;;  %v3125_v11 = vpack.c.bf16 %v3093_v7, %v3093_v7 }
 0x441   : > { %v2899_v62 = vmul.f32 %v6039_v37, %v2898_v35  ;;  %v2905_v33 = vmul.f32 %v6041_v26, %v2710_v2  ;;  %5603 = vmatmul.msk.bf16.vlgmr.msrb.gmra.mxu3 %vm1059_vm11, %v8703_v22  ;;  %vm2911_vm12 = vweird.f32 %v6041_v26 }
 0x442   : > { %6042 = vrsqrt.f32 %v2711_v47  ;;  %vm2912_vm14 = vmor %vm2910_vm13, %vm2911_vm12  ;;  %vm2920_vm9 = vweird.f32 %v2711_v47 }
 0x443   : > { %v2903_v0 = vsel %vm2902_vm8, %v6039_v37, %v2899_v62  ;;  %v2906_v3 = vmul.f32 %v6041_v26, %v2905_v33  ;;  %v3321_v37 = vunpack.c.l.b16 %v3125_v11 }
 0x444   : > { %v3061_v49 = vmul.f32 %v2903_v0, %v8669_v1 }
 0x445   : > { %v2907_v15 = vmul.f32 0.5, %v2906_v3  ;;  %v2626_v51 = vpop.xlane.xlu2 %2625 }
 0x446   : > { %v2680_v34 = vmul.f32 %v2626_v51, %v6692_v56  ;;  %v3094_v13 = vmul.f32 %v8680_v8, %v3061_v49 }
 0x447   : > { %v2908_v60 = vsub.f32 1.5, %v2907_v15 }
 0x448   : > { %v6043_v20 = vpop.eup %6042  ;;  %v2712_v40 = vadd.f32 1.1920929e-07, %v2680_v34  ;;  %v3126_v5 = vpack.c.bf16 %v3094_v13, %v3094_v13 }
 0x449   : > { %v2909_v10 = vmul.f32 %v6041_v26, %v2908_v60  ;;  %v2915_v17 = vmul.f32 %v6043_v20, %v2711_v47  ;;  %vm2921_vm1 = vweird.f32 %v6043_v20 }
 0x44a   : > { %6044 = vrsqrt.f32 %v2712_v40  ;;  %v3322_v63 = vunpack.c.l.b16 %v3126_v5  ;;  %vm2922_vm2 = vmor %vm2920_vm9, %vm2921_vm1  ;;  %vm2930_vm5 = vweird.f32 %v2712_v40 }
 0x44b   : > { %v2916_v25 = vmul.f32 %v6043_v20, %v2915_v17  ;;  %v2913_v53 = vsel %vm2912_vm14, %v6041_v26, %v2909_v10  ;;  %vm10371_vm9 = vmmov %vm10369_vm6 }
 0x44c   : > { %v3323_v36 = vpack.c.b16 %v3322_v63, %v3321_v37  ;;  %v3062_v4 = vmul.f32 %v2913_v53, %v8683_v46 }
 0x44d   : > { %v2917_v54 = vmul.f32 0.5, %v2916_v25  ;;  %v2629_v45 = vpop.xlane.xlu0 %2628 }
 0x44e   : > { %3332 = vmatpush.bf16.msra.mxu2 %v3323_v36  ;;  %v2681_v62 = vmul.f32 %v2629_v45, %v6692_v56  ;;  %v3095_v49 = vmul.f32 %v8680_v8, %v3062_v4 }
 0x44f   : > { %v2918_v35 = vsub.f32 1.5, %v2917_v54 }
 0x450   : > { %v6045_v33 = vpop.eup %6044  ;;  %v2713_v0 = vadd.f32 1.1920929e-07, %v2681_v62  ;;  %v3127_v60 = vpack.c.bf16 %v3095_v49, %v3095_v49 }
 0x451   : > { %v2919_v7 = vmul.f32 %v6043_v20, %v2918_v35  ;;  %v2925_v2 = vmul.f32 %v6045_v33, %v2712_v40  ;;  %5604 = vmatmul.msk.bf16.vlgmr.msra.gmra.mxu2 %vm1059_vm11, %v8703_v22  ;;  %vm2931_vm3 = vweird.f32 %v6045_v33 }
 0x452   : > { %6046 = vrsqrt.f32 %v2713_v0  ;;  %vm2932_vm0 = vmor %vm2930_vm5, %vm2931_vm3  ;;  %v3341_v63 = vunpack.c.l.b16 %v3127_v60  ;;  %vm2940_vm10 = vweird.f32 %v2713_v0 }
 0x453   : > { %v2923_v26 = vsel %vm2922_vm2, %v6043_v20, %v2919_v7  ;;  %v2926_v3 = vmul.f32 %v6045_v33, %v2925_v2  ;;  %vm10372_vm2 = vmmov %vm10369_vm6 }
 0x454   : > { %v3063_v15 = vmul.f32 %v2923_v26, %v8694_v55 }
 0x455   : > { %v2927_v51 = vmul.f32 0.5, %v2926_v3  ;;  %v2632_v34 = vpop.xlane.xlu1 %2631  ;;  %v3174_v3 = vpop.f32.mrf.mxu2 }
 0x456   : > { %v2682_v13 = vmul.f32 %v2632_v34, %v6692_v56  ;;  %v3096_v11 = vmul.f32 %v8680_v8, %v3063_v15  ;;  %v8861_v15 = vpop.f32.mrf.mxu1 }
 0x457   : > { %v2928_v47 = vsub.f32 1.5, %v2927_v51 }
 0x458   : > { %v2714_v5 = vadd.f32 1.1920929e-07, %v2682_v13  ;;  %v3128_v10 = vpack.c.bf16 %v3096_v11, %v3096_v11  ;;  %v6047_v17 = vpop.eup %6046 }
 0x459   : > { %v2929_v37 = vmul.f32 %v6045_v33, %v2928_v47  ;;  %v2935_v20 = vmul.f32 %v6047_v17, %v2713_v0  ;;  %vm2941_vm7 = vweird.f32 %v6047_v17 }
 0x45a   : > { %6048 = vrsqrt.f32 %v2714_v5  ;;  %v3342_v25 = vunpack.c.l.b16 %v3128_v10  ;;  %vm2942_vm15 = vmor %vm2940_vm10, %vm2941_vm7  ;;  %vm2950_vm8 = vweird.f32 %v2714_v5 }
 0x45b   : > { %v2933_v53 = vsel %vm2932_vm0, %v6045_v33, %v2929_v37  ;;  %v2936_v36 = vmul.f32 %v6047_v17, %v2935_v20  ;;  %vm10373_vm7 = vmmov %vm10372_vm2 }
 0x45c   : > { %v3343_v45 = vpack.c.b16 %v3342_v25, %v3341_v63  ;;  %v3064_v62 = vmul.f32 %v2933_v53, %v8708_v6  ;;  %vm10374_vm10 = vmmov %vm10372_vm2 }
 0x45d   : > { %v2635_v54 = vpop.xlane.xlu2 %2634  ;;  %v2937_v4 = vmul.f32 0.5, %v2936_v36 }
 0x45e   : > { %v2683_v35 = vmul.f32 %v2635_v54, %v6692_v56  ;;  %3352 = vmatpush.bf16.msra.mxu3 %v3343_v45  ;;  %v3097_v11 = vmul.f32 %v8680_v8, %v3064_v62 }
 0x45f   : > { %v2938_v2 = vsub.f32 1.5, %v2937_v4 }
 0x460   : > { %v6049_v7 = vpop.eup %6048  ;;  %v8857_v26 = vadd.f32 1.1920929e-07, %v2683_v35  ;;  %v8859_v49 = vpop.permute.xlu0 %3143  ;;  %v3129_v36 = vpack.c.bf16 %v3097_v11, %v3097_v11 }
 0x461   : > { %v2945_v40 = vmul.f32 %v6049_v7, %v2714_v5  ;;  %v2939_v33 = vmul.f32 %v6047_v17, %v2938_v2  ;;  %5605 = vmatmul.msk.bf16.vlgmr.msra.gmra.mxu3 %vm1059_vm11, %v8703_v22  ;;  %v3175_v51 = vadd.f32 %v3174_v3, %v8859_v49  ;;  %vm2951_vm4 = vweird.f32 %v6049_v7 }
 0x462   : > { %6050 = vrsqrt.f32 %v8857_v26  ;;  %vm2952_vm12 = vmor %vm2950_vm8, %vm2951_vm4  ;;  %vm2960_vm14 = vweird.f32 %v8857_v26 }
 0x463   : > { %v2946_v34 = vmul.f32 %v6049_v7, %v2945_v40  ;;  %v2943_v47 = vsel %vm2942_vm15, %v6047_v17, %v2939_v33  ;;  %v8869_v60 = vadd.f32 %v3175_v51, %v8520_v52  ;;  %v3176_v40 = vpop.f32.mrf.mxu2  ;;  %v3361_v33 = vunpack.c.l.b16 %v3129_v36  ;;  %vm10375_vm8 = vmmov %vm10372_vm2 }
 0x464   : > { %v3194_v13 = vpop.f32.mrf.mxu3  ;;  %v3065_v10 = vmul.f32 %v2943_v47, %v8720_v48 }
 0x465   : > { %10368 = vst [vmem:[#allocation12_spill] sm:$0xff] %v8869_v60  ;;  %v2947_v37 = vmul.f32 0.5, %v2946_v34  ;;  %v2638_v0 = vpop.xlane.xlu2 %2637  ;;  %v3511_v63 = vmul.f32 %v8869_v60, %v8869_v60  ;;  %v2489_v34 = vpop.f32.mrf.mxu1 }
 0x466   : > { %v2684_v20 = vmul.f32 %v2638_v0, %v6692_v56  ;;  %v3098_v53 = vmul.f32 %v8680_v8, %v3065_v10 }
 0x467   : > { %v2948_v25 = vsub.f32 1.5, %v2947_v37  ;;  %v3543_v52 = vsel %vm10369_vm6, %v3511_v63, 0.0 }
 0x468   : > { %v6051_v54 = vpop.eup %6050  ;;  %v8876_v45 = vadd.f32 1.1920929e-07, %v2684_v20  ;;  %3544 = vadd.xlane.f32.xlu2 %v3543_v52  ;;  %v3130_v35 = vpack.c.bf16 %v3098_v53, %v3098_v53  ;;  %v3195_v52 = vadd.f32 %v3194_v13, %v8859_v49 }
 0x469   : > { %v2949_v17 = vmul.f32 %v6049_v7, %v2948_v25  ;;  %v2955_v4 = vmul.f32 %v6051_v54, %v8857_v26  ;;  %vm2961_vm13 = vweird.f32 %v6051_v54 }
 0x46a   : > { %6052 = vrsqrt.f32 %v8876_v45  ;;  %v3362_v51 = vunpack.c.l.b16 %v3130_v35  ;;  %vm2962_vm1 = vmor %vm2960_vm14, %vm2961_vm13  ;;  %vm2970_vm5 = vweird.f32 %v8876_v45 }
 0x46b   : > { %v2953_v62 = vsel %vm2952_vm12, %v6049_v7, %v2949_v17  ;;  %v2956_v2 = vmul.f32 %v6051_v54, %v2955_v4  ;;  %v6293_v7 = vld [vmem:[%s10145_s7] ss:$0 sm:$0xff]  ;;  %vm10376_vm12 = vmmov %vm10372_vm2 }
 0x46c   : > { %v3196_v3 = vpop.f32.mrf.mxu3  ;;  %v3363_v37 = vpack.c.b16 %v3362_v51, %v3361_v33  ;;  %v3066_v5 = vmul.f32 %v2953_v62, %v8729_v59  ;;  %v2490_v25 = vadd.f32 %v6293_v7, %v2489_v34  ;;  %v8911_v34 = vadd.f32 %v3195_v52, %v8540_v42  ;;  %vm10377_vm13 = vmmov %vm10372_vm2 }
 0x46d   : > { %v2957_v11 = vmul.f32 0.5, %v2956_v2  ;;  %v2641_v47 = vpop.xlane.xlu2 %2640  ;;  %v8881_v10 = vpop.permute.xlu1 %3148  ;;  %vm10378_vm14 = vmmov %vm10372_vm2 }
 0x46e   : > { %v2685_v0 = vmul.f32 %v2641_v47, %v6692_v56  ;;  %v3197_v20 = vadd.f32 %v3196_v3, %v8881_v10  ;;  %v3177_v63 = vadd.f32 %v3176_v40, %v8881_v10  ;;  %3372 = vmatpush.bf16.msrb.mxu2 %v3363_v37  ;;  %v3099_v40 = vmul.f32 %v8680_v8, %v3066_v5 }
 0x46f   : > { %v2958_v53 = vsub.f32 1.5, %v2957_v11  ;;  %v3513_v42 = vmul.f32 %v8911_v34, %v8911_v34 }
 0x470   : > { %v6053_v36 = vpop.eup %6052  ;;  %v2717_v17 = vadd.f32 1.1920929e-07, %v2685_v0  ;;  %v8892_v4 = vadd.f32 %v3197_v20, %v8550_v61  ;;  %v8895_v35 = vadd.f32 %v3177_v63, %v8533_v30  ;;  %v8907_v30 = vadd.f32 %v2490_v25, %v7906_v24 }
 0x471   : > { %v2959_v62 = vmul.f32 %v6051_v54, %v2958_v53  ;;  %v2965_v2 = vmul.f32 %v6053_v36, %v8876_v45  ;;  %5606 = vmatmul.msk.bf16.vlgmr.msrb.gmra.mxu2 %vm1059_vm11, %v8703_v22  ;;  %v3131_v5 = vpack.c.bf16 %v3099_v40, %v3099_v40  ;;  %v2488_v24 = vadd.f32 %v6293_v7, %v8861_v15 }
 0x472   : > { %10370 = vst [vmem:[#allocation14_spill] sm:$0xff] %v8895_v35  ;;  %6054 = vrsqrt.f32 %v2717_v17  ;;  %v3514_v13 = vmul.f32 %v8892_v4, %v8892_v4  ;;  %v3512_v61 = vmul.f32 %v8895_v35, %v8895_v35  ;;  %vm2971_vm3 = vweird.f32 %v6053_v36 }
 0x473   : > { %v2963_v3 = vsel %vm2962_vm1, %v6051_v54, %v2959_v62  ;;  %v2966_v26 = vmul.f32 %v6053_v36, %v2965_v2  ;;  %v2563_v20 = vmul.f32 %v8907_v30, %v8907_v30  ;;  %vm2972_vm0 = vmor %vm2970_vm5, %vm2971_vm3  ;;  %v3381_v52 = vunpack.c.l.b16 %v3131_v5  ;;  %v8940_v5 = vld [vmem:[%s10139_s1 + $0x8] sm:$0xff] }
 0x474   : > { %v3214_v33 = vpop.f32.mrf.mxu2  ;;  %v3067_v51 = vmul.f32 %v2963_v3, %v8742_v38  ;;  %v3552_v22 = vsel %vm10371_vm9, %v3514_v13, 0.0  ;;  %v3546_v11 = vsel %vm10372_vm2, %v3512_v61, 0.0  ;;  %v8923_v2 = vadd.f32 %v2488_v24, %v7896_v19  ;;  %vm10379_vm1 = vmmov %vm10372_vm2 }
 0x475   : > { %v2967_v47 = vmul.f32 0.5, %v2966_v26  ;;  %3553 = vadd.xlane.f32.xlu0 %v3552_v22  ;;  %3547 = vadd.xlane.f32.xlu2 %v3546_v11  ;;  %v2657_v40 = vsel %vm10373_vm7, %v2563_v20, 0.0  ;;  %v3549_v3 = vsel %vm10374_vm10, %v3513_v42, 0.0  ;;  %vm2980_vm4 = vweird.f32 %v2717_v17  ;;  %vm10380_vm9 = vmmov %vm10379_vm1 }
 0x476   : > { %v3100_v37 = vmul.f32 %v8680_v8, %v3067_v51 }
 0x477   : > { %v2968_v54 = vsub.f32 1.5, %v2967_v47  ;;  %v2562_v47 = vmul.f32 %v8923_v2, %v8923_v2 }
 0x478   : > { %v6055_v0 = vpop.eup %6054  ;;  %v3132_v63 = vpack.c.bf16 %v3100_v37, %v3100_v37 }
 0x479   : > { %v2969_v25 = vmul.f32 %v6053_v36, %v2968_v54  ;;  %v2975_v53 = vmul.f32 %v6055_v0, %v2717_v17  ;;  %vm2981_vm15 = vweird.f32 %v6055_v0  ;;  %v2654_v42 = vsel %vm10376_vm12, %v2562_v47, 0.0 }
 0x47a   : > { %v3382_v62 = vunpack.c.l.b16 %v3132_v63  ;;  %vm2982_vm6 = vmor %vm2980_vm4, %vm2981_vm15 }
 0x47b   : > { %v2973_v15 = vsel %vm2972_vm0, %v6053_v36, %v2969_v25  ;;  %v2976_v7 = vmul.f32 %v6055_v0, %v2975_v53  ;;  %v3215_v36 = vadd.f32 %v3214_v33, %v8859_v49  ;;  %vm10381_vm15 = vmmov %vm10379_vm1 }
 0x47c   : > { %v3216_v13 = vpop.f32.mrf.mxu2  ;;  %v3383_v26 = vpack.c.b16 %v3382_v62, %v3381_v52  ;;  %v3068_v45 = vmul.f32 %v2973_v15, %v8753_v58 }
 0x47d   : > { %v3217_v61 = vadd.f32 %v3216_v13, %v8881_v10  ;;  %v2977_v51 = vmul.f32 0.5, %v2976_v7  ;;  %2658 = vadd.xlane.f32.xlu0 %v2657_v40  ;;  %3550 = vadd.xlane.f32.xlu2 %v3549_v3  ;;  %v8948_v20 = vadd.f32 %v3215_v36, %v8557_v14 }
 0x47e   : > { %3392 = vmatpush.bf16.msrb.mxu3 %v3383_v26  ;;  %v3101_v33 = vmul.f32 %v8680_v8, %v3068_v45 }
 0x47f   : > { %v8930_v22 = vadd.f32 %v3217_v61, %v8567_v16  ;;  %v2978_v19 = vsub.f32 1.5, %v2977_v51 }
 0x480   : > { %v3133_v53 = vpack.c.bf16 %v3101_v33, %v3101_v33 }
 0x481   : > { %v3516_v11 = vmul.f32 %v8930_v22, %v8930_v22  ;;  %v2979_v37 = vmul.f32 %v6055_v0, %v2978_v19  ;;  %5607 = vmatmul.msk.bf16.vlgmr.msrb.gmra.mxu3 %vm1059_vm11, %v8940_v5 }
 0x482   : > { %v3401_v15 = vunpack.c.l.b16 %v3133_v53 }
 0x483   : > { %v3558_v16 = vsel %vm10375_vm8, %v3516_v11, 0.0  ;;  %v2983_v24 = vsel %vm2982_vm6, %v6055_v0, %v2979_v37  ;;  %v3515_v0 = vmul.f32 %v8948_v20, %v8948_v20 }
 0x484   : > { %3559 = vadd.xlane.f32.xlu1 %v3558_v16  ;;  %v3069_v54 = vmul.f32 %v2983_v24, %v8766_v41  ;;  %v3234_v17 = vpop.f32.mrf.mxu3 }
 0x485   : > { %v3235_v63 = vadd.f32 %v3234_v17, %v8859_v49  ;;  %2655 = vadd.xlane.f32.xlu2 %v2654_v42  ;;  %v3555_v3 = vsel %vm10378_vm14, %v3515_v0, 0.0 }
 0x486   : > { %v3102_v25 = vmul.f32 %v8680_v8, %v3069_v54 }
 0x487   : > { %v8954_v52 = vadd.f32 %v3235_v63, %v8574_v39 }
 0x488   : > { %v3134_v62 = vpack.c.bf16 %v3102_v25, %v3102_v25 }
 0x489   : > { %v3517_v14 = vmul.f32 %v8954_v52, %v8954_v52 }
 0x48a   : > { %v3402_v7 = vunpack.c.l.b16 %v3134_v62 }
 0x48b   : > { %v3561_v13 = vsel %vm10377_vm13, %v3517_v14, 0.0  ;;  %v2650_v61 = vpop.xlane.xlu0 %2649  ;;  %vm10382_vm13 = vmmov %vm10379_vm1 }
 0x48c   : > { %v3236_v40 = vpop.f32.mrf.mxu3  ;;  %3562 = vadd.xlane.f32.xlu0 %v3561_v13  ;;  %v3403_v26 = vpack.c.b16 %v3402_v7, %v3401_v15  ;;  %v2688_v39 = vmul.f32 %v2650_v61, %v6692_v56 }
 0x48d   : > { %v3237_v51 = vadd.f32 %v3236_v40, %v8881_v10  ;;  %v2653_v45 = vpop.xlane.xlu2 %2652  ;;  %3556 = vadd.xlane.f32.xlu2 %v3555_v3 }
 0x48e   : > { %v2689_v19 = vmul.f32 %v2653_v45, %v6692_v56  ;;  %3412 = vmatpush.bf16.msra.mxu2 %v3403_v26  ;;  %v2720_v36 = vadd.f32 1.1920929e-07, %v2688_v39 }
 0x48f   : > { %v8966_v11 = vadd.f32 %v3237_v51, %v8584_v44 }
 0x490   : > { %v2721_v47 = vadd.f32 1.1920929e-07, %v2689_v19  ;;  %6056 = vrsqrt.f32 %v2720_v36  ;;  %vm3010_vm5 = vweird.f32 %v2720_v36 }
 0x491   : > { %5608 = vmatmul.msk.bf16.vlgmr.msra.gmra.mxu2 %vm1059_vm11, %v8940_v5  ;;  %v3518_v37 = vmul.f32 %v8966_v11, %v8966_v11 }
 0x492   : > { %6058 = vrsqrt.f32 %v2721_v47  ;;  %vm3020_vm7 = vweird.f32 %v2721_v47 }
 0x493   : > { %v3564_v16 = vsel %vm10379_vm1, %v3518_v37, 0.0 }
 0x494   : > { %v3254_v33 = vpop.f32.mrf.mxu2 }
 0x495   : > { %v3255_v24 = vadd.f32 %v3254_v33, %v8859_v49  ;;  %v2647_v54 = vpop.xlane.xlu2 %2646  ;;  %3565 = vadd.xlane.f32.xlu2 %v3564_v16 }
 0x496   : > { %v2687_v17 = vmul.f32 %v2647_v54, %v6692_v56  ;;  %v6057_v44 = vpop.eup %6056 }
 0x497   : > { %v8976_v42 = vadd.f32 %v3255_v24, %v8591_v18  ;;  %v3005_v25 = vmul.f32 %v6057_v44, %v2720_v36  ;;  %vm3011_vm2 = vweird.f32 %v6057_v44 }
 0x498   : > { %v6059_v63 = vpop.eup %6058  ;;  %v2719_v53 = vadd.f32 1.1920929e-07, %v2687_v17  ;;  %v2644_v0 = vpop.xlane.xlu1 %2643  ;;  %vm3012_vm0 = vmor %vm3010_vm5, %vm3011_vm2 }
 0x499   : > { %v3015_v62 = vmul.f32 %v6059_v63, %v2721_v47  ;;  %v2686_v14 = vmul.f32 %v2644_v0, %v6692_v56  ;;  %v3519_v15 = vmul.f32 %v8976_v42, %v8976_v42  ;;  %v3006_v7 = vmul.f32 %v6057_v44, %v3005_v25  ;;  %vm10383_vm2 = vmmov %vm10380_vm9 }
 0x49a   : > { %6060 = vrsqrt.f32 %v2719_v53  ;;  %vm3021_vm3 = vweird.f32 %v6059_v63  ;;  %vm3000_vm6 = vweird.f32 %v2719_v53  ;;  %vm10385_vm5 = vmmov %vm10383_vm2 }
 0x49b   : > { %v3016_v13 = vmul.f32 %v6059_v63, %v3015_v62  ;;  %v2718_v61 = vadd.f32 1.1920929e-07, %v2686_v14  ;;  %v3567_v40 = vsel %vm10380_vm9, %v3519_v15, 0.0  ;;  %v3007_v3 = vmul.f32 0.5, %v3006_v7  ;;  %vm3022_vm10 = vmor %vm3020_vm7, %vm3021_vm3 }
 0x49c   : > { %v3256_v26 = vpop.f32.mrf.mxu2  ;;  %3568 = vadd.xlane.f32.xlu1 %v3567_v40  ;;  %vm10384_vm3 = vmmov %vm10383_vm2 }
 0x49d   : > { %v3017_v18 = vmul.f32 0.5, %v3016_v13  ;;  %6062 = vrsqrt.f32 %v2718_v61  ;;  %v3257_v39 = vadd.f32 %v3256_v26, %v8881_v10  ;;  %v3008_v51 = vsub.f32 1.5, %v3007_v3 }
 0x49e   : > { %vm2990_vm14 = vweird.f32 %v2718_v61 }
 0x49f   : > { %v3018_v45 = vsub.f32 1.5, %v3017_v18  ;;  %v8984_v19 = vadd.f32 %v3257_v39, %v8601_v31  ;;  %v3009_v16 = vmul.f32 %v6057_v44, %v3008_v51 }
 0x4a0   : > { %v6061_v37 = vpop.eup %6060 }
 0x4a1   : > { %v3019_v33 = vmul.f32 %v6059_v63, %v3018_v45  ;;  %v2995_v24 = vmul.f32 %v6061_v37, %v2719_v53  ;;  %v3520_v54 = vmul.f32 %v8984_v19, %v8984_v19  ;;  %v3013_v17 = vsel %vm3012_vm0, %v6057_v44, %v3009_v16  ;;  %vm10386_vm0 = vmmov %vm10383_vm2 }
 0x4a2   : > { %v3072_v0 = vmul.f32 %v3013_v17, %v8790_v43  ;;  %vm3001_vm4 = vweird.f32 %v6061_v37  ;;  %vm10387_vm7 = vmmov %vm10386_vm0 }
 0x4a3   : > { %v6063_v25 = vpop.eup %6062  ;;  %v3023_v62 = vsel %vm3022_vm10, %v6059_v63, %v3019_v33  ;;  %v2996_v14 = vmul.f32 %v6061_v37, %v2995_v24  ;;  %v3570_v31 = vsel %vm10381_vm15, %v3520_v54, 0.0  ;;  %vm3002_vm8 = vmor %vm3000_vm6, %vm3001_vm4 }
 0x4a4   : > { %v3073_v15 = vmul.f32 %v3023_v62, %v8801_v9  ;;  %v2985_v7 = vmul.f32 %v6063_v25, %v2718_v61  ;;  %v3274_v36 = vpop.f32.mrf.mxu3  ;;  %3571 = vadd.xlane.f32.xlu0 %v3570_v31  ;;  %v3105_v40 = vmul.f32 %v8680_v8, %v3072_v0  ;;  %vm2991_vm12 = vweird.f32 %v6063_v25  ;;  %vm10388_vm10 = vmmov %vm10386_vm0 }
 0x4a5   : > { %v2997_v13 = vmul.f32 0.5, %v2996_v14  ;;  %v3275_v47 = vadd.f32 %v3274_v36, %v8859_v49  ;;  %vm2992_vm1 = vmor %vm2990_vm14, %vm2991_vm12 }
 0x4a6   : > { %v2986_v3 = vmul.f32 %v6063_v25, %v2985_v7  ;;  %v3106_v44 = vmul.f32 %v8680_v8, %v3073_v15  ;;  %v3137_v18 = vpack.c.bf16 %v3105_v40, %v3105_v40  ;;  %vm10389_vm15 = vmmov %vm10386_vm0 }
 0x4a7   : > { %v2998_v26 = vsub.f32 1.5, %v2997_v13  ;;  %v8995_v63 = vadd.f32 %v3275_v47, %v8608_v57  ;;  %vm10390_vm6 = vmmov %vm10386_vm0 }
 0x4a8   : > { %v2987_v39 = vmul.f32 0.5, %v2986_v3  ;;  %v3138_v51 = vpack.c.bf16 %v3106_v44, %v3106_v44  ;;  %v3441_v24 = vunpack.c.l.b16 %v3137_v18 }
 0x4a9   : > { %v2999_v45 = vmul.f32 %v6061_v37, %v2998_v26  ;;  %v3521_v16 = vmul.f32 %v8995_v63, %v8995_v63 }
 0x4aa   : > { %v2988_v33 = vsub.f32 1.5, %v2987_v39  ;;  %v3442_v54 = vunpack.c.l.b16 %v3138_v51 }
 0x4ab   : > { %v3003_v17 = vsel %vm3002_vm8, %v6061_v37, %v2999_v45  ;;  %v3573_v0 = vsel %vm10382_vm13, %v3521_v16, 0.0 }
 0x4ac   : > { %v3071_v62 = vmul.f32 %v3003_v17, %v8810_v27  ;;  %v2989_v57 = vmul.f32 %v6063_v25, %v2988_v33  ;;  %v3276_v14 = vpop.f32.mrf.mxu3  ;;  %3574 = vadd.xlane.f32.xlu2 %v3573_v0  ;;  %v3443_v31 = vpack.c.b16 %v3442_v54, %v3441_v24 }
 0x4ad   : > { %v3277_v53 = vadd.f32 %v3276_v14, %v8881_v10 }
 0x4ae   : > { %v2993_v15 = vsel %vm2992_vm1, %v6063_v25, %v2989_v57  ;;  %3452 = vmatpush.bf16.msrb.mxu2 %v3443_v31  ;;  %v3104_v7 = vmul.f32 %v8680_v8, %v3071_v62 }
 0x4af   : > { %v3070_v36 = vmul.f32 %v2993_v15, %v8815_v29  ;;  %v9005_v37 = vadd.f32 %v3277_v53, %v8618_v50 }
 0x4b0   : > { %v3136_v47 = vpack.c.bf16 %v3104_v7, %v3104_v7 }
 0x4b1   : > { %5610 = vmatmul.msk.bf16.vlgmr.msrb.gmra.mxu2 %vm1059_vm11, %v8940_v5  ;;  %v3522_v61 = vmul.f32 %v9005_v37, %v9005_v37  ;;  %v3103_v13 = vmul.f32 %v8680_v8, %v3070_v36 }
 0x4b2   : > { %v3422_v18 = vunpack.c.l.b16 %v3136_v47 }
 0x4b3   : > { %v3576_v40 = vsel %vm10380_vm9, %v3522_v61, 0.0  ;;  %v3135_v25 = vpack.c.bf16 %v3103_v13, %v3103_v13  ;;  %vm10391_vm9 = vmmov %vm10386_vm0 }
 0x4b4   : > { %v3294_v3 = vpop.f32.mrf.mxu2  ;;  %3577 = vadd.xlane.f32.xlu1 %v3576_v40 }
 0x4b5   : > { %v3295_v44 = vadd.f32 %v3294_v3, %v8859_v49  ;;  %v3421_v26 = vunpack.c.l.b16 %v3135_v25 }
 0x4b7   : > { %v9015_v50 = vadd.f32 %v3295_v44, %v8625_v12  ;;  %v3423_v39 = vpack.c.b16 %v3422_v18, %v3421_v26 }
 0x4b9   : > { %3432 = vmatpush.bf16.msra.mxu3 %v3423_v39  ;;  %v3523_v51 = vmul.f32 %v9015_v50, %v9015_v50 }
 0x4bb   : > { %v3579_v45 = vsel %vm10383_vm2, %v3523_v51, 0.0 }
 0x4bc   : > { %v3296_v16 = vpop.f32.mrf.mxu2  ;;  %5609 = vmatmul.msk.bf16.vlgmr.msra.gmra.mxu3 %vm1059_vm11, %v8940_v5  ;;  %3580 = vadd.xlane.f32.xlu0 %v3579_v45 }
 0x4bd   : > { %v3297_v33 = vadd.f32 %v3296_v16, %v8881_v10 }
 0x4bf   : > { %v9024_v24 = vadd.f32 %v3297_v33, %v8635_v23 }
 0x4c1   : > { %v3524_v12 = vmul.f32 %v9024_v24, %v9024_v24 }
 0x4c3   : > { %v3582_v54 = vsel %vm10384_vm3, %v3524_v12, 0.0 }
 0x4c4   : > { %v3314_v17 = vpop.f32.mrf.mxu3  ;;  %3583 = vadd.xlane.f32.xlu2 %v3582_v54 }
 0x4c5   : > { %v3315_v0 = vadd.f32 %v3314_v17, %v8859_v49 }
 0x4c7   : > { %v9031_v62 = vadd.f32 %v3315_v0, %v8642_v28 }
 0x4c9   : > { %v3525_v57 = vmul.f32 %v9031_v62, %v9031_v62 }
 0x4cb   : > { %v3585_v14 = vsel %vm10385_vm5, %v3525_v57, 0.0 }
 0x4cc   : > { %v3316_v31 = vpop.f32.mrf.mxu3  ;;  %3586 = vadd.xlane.f32.xlu1 %v3585_v14 }
 0x4cd   : > { %v3317_v23 = vadd.f32 %v3316_v31, %v8881_v10 }
 0x4cf   : > { %v9038_v53 = vadd.f32 %v3317_v23, %v8653_v32 }
 0x4d1   : > { %v3526_v15 = vmul.f32 %v9038_v53, %v9038_v53 }
 0x4d3   : > { %v3588_v7 = vsel %vm10386_vm0, %v3526_v15, 0.0 }
 0x4d4   : > { %v3334_v36 = vpop.f32.mrf.mxu2  ;;  %3589 = vadd.xlane.f32.xlu0 %v3588_v7 }
 0x4d5   : > { %v3335_v28 = vadd.f32 %v3334_v36, %v8859_v49 }
 0x4d7   : > { %v9045_v61 = vadd.f32 %v3335_v28, %v8661_v21 }
 0x4d9   : > { %v3527_v13 = vmul.f32 %v9045_v61, %v9045_v61 }
 0x4db   : > { %v3591_v47 = vsel %vm10387_vm7, %v3527_v13, 0.0  ;;  %v3545_v40 = vpop.xlane.xlu2 %3544  ;;  %vm10392_vm7 = vmmov %vm10390_vm6 }
 0x4dc   : > { %v3336_v32 = vpop.f32.mrf.mxu2  ;;  %3592 = vadd.xlane.f32.xlu2 %v3591_v47  ;;  %v3639_v25 = vmul.f32 %v3545_v40, %v6692_v56 }
 0x4dd   : > { %v3337_v3 = vadd.f32 %v3336_v32, %v8881_v10 }
 0x4de   : > { %v3671_v44 = vadd.f32 1.1920929e-07, %v3639_v25 }
 0x4df   : > { %v9053_v26 = vadd.f32 %v3337_v3, %v8669_v1  ;;  %v5734_v3 = vld [vmem:[%s10142_s4 + $0x10] sm:$0xff] }
 0x4e0   : > { %6064 = vrsqrt.f32 %v3671_v44  ;;  %vm3709_vm8 = vweird.f32 %v3671_v44 }
 0x4e1   : > { %v3528_v21 = vmul.f32 %v9053_v26, %v9053_v26 }
 0x4e3   : > { %v3594_v18 = vsel %vm10388_vm10, %v3528_v21, 0.0 }
 0x4e4   : > { %3595 = vadd.xlane.f32.xlu1 %v3594_v18  ;;  %v3354_v39 = vpop.f32.mrf.mxu3 }
 0x4e5   : > { %v3355_v51 = vadd.f32 %v3354_v39, %v8859_v49 }
 0x4e6   : > { %v6065_v45 = vpop.eup %6064 }
 0x4e7   : > { %v3704_v16 = vmul.f32 %v6065_v45, %v3671_v44  ;;  %v9060_v33 = vadd.f32 %v3355_v51, %v8683_v46  ;;  %v5735_v46 = vld [vmem:[%s10142_s4 + $0x18] sm:$0xff]  ;;  %vm3710_vm4 = vweird.f32 %v6065_v45 }
 0x4e8   : > { %v3548_v12 = vpop.xlane.xlu2 %3547  ;;  %v3554_v54 = vpop.xlane.xlu0 %3553  ;;  %4180 = vmatpush.bf16.msra.mxu2 %v5735_v46  ;;  %vm3711_vm12 = vmor %vm3709_vm8, %vm3710_vm4 }
 0x4e9   : > { %v3640_v1 = vmul.f32 %v3548_v12, %v6692_v56  ;;  %v3642_v17 = vmul.f32 %v3554_v54, %v6692_v56  ;;  %v3705_v0 = vmul.f32 %v6065_v45, %v3704_v16  ;;  %v3529_v57 = vmul.f32 %v9060_v33, %v9060_v33  ;;  %vm10397_vm8 = vmmov %vm10392_vm7 }
 0x4eb   : > { %v3672_v14 = vadd.f32 1.1920929e-07, %v3640_v1  ;;  %v9066_v31 = vadd.f32 1.1920929e-07, %v3642_v17  ;;  %v3706_v23 = vmul.f32 0.5, %v3705_v0  ;;  %v3597_v15 = vsel %vm10389_vm15, %v3529_v57, 0.0 }
 0x4ec   : > { %v3356_v7 = vpop.f32.mrf.mxu3  ;;  %3598 = vadd.xlane.f32.xlu0 %v3597_v15  ;;  %4181 = vmatpush.bf16.msra.mxu2 %v5734_v3  ;;  %v6295_v3 = vld [vmem:[%s10141_s3 + $0x2] sm:$0x3] }
 0x4ed   : > { %6066 = vrsqrt.f32 %v3672_v14  ;;  %v3357_v36 = vadd.f32 %v3356_v7, %v8881_v10  ;;  %v3707_v28 = vsub.f32 1.5, %v3706_v23  ;;  %vm3719_vm14 = vweird.f32 %v3672_v14 }
 0x4ee   : > { %6068 = vrsqrt.f32 %v9066_v31  ;;  %vm3739_vm4 = vweird.f32 %v9066_v31 }
 0x4ef   : > { %v9075_v13 = vadd.f32 %v3357_v36, %v8694_v55  ;;  %v3708_v16 = vmul.f32 %v6065_v45, %v3707_v28 }
 0x4f0   : > { %v3551_v47 = vpop.xlane.xlu2 %3550  ;;  %v2659_v40 = vpop.xlane.xlu0 %2658 }
 0x4f1   : > { %v3641_v32 = vmul.f32 %v3551_v47, %v6692_v56  ;;  %v2691_v25 = vmul.f32 %v2659_v40, %v6692_v56  ;;  %v3530_v21 = vmul.f32 %v9075_v13, %v9075_v13  ;;  %v3712_v7 = vsel %vm3711_vm12, %v6065_v45, %v3708_v16 }
 0x4f2   : > { %v9109_v45 = vperm.slane %v6295_v3, 1 }
 0x4f3   : > { %v6067_v18 = vpop.eup %6066  ;;  %v9084_v39 = vadd.f32 1.1920929e-07, %v3641_v32  ;;  %v9086_v51 = vadd.f32 1.1920929e-07, %v2691_v25  ;;  %v3600_v54 = vsel %vm10390_vm6, %v3530_v21, 0.0  ;;  %v4023_v21 = vmul.f32 %v3712_v7, %v8869_v60 }
 0x4f4   : > { %v9088_v55 = vpop.eup %6068  ;;  %v3714_v12 = vmul.f32 %v6067_v18, %v3672_v14  ;;  %v3374_v17 = vpop.f32.mrf.mxu2  ;;  %3601 = vadd.xlane.f32.xlu2 %v3600_v54  ;;  %vm3720_vm13 = vweird.f32 %v6067_v18 }
 0x4f5   : > { %v3734_v1 = vmul.f32 %v9088_v55, %v9066_v31  ;;  %6070 = vrsqrt.f32 %v9084_v39  ;;  %v3375_v23 = vadd.f32 %v3374_v17, %v8859_v49  ;;  %vm3721_vm1 = vmor %vm3719_vm14, %vm3720_vm13  ;;  %vm3740_vm5 = vweird.f32 %v9088_v55 }
 0x4f6   : > { %v3715_v0 = vmul.f32 %v6067_v18, %v3714_v12  ;;  %6072 = vrsqrt.f32 %v9086_v51  ;;  %vm3040_vm0 = vweird.f32 %v9086_v51  ;;  %vm3729_vm10 = vweird.f32 %v9084_v39  ;;  %vm9173_vm12 = vmor %vm3739_vm4, %vm3740_vm5 }
 0x4f7   : > { %v3560_v57 = vpop.xlane.xlu1 %3559  ;;  %v3735_v28 = vmul.f32 %v9088_v55, %v3734_v1  ;;  %v9099_v47 = vadd.f32 %v3375_v23, %v8708_v6 }
 0x4f8   : > { %v3644_v15 = vmul.f32 %v3560_v57, %v6692_v56  ;;  %v3716_v46 = vmul.f32 0.5, %v3715_v0  ;;  %v2656_v36 = vpop.xlane.xlu2 %2655 }
 0x4f9   : > { %v2690_v44 = vmul.f32 %v2656_v36, %v6692_v56  ;;  %v3531_v1 = vmul.f32 %v9099_v47, %v9099_v47  ;;  %v3736_v17 = vmul.f32 0.5, %v3735_v28 }
 0x4fa   : > { %v9101_v40 = vadd.f32 1.1920929e-07, %v3644_v15  ;;  %v3717_v32 = vsub.f32 1.5, %v3716_v46 }
 0x4fb   : > { %v9104_v25 = vpop.eup %6070  ;;  %v9112_v16 = vadd.f32 1.1920929e-07, %v2690_v44  ;;  %v3603_v36 = vsel %vm10391_vm9, %v3531_v1, 0.0  ;;  %v4056_v44 = vmul.f32 %v9109_v45, %v4023_v21  ;;  %vm10400_vm9 = vmmov %vm10392_vm7 }
 0x4fc   : > { %v9114_v6 = vpop.eup %6072  ;;  %v3718_v12 = vmul.f32 %v6067_v18, %v3717_v32  ;;  %v3724_v54 = vmul.f32 %v9104_v25, %v9084_v39  ;;  %6074 = vrsqrt.f32 %v9101_v40  ;;  %v3376_v14 = vpop.f32.mrf.mxu2  ;;  %3604 = vadd.xlane.f32.xlu1 %v3603_v36  ;;  %vm3730_vm3 = vweird.f32 %v9104_v25 }
 0x4fd   : > { %v3035_v0 = vmul.f32 %v9114_v6, %v9086_v51  ;;  %6076 = vrsqrt.f32 %v9112_v16  ;;  %v3377_v15 = vadd.f32 %v3376_v14, %v8881_v10  ;;  %vm3041_vm2 = vweird.f32 %v9114_v6  ;;  %vm9164_vm6 = vmor %vm3729_vm10, %vm3730_vm3 }
 0x4fe   : > { %v3722_v57 = vsel %vm3721_vm1, %v6067_v18, %v3718_v12  ;;  %v3725_v23 = vmul.f32 %v9104_v25, %v3724_v54  ;;  %v3737_v12 = vsub.f32 1.5, %v3736_v17  ;;  %vm9154_vm15 = vmor %vm3040_vm0, %vm3041_vm2  ;;  %vm3030_vm14 = vweird.f32 %v9112_v16 }
 0x4ff   : > { %v4024_v7 = vmul.f32 %v3722_v57, %v8895_v35  ;;  %v3036_v46 = vmul.f32 %v9114_v6, %v3035_v0  ;;  %v9131_v32 = vadd.f32 %v3377_v15, %v8720_v48  ;;  %v3563_v60 = vpop.xlane.xlu0 %3562  ;;  %vm10401_vm0 = vmmov %vm10392_vm7  ;;  %vm3759_vm10 = vweird.f32 %v9101_v40 }
 0x500   : > { %v3726_v28 = vmul.f32 0.5, %v3725_v23  ;;  %v3557_v3 = vpop.xlane.xlu2 %3556  ;;  %v3738_v36 = vmul.f32 %v9088_v55, %v3737_v12 }
 0x501   : > { %v4057_v18 = vmul.f32 %v9109_v45, %v4024_v7  ;;  %v3037_v54 = vmul.f32 0.5, %v3036_v46  ;;  %v3643_v14 = vmul.f32 %v3557_v3, %v6692_v56  ;;  %v3532_v48 = vmul.f32 %v9131_v32, %v9131_v32 }
 0x502   : > { %v9135_v57 = vpop.eup %6074  ;;  %v3727_v0 = vsub.f32 1.5, %v3726_v28  ;;  %v3645_v7 = vmul.f32 %v3563_v60, %v6692_v56 }
 0x503   : > { %v6077_v1 = vpop.eup %6076  ;;  %v4088_v21 = vpack.c.bf16 %v4057_v18, %v4056_v44  ;;  %v3038_v23 = vsub.f32 1.5, %v3037_v54  ;;  %v9138_v35 = vadd.f32 1.1920929e-07, %v3643_v14  ;;  %v3754_v60 = vmul.f32 %v9135_v57, %v9101_v40 }
 0x504   : > { %v3728_v15 = vmul.f32 %v9104_v25, %v3727_v0  ;;  %v3025_v17 = vmul.f32 %v6077_v1, %v9112_v16  ;;  %v3394_v46 = vpop.f32.mrf.mxu3  ;;  %v3606_v12 = vsel %vm10397_vm8, %v3532_v48, 0.0  ;;  %v9180_v0 = vadd.f32 1.1920929e-07, %v3645_v7 }
 0x505   : > { %v3039_v44 = vmul.f32 %v9114_v6, %v3038_v23  ;;  %5625 = vmatmul.msk.bf16.vlgmr.msra.gmra.mxu2 %vm10392_vm7, %v4088_v21  ;;  %6078 = vrsqrt.f32 %v9138_v35  ;;  %v3395_v18 = vadd.f32 %v3394_v46, %v8859_v49  ;;  %3607 = vadd.xlane.f32.xlu0 %v3606_v12  ;;  %v3755_v46 = vmul.f32 %v9135_v57, %v3754_v60  ;;  %vm10402_vm7 = vmmov %vm10401_vm0 }
 0x506   : > { %v3026_v3 = vmul.f32 %v6077_v1, %v3025_v17  ;;  %v3732_v31 = vsel %vm9164_vm6, %v9104_v25, %v3728_v15  ;;  %vm3031_vm13 = vweird.f32 %v6077_v1  ;;  %6080 = vrsqrt.f32 %v9180_v0  ;;  %vm10403_vm6 = vmmov %vm10401_vm0 }
 0x507   : > { %v3043_v39 = vsel %vm9154_vm15, %v9114_v6, %v3039_v44  ;;  %v3742_v6 = vsel %vm9173_vm12, %v9088_v55, %v3738_v36  ;;  %v9186_v23 = vadd.f32 %v3395_v18, %v8729_v59  ;;  %v4025_v25 = vmul.f32 %v3732_v31, %v8911_v34  ;;  %vm3032_vm1 = vmor %vm3030_vm14, %vm3031_vm13 }
 0x508   : > { %v3027_v14 = vmul.f32 0.5, %v3026_v3  ;;  %v3566_v21 = vpop.xlane.xlu2 %3565  ;;  %v3075_v17 = vmul.f32 %v3043_v39, %v8907_v30  ;;  %v4026_v36 = vmul.f32 %v3742_v6, %v8892_v4  ;;  %v3756_v3 = vmul.f32 0.5, %v3755_v46  ;;  %vm10405_vm12 = vmmov %vm10401_vm0 }
 0x509   : > { %v3646_v48 = vmul.f32 %v3566_v21, %v6692_v56  ;;  %v3533_v7 = vmul.f32 %v9186_v23, %v9186_v23  ;;  %v4058_v31 = vmul.f32 %v9109_v45, %v4025_v25  ;;  %vm3760_vm2 = vweird.f32 %v9135_v57 }
 0x50a   : > { %v3028_v44 = vsub.f32 1.5, %v3027_v14  ;;  %v3108_v18 = vmul.f32 %v8680_v8, %v3075_v17  ;;  %v4059_v6 = vmul.f32 %v9109_v45, %v4026_v36  ;;  %v3757_v46 = vsub.f32 1.5, %v3756_v3  ;;  %vm3761_vm4 = vmor %vm3759_vm10, %vm3760_vm2 }
 0x50b   : > { %v9192_v15 = vadd.f32 1.1920929e-07, %v3646_v48  ;;  %v6079_v28 = vpop.eup %6078  ;;  %v3609_v16 = vsel %vm10400_vm9, %v3533_v7, 0.0  ;;  %vm3749_vm3 = vweird.f32 %v9138_v35  ;;  %vm3769_vm9 = vweird.f32 %v9180_v0 }
 0x50c   : > { %v3029_v55 = vmul.f32 %v6077_v1, %v3028_v44  ;;  %v3396_v59 = vpop.f32.mrf.mxu3  ;;  %v3744_v60 = vmul.f32 %v6079_v28, %v9138_v35  ;;  %3610 = vadd.xlane.f32.xlu2 %v3609_v16  ;;  %v9211_v48 = vpop.eup %6080  ;;  %vm3750_vm5 = vweird.f32 %v6079_v28 }
 0x50d   : > { %6082 = vrsqrt.f32 %v9192_v15  ;;  %v3397_v39 = vadd.f32 %v3396_v59, %v8881_v10  ;;  %v4089_v59 = vpack.c.bf16 %v4059_v6, %v4058_v31  ;;  %vm3751_vm15 = vmor %vm3749_vm3, %vm3750_vm5  ;;  %vm3770_vm13 = vweird.f32 %v9211_v48 }
 0x50e   : > { %v3033_v51 = vsel %vm3032_vm1, %v6077_v1, %v3029_v55  ;;  %v3745_v54 = vmul.f32 %v6079_v28, %v3744_v60  ;;  %v3140_v55 = vpack.c.bf16 %v3108_v18, %v3108_v18  ;;  %v3758_v18 = vmul.f32 %v9135_v57, %v3757_v46  ;;  %vm3771_vm2 = vmor %vm3769_vm9, %vm3770_vm13 }
 0x50f   : > { %v3074_v12 = vmul.f32 %v3033_v51, %v8923_v2  ;;  %v9207_v14 = vadd.f32 %v3397_v39, %v8742_v38  ;;  %v3569_v17 = vpop.xlane.xlu1 %3568  ;;  %vm3779_vm14 = vweird.f32 %v9192_v15  ;;  %vm10406_vm5 = vmmov %vm10401_vm0 }
 0x510   : > { %v3746_v21 = vmul.f32 0.5, %v3745_v54  ;;  %v3647_v3 = vmul.f32 %v3569_v17, %v6692_v56  ;;  %v3462_v16 = vunpack.c.l.b16 %v3140_v55  ;;  %v3762_v35 = vsel %vm3761_vm4, %v9135_v57, %v3758_v18 }
 0x511   : > { %v3107_v1 = vmul.f32 %v8680_v8, %v3074_v12  ;;  %v3534_v44 = vmul.f32 %v9207_v14, %v9207_v14  ;;  %v3764_v12 = vmul.f32 %v9211_v48, %v9180_v0 }
 0x512   : > { %v3747_v25 = vsub.f32 1.5, %v3746_v21 }
 0x513   : > { %v9215_v7 = vpop.eup %6082  ;;  %v3139_v38 = vpack.c.bf16 %v3107_v1, %v3107_v1  ;;  %v3612_v39 = vsel %vm10401_vm0, %v3534_v44, 0.0  ;;  %v9238_v44 = vadd.f32 1.1920929e-07, %v3647_v3 }
 0x514   : > { %v3774_v8 = vmul.f32 %v9215_v7, %v9192_v15  ;;  %v3414_v36 = vpop.f32.mrf.mxu2  ;;  %v3748_v60 = vmul.f32 %v6079_v28, %v3747_v25  ;;  %3613 = vadd.xlane.f32.xlu1 %v3612_v39  ;;  %vm3780_vm8 = vweird.f32 %v9215_v7 }
 0x515   : > { %v3415_v51 = vadd.f32 %v3414_v36, %v8859_v49  ;;  %5626 = vmatmul.msk.bf16.gmra.mxu2 %vm10402_vm7, %v4089_v59  ;;  %v3461_v54 = vunpack.c.l.b16 %v3139_v38  ;;  %vm3781_vm1 = vmor %vm3779_vm14, %vm3780_vm8 }
 0x516   : > { %v3752_v6 = vsel %vm3751_vm15, %v6079_v28, %v3748_v60  ;;  %v3775_v1 = vmul.f32 %v9215_v7, %v3774_v8  ;;  %v4028_v8 = vmul.f32 %v3762_v35, %v8930_v22  ;;  %vm3789_vm15 = vweird.f32 %v9238_v44  ;;  %vm10409_vm14 = vmmov %vm10406_vm5 }
 0x517   : > { %v9232_v31 = vadd.f32 %v3415_v51, %v8753_v58  ;;  %v3572_v21 = vpop.xlane.xlu0 %3571  ;;  %v3463_v17 = vpack.c.b16 %v3462_v16, %v3461_v54  ;;  %v3765_v58 = vmul.f32 %v9211_v48, %v3764_v12  ;;  %v4027_v28 = vmul.f32 %v3752_v6, %v8948_v20 }
 0x518   : > { %v3648_v46 = vmul.f32 %v3572_v21, %v6692_v56  ;;  %v3776_v59 = vmul.f32 0.5, %v3775_v1  ;;  %v4061_v12 = vmul.f32 %v9109_v45, %v4028_v8 }
 0x519   : > { %v3535_v40 = vmul.f32 %v9232_v31, %v9232_v31  ;;  %3472 = vmatpush.bf16.msrb.mxu3 %v3463_v17  ;;  %v3766_v36 = vmul.f32 0.5, %v3765_v58  ;;  %v4060_v3 = vmul.f32 %v9109_v45, %v4027_v28 }
 0x51a   : > { %v9244_v55 = vadd.f32 1.1920929e-07, %v3648_v46  ;;  %v3777_v51 = vsub.f32 1.5, %v3776_v59 }
 0x51b   : > { %v3615_v25 = vsel %vm10403_vm6, %v3535_v40, 0.0  ;;  %v3767_v16 = vsub.f32 1.5, %v3766_v36  ;;  %vm10407_vm6 = vmmov %vm10406_vm5 }
 0x51c   : > { %6084 = vrsqrt.f32 %v9244_v55  ;;  %v3416_v38 = vpop.f32.mrf.mxu2  ;;  %3616 = vadd.xlane.f32.xlu0 %v3615_v25  ;;  %5611 = vmatmul.msk.bf16.vlgmr.msrb.gmra.mxu3 %vm1059_vm11, %v8940_v5  ;;  %vm10404_vm11 = vmmov %vm10401_vm0  ;;  %v3778_v1 = vmul.f32 %v9215_v7, %v3777_v51  ;;  %vm3799_vm7 = vweird.f32 %v9244_v55 }
 0x51d   : > { %6086 = vrsqrt.f32 %v9238_v44  ;;  %v3417_v57 = vadd.f32 %v3416_v38, %v8881_v10  ;;  %v3768_v17 = vmul.f32 %v9211_v48, %v3767_v16 }
 0x51e   : > { %v3782_v28 = vsel %vm3781_vm1, %v9215_v7, %v3778_v1 }
 0x51f   : > { %v9255_v60 = vadd.f32 %v3417_v57, %v8766_v41  ;;  %v3575_v39 = vpop.xlane.xlu2 %3574  ;;  %v4090_v41 = vpack.c.bf16 %v4061_v12, %v4060_v3  ;;  %v3772_v38 = vsel %vm3771_vm2, %v9211_v48, %v3768_v17  ;;  %v4030_v57 = vmul.f32 %v3782_v28, %v8966_v11 }
 0x520   : > { %v3649_v5 = vmul.f32 %v3575_v39, %v6692_v56  ;;  %v4029_v0 = vmul.f32 %v3772_v38, %v8954_v52 }
 0x521   : > { %v3536_v18 = vmul.f32 %v9255_v60, %v9255_v60  ;;  %v4063_v3 = vmul.f32 %v9109_v45, %v4030_v57 }
 0x522   : > { %v9261_v54 = vpop.eup %6084  ;;  %v9277_v35 = vadd.f32 1.1920929e-07, %v3649_v5  ;;  %v4062_v48 = vmul.f32 %v9109_v45, %v4029_v0 }
 0x523   : > { %v9263_v21 = vpop.eup %6086  ;;  %v3618_v6 = vsel %vm10404_vm11, %v3536_v18, 0.0  ;;  %v3794_v46 = vmul.f32 %v9261_v54, %v9244_v55  ;;  %vm3800_vm3 = vweird.f32 %v9261_v54 }
 0x524   : > { %3619 = vadd.xlane.f32.xlu2 %v3618_v6  ;;  %v3784_v40 = vmul.f32 %v9263_v21, %v9238_v44  ;;  %6088 = vrsqrt.f32 %v9277_v35  ;;  %v4091_v5 = vpack.c.bf16 %v4063_v3, %v4062_v48  ;;  %vm3790_vm0 = vweird.f32 %v9263_v21  ;;  %vm3801_vm10 = vmor %vm3799_vm7, %vm3800_vm3 }
 0x525   : > { %5627 = vmatmul.msk.bf16.gmra.mxu2 %vm10405_vm12, %v4090_v41  ;;  %v3795_v25 = vmul.f32 %v9261_v54, %v3794_v46  ;;  %vm3791_vm4 = vmor %vm3789_vm15, %vm3790_vm0  ;;  %vm3809_vm1 = vweird.f32 %v9277_v35 }
 0x526   : > { %v3785_v15 = vmul.f32 %v9263_v21, %v3784_v40  ;;  %vm10408_vm12 = vmmov %vm10406_vm5 }
 0x527   : > { %v3578_v58 = vpop.xlane.xlu1 %3577  ;;  %v3796_v36 = vmul.f32 0.5, %v3795_v25  ;;  %vm10410_vm3 = vmmov %vm10406_vm5 }
 0x528   : > { %v3650_v59 = vmul.f32 %v3578_v58, %v6692_v56  ;;  %v3786_v7 = vmul.f32 0.5, %v3785_v15  ;;  %vm10412_vm7 = vmmov %vm10410_vm3 }
 0x529   : > { %v3797_v51 = vsub.f32 1.5, %v3796_v36 }
 0x52a   : > { %v9285_v8 = vadd.f32 1.1920929e-07, %v3650_v59  ;;  %v9292_v39 = vpop.eup %6088  ;;  %v3787_v12 = vsub.f32 1.5, %v3786_v7 }
 0x52b   : > { %v3798_v6 = vmul.f32 %v9261_v54, %v3797_v51  ;;  %v3804_v46 = vmul.f32 %v9292_v39, %v9277_v35  ;;  %vm3810_vm8 = vweird.f32 %v9292_v39 }
 0x52c   : > { %6090 = vrsqrt.f32 %v9285_v8  ;;  %v3788_v58 = vmul.f32 %v9263_v21, %v3787_v12  ;;  %vm3819_vm13 = vweird.f32 %v9285_v8  ;;  %vm3811_vm2 = vmor %vm3809_vm1, %vm3810_vm8 }
 0x52d   : > { %v3802_v59 = vsel %vm3801_vm10, %v9261_v54, %v3798_v6  ;;  %v3805_v57 = vmul.f32 %v9292_v39, %v3804_v46 }
 0x52e   : > { %v4032_v44 = vmul.f32 %v3802_v59, %v8984_v19 }
 0x52f   : > { %v3581_v16 = vpop.xlane.xlu0 %3580  ;;  %v3806_v51 = vmul.f32 0.5, %v3805_v57 }
 0x530   : > { %v3651_v17 = vmul.f32 %v3581_v16, %v6692_v56  ;;  %v4065_v16 = vmul.f32 %v9109_v45, %v4032_v44 }
 0x531   : > { %v3807_v6 = vsub.f32 1.5, %v3806_v51 }
 0x532   : > { %v9295_v18 = vpop.eup %6090  ;;  %v9317_v36 = vadd.f32 1.1920929e-07, %v3651_v17 }
 0x533   : > { %v3814_v41 = vmul.f32 %v9295_v18, %v9285_v8  ;;  %vm3820_vm11 = vweird.f32 %v9295_v18  ;;  %v3808_v57 = vmul.f32 %v9292_v39, %v3807_v6 }
 0x534   : > { %v3454_v1 = vpop.f32.mrf.mxu2  ;;  %vm3821_vm9 = vmor %vm3819_vm13, %vm3820_vm11 }
 0x535   : > { %v3455_v40 = vadd.f32 %v3454_v1, %v8859_v49  ;;  %5628 = vmatmul.msk.bf16.gmra.mxu2 %vm10406_vm5, %v4091_v5  ;;  %v3815_v38 = vmul.f32 %v9295_v18, %v3814_v41  ;;  %vm10411_vm5 = vmmov %vm10410_vm3 }
 0x537   : > { %v9310_v28 = vadd.f32 %v3455_v40, %v8790_v43  ;;  %v3584_v25 = vpop.xlane.xlu2 %3583  ;;  %v3792_v43 = vsel %vm3791_vm4, %v9263_v21, %v3788_v58  ;;  %v3816_v7 = vmul.f32 0.5, %v3815_v38 }
 0x538   : > { %v3652_v15 = vmul.f32 %v3584_v25, %v6692_v56  ;;  %v4031_v3 = vmul.f32 %v3792_v43, %v8976_v42 }
 0x539   : > { %v3539_v55 = vmul.f32 %v9310_v28, %v9310_v28  ;;  %v3817_v21 = vsub.f32 1.5, %v3816_v7 }
 0x53a   : > { %v9322_v0 = vadd.f32 1.1920929e-07, %v3652_v15  ;;  %v4064_v41 = vmul.f32 %v9109_v45, %v4031_v3 }
 0x53b   : > { %v3627_v54 = vsel %vm10407_vm6, %v3539_v55, 0.0  ;;  %v3818_v59 = vmul.f32 %v9295_v18, %v3817_v21  ;;  %vm3829_vm6 = vweird.f32 %v9317_v36 }
 0x53c   : > { %6092 = vrsqrt.f32 %v9322_v0  ;;  %3628 = vadd.xlane.f32.xlu2 %v3627_v54  ;;  %v3456_v48 = vpop.f32.mrf.mxu2  ;;  %v4092_v25 = vpack.c.bf16 %v4065_v16, %v4064_v41  ;;  %vm3839_vm15 = vweird.f32 %v9322_v0 }
 0x53d   : > { %6094 = vrsqrt.f32 %v9317_v36  ;;  %v3457_v46 = vadd.f32 %v3456_v48, %v8881_v10  ;;  %v3822_v3 = vsel %vm3821_vm9, %v9295_v18, %v3818_v59 }
 0x53f   : > { %v3434_v12 = vpop.f32.mrf.mxu3  ;;  %v3587_v40 = vpop.xlane.xlu1 %3586  ;;  %v9354_v43 = vadd.f32 %v3457_v46, %v8801_v9  ;;  %v3812_v9 = vsel %vm3811_vm2, %v9292_v39, %v3808_v57 }
 0x540   : > { %v3435_v5 = vadd.f32 %v3434_v12, %v8859_v49  ;;  %v4033_v41 = vmul.f32 %v3812_v9, %v8995_v63 }
 0x541   : > { %v3540_v18 = vmul.f32 %v9354_v43, %v9354_v43 }
 0x542   : > { %v9332_v1 = vpop.eup %6092  ;;  %v9336_v17 = vadd.f32 %v3435_v5, %v8815_v29  ;;  %v3653_v29 = vmul.f32 %v3587_v40, %v6692_v56  ;;  %v4034_v5 = vmul.f32 %v3822_v3, %v9005_v37 }
 0x543   : > { %v9338_v58 = vpop.eup %6094  ;;  %v3834_v38 = vmul.f32 %v9332_v1, %v9322_v0  ;;  %v3630_v40 = vsel %vm10411_vm5, %v3540_v18, 0.0  ;;  %vm3840_vm0 = vweird.f32 %v9332_v1 }
 0x544   : > { %v3537_v15 = vmul.f32 %v9336_v17, %v9336_v17  ;;  %v3824_v55 = vmul.f32 %v9338_v58, %v9317_v36  ;;  %v9363_v12 = vadd.f32 1.1920929e-07, %v3653_v29  ;;  %vm3830_vm10 = vweird.f32 %v9338_v58  ;;  %vm3841_vm4 = vmor %vm3839_vm15, %vm3840_vm0 }
 0x545   : > { %5629 = vmatmul.msk.bf16.gmra.mxu2 %vm10408_vm12, %v4092_v25  ;;  %v3835_v51 = vmul.f32 %v9332_v1, %v3834_v38  ;;  %v4067_v25 = vmul.f32 %v9109_v45, %v4034_v5  ;;  %v4066_v38 = vmul.f32 %v9109_v45, %v4033_v41  ;;  %vm3831_vm11 = vmor %vm3829_vm6, %vm3830_vm10 }
 0x546   : > { %v3621_v44 = vsel %vm10409_vm14, %v3537_v15, 0.0  ;;  %v3825_v16 = vmul.f32 %v9338_v58, %v3824_v55  ;;  %vm10413_vm12 = vmmov %vm10410_vm3  ;;  %vm3849_vm9 = vweird.f32 %v9363_v12 }
 0x547   : > { %v3436_v54 = vpop.f32.mrf.mxu3  ;;  %3622 = vadd.xlane.f32.xlu1 %v3621_v44  ;;  %v3590_v7 = vpop.xlane.xlu0 %3589  ;;  %v3836_v6 = vmul.f32 0.5, %v3835_v51  ;;  %v4093_v44 = vpack.c.bf16 %v4067_v25, %v4066_v38 }
 0x548   : > { %v3437_v8 = vadd.f32 %v3436_v54, %v8881_v10  ;;  %v3654_v48 = vmul.f32 %v3590_v7, %v6692_v56  ;;  %v3826_v46 = vmul.f32 0.5, %v3825_v16 }
 0x549   : > { %v3837_v59 = vsub.f32 1.5, %v3836_v6 }
 0x54a   : > { %v9367_v35 = vadd.f32 %v3437_v8, %v8810_v27  ;;  %v9369_v21 = vadd.f32 1.1920929e-07, %v3654_v48  ;;  %v3827_v57 = vsub.f32 1.5, %v3826_v46 }
 0x54b   : > { %v3838_v54 = vmul.f32 %v9332_v1, %v3837_v59 }
 0x54c   : > { %6096 = vrsqrt.f32 %v9369_v21  ;;  %v3538_v39 = vmul.f32 %v9367_v35, %v9367_v35  ;;  %v3828_v51 = vmul.f32 %v9338_v58, %v3827_v57  ;;  %vm3859_vm14 = vweird.f32 %v9369_v21 }
 0x54d   : > { %6098 = vrsqrt.f32 %v9363_v12  ;;  %v3842_v9 = vsel %vm3841_vm4, %v9332_v1, %v3838_v54 }
 0x54e   : > { %v3624_v27 = vsel %vm10410_vm3, %v3538_v39, 0.0  ;;  %v3832_v6 = vsel %vm3831_vm11, %v9338_v58, %v3828_v51  ;;  %v4036_v0 = vmul.f32 %v3842_v9, %v9024_v24  ;;  %vm10414_vm11 = vmmov %vm10411_vm5 }
 0x54f   : > { %3625 = vadd.xlane.f32.xlu0 %v3624_v27  ;;  %3631 = vadd.xlane.f32.xlu1 %v3630_v40  ;;  %v3593_v29 = vpop.xlane.xlu2 %3592  ;;  %v4035_v27 = vmul.f32 %v3832_v6, %v9015_v50 }
 0x550   : > { %v3655_v3 = vmul.f32 %v3593_v29, %v6692_v56  ;;  %v4069_v1 = vmul.f32 %v9109_v45, %v4036_v0 }
 0x551   : > { %v4068_v59 = vmul.f32 %v9109_v45, %v4035_v27 }
 0x552   : > { %v6097_v15 = vpop.eup %6096  ;;  %v9395_v5 = vadd.f32 1.1920929e-07, %v3655_v3 }
 0x553   : > { %v6099_v55 = vpop.eup %6098  ;;  %v3854_v7 = vmul.f32 %v6097_v15, %v9369_v21  ;;  %v4094_v29 = vpack.c.bf16 %v4069_v1, %v4068_v59  ;;  %vm3860_vm8 = vweird.f32 %v6097_v15 }
 0x554   : > { %v3844_v8 = vmul.f32 %v6099_v55, %v9363_v12  ;;  %vm3850_vm13 = vweird.f32 %v6099_v55  ;;  %vm3861_vm1 = vmor %vm3859_vm14, %vm3860_vm8  ;;  %vm3869_vm15 = vweird.f32 %v9395_v5 }
 0x555   : > { %5630 = vmatmul.msk.bf16.gmra.mxu2 %vm10412_vm7, %v4093_v44  ;;  %v3855_v16 = vmul.f32 %v6097_v15, %v3854_v7  ;;  %vm3851_vm2 = vmor %vm3849_vm9, %vm3850_vm13 }
 0x556   : > { %v3845_v39 = vmul.f32 %v6099_v55, %v3844_v8 }
 0x557   : > { %v3596_v48 = vpop.xlane.xlu1 %3595  ;;  %v3856_v46 = vmul.f32 0.5, %v3855_v16 }
 0x558   : > { %v3656_v18 = vmul.f32 %v3596_v48, %v6692_v56  ;;  %v3846_v36 = vmul.f32 0.5, %v3845_v39 }
 0x559   : > { %v3857_v40 = vsub.f32 1.5, %v3856_v46 }
 0x55a   : > { %v3688_v41 = vadd.f32 1.1920929e-07, %v3656_v18  ;;  %v3847_v57 = vsub.f32 1.5, %v3846_v36 }
 0x55b   : > { %v3858_v44 = vmul.f32 %v6097_v15, %v3857_v40 }
 0x55c   : > { %6100 = vrsqrt.f32 %v3688_v41  ;;  %v3848_v3 = vmul.f32 %v6099_v55, %v3847_v57  ;;  %vm3879_vm7 = vweird.f32 %v3688_v41 }
 0x55d   : > { %6102 = vrsqrt.f32 %v9395_v5  ;;  %v3862_v8 = vsel %vm3861_vm1, %v6097_v15, %v3858_v44 }
 0x55e   : > { %v3852_v6 = vsel %vm3851_vm2, %v6099_v55, %v3848_v3  ;;  %v4038_v0 = vmul.f32 %v3862_v8, %v9038_v53  ;;  %vm10415_vm2 = vmmov %vm10411_vm5 }
 0x55f   : > { %v3599_v25 = vpop.xlane.xlu0 %3598  ;;  %v4037_v12 = vmul.f32 %v3852_v6, %v9031_v62 }
 0x560   : > { %v3657_v7 = vmul.f32 %v3599_v25, %v6692_v56  ;;  %v4071_v27 = vmul.f32 %v9109_v45, %v4038_v0 }
 0x561   : > { %v4070_v1 = vmul.f32 %v9109_v45, %v4037_v12 }
 0x562   : > { %v6101_v38 = vpop.eup %6100  ;;  %v9411_v9 = vadd.f32 1.1920929e-07, %v3657_v7 }
 0x563   : > { %v9403_v58 = vpop.eup %6102  ;;  %v3874_v54 = vmul.f32 %v6101_v38, %v3688_v41  ;;  %v4095_v57 = vpack.c.bf16 %v4071_v27, %v4070_v1  ;;  %vm3880_vm3 = vweird.f32 %v6101_v38  ;;  %v5740_v1 = vld [vmem:[%s10144_s6 + $0x60] sm:$0xff] }
 0x564   : > { %v3864_v51 = vmul.f32 %v9403_v58, %v9395_v5  ;;  %6104 = vrsqrt.f32 %v9411_v9  ;;  %vm3870_vm0 = vweird.f32 %v9403_v58  ;;  %vm3881_vm10 = vmor %vm3879_vm7, %vm3880_vm3  ;;  %vm3889_vm14 = vweird.f32 %v9411_v9 }
 0x565   : > { %5631 = vmatmul.msk.bf16.gmra.mxu2 %vm10413_vm12, %v4094_v29  ;;  %v3875_v48 = vmul.f32 %v6101_v38, %v3874_v54  ;;  %v5743_v54 = vld [vmem:[%s10144_s6 + $0x78] sm:$0xff]  ;;  %vm3871_vm4 = vmor %vm3869_vm15, %vm3870_vm0 }
 0x566   : > { %v3865_v39 = vmul.f32 %v9403_v58, %v3864_v51  ;;  %4509 = vmatpush.bf16.msra.mxu3 %v5743_v54 }
 0x567   : > { %v3602_v16 = vpop.xlane.xlu2 %3601  ;;  %v3876_v46 = vmul.f32 0.5, %v3875_v48 }
 0x568   : > { %v3658_v18 = vmul.f32 %v3602_v16, %v6692_v56  ;;  %v3866_v15 = vmul.f32 0.5, %v3865_v39  ;;  %v5742_v16 = vld [vmem:[%s10144_s6 + $0x70] sm:$0xff] }
 0x569   : > { %v3877_v36 = vsub.f32 1.5, %v3876_v46 }
 0x56a   : > { %v9416_v21 = vadd.f32 1.1920929e-07, %v3658_v18  ;;  %v9423_v55 = vpop.eup %6104  ;;  %v3867_v40 = vsub.f32 1.5, %v3866_v15  ;;  %4510 = vmatpush.bf16.msra.mxu3 %v5742_v16 }
 0x56b   : > { %v3878_v29 = vmul.f32 %v6101_v38, %v3877_v36  ;;  %v3884_v51 = vmul.f32 %v9423_v55, %v9411_v9  ;;  %vm3890_vm8 = vweird.f32 %v9423_v55 }
 0x56c   : > { %6106 = vrsqrt.f32 %v9416_v21  ;;  %v3868_v3 = vmul.f32 %v9403_v58, %v3867_v40  ;;  %vm3899_vm12 = vweird.f32 %v9416_v21  ;;  %vm3891_vm1 = vmor %vm3889_vm14, %vm3890_vm8 }
 0x56d   : > { %v3882_v8 = vsel %vm3881_vm10, %v6101_v38, %v3878_v29  ;;  %v3885_v41 = vmul.f32 %v9423_v55, %v3884_v51  ;;  %v5741_v38 = vld [vmem:[%s10144_s6 + $0x68] sm:$0xff]  ;;  %v9474_v51 = vld [vmem:[%s10143_s5 + $0x1] ss:$0 sm:$0xff] }
 0x56e   : > { %v3872_v6 = vsel %vm3871_vm4, %v9403_v58, %v3868_v3  ;;  %v4040_v39 = vmul.f32 %v3882_v8, %v9053_v26  ;;  %4511 = vmatpush.bf16.msra.mxu3 %v5741_v38  ;;  %v5739_v3 = vld [vmem:[%s10144_s6 + $0x58] sm:$0xff] }
 0x56f   : > { %v3605_v59 = vpop.xlane.xlu1 %3604  ;;  %v4039_v12 = vmul.f32 %v3872_v6, %v9045_v61  ;;  %v3886_v15 = vmul.f32 0.5, %v3885_v41 }
 0x570   : > { %v3659_v7 = vmul.f32 %v3605_v59, %v6692_v56  ;;  %v4073_v58 = vmul.f32 %v9109_v45, %v4040_v39 }
 0x571   : > { %v4072_v40 = vmul.f32 %v9109_v45, %v4039_v12  ;;  %v3887_v59 = vsub.f32 1.5, %v3886_v15 }
 0x572   : > { %v9425_v25 = vpop.eup %6106  ;;  %v9443_v18 = vadd.f32 1.1920929e-07, %v3659_v7  ;;  %4512 = vmatpush.bf16.msra.mxu3 %v5740_v1 }
 0x573   : > { %v3894_v44 = vmul.f32 %v9425_v25, %v9416_v21  ;;  %vm3900_vm6 = vweird.f32 %v9425_v25 }
 0x574   : > { %6108 = vrsqrt.f32 %v9443_v18  ;;  %vm3901_vm13 = vmor %vm3899_vm12, %vm3900_vm6  ;;  %vm3909_vm7 = vweird.f32 %v9443_v18 }
 0x575   : > { %5632 = vmatmul.msk.bf16.gmra.mxu2 %vm10411_vm5, %v4095_v57  ;;  %v3895_v48 = vmul.f32 %v9425_v25, %v3894_v44  ;;  %v4096_v44 = vpack.c.bf16 %v4073_v58, %v4072_v40  ;;  %v5737_v40 = vld [vmem:[%s10144_s6 + $0x48] sm:$0xff]  ;;  %vm10416_vm6 = vmmov %vm10415_vm2 }
 0x576   : > { %4513 = vmatpush.bf16.msra.mxu3 %v5739_v3  ;;  %vm10417_vm12 = vmmov %vm10415_vm2 }
 0x577   : > { %v3896_v46 = vmul.f32 0.5, %v3895_v48  ;;  %v3888_v48 = vmul.f32 %v9423_v55, %v3887_v59 }
 0x578   : > { %v3608_v0 = vpop.xlane.xlu0 %3607 }
 0x579   : > { %v3660_v5 = vmul.f32 %v3608_v0, %v6692_v56  ;;  %v3897_v36 = vsub.f32 1.5, %v3896_v46  ;;  %v5738_v46 = vld [vmem:[%s10144_s6 + $0x50] sm:$0xff]  ;;  %v3892_v12 = vsel %vm3891_vm1, %v9423_v55, %v3888_v48  ;;  %vm10418_vm1 = vmmov %vm10415_vm2 }
 0x57a   : > { %v9462_v57 = vpop.eup %6108  ;;  %4514 = vmatpush.bf16.msra.mxu3 %v5738_v46  ;;  %v4041_v55 = vmul.f32 %v3892_v12, %v9060_v33 }
 0x57b   : > { %v9454_v27 = vadd.f32 1.1920929e-07, %v3660_v5  ;;  %v3898_v54 = vmul.f32 %v9425_v25, %v3897_v36  ;;  %v3904_v16 = vmul.f32 %v9462_v57, %v9443_v18  ;;  %vm3910_vm3 = vweird.f32 %v9462_v57 }
 0x57c   : > { %v4074_v48 = vmul.f32 %v9109_v45, %v4041_v55  ;;  %vm3911_vm10 = vmor %vm3909_vm7, %vm3910_vm3 }
 0x57d   : > { %6110 = vrsqrt.f32 %v9454_v27  ;;  %v3902_v41 = vsel %vm3901_vm13, %v9425_v25, %v3898_v54  ;;  %v3905_v9 = vmul.f32 %v9462_v57, %v3904_v16  ;;  %vm3919_vm5 = vweird.f32 %v9454_v27 }
 0x57e   : > { %v4042_v15 = vmul.f32 %v3902_v41, %v9075_v13  ;;  %4515 = vmatpush.bf16.msra.mxu3 %v5737_v40 }
 0x57f   : > { %v3611_v29 = vpop.xlane.xlu2 %3610  ;;  %v3906_v59 = vmul.f32 0.5, %v3905_v9 }
 0x580   : > { %v3661_v7 = vmul.f32 %v3611_v29, %v6692_v56  ;;  %v4075_v29 = vmul.f32 %v9109_v45, %v4042_v15 }
 0x582   : > { %v9487_v39 = vadd.f32 1.1920929e-07, %v3661_v7  ;;  %v5736_v7 = vld [vmem:[%s10144_s6 + $0x40] sm:$0xff] }
 0x583   : > { %v9476_v8 = vpop.eup %6110  ;;  %4516 = vmatpush.bf16.msra.mxu3 %v5736_v7 }
 0x584   : > { %v3914_v6 = vmul.f32 %v9476_v8, %v9454_v27  ;;  %6112 = vrsqrt.f32 %v9487_v39  ;;  %vm3920_vm9 = vweird.f32 %v9476_v8  ;;  %vm3929_vm13 = vweird.f32 %v9487_v39 }
 0x585   : > { %5633 = vmatmul.msk.bf16.gmra.mxu2 %vm10414_vm11, %v4096_v44  ;;  %vm3921_vm0 = vmor %vm3919_vm5, %vm3920_vm9 }
 0x586   : > { %v3915_v21 = vmul.f32 %v9476_v8, %v3914_v6  ;;  %v3907_v6 = vsub.f32 1.5, %v3906_v59 }
 0x587   : > { %v3614_v5 = vpop.xlane.xlu1 %3613 }
 0x588   : > { %v4183_v0 = vpop.f32.mrf.mxu2  ;;  %v3662_v25 = vmul.f32 %v3614_v5, %v6692_v56  ;;  %v3916_v36 = vmul.f32 0.5, %v3915_v21  ;;  %v4097_v21 = vpack.c.bf16 %v4075_v29, %v4074_v48  ;;  %v3908_v15 = vmul.f32 %v9462_v57, %v3907_v6 }
 0x589   : > { %v9494_v38 = vadd.f32 %v9474_v51, %v4183_v0 }
 0x58a   : > { %v9502_v1 = vadd.f32 1.1920929e-07, %v3662_v25  ;;  %v3917_v44 = vsub.f32 1.5, %v3916_v36  ;;  %v9515_v16 = vpop.eup %6112  ;;  %v3912_v7 = vsel %vm3911_vm10, %v9462_v57, %v3908_v15 }
 0x58b   : > { %v4263_v58 = vmul.f32 0.5, %v9494_v38  ;;  %vm3930_vm11 = vweird.f32 %v9515_v16 }
 0x58c   : > { %v3918_v12 = vmul.f32 %v9476_v8, %v3917_v44  ;;  %vm3939_vm4 = vweird.f32 %v9502_v1  ;;  %vm3931_vm14 = vmor %vm3929_vm13, %vm3930_vm11 }
 0x58d   : > { %6114 = vtanh.f32 %v4263_v58  ;;  %v3924_v58 = vmul.f32 %v9515_v16, %v9487_v39 }
 0x58e   : > { %6116 = vrsqrt.f32 %v9502_v1  ;;  %v3922_v55 = vsel %vm3921_vm0, %v9476_v8, %v3918_v12  ;;  %v4043_v12 = vmul.f32 %v3912_v7, %v9099_v47 }
 0x58f   : > { %v3617_v41 = vpop.xlane.xlu0 %3616  ;;  %v3925_v48 = vmul.f32 %v9515_v16, %v3924_v58  ;;  %v4044_v8 = vmul.f32 %v3922_v55, %v9131_v32 }
 0x590   : > { %v4185_v54 = vpop.f32.mrf.mxu2  ;;  %v3663_v25 = vmul.f32 %v3617_v41, %v6692_v56 }
 0x591   : > { %v4186_v3 = vadd.f32 %v9474_v51, %v4185_v54 }
 0x592   : > { %v9534_v54 = vadd.f32 1.1920929e-07, %v3663_v25  ;;  %v4077_v25 = vmul.f32 %v9109_v45, %v4044_v8 }
 0x593   : > { %v6115_v0 = vpop.eup %6114  ;;  %v4264_v46 = vmul.f32 0.5, %v4186_v3 }
 0x594   : > { %v9517_v5 = vpop.eup %6116  ;;  %v4327_v36 = vadd.f32 1.0, %v6115_v0  ;;  %vm3949_vm7 = vweird.f32 %v9534_v54 }
 0x595   : > { %v3934_v9 = vmul.f32 %v9517_v5, %v9502_v1  ;;  %6118 = vtanh.f32 %v4264_v46  ;;  %5634 = vmatmul.msk.bf16.gmra.mxu2 %vm10415_vm2, %v4097_v21  ;;  %vm3940_vm15 = vweird.f32 %v9517_v5  ;;  %vm10419_vm2 = vmmov %vm10418_vm1 }
 0x596   : > { %v4359_v41 = vmul.f32 0.5, %v4327_v36  ;;  %vm3941_vm8 = vmor %vm3939_vm4, %vm3940_vm15 }
 0x597   : > { %v3620_v40 = vpop.xlane.xlu2 %3619  ;;  %v3935_v59 = vmul.f32 %v9517_v5, %v3934_v9  ;;  %v3926_v9 = vmul.f32 0.5, %v3925_v48  ;;  %vm10420_vm15 = vmmov %vm10418_vm1 }
 0x598   : > { %v3664_v29 = vmul.f32 %v3620_v40, %v6692_v56  ;;  %v4188_v44 = vpop.f32.mrf.mxu2  ;;  %v4391_v58 = vmul.f32 %v4359_v41, %v9494_v38 }
 0x599   : > { %v9537_v27 = vadd.f32 %v9474_v51, %v4188_v44  ;;  %v3936_v0 = vmul.f32 0.5, %v3935_v59  ;;  %v4076_v44 = vmul.f32 %v9109_v45, %v4043_v12 }
 0x59a   : > { %v9541_v6 = vadd.f32 1.1920929e-07, %v3664_v29 }
 0x59b   : > { %v6119_v18 = vpop.eup %6118  ;;  %v4265_v21 = vmul.f32 0.5, %v9537_v27  ;;  %v3937_v15 = vsub.f32 1.5, %v3936_v0  ;;  %v4098_v38 = vpack.c.bf16 %v4077_v25, %v4076_v44 }
 0x59c   : > { %v4328_v46 = vadd.f32 1.0, %v6119_v18  ;;  %6120 = vrsqrt.f32 %v9541_v6  ;;  %v3927_v18 = vsub.f32 1.5, %v3926_v9  ;;  %vm3959_vm5 = vweird.f32 %v9541_v6 }
 0x59d   : > { %6122 = vrsqrt.f32 %v9534_v54 }
 0x59e   : > { %v4360_v57 = vmul.f32 0.5, %v4328_v46  ;;  %6124 = vtanh.f32 %v4265_v21 }
 0x59f   : > { %v3474_v36 = vpop.f32.mrf.mxu3 }
 0x5a0   : > { %v4392_v40 = vmul.f32 %v4360_v57, %v4186_v3  ;;  %v4190_v55 = vpop.f32.mrf.mxu2  ;;  %v3475_v59 = vadd.f32 %v3474_v36, %v8859_v49  ;;  %v3938_v3 = vmul.f32 %v9517_v5, %v3937_v15 }
 0x5a1   : > { %v4191_v29 = vadd.f32 %v9474_v51, %v4190_v55 }
 0x5a2   : > { %v9553_v7 = vpop.eup %6120  ;;  %v4423_v48 = vpack.c.bf16 %v4392_v40, %v4391_v58  ;;  %v9558_v8 = vadd.f32 %v3475_v59, %v8923_v2  ;;  %v3928_v2 = vmul.f32 %v9515_v16, %v3927_v18  ;;  %v3942_v1 = vsel %vm3941_vm8, %v9517_v5, %v3938_v3 }
 0x5a3   : > { %v9555_v46 = vpop.eup %6122  ;;  %v3954_v49 = vmul.f32 %v9553_v7, %v9541_v6  ;;  %v4266_v41 = vmul.f32 0.5, %v4191_v29  ;;  %v4046_v44 = vmul.f32 %v3942_v1, %v9207_v14  ;;  %vm3960_vm9 = vweird.f32 %v9553_v7 }
 0x5a4   : > { %4517 = vmatmul.bf16.vlgmr.msra.gmra.mxu3 %v4423_v48  ;;  %v3541_v0 = vmul.f32 %v9558_v8, %v9558_v8  ;;  %v6125_v21 = vpop.eup %6124  ;;  %v3944_v12 = vmul.f32 %v9555_v46, %v9534_v54  ;;  %v3932_v55 = vsel %vm3931_vm14, %v9515_v16, %v3928_v2  ;;  %vm3950_vm3 = vweird.f32 %v9555_v46  ;;  %vm3961_vm0 = vmor %vm3959_vm5, %vm3960_vm9 }
 0x5a5   : > { %5635 = vmatmul.msk.bf16.gmra.mxu2 %vm10416_vm6, %v4098_v38  ;;  %6126 = vtanh.f32 %v4266_v41  ;;  %v3955_v57 = vmul.f32 %v9553_v7, %v3954_v49  ;;  %v4329_v58 = vadd.f32 1.0, %v6125_v21  ;;  %v4045_v38 = vmul.f32 %v3932_v55, %v9186_v23  ;;  %vm3951_vm10 = vmor %vm3949_vm7, %vm3950_vm3 }
 0x5a6   : > { %v3633_v9 = vsel %vm10417_vm12, %v3541_v0, 0.0  ;;  %v3945_v59 = vmul.f32 %v9555_v46, %v3944_v12  ;;  %v4079_v21 = vmul.f32 %v9109_v45, %v4046_v44  ;;  %vm10421_vm7 = vmmov %vm10418_vm1 }
 0x5a7   : > { %v3476_v25 = vpop.f32.mrf.mxu3  ;;  %3634 = vadd.xlane.f32.xlu0 %v3633_v9  ;;  %v3956_v48 = vmul.f32 0.5, %v3955_v57  ;;  %v4361_v3 = vmul.f32 0.5, %v4329_v58  ;;  %v4078_v57 = vmul.f32 %v9109_v45, %v4045_v38 }
 0x5a8   : > { %v4193_v15 = vpop.f32.mrf.mxu2  ;;  %v3477_v40 = vadd.f32 %v3476_v25, %v8881_v10  ;;  %v3946_v41 = vmul.f32 0.5, %v3945_v59 }
 0x5a9   : > { %v4194_v36 = vadd.f32 %v9474_v51, %v4193_v15  ;;  %v3957_v2 = vsub.f32 1.5, %v3956_v48  ;;  %v4393_v12 = vmul.f32 %v4361_v3, %v9537_v27 }
 0x5aa   : > { %v9582_v39 = vadd.f32 %v3477_v40, %v8907_v30  ;;  %v3947_v25 = vsub.f32 1.5, %v3946_v41  ;;  %v4099_v40 = vpack.c.bf16 %v4079_v21, %v4078_v57 }
 0x5ab   : > { %v4267_v5 = vmul.f32 0.5, %v4194_v36  ;;  %v6127_v18 = vpop.eup %6126  ;;  %v3958_v55 = vmul.f32 %v9553_v7, %v3957_v2 }
 0x5ac   : > { %v4330_v49 = vadd.f32 1.0, %v6127_v18  ;;  %v3542_v10 = vmul.f32 %v9582_v39, %v9582_v39  ;;  %v3948_v27 = vmul.f32 %v9555_v46, %v3947_v25 }
 0x5ad   : > { %6128 = vtanh.f32 %v4267_v5 }
 0x5ae   : > { %v4362_v0 = vmul.f32 0.5, %v4330_v49  ;;  %v3636_v16 = vsel %vm10418_vm1, %v3542_v10, 0.0  ;;  %v3952_v48 = vsel %vm3951_vm10, %v9555_v46, %v3948_v27  ;;  %vm10423_vm10 = vmmov %vm10418_vm1 }
 0x5af   : > { %3637 = vadd.xlane.f32.xlu2 %v3636_v16  ;;  %v3629_v10 = vpop.xlane.xlu2 %3628  ;;  %v4047_v54 = vmul.f32 %v3952_v48, %v9232_v31 }
 0x5b0   : > { %v4195_v30 = vpop.f32.mrf.mxu2  ;;  %v4394_v9 = vmul.f32 %v4362_v0, %v4191_v29  ;;  %v3962_v29 = vsel %vm3961_vm0, %v9553_v7, %v3958_v55  ;;  %v3667_v21 = vmul.f32 %v3629_v10, %v6692_v56 }
 0x5b1   : > { %v4196_v1 = vadd.f32 %v9474_v51, %v4195_v30  ;;  %v4048_v49 = vmul.f32 %v3962_v29, %v9255_v60  ;;  %v4080_v25 = vmul.f32 %v9109_v45, %v4047_v54 }
 0x5b2   : > { %v4424_v58 = vpack.c.bf16 %v4394_v9, %v4393_v12 }
 0x5b3   : > { %v4268_v15 = vmul.f32 0.5, %v4196_v1  ;;  %v6129_v59 = vpop.eup %6128  ;;  %v4081_v46 = vmul.f32 %v9109_v45, %v4048_v49 }
 0x5b4   : > { %4522 = vmatmul.bf16.gmra.mxu3 %v4424_v58  ;;  %v4331_v44 = vadd.f32 1.0, %v6129_v59 }
 0x5b5   : > { %6130 = vtanh.f32 %v4268_v15  ;;  %5636 = vmatmul.msk.bf16.gmra.mxu2 %vm10419_vm2, %v4099_v40  ;;  %v9609_v15 = vadd.f32 1.1920929e-07, %v3667_v21 }
 0x5b6   : > { %v4363_v0 = vmul.f32 0.5, %v4331_v44  ;;  %v4100_v44 = vpack.c.bf16 %v4081_v46, %v4080_v25 }
 0x5b7   : > { %vm3989_vm5 = vweird.f32 %v9609_v15 }
 0x5b8   : > { %v4198_v5 = vpop.f32.mrf.mxu2  ;;  %v4395_v30 = vmul.f32 %v4363_v0, %v4194_v36 }
 0x5b9   : > { %v4199_v18 = vadd.f32 %v9474_v51, %v4198_v5 }
 0x5ba   : > { %v3623_v38 = vpop.xlane.xlu1 %3622 }
 0x5bb   : > { %v6131_v3 = vpop.eup %6130  ;;  %v4269_v41 = vmul.f32 0.5, %v4199_v18  ;;  %v3665_v6 = vmul.f32 %v3623_v38, %v6692_v56 }
 0x5bc   : > { %v4332_v16 = vadd.f32 1.0, %v6131_v3 }
 0x5bd   : > { %v3697_v7 = vadd.f32 1.1920929e-07, %v3665_v6  ;;  %6132 = vtanh.f32 %v4269_v41 }
 0x5be   : > { %v4364_v2 = vmul.f32 0.5, %v4332_v16 }
 0x5bf   : > { %6134 = vrsqrt.f32 %v3697_v7  ;;  %vm3969_vm6 = vweird.f32 %v3697_v7 }
 0x5c0   : > { %v4396_v12 = vmul.f32 %v4364_v2, %v4196_v1  ;;  %v4200_v9 = vpop.f32.mrf.mxu2 }
 0x5c1   : > { %v4201_v57 = vadd.f32 %v9474_v51, %v4200_v9 }
 0x5c2   : > { %v3632_v58 = vpop.xlane.xlu1 %3631  ;;  %v3626_v40 = vpop.xlane.xlu0 %3625  ;;  %v4425_v55 = vpack.c.bf16 %v4396_v12, %v4395_v30 }
 0x5c3   : > { %v4270_v59 = vmul.f32 0.5, %v4201_v57  ;;  %v3668_v27 = vmul.f32 %v3632_v58, %v6692_v56  ;;  %v3666_v29 = vmul.f32 %v3626_v40, %v6692_v56  ;;  %v6133_v5 = vpop.eup %6132 }
 0x5c4   : > { %4527 = vmatmul.bf16.gmra.mxu3 %v4425_v55  ;;  %v4333_v3 = vadd.f32 1.0, %v6133_v5 }
 0x5c5   : > { %v6135_v48 = vpop.eup %6134  ;;  %6136 = vtanh.f32 %v4270_v59  ;;  %v9613_v36 = vadd.f32 1.1920929e-07, %v3668_v27  ;;  %v3698_v1 = vadd.f32 1.1920929e-07, %v3666_v29  ;;  %5637 = vmatmul.msk.bf16.gmra.mxu2 %vm10420_vm15, %v4100_v44 }
 0x5c6   : > { %6138 = vrsqrt.f32 %v9609_v15  ;;  %v3964_v38 = vmul.f32 %v6135_v48, %v3697_v7  ;;  %v4365_v21 = vmul.f32 0.5, %v4333_v3  ;;  %vm3970_vm4 = vweird.f32 %v6135_v48 }
 0x5c7   : > { %6140 = vrsqrt.f32 %v9613_v36  ;;  %vm3971_vm11 = vmor %vm3969_vm6, %vm3970_vm4  ;;  %vm3979_vm12 = vweird.f32 %v3698_v1  ;;  %vm3999_vm2 = vweird.f32 %v9613_v36 }
 0x5c8   : > { %v3965_v49 = vmul.f32 %v6135_v48, %v3964_v38  ;;  %6142 = vrsqrt.f32 %v3698_v1  ;;  %v4203_v10 = vpop.f32.mrf.mxu2  ;;  %v4397_v55 = vmul.f32 %v4365_v21, %v4199_v18 }
 0x5c9   : > { %v4204_v41 = vadd.f32 %v9474_v51, %v4203_v10 }
 0x5ca   : > { %v3966_v6 = vmul.f32 0.5, %v3965_v49 }
 0x5cb   : > { %v6137_v0 = vpop.eup %6136  ;;  %v4271_v16 = vmul.f32 0.5, %v4204_v41 }
 0x5cc   : > { %v9619_v54 = vpop.eup %6138  ;;  %v4334_v2 = vadd.f32 1.0, %v6137_v0  ;;  %v3967_v30 = vsub.f32 1.5, %v3966_v6 }
 0x5cd   : > { %v9621_v46 = vpop.eup %6140  ;;  %6144 = vtanh.f32 %v4271_v16  ;;  %v3984_v40 = vmul.f32 %v9619_v54, %v9609_v15  ;;  %vm3990_vm9 = vweird.f32 %v9619_v54 }
 0x5ce   : > { %v6143_v12 = vpop.eup %6142  ;;  %v4366_v9 = vmul.f32 0.5, %v4334_v2  ;;  %v3994_v25 = vmul.f32 %v9621_v46, %v9613_v36  ;;  %v3968_v29 = vmul.f32 %v6135_v48, %v3967_v30  ;;  %vm4000_vm14 = vweird.f32 %v9621_v46  ;;  %vm3991_vm0 = vmor %vm3989_vm5, %vm3990_vm9 }
 0x5cf   : > { %v3974_v58 = vmul.f32 %v6143_v12, %v3698_v1  ;;  %v3985_v6 = vmul.f32 %v9619_v54, %v3984_v40  ;;  %vm3980_vm8 = vweird.f32 %v6143_v12  ;;  %vm4001_vm3 = vmor %vm3999_vm2, %vm4000_vm14 }
 0x5d0   : > { %v4398_v59 = vmul.f32 %v4366_v9, %v4201_v57  ;;  %v4205_v27 = vpop.f32.mrf.mxu2  ;;  %v3995_v3 = vmul.f32 %v9621_v46, %v3994_v25  ;;  %v3972_v16 = vsel %vm3971_vm11, %v6135_v48, %v3968_v29  ;;  %vm3981_vm13 = vmor %vm3979_vm12, %vm3980_vm8 }
 0x5d1   : > { %v3975_v44 = vmul.f32 %v6143_v12, %v3974_v58  ;;  %v4206_v5 = vadd.f32 %v9474_v51, %v4205_v27  ;;  %v4049_v21 = vmul.f32 %v3972_v16, %v9336_v17  ;;  %v3986_v9 = vmul.f32 0.5, %v3985_v6  ;;  %vm10425_vm8 = vmmov %vm10418_vm1 }
 0x5d2   : > { %v4426_v38 = vpack.c.bf16 %v4398_v59, %v4397_v55  ;;  %v3996_v18 = vmul.f32 0.5, %v3995_v3  ;;  %vm10426_vm14 = vmmov %vm10418_vm1 }
 0x5d3   : > { %v3976_v49 = vmul.f32 0.5, %v3975_v44  ;;  %v4272_v10 = vmul.f32 0.5, %v4206_v5  ;;  %v6145_v0 = vpop.eup %6144  ;;  %v4082_v44 = vmul.f32 %v9109_v45, %v4049_v21  ;;  %vm10427_vm9 = vmmov %vm10418_vm1 }
 0x5d4   : > { %4532 = vmatmul.bf16.gmra.mxu3 %v4426_v38  ;;  %v4335_v7 = vadd.f32 1.0, %v6145_v0  ;;  %v3997_v48 = vsub.f32 1.5, %v3996_v18  ;;  %v3987_v38 = vsub.f32 1.5, %v3986_v9  ;;  %vm10428_vm2 = vmmov %vm10418_vm1 }
 0x5d5   : > { %v3977_v2 = vsub.f32 1.5, %v3976_v49  ;;  %6146 = vtanh.f32 %v4272_v10  ;;  %vm10430_vm5 = vmmov %vm10418_vm1 }
 0x5d6   : > { %v4367_v27 = vmul.f32 0.5, %v4335_v7  ;;  %v3998_v10 = vmul.f32 %v9621_v46, %v3997_v48  ;;  %v3988_v16 = vmul.f32 %v9619_v54, %v3987_v38 }
 0x5d7   : > { %v3978_v57 = vmul.f32 %v6143_v12, %v3977_v2 }
 0x5d8   : > { %v4208_v30 = vpop.f32.mrf.mxu2 }
 0x5d9   : > { %v3982_v25 = vsel %vm3981_vm13, %v6143_v12, %v3978_v57  ;;  %v4209_v58 = vadd.f32 %v9474_v51, %v4208_v30  ;;  %v4399_v12 = vmul.f32 %v4367_v27, %v4204_v41  ;;  %v4002_v57 = vsel %vm4001_vm3, %v9621_v46, %v3998_v10  ;;  %vm10429_vm3 = vmmov %vm10418_vm1 }
 0x5da   : > { %v4050_v40 = vmul.f32 %v3982_v25, %v9367_v35  ;;  %v4052_v7 = vmul.f32 %v4002_v57, %v9354_v43 }
 0x5db   : > { %v6147_v55 = vpop.eup %6146  ;;  %v4273_v59 = vmul.f32 0.5, %v4209_v58 }
 0x5dc   : > { %v4336_v29 = vadd.f32 1.0, %v6147_v55  ;;  %v4083_v1 = vmul.f32 %v9109_v45, %v4050_v40  ;;  %v4085_v40 = vmul.f32 %v9109_v45, %v4052_v7 }
 0x5dd   : > { %6148 = vtanh.f32 %v4273_v59 }
 0x5de   : > { %v4368_v3 = vmul.f32 0.5, %v4336_v29  ;;  %v4101_v49 = vpack.c.bf16 %v4083_v1, %v4082_v44 }
 0x5e0   : > { %v4400_v6 = vmul.f32 %v4368_v3, %v4206_v5  ;;  %5638 = vmatmul.msk.bf16.gmra.mxu2 %vm10418_vm1, %v4101_v49  ;;  %v4210_v0 = vpop.f32.mrf.mxu2  ;;  %v3992_v5 = vsel %vm3991_vm0, %v9619_v54, %v3988_v16  ;;  %vm10431_vm0 = vmmov %vm10418_vm1 }
 0x5e1   : > { %v4211_v2 = vadd.f32 %v9474_v51, %v4210_v0  ;;  %v4051_v30 = vmul.f32 %v3992_v5, %v9310_v28 }
 0x5e2   : > { %v4427_v18 = vpack.c.bf16 %v4400_v6, %v4399_v12 }
 0x5e3   : > { %v4274_v21 = vmul.f32 0.5, %v4211_v2  ;;  %v6149_v41 = vpop.eup %6148  ;;  %v4084_v59 = vmul.f32 %v9109_v45, %v4051_v30 }
 0x5e4   : > { %4537 = vmatmul.bf16.gmra.mxu3 %v4427_v18  ;;  %v4337_v36 = vadd.f32 1.0, %v6149_v41 }
 0x5e5   : > { %6150 = vtanh.f32 %v4274_v21  ;;  %v4102_v54 = vpack.c.bf16 %v4085_v40, %v4084_v59 }
 0x5e6   : > { %v4369_v46 = vmul.f32 0.5, %v4337_v36 }
 0x5e8   : > { %v4213_v9 = vpop.f32.mrf.mxu2  ;;  %v4401_v29 = vmul.f32 %v4369_v46, %v4209_v58 }
 0x5e9   : > { %v4214_v25 = vadd.f32 %v9474_v51, %v4213_v9 }
 0x5eb   : > { %v6151_v15 = vpop.eup %6150  ;;  %v4275_v55 = vmul.f32 0.5, %v4214_v25 }
 0x5ec   : > { %v4338_v48 = vadd.f32 1.0, %v6151_v15 }
 0x5ed   : > { %6152 = vtanh.f32 %v4275_v55 }
 0x5ee   : > { %v4370_v27 = vmul.f32 0.5, %v4338_v48 }
 0x5f0   : > { %v4402_v44 = vmul.f32 %v4370_v27, %v4211_v2  ;;  %5639 = vmatmul.msk.bf16.gmra.mxu2 %vm10421_vm7, %v4102_v54  ;;  %v4215_v1 = vpop.f32.mrf.mxu2  ;;  %vm10432_vm7 = vmmov %vm10431_vm0 }
 0x5f1   : > { %v4216_v38 = vadd.f32 %v9474_v51, %v4215_v1 }
 0x5f2   : > { %v4428_v3 = vpack.c.bf16 %v4402_v44, %v4401_v29 }
 0x5f3   : > { %v4276_v49 = vmul.f32 0.5, %v4216_v38  ;;  %v6153_v10 = vpop.eup %6152 }
 0x5f4   : > { %4542 = vmatmul.bf16.gmra.mxu3 %v4428_v3  ;;  %v4339_v12 = vadd.f32 1.0, %v6153_v10 }
 0x5f5   : > { %6154 = vtanh.f32 %v4276_v49 }
 0x5f6   : > { %v4371_v57 = vmul.f32 0.5, %v4339_v12 }
 0x5f8   : > { %v4218_v6 = vpop.f32.mrf.mxu2  ;;  %v4403_v2 = vmul.f32 %v4371_v57, %v4214_v25 }
 0x5f9   : > { %v4219_v0 = vadd.f32 %v9474_v51, %v4218_v6 }
 0x5fb   : > { %v6155_v16 = vpop.eup %6154  ;;  %v4277_v18 = vmul.f32 0.5, %v4219_v0 }
 0x5fc   : > { %v4340_v21 = vadd.f32 1.0, %v6155_v16 }
 0x5fd   : > { %6156 = vtanh.f32 %v4277_v18 }
 0x5fe   : > { %v4372_v58 = vmul.f32 0.5, %v4340_v21 }
 0x600   : > { %v4404_v41 = vmul.f32 %v4372_v58, %v4216_v38  ;;  %v4220_v5 = vpop.f32.mrf.mxu2 }
 0x601   : > { %v4221_v7 = vadd.f32 %v9474_v51, %v4220_v5 }
 0x602   : > { %v4429_v30 = vpack.c.bf16 %v4404_v41, %v4403_v2 }
 0x603   : > { %v4278_v36 = vmul.f32 0.5, %v4221_v7  ;;  %v6157_v9 = vpop.eup %6156 }
 0x604   : > { %4547 = vmatmul.bf16.gmra.mxu3 %v4429_v30  ;;  %v4341_v40 = vadd.f32 1.0, %v6157_v9 }
 0x605   : > { %6158 = vtanh.f32 %v4278_v36 }
 0x606   : > { %v4373_v59 = vmul.f32 0.5, %v4341_v40 }
 0x608   : > { %v4223_v15 = vpop.f32.mrf.mxu2  ;;  %v4405_v25 = vmul.f32 %v4373_v59, %v4219_v0 }
 0x609   : > { %v4224_v55 = vadd.f32 %v9474_v51, %v4223_v15 }
 0x60b   : > { %v6159_v46 = vpop.eup %6158  ;;  %v4279_v48 = vmul.f32 0.5, %v4224_v55 }
 0x60c   : > { %v4342_v27 = vadd.f32 1.0, %v6159_v46 }
 0x60d   : > { %6160 = vtanh.f32 %v4279_v48  ;;  %v9663_v48 = vld [vmem:[%s10145_s7 + $0x1] ss:$0 sm:$0xff] }
 0x60e   : > { %v4374_v54 = vmul.f32 0.5, %v4342_v27 }
 0x610   : > { %v4406_v29 = vmul.f32 %v4374_v54, %v4221_v7  ;;  %v4225_v44 = vpop.f32.mrf.mxu2 }
 0x611   : > { %v4226_v1 = vadd.f32 %v9474_v51, %v4225_v44 }
 0x612   : > { %v4430_v38 = vpack.c.bf16 %v4406_v29, %v4405_v25 }
 0x613   : > { %v4280_v3 = vmul.f32 0.5, %v4226_v1  ;;  %v6161_v49 = vpop.eup %6160 }
 0x614   : > { %4552 = vmatmul.bf16.gmra.mxu3 %v4430_v38  ;;  %v4343_v10 = vadd.f32 1.0, %v6161_v49  ;;  %v10422_v49 = vld [vmem:[#allocation12_spill] sm:$0xff] }
 0x615   : > { %6162 = vtanh.f32 %v4280_v3 }
 0x616   : > { %v4375_v21 = vmul.f32 0.5, %v4343_v10 }
 0x618   : > { %v4228_v12 = vpop.f32.mrf.mxu2  ;;  %v4407_v5 = vmul.f32 %v4375_v21, %v4224_v55 }
 0x619   : > { %v4229_v6 = vadd.f32 %v9474_v51, %v4228_v12 }
 0x61a   : > { %v3635_v57 = vpop.xlane.xlu0 %3634 }
 0x61b   : > { %v6163_v16 = vpop.eup %6162  ;;  %v4281_v18 = vmul.f32 0.5, %v4229_v6  ;;  %v3669_v0 = vmul.f32 %v3635_v57, %v6692_v56 }
 0x61c   : > { %v4344_v58 = vadd.f32 1.0, %v6163_v16 }
 0x61d   : > { %v3701_v41 = vadd.f32 1.1920929e-07, %v3669_v0  ;;  %6164 = vtanh.f32 %v4281_v18 }
 0x61e   : > { %v4376_v2 = vmul.f32 0.5, %v4344_v58 }
 0x61f   : > { %6166 = vrsqrt.f32 %v3701_v41  ;;  %vm4009_vm4 = vweird.f32 %v3701_v41 }
 0x620   : > { %v4408_v7 = vmul.f32 %v4376_v2, %v4226_v1  ;;  %v4230_v30 = vpop.f32.mrf.mxu2 }
 0x621   : > { %v4231_v36 = vadd.f32 %v9474_v51, %v4230_v30 }
 0x622   : > { %v4431_v9 = vpack.c.bf16 %v4408_v7, %v4407_v5  ;;  %v3638_v15 = vpop.xlane.xlu2 %3637 }
 0x623   : > { %v4282_v40 = vmul.f32 0.5, %v4231_v36  ;;  %v3670_v46 = vmul.f32 %v3638_v15, %v6692_v56  ;;  %v6165_v59 = vpop.eup %6164 }
 0x624   : > { %4557 = vmatmul.bf16.gmra.mxu3 %v4431_v9  ;;  %v4345_v29 = vadd.f32 1.0, %v6165_v59 }
 0x625   : > { %6168 = vtanh.f32 %v4282_v40  ;;  %v6167_v27 = vpop.eup %6166  ;;  %v3702_v55 = vadd.f32 1.1920929e-07, %v3670_v46 }
 0x626   : > { %v4004_v54 = vmul.f32 %v6167_v27, %v3701_v41  ;;  %v4377_v57 = vmul.f32 0.5, %v4345_v29  ;;  %vm4010_vm15 = vweird.f32 %v6167_v27 }
 0x627   : > { %v4518_v25 = vpop.f32.mrf.mxu3  ;;  %6170 = vrsqrt.f32 %v3702_v55  ;;  %vm4011_vm6 = vmor %vm4009_vm4, %vm4010_vm15  ;;  %vm4019_vm12 = vweird.f32 %v3702_v55 }
 0x628   : > { %v4519_v44 = vadd.f32 %v9663_v48, %v4518_v25  ;;  %v4233_v1 = vpop.f32.mrf.mxu2  ;;  %v4005_v38 = vmul.f32 %v6167_v27, %v4004_v54  ;;  %v4409_v40 = vmul.f32 %v4377_v57, %v4229_v6  ;;  %vm10434_vm15 = vmmov %vm10431_vm0 }
 0x629   : > { %v4234_v3 = vadd.f32 %v9474_v51, %v4233_v1  ;;  %vm10435_vm4 = vmmov %vm10431_vm0 }
 0x62a   : > { %v9668_v10 = vadd.f32 %v4519_v44, %v10422_v49  ;;  %v4006_v16 = vmul.f32 0.5, %v4005_v38  ;;  %v10424_v44 = vld [vmem:[#allocation14_spill] sm:$0xff] }
 0x62b   : > { %v6169_v12 = vpop.eup %6168  ;;  %v4283_v18 = vmul.f32 0.5, %v4234_v3 }
 0x62c   : > { %v4346_v21 = vadd.f32 1.0, %v6169_v12  ;;  %v4631_v58 = vmul.f32 %v9668_v10, %v9668_v10  ;;  %v4007_v0 = vsub.f32 1.5, %v4006_v16 }
 0x62d   : > { %v6171_v2 = vpop.eup %6170  ;;  %6172 = vtanh.f32 %v4283_v18 }
 0x62e   : > { %v4378_v5 = vmul.f32 0.5, %v4346_v21  ;;  %v4663_v7 = vsel %vm10423_vm10, %v4631_v58, 0.0  ;;  %v4014_v30 = vmul.f32 %v6171_v2, %v3702_v55  ;;  %v4008_v54 = vmul.f32 %v6167_v27, %v4007_v0  ;;  %vm10433_vm10 = vmmov %vm10431_vm0 }
 0x62f   : > { %v4520_v9 = vpop.f32.mrf.mxu3  ;;  %4664 = vadd.xlane.f32.xlu1 %v4663_v7  ;;  %vm4020_vm11 = vweird.f32 %v6171_v2 }
 0x630   : > { %v4410_v15 = vmul.f32 %v4378_v5, %v4231_v36  ;;  %v4521_v46 = vadd.f32 %v9663_v48, %v4520_v9  ;;  %v4235_v59 = vpop.f32.mrf.mxu2  ;;  %v4015_v25 = vmul.f32 %v6171_v2, %v4014_v30  ;;  %v4012_v16 = vsel %vm4011_vm6, %v6167_v27, %v4008_v54  ;;  %vm4021_vm13 = vmor %vm4019_vm12, %vm4020_vm11 }
 0x631   : > { %v4236_v29 = vadd.f32 %v9474_v51, %v4235_v59  ;;  %v4053_v58 = vmul.f32 %v4012_v16, %v9558_v8  ;;  %vm10436_vm6 = vmmov %vm10431_vm0 }
 0x632   : > { %v9676_v1 = vadd.f32 %v4521_v46, %v10424_v44  ;;  %v4432_v38 = vpack.c.bf16 %v4410_v15, %v4409_v40  ;;  %v4016_v49 = vmul.f32 0.5, %v4015_v25  ;;  %vm10437_vm11 = vmmov %vm10431_vm0 }
 0x633   : > { %v4284_v12 = vmul.f32 0.5, %v4236_v29  ;;  %v6173_v36 = vpop.eup %6172  ;;  %v4086_v54 = vmul.f32 %v9109_v45, %v4053_v58  ;;  %vm10439_vm12 = vmmov %vm10431_vm0 }
 0x634   : > { %v4632_v6 = vmul.f32 %v9676_v1, %v9676_v1  ;;  %v4017_v18 = vsub.f32 1.5, %v4016_v49  ;;  %4562 = vmatmul.bf16.gmra.mxu3 %v4432_v38  ;;  %v4347_v41 = vadd.f32 1.0, %v6173_v36 }
 0x635   : > { %6174 = vtanh.f32 %v4284_v12 }
 0x636   : > { %v4666_v57 = vsel %vm10425_vm8, %v4632_v6, 0.0  ;;  %v4018_v21 = vmul.f32 %v6171_v2, %v4017_v18  ;;  %v4379_v55 = vmul.f32 0.5, %v4347_v41  ;;  %vm10438_vm8 = vmmov %vm10431_vm0 }
 0x637   : > { %4667 = vadd.xlane.f32.xlu0 %v4666_v57  ;;  %v4523_v0 = vpop.f32.mrf.mxu3 }
 0x638   : > { %v4238_v5 = vpop.f32.mrf.mxu2  ;;  %v4022_v7 = vsel %vm4021_vm13, %v6171_v2, %v4018_v21  ;;  %v4524_v30 = vadd.f32 %v9663_v48, %v4523_v0  ;;  %v4411_v12 = vmul.f32 %v4379_v55, %v4234_v3  ;;  %vm10440_vm13 = vmmov %vm10431_vm0 }
 0x639   : > { %v4239_v27 = vadd.f32 %v9474_v51, %v4238_v5  ;;  %v4054_v9 = vmul.f32 %v4022_v7, %v9582_v39 }
 0x63a   : > { %v9686_v15 = vadd.f32 %v4524_v30, %v8911_v34 }
 0x63b   : > { %v6175_v40 = vpop.eup %6174  ;;  %v4285_v46 = vmul.f32 0.5, %v4239_v27  ;;  %v4087_v25 = vmul.f32 %v9109_v45, %v4054_v9 }
 0x63c   : > { %v4348_v59 = vadd.f32 1.0, %v6175_v40  ;;  %v4633_v2 = vmul.f32 %v9686_v15, %v9686_v15 }
 0x63d   : > { %v4103_v38 = vpack.c.bf16 %v4087_v25, %v4086_v54  ;;  %6176 = vtanh.f32 %v4285_v46 }
 0x63e   : > { %v4380_v44 = vmul.f32 0.5, %v4348_v59  ;;  %v4669_v49 = vsel %vm10426_vm14, %v4633_v2, 0.0  ;;  %vm10441_vm14 = vmmov %vm10431_vm0 }
 0x63f   : > { %v4525_v36 = vpop.f32.mrf.mxu3  ;;  %4670 = vadd.xlane.f32.xlu2 %v4669_v49  ;;  %5640 = vmatmul.msk.bf16.gmra.mxu2 %vm10418_vm1, %v4103_v38 }
 0x640   : > { %v4412_v6 = vmul.f32 %v4380_v44, %v4236_v29  ;;  %v4240_v34 = vpop.f32.mrf.mxu2  ;;  %v4526_v16 = vadd.f32 %v9663_v48, %v4525_v36 }
 0x641   : > { %v4241_v18 = vadd.f32 %v9474_v51, %v4240_v34 }
 0x642   : > { %v4433_v45 = vpack.c.bf16 %v4412_v6, %v4411_v12  ;;  %v9697_v57 = vadd.f32 %v4526_v16, %v8892_v4 }
 0x643   : > { %v4286_v21 = vmul.f32 0.5, %v4241_v18  ;;  %v6177_v58 = vpop.eup %6176 }
 0x644   : > { %4567 = vmatmul.bf16.gmra.mxu3 %v4433_v45  ;;  %v4634_v3 = vmul.f32 %v9697_v57, %v9697_v57  ;;  %v4349_v41 = vadd.f32 1.0, %v6177_v58 }
 0x645   : > { %6178 = vtanh.f32 %v4286_v21 }
 0x646   : > { %v4672_v29 = vsel %vm10427_vm9, %v4634_v3, 0.0  ;;  %v4381_v46 = vmul.f32 0.5, %v4349_v41 }
 0x647   : > { %v4528_v0 = vpop.f32.mrf.mxu3  ;;  %4673 = vadd.xlane.f32.xlu1 %v4672_v29 }
 0x648   : > { %v4243_v5 = vpop.f32.mrf.mxu2  ;;  %v4529_v7 = vadd.f32 %v9663_v48, %v4528_v0  ;;  %v4413_v2 = vmul.f32 %v4381_v46, %v4239_v27 }
 0x649   : > { %v4244_v30 = vadd.f32 %v9474_v51, %v4243_v5 }
 0x64a   : > { %v9705_v4 = vadd.f32 %v4529_v7, %v8948_v20 }
 0x64b   : > { %v6179_v9 = vpop.eup %6178  ;;  %v4287_v40 = vmul.f32 0.5, %v4244_v30 }
 0x64c   : > { %v4350_v55 = vadd.f32 1.0, %v6179_v9  ;;  %v4635_v59 = vmul.f32 %v9705_v4, %v9705_v4 }
 0x64d   : > { %6180 = vtanh.f32 %v4287_v40 }
 0x64e   : > { %v4382_v54 = vmul.f32 0.5, %v4350_v55  ;;  %v4675_v25 = vsel %vm10428_vm2, %v4635_v59, 0.0 }
 0x64f   : > { %v4530_v38 = vpop.f32.mrf.mxu3  ;;  %4676 = vadd.xlane.f32.xlu0 %v4675_v25 }
 0x650   : > { %v4414_v44 = vmul.f32 %v4382_v54, %v4241_v18  ;;  %v4245_v49 = vpop.f32.mrf.mxu2  ;;  %v4531_v12 = vadd.f32 %v9663_v48, %v4530_v38 }
 0x651   : > { %v4246_v20 = vadd.f32 %v9474_v51, %v4245_v49 }
 0x652   : > { %v4434_v6 = vpack.c.bf16 %v4414_v44, %v4413_v2  ;;  %v9713_v36 = vadd.f32 %v4531_v12, %v8930_v22 }
 0x653   : > { %v4288_v34 = vmul.f32 0.5, %v4246_v20  ;;  %v6181_v16 = vpop.eup %6180 }
 0x654   : > { %4572 = vmatmul.bf16.gmra.mxu3 %v4434_v6  ;;  %v4636_v45 = vmul.f32 %v9713_v36, %v9713_v36  ;;  %v4351_v18 = vadd.f32 1.0, %v6181_v16 }
 0x655   : > { %6182 = vtanh.f32 %v4288_v34 }
 0x656   : > { %v4678_v27 = vsel %vm10429_vm3, %v4636_v45, 0.0  ;;  %v4383_v22 = vmul.f32 0.5, %v4351_v18  ;;  %v5745_v45 = vld [vmem:[%s10147_s9 + $0x8] sm:$0xff] }
 0x657   : > { %4679 = vadd.xlane.f32.xlu2 %v4678_v27  ;;  %v4533_v21 = vpop.f32.mrf.mxu3  ;;  %5296 = vmatpush.bf16.msra.mxu0 %v5745_v45 }
 0x658   : > { %v4534_v58 = vadd.f32 %v9663_v48, %v4533_v21  ;;  %v4415_v9 = vmul.f32 %v4383_v22, %v4244_v30 }
 0x65a   : > { %v9720_v29 = vadd.f32 %v4534_v58, %v8954_v52 }
 0x65b   : > { %v6183_v3 = vpop.eup %6182 }
 0x65c   : > { %v4352_v41 = vadd.f32 1.0, %v6183_v3  ;;  %v4637_v0 = vmul.f32 %v9720_v29, %v9720_v29 }
 0x65e   : > { %v4384_v5 = vmul.f32 0.5, %v4352_v41  ;;  %v4681_v7 = vsel %vm10430_vm5, %v4637_v0, 0.0 }
 0x65f   : > { %v4535_v46 = vpop.f32.mrf.mxu3  ;;  %4682 = vadd.xlane.f32.xlu1 %v4681_v7 }
 0x660   : > { %v4416_v40 = vmul.f32 %v4384_v5, %v4246_v20  ;;  %v4536_v55 = vadd.f32 %v9663_v48, %v4535_v46 }
 0x662   : > { %v4435_v59 = vpack.c.bf16 %v4416_v40, %v4415_v9  ;;  %v9727_v54 = vadd.f32 %v4536_v55, %v8966_v11 }
 0x663   : > { %v4248_v52 = vpop.f32.mrf.mxu2 }
 0x664   : > { %v4249_v25 = vadd.f32 %v9474_v51, %v4248_v52  ;;  %4577 = vmatmul.bf16.gmra.mxu3 %v4435_v59  ;;  %v4638_v2 = vmul.f32 %v9727_v54, %v9727_v54  ;;  %v9740_v51 = vld [vmem:[%s10143_s5 + $0x1] ss:$0 sm:$0xff] }
 0x666   : > { %v4289_v44 = vmul.f32 0.5, %v4249_v25  ;;  %v4684_v38 = vsel %vm10431_vm0, %v4638_v2, 0.0 }
 0x667   : > { %4685 = vadd.xlane.f32.xlu0 %v4684_v38  ;;  %v4538_v30 = vpop.f32.mrf.mxu3 }
 0x668   : > { %v4539_v49 = vadd.f32 %v9663_v48, %v4538_v30  ;;  %6184 = vtanh.f32 %v4289_v44 }
 0x66a   : > { %v9735_v12 = vadd.f32 %v4539_v49, %v8976_v42 }
 0x66b   : > { %v4250_v11 = vpop.f32.mrf.mxu2 }
 0x66c   : > { %v4251_v20 = vadd.f32 %v9740_v51, %v4250_v11  ;;  %v4639_v6 = vmul.f32 %v9735_v12, %v9735_v12 }
 0x66e   : > { %v4290_v34 = vmul.f32 0.5, %v4251_v20  ;;  %v4687_v16 = vsel %vm10432_vm7, %v4639_v6, 0.0  ;;  %v6185_v42 = vpop.eup %6184  ;;  %vm10442_vm7 = vmmov %vm10435_vm4 }
 0x66f   : > { %v4540_v27 = vpop.f32.mrf.mxu3  ;;  %4688 = vadd.xlane.f32.xlu2 %v4687_v16  ;;  %v4353_v21 = vadd.f32 1.0, %v6185_v42 }
 0x670   : > { %6186 = vtanh.f32 %v4290_v34  ;;  %v4541_v18 = vadd.f32 %v9663_v48, %v4540_v27 }
 0x671   : > { %v4385_v7 = vmul.f32 0.5, %v4353_v21 }
 0x672   : > { %v9751_v58 = vadd.f32 %v4541_v18, %v8984_v19 }
 0x673   : > { %v4253_v3 = vpop.f32.mrf.mxu2  ;;  %v4417_v19 = vmul.f32 %v4385_v7, %v4249_v25 }
 0x674   : > { %v4254_v22 = vadd.f32 %v9740_v51, %v4253_v3  ;;  %v4640_v41 = vmul.f32 %v9751_v58, %v9751_v58 }
 0x676   : > { %v6187_v0 = vpop.eup %6186  ;;  %v4291_v5 = vmul.f32 0.5, %v4254_v22  ;;  %v4690_v40 = vsel %vm10433_vm10, %v4640_v41, 0.0  ;;  %vm10443_vm10 = vmmov %vm10435_vm4 }
 0x677   : > { %v4354_v9 = vadd.f32 1.0, %v6187_v0  ;;  %v4543_v46 = vpop.f32.mrf.mxu3  ;;  %4691 = vadd.xlane.f32.xlu1 %v4690_v40 }
 0x678   : > { %v4544_v59 = vadd.f32 %v9663_v48, %v4543_v46  ;;  %6188 = vtanh.f32 %v4291_v5 }
 0x679   : > { %v4386_v55 = vmul.f32 0.5, %v4354_v9 }
 0x67a   : > { %v9759_v2 = vadd.f32 %v4544_v59, %v8995_v63 }
 0x67b   : > { %v4418_v52 = vmul.f32 %v4386_v55, %v4251_v20  ;;  %v4255_v44 = vpop.f32.mrf.mxu2 }
 0x67c   : > { %v4256_v38 = vadd.f32 %v9740_v51, %v4255_v44  ;;  %v4641_v49 = vmul.f32 %v9759_v2, %v9759_v2 }
 0x67d   : > { %v4436_v30 = vpack.c.bf16 %v4418_v52, %v4417_v19 }
 0x67e   : > { %v4292_v11 = vmul.f32 0.5, %v4256_v38  ;;  %v4693_v6 = vsel %vm10434_vm15, %v4641_v49, 0.0  ;;  %v6189_v34 = vpop.eup %6188  ;;  %vm10444_vm15 = vmmov %vm10435_vm4 }
 0x67f   : > { %4582 = vmatmul.bf16.gmra.mxu3 %v4436_v30  ;;  %v4545_v16 = vpop.f32.mrf.mxu3  ;;  %4694 = vadd.xlane.f32.xlu0 %v4693_v6  ;;  %v4355_v20 = vadd.f32 1.0, %v6189_v34 }
 0x680   : > { %6190 = vtanh.f32 %v4292_v11  ;;  %v4546_v25 = vadd.f32 %v9663_v48, %v4545_v16 }
 0x681   : > { %v4387_v27 = vmul.f32 0.5, %v4355_v20 }
 0x682   : > { %v9767_v63 = vadd.f32 %v4546_v25, %v9005_v37 }
 0x683   : > { %v4419_v5 = vmul.f32 %v4387_v27, %v4254_v22 }
 0x684   : > { %v4642_v45 = vmul.f32 %v9767_v63, %v9767_v63 }
 0x686   : > { %v6191_v42 = vpop.eup %6190  ;;  %v4696_v21 = vsel %vm10435_vm4, %v4642_v45, 0.0 }
 0x687   : > { %v4356_v18 = vadd.f32 1.0, %v6191_v42  ;;  %4697 = vadd.xlane.f32.xlu2 %v4696_v21  ;;  %v4548_v3 = vpop.f32.mrf.mxu3 }
 0x688   : > { %v4549_v0 = vadd.f32 %v9663_v48, %v4548_v3 }
 0x689   : > { %v4388_v41 = vmul.f32 0.5, %v4356_v18 }
 0x68a   : > { %v9774_v9 = vadd.f32 %v4549_v0, %v9015_v50 }
 0x68b   : > { %v4420_v7 = vmul.f32 %v4388_v41, %v4256_v38 }
 0x68c   : > { %v4643_v40 = vmul.f32 %v9774_v9, %v9774_v9 }
 0x68d   : > { %v4437_v37 = vpack.c.bf16 %v4420_v7, %v4419_v5 }
 0x68e   : > { %v4699_v46 = vsel %vm10436_vm6, %v4643_v40, 0.0 }
 0x68f   : > { %4587 = vmatmul.bf16.gmra.mxu3 %v4437_v37  ;;  %v4550_v55 = vpop.f32.mrf.mxu3  ;;  %4700 = vadd.xlane.f32.xlu1 %v4699_v46 }
 0x690   : > { %v4551_v59 = vadd.f32 %v9663_v48, %v4550_v55 }
 0x692   : > { %v9781_v19 = vadd.f32 %v4551_v59, %v9024_v24  ;;  %v5744_v59 = vld [vmem:[%s10147_s9] sm:$0xff] }
 0x693   : > { %5297 = vmatpush.bf16.msra.mxu0 %v5744_v59 }
 0x694   : > { %v4644_v22 = vmul.f32 %v9781_v19, %v9781_v19 }
 0x696   : > { %v4702_v50 = vsel %vm10437_vm11, %v4644_v22, 0.0 }
 0x697   : > { %4703 = vadd.xlane.f32.xlu0 %v4702_v50  ;;  %v4553_v52 = vpop.f32.mrf.mxu3 }
 0x698   : > { %v4554_v44 = vadd.f32 %v9663_v48, %v4553_v52 }
 0x69a   : > { %v9788_v38 = vadd.f32 %v4554_v44, %v9031_v62 }
 0x69c   : > { %v4645_v30 = vmul.f32 %v9788_v38, %v9788_v38 }
 0x69e   : > { %v4705_v49 = vsel %vm10438_vm8, %v4645_v30, 0.0 }
 0x69f   : > { %v4555_v11 = vpop.f32.mrf.mxu3  ;;  %4706 = vadd.xlane.f32.xlu2 %v4705_v49 }
 0x6a0   : > { %v4556_v24 = vadd.f32 %v9663_v48, %v4555_v11 }
 0x6a2   : > { %v4665_v6 = vpop.xlane.xlu1 %4664  ;;  %v9795_v34 = vadd.f32 %v4556_v24, %v9038_v53 }
 0x6a3   : > { %v4759_v16 = vmul.f32 %v4665_v6, %v6692_v56 }
 0x6a4   : > { %v4646_v62 = vmul.f32 %v9795_v34, %v9795_v34 }
 0x6a5   : > { %v4791_v25 = vadd.f32 1.1920929e-07, %v4759_v16 }
 0x6a6   : > { %v4708_v20 = vsel %vm10439_vm12, %v4646_v62, 0.0 }
 0x6a7   : > { %6192 = vrsqrt.f32 %v4791_v25  ;;  %v4558_v45 = vpop.f32.mrf.mxu3  ;;  %4709 = vadd.xlane.f32.xlu1 %v4708_v20  ;;  %vm4829_vm9 = vweird.f32 %v4791_v25 }
 0x6a8   : > { %v4559_v42 = vadd.f32 %v9663_v48, %v4558_v45 }
 0x6aa   : > { %v4668_v27 = vpop.xlane.xlu0 %4667  ;;  %v9803_v18 = vadd.f32 %v4559_v42, %v9045_v61 }
 0x6ab   : > { %v4760_v53 = vmul.f32 %v4668_v27, %v6692_v56 }
 0x6ac   : > { %v4647_v41 = vmul.f32 %v9803_v18, %v9803_v18 }
 0x6ad   : > { %v6193_v21 = vpop.eup %6192  ;;  %v4792_v3 = vadd.f32 1.1920929e-07, %v4760_v53 }
 0x6ae   : > { %v4824_v0 = vmul.f32 %v6193_v21, %v4791_v25  ;;  %v4711_v5 = vsel %vm10440_vm13, %v4647_v41, 0.0  ;;  %vm4830_vm1 = vweird.f32 %v6193_v21  ;;  %v9830_v25 = vld [vmem:[%s10146_s8] ss:$0 sm:$0xff]  ;;  %vm10445_vm13 = vmmov %vm10442_vm7 }
 0x6af   : > { %6194 = vrsqrt.f32 %v4792_v3  ;;  %v4560_v37 = vpop.f32.mrf.mxu3  ;;  %4712 = vadd.xlane.f32.xlu0 %v4711_v5  ;;  %vm4831_vm2 = vmor %vm4829_vm9, %vm4830_vm1  ;;  %vm4839_vm5 = vweird.f32 %v4792_v3 }
 0x6b0   : > { %v4825_v7 = vmul.f32 %v6193_v21, %v4824_v0  ;;  %v4561_v40 = vadd.f32 %v9663_v48, %v4560_v37  ;;  %vm10446_vm1 = vmmov %vm10442_vm7 }
 0x6b1   : > { %vm10447_vm9 = vmmov %vm10446_vm1 }
 0x6b2   : > { %v4826_v46 = vmul.f32 0.5, %v4825_v7  ;;  %v9811_v61 = vadd.f32 %v4561_v40, %v9053_v26  ;;  %v4671_v55 = vpop.xlane.xlu2 %4670 }
 0x6b3   : > { %v4761_v50 = vmul.f32 %v4671_v55, %v6692_v56 }
 0x6b4   : > { %v4827_v22 = vsub.f32 1.5, %v4826_v46  ;;  %v4648_v44 = vmul.f32 %v9811_v61, %v9811_v61 }
 0x6b5   : > { %v6195_v52 = vpop.eup %6194  ;;  %v4793_v49 = vadd.f32 1.1920929e-07, %v4761_v50 }
 0x6b6   : > { %v4834_v30 = vmul.f32 %v6195_v52, %v4792_v3  ;;  %v4714_v11 = vsel %vm10441_vm14, %v4648_v44, 0.0  ;;  %v4828_v24 = vmul.f32 %v6193_v21, %v4827_v22  ;;  %vm4840_vm3 = vweird.f32 %v6195_v52 }
 0x6b7   : > { %6196 = vrsqrt.f32 %v4793_v49  ;;  %4715 = vadd.xlane.f32.xlu2 %v4714_v11  ;;  %v4563_v6 = vpop.f32.mrf.mxu3  ;;  %vm4841_vm0 = vmor %vm4839_vm5, %vm4840_vm3  ;;  %vm4849_vm6 = vweird.f32 %v4793_v49 }
 0x6b8   : > { %v4835_v26 = vmul.f32 %v6195_v52, %v4834_v30  ;;  %v4564_v16 = vadd.f32 %v9663_v48, %v4563_v6  ;;  %v4832_v42 = vsel %vm4831_vm2, %v6193_v21, %v4828_v24 }
 0x6ba   : > { %v4836_v62 = vmul.f32 0.5, %v4835_v26  ;;  %v9822_v20 = vadd.f32 %v4564_v16, %v9060_v33  ;;  %v4674_v45 = vpop.xlane.xlu1 %4673  ;;  %v5143_v33 = vmul.f32 %v4832_v42, %v9668_v10 }
 0x6bb   : > { %v4762_v53 = vmul.f32 %v4674_v45, %v6692_v56 }
 0x6bc   : > { %v4837_v27 = vsub.f32 1.5, %v4836_v62  ;;  %v4649_v41 = vmul.f32 %v9822_v20, %v9822_v20  ;;  %v5178_v22 = vmul.f32 %v9830_v25, %v5143_v33 }
 0x6bd   : > { %v6197_v0 = vpop.eup %6196  ;;  %v4794_v7 = vadd.f32 1.1920929e-07, %v4762_v53 }
 0x6be   : > { %v4838_v5 = vmul.f32 %v6195_v52, %v4837_v27  ;;  %v4844_v21 = vmul.f32 %v6197_v0, %v4793_v49  ;;  %v4717_v37 = vsel %vm10442_vm7, %v4649_v41, 0.0  ;;  %vm4850_vm4 = vweird.f32 %v6197_v0 }
 0x6bf   : > { %6198 = vrsqrt.f32 %v4794_v7  ;;  %v4565_v46 = vpop.f32.mrf.mxu3  ;;  %4718 = vadd.xlane.f32.xlu1 %v4717_v37  ;;  %vm4851_vm11 = vmor %vm4849_vm6, %vm4850_vm4  ;;  %vm4859_vm12 = vweird.f32 %v4794_v7 }
 0x6c0   : > { %v4842_v40 = vsel %vm4841_vm0, %v6195_v52, %v4838_v5  ;;  %v4845_v59 = vmul.f32 %v6197_v0, %v4844_v21  ;;  %v4566_v3 = vadd.f32 %v9663_v48, %v4565_v46  ;;  %vm10449_vm4 = vmmov %vm10446_vm1 }
 0x6c1   : > { %v5144_v55 = vmul.f32 %v4842_v40, %v9676_v1  ;;  %vm10450_vm6 = vmmov %vm10446_vm1 }
 0x6c2   : > { %v4846_v44 = vmul.f32 0.5, %v4845_v59  ;;  %v9839_v10 = vadd.f32 %v4566_v3, %v9075_v13  ;;  %v4258_v30 = vpop.f32.mrf.mxu2  ;;  %v4677_v11 = vpop.xlane.xlu0 %4676 }
 0x6c3   : > { %v5179_v50 = vmul.f32 %v9830_v25, %v5144_v55  ;;  %v9842_v52 = vadd.f32 %v9740_v51, %v4258_v30  ;;  %v4763_v24 = vmul.f32 %v4677_v11, %v6692_v56 }
 0x6c4   : > { %v4847_v1 = vsub.f32 1.5, %v4846_v44  ;;  %v4650_v6 = vmul.f32 %v9839_v10, %v9839_v10 }
 0x6c5   : > { %v5210_v26 = vpack.c.bf16 %v5179_v50, %v5178_v22  ;;  %v6199_v16 = vpop.eup %6198  ;;  %v9847_v62 = vadd.f32 1.1920929e-07, %v4763_v24  ;;  %v4293_v42 = vmul.f32 0.5, %v9842_v52 }
 0x6c6   : > { %v4854_v45 = vmul.f32 %v6199_v16, %v4794_v7  ;;  %v4720_v13 = vsel %vm10443_vm10, %v4650_v6, 0.0  ;;  %v4848_v27 = vmul.f32 %v6197_v0, %v4847_v1  ;;  %vm4860_vm8 = vweird.f32 %v6199_v16  ;;  %vm10448_vm10 = vmmov %vm10446_vm1 }
 0x6c7   : > { %5698 = vmatmul.msk.bf16.vlgmr.msra.gmra.mxu0 %vm10444_vm15, %v5210_v26  ;;  %4721 = vadd.xlane.f32.xlu0 %v4720_v13  ;;  %v4568_v53 = vpop.f32.mrf.mxu3  ;;  %6200 = vrsqrt.f32 %v9847_v62  ;;  %vm4861_vm14 = vmor %vm4859_vm12, %vm4860_vm8  ;;  %vm4869_vm3 = vweird.f32 %v9847_v62 }
 0x6c8   : > { %v4855_v41 = vmul.f32 %v6199_v16, %v4854_v45  ;;  %v4569_v5 = vadd.f32 %v9663_v48, %v4568_v53  ;;  %6202 = vtanh.f32 %v4293_v42  ;;  %v4852_v46 = vsel %vm4851_vm11, %v6197_v0, %v4848_v27 }
 0x6c9   : > { %v5145_v30 = vmul.f32 %v4852_v46, %v9686_v15 }
 0x6ca   : > { %v4856_v33 = vmul.f32 0.5, %v4855_v41  ;;  %v9855_v21 = vadd.f32 %v4569_v5, %v9099_v47  ;;  %v4680_v37 = vpop.xlane.xlu2 %4679  ;;  %v4260_v40 = vpop.f32.mrf.mxu2 }
 0x6cb   : > { %v4764_v55 = vmul.f32 %v4680_v37, %v6692_v56  ;;  %v4261_v59 = vadd.f32 %v9740_v51, %v4260_v40  ;;  %v5180_v42 = vmul.f32 %v9830_v25, %v5145_v30 }
 0x6cc   : > { %v4857_v3 = vsub.f32 1.5, %v4856_v33  ;;  %v4651_v22 = vmul.f32 %v9855_v21, %v9855_v21 }
 0x6cd   : > { %v9861_v50 = vadd.f32 1.1920929e-07, %v4764_v55  ;;  %v4294_v49 = vmul.f32 0.5, %v4261_v59  ;;  %v6201_v44 = vpop.eup %6200 }
 0x6ce   : > { %v4858_v47 = vmul.f32 %v6199_v16, %v4857_v3  ;;  %v4723_v11 = vsel %vm10445_vm13, %v4651_v22, 0.0  ;;  %v4864_v0 = vmul.f32 %v6201_v44, %v9847_v62  ;;  %v6203_v24 = vpop.eup %6202  ;;  %vm4870_vm2 = vweird.f32 %v6201_v44 }
 0x6cf   : > { %6204 = vrsqrt.f32 %v9861_v50  ;;  %v4570_v51 = vpop.f32.mrf.mxu3  ;;  %4724 = vadd.xlane.f32.xlu2 %v4723_v11  ;;  %v4357_v13 = vadd.f32 1.0, %v6203_v24  ;;  %vm4871_vm5 = vmor %vm4869_vm3, %vm4870_vm2  ;;  %vm4879_vm7 = vweird.f32 %v9861_v50 }
 0x6d0   : > { %v4862_v26 = vsel %vm4861_vm14, %v6199_v16, %v4858_v47  ;;  %6206 = vtanh.f32 %v4294_v49  ;;  %v4571_v1 = vadd.f32 %v9663_v48, %v4570_v51  ;;  %v4865_v45 = vmul.f32 %v6201_v44, %v4864_v0  ;;  %vm10451_vm2 = vmmov %vm10446_vm1 }
 0x6d1   : > { %v5146_v6 = vmul.f32 %v4862_v26, %v9697_v57  ;;  %v4389_v55 = vmul.f32 0.5, %v4357_v13  ;;  %vm10452_vm3 = vmmov %vm10446_vm1 }
 0x6d2   : > { %v9870_v15 = vadd.f32 %v4571_v1, %v9131_v32  ;;  %v4683_v7 = vpop.xlane.xlu1 %4682  ;;  %v4866_v27 = vmul.f32 0.5, %v4865_v45 }
 0x6d3   : > { %v4765_v53 = vmul.f32 %v4683_v7, %v6692_v56  ;;  %v5181_v41 = vmul.f32 %v9830_v25, %v5146_v6  ;;  %v4421_v26 = vmul.f32 %v4389_v55, %v9842_v52 }
 0x6d4   : > { %v4652_v16 = vmul.f32 %v9870_v15, %v9870_v15  ;;  %v4867_v33 = vsub.f32 1.5, %v4866_v27 }
 0x6d5   : > { %v6205_v5 = vpop.eup %6204  ;;  %v9877_v37 = vadd.f32 1.1920929e-07, %v4765_v53  ;;  %v5211_v57 = vpack.c.bf16 %v5181_v41, %v5180_v42 }
 0x6d6   : > { %v6207_v40 = vpop.eup %6206  ;;  %v4874_v32 = vmul.f32 %v6205_v5, %v9861_v50  ;;  %v4726_v46 = vsel %vm10446_vm1, %v4652_v16, 0.0  ;;  %v4868_v49 = vmul.f32 %v6201_v44, %v4867_v33  ;;  %vm4880_vm0 = vweird.f32 %v6205_v5 }
 0x6d7   : > { %v4358_v3 = vadd.f32 1.0, %v6207_v40  ;;  %6208 = vrsqrt.f32 %v9877_v37  ;;  %v4573_v22 = vpop.f32.mrf.mxu3  ;;  %4727 = vadd.xlane.f32.xlu1 %v4726_v46  ;;  %5699 = vmatmul.msk.bf16.gmra.mxu0 %vm10447_vm9, %v5211_v57  ;;  %vm4881_vm15 = vmor %vm4879_vm7, %vm4880_vm0  ;;  %vm4889_vm8 = vweird.f32 %v9877_v37 }
 0x6d8   : > { %v4875_v30 = vmul.f32 %v6205_v5, %v4874_v32  ;;  %v4574_v47 = vadd.f32 %v9663_v48, %v4573_v22  ;;  %v4872_v45 = vsel %vm4871_vm5, %v6201_v44, %v4868_v49 }
 0x6d9   : > { %v4390_v11 = vmul.f32 0.5, %v4358_v3 }
 0x6da   : > { %v4876_v0 = vmul.f32 0.5, %v4875_v30  ;;  %v9886_v51 = vadd.f32 %v4574_v47, %v9186_v23  ;;  %v4686_v24 = vpop.xlane.xlu0 %4685 }
 0x6db   : > { %v4422_v1 = vmul.f32 %v4390_v11, %v4261_v59  ;;  %v4766_v6 = vmul.f32 %v4686_v24, %v6692_v56  ;;  %v5147_v59 = vmul.f32 %v4872_v45, %v9705_v4 }
 0x6dc   : > { %v4877_v7 = vsub.f32 1.5, %v4876_v0  ;;  %v4653_v42 = vmul.f32 %v9886_v51, %v9886_v51 }
 0x6dd   : > { %v6209_v13 = vpop.eup %6208  ;;  %v4798_v27 = vadd.f32 1.1920929e-07, %v4766_v6  ;;  %v4438_v62 = vpack.c.bf16 %v4422_v1, %v4421_v26  ;;  %v5182_v4 = vmul.f32 %v9830_v25, %v5147_v59 }
 0x6de   : > { %v4878_v53 = vmul.f32 %v6205_v5, %v4877_v7  ;;  %v4884_v23 = vmul.f32 %v6209_v13, %v9877_v37  ;;  %v4729_v52 = vsel %vm10448_vm10, %v4653_v42, 0.0  ;;  %vm4890_vm11 = vweird.f32 %v6209_v13 }
 0x6df   : > { %6210 = vrsqrt.f32 %v4798_v27  ;;  %4592 = vmatmul.bf16.gmra.mxu3 %v4438_v62  ;;  %v4575_v44 = vpop.f32.mrf.mxu3  ;;  %4730 = vadd.xlane.f32.xlu0 %v4729_v52  ;;  %vm4891_vm12 = vmor %vm4889_vm8, %vm4890_vm11  ;;  %vm4899_vm14 = vweird.f32 %v4798_v27 }
 0x6e0   : > { %v4882_v41 = vsel %vm4881_vm15, %v6205_v5, %v4878_v53  ;;  %v4885_v16 = vmul.f32 %v6209_v13, %v4884_v23  ;;  %v4576_v33 = vadd.f32 %v9663_v48, %v4575_v44  ;;  %vm10454_vm8 = vmmov %vm10446_vm1 }
 0x6e1   : > { %v5148_v57 = vmul.f32 %v4882_v41, %v9713_v36 }
 0x6e2   : > { %v4886_v40 = vmul.f32 0.5, %v4885_v16  ;;  %v9899_v50 = vadd.f32 %v4576_v33, %v9207_v14  ;;  %v4689_v32 = vpop.xlane.xlu2 %4688 }
 0x6e3   : > { %v4767_v46 = vmul.f32 %v4689_v32, %v6692_v56  ;;  %v5183_v55 = vmul.f32 %v9830_v25, %v5148_v57 }
 0x6e4   : > { %v4887_v3 = vsub.f32 1.5, %v4886_v40  ;;  %v4654_v5 = vmul.f32 %v9899_v50, %v9899_v50 }
 0x6e5   : > { %v6211_v22 = vpop.eup %6210  ;;  %v4799_v49 = vadd.f32 1.1920929e-07, %v4767_v46  ;;  %v5212_v30 = vpack.c.bf16 %v5183_v55, %v5182_v4 }
 0x6e6   : > { %v4894_v47 = vmul.f32 %v6211_v22, %v4798_v27  ;;  %v4732_v36 = vsel %vm10449_vm4, %v4654_v5, 0.0  ;;  %v4888_v11 = vmul.f32 %v6209_v13, %v4887_v3  ;;  %vm4900_vm13 = vweird.f32 %v6211_v22 }
 0x6e7   : > { %6212 = vrsqrt.f32 %v4799_v49  ;;  %4733 = vadd.xlane.f32.xlu2 %v4732_v36  ;;  %v4578_v14 = vpop.f32.mrf.mxu3  ;;  %5700 = vmatmul.msk.bf16.gmra.mxu0 %vm10450_vm6, %v5212_v30  ;;  %vm4901_vm9 = vmor %vm4899_vm14, %vm4900_vm13  ;;  %vm4909_vm0 = vweird.f32 %v4799_v49 }
 0x6e8   : > { %v4895_v0 = vmul.f32 %v6211_v22, %v4894_v47  ;;  %v4579_v24 = vadd.f32 %v9663_v48, %v4578_v14  ;;  %v4892_v7 = vsel %vm4891_vm12, %v6209_v13, %v4888_v11  ;;  %vm10453_vm6 = vmmov %vm10446_vm1 }
 0x6ea   : > { %v4896_v26 = vmul.f32 0.5, %v4895_v0  ;;  %v9911_v1 = vadd.f32 %v4579_v24, %v9232_v31  ;;  %v4692_v6 = vpop.xlane.xlu1 %4691  ;;  %v5149_v31 = vmul.f32 %v4892_v7, %v9720_v29 }
 0x6eb   : > { %v4768_v45 = vmul.f32 %v4692_v6, %v6692_v56 }
 0x6ec   : > { %v4897_v42 = vsub.f32 1.5, %v4896_v26  ;;  %v4655_v62 = vmul.f32 %v9911_v1, %v9911_v1  ;;  %v5184_v46 = vmul.f32 %v9830_v25, %v5149_v31 }
 0x6ed   : > { %v6213_v53 = vpop.eup %6212  ;;  %v4800_v23 = vadd.f32 1.1920929e-07, %v4768_v45 }
 0x6ee   : > { %v4898_v52 = vmul.f32 %v6211_v22, %v4897_v42  ;;  %v4904_v59 = vmul.f32 %v6213_v53, %v4799_v49  ;;  %v4735_v37 = vsel %vm10446_vm1, %v4655_v62, 0.0  ;;  %vm4910_vm5 = vweird.f32 %v6213_v53 }
 0x6ef   : > { %6214 = vrsqrt.f32 %v4800_v23  ;;  %v4580_v44 = vpop.f32.mrf.mxu3  ;;  %4736 = vadd.xlane.f32.xlu1 %v4735_v37  ;;  %vm4911_vm7 = vmor %vm4909_vm0, %vm4910_vm5  ;;  %vm4919_vm15 = vweird.f32 %v4800_v23 }
 0x6f0   : > { %v4902_v41 = vsel %vm4901_vm9, %v6211_v22, %v4898_v52  ;;  %v4905_v13 = vmul.f32 %v6213_v53, %v4904_v59  ;;  %v4581_v16 = vadd.f32 %v9663_v48, %v4580_v44  ;;  %vm10456_vm0 = vmmov %vm10451_vm2 }
 0x6f1   : > { %v5150_v33 = vmul.f32 %v4902_v41, %v9727_v54 }
 0x6f2   : > { %v4906_v57 = vmul.f32 0.5, %v4905_v13  ;;  %v9921_v40 = vadd.f32 %v4581_v16, %v9255_v60  ;;  %v4695_v27 = vpop.xlane.xlu0 %4694 }
 0x6f3   : > { %v4769_v32 = vmul.f32 %v4695_v27, %v6692_v56  ;;  %v5185_v29 = vmul.f32 %v9830_v25, %v5150_v33 }
 0x6f4   : > { %v4907_v4 = vsub.f32 1.5, %v4906_v57  ;;  %v4656_v55 = vmul.f32 %v9921_v40, %v9921_v40 }
 0x6f5   : > { %v6215_v3 = vpop.eup %6214  ;;  %v4801_v5 = vadd.f32 1.1920929e-07, %v4769_v32  ;;  %v5213_v22 = vpack.c.bf16 %v5185_v29, %v5184_v46 }
 0x6f6   : > { %v4914_v30 = vmul.f32 %v6215_v3, %v4800_v23  ;;  %v4738_v54 = vsel %vm10451_vm2, %v4656_v55, 0.0  ;;  %v4908_v60 = vmul.f32 %v6213_v53, %v4907_v4  ;;  %vm4920_vm10 = vweird.f32 %v6215_v3 }
 0x6f7   : > { %6216 = vrsqrt.f32 %v4801_v5  ;;  %4739 = vadd.xlane.f32.xlu0 %v4738_v54  ;;  %5701 = vmatmul.msk.bf16.gmra.mxu0 %vm10452_vm3, %v5213_v22  ;;  %vm4921_vm4 = vmor %vm4919_vm15, %vm4920_vm10  ;;  %vm4929_vm12 = vweird.f32 %v4801_v5 }
 0x6f8   : > { %v4915_v47 = vmul.f32 %v6215_v3, %v4914_v30  ;;  %v4912_v0 = vsel %vm4911_vm7, %v6213_v53, %v4908_v60  ;;  %vm10455_vm3 = vmmov %vm10451_vm2 }
 0x6f9   : > { %v5151_v42 = vmul.f32 %v4912_v0, %v9735_v12 }
 0x6fa   : > { %v4916_v36 = vmul.f32 0.5, %v4915_v47  ;;  %v4698_v14 = vpop.xlane.xlu2 %4697 }
 0x6fb   : > { %v4770_v11 = vmul.f32 %v4698_v14, %v6692_v56  ;;  %v5186_v41 = vmul.f32 %v9830_v25, %v5151_v42 }
 0x6fc   : > { %v4917_v24 = vsub.f32 1.5, %v4916_v36 }
 0x6fd   : > { %v6217_v26 = vpop.eup %6216  ;;  %v4802_v6 = vadd.f32 1.1920929e-07, %v4770_v11 }
 0x6fe   : > { %v4918_v45 = vmul.f32 %v6215_v3, %v4917_v24  ;;  %v4924_v7 = vmul.f32 %v6217_v26, %v4801_v5  ;;  %vm4930_vm11 = vweird.f32 %v6217_v26 }
 0x6ff   : > { %6218 = vrsqrt.f32 %v4802_v6  ;;  %vm4931_vm13 = vmor %vm4929_vm12, %vm4930_vm11  ;;  %vm4939_vm1 = vweird.f32 %v4802_v6 }
 0x700   : > { %v4922_v62 = vsel %vm4921_vm4, %v6215_v3, %v4918_v45  ;;  %v4925_v52 = vmul.f32 %v6217_v26, %v4924_v7  ;;  %vm10457_vm11 = vmmov %vm10456_vm0 }
 0x701   : > { %v5152_v49 = vmul.f32 %v4922_v62, %v9751_v58 }
 0x702   : > { %v4583_v59 = vpop.f32.mrf.mxu3  ;;  %v4926_v37 = vmul.f32 0.5, %v4925_v52  ;;  %v4701_v53 = vpop.xlane.xlu1 %4700 }
 0x703   : > { %v4584_v31 = vadd.f32 %v9663_v48, %v4583_v59  ;;  %v4771_v44 = vmul.f32 %v4701_v53, %v6692_v56  ;;  %v5187_v23 = vmul.f32 %v9830_v25, %v5152_v49 }
 0x704   : > { %v4927_v13 = vsub.f32 1.5, %v4926_v37 }
 0x705   : > { %v9938_v12 = vadd.f32 %v4584_v31, %v9336_v17  ;;  %v6219_v16 = vpop.eup %6218  ;;  %v9940_v33 = vadd.f32 1.1920929e-07, %v4771_v44  ;;  %v5214_v57 = vpack.c.bf16 %v5187_v23, %v5186_v41 }
 0x706   : > { %v4934_v58 = vmul.f32 %v6219_v16, %v4802_v6  ;;  %v4928_v32 = vmul.f32 %v6217_v26, %v4927_v13  ;;  %vm4940_vm14 = vweird.f32 %v6219_v16  ;;  %v9961_v6 = vld [vmem:[%s10145_s7 + $0x1] ss:$0 sm:$0xff] }
 0x707   : > { %v4657_v27 = vmul.f32 %v9938_v12, %v9938_v12  ;;  %6220 = vrsqrt.f32 %v9940_v33  ;;  %5702 = vmatmul.msk.bf16.gmra.mxu0 %vm10453_vm6, %v5214_v57  ;;  %vm4941_vm9 = vmor %vm4939_vm1, %vm4940_vm14  ;;  %vm4949_vm7 = vweird.f32 %v9940_v33 }
 0x708   : > { %v4935_v46 = vmul.f32 %v6219_v16, %v4934_v58  ;;  %v4932_v30 = vsel %vm4931_vm13, %v6217_v26, %v4928_v32 }
 0x709   : > { %v4741_v29 = vsel %vm10454_vm8, %v4657_v27, 0.0  ;;  %vm10458_vm8 = vmmov %vm10456_vm0 }
 0x70a   : > { %v4585_v4 = vpop.f32.mrf.mxu3  ;;  %4742 = vadd.xlane.f32.xlu2 %v4741_v29  ;;  %v4936_v17 = vmul.f32 0.5, %v4935_v46  ;;  %v4704_v3 = vpop.xlane.xlu0 %4703 }
 0x70b   : > { %v4586_v55 = vadd.f32 %v9663_v48, %v4585_v4  ;;  %v4772_v22 = vmul.f32 %v4704_v3, %v6692_v56  ;;  %v5153_v48 = vmul.f32 %v4932_v30, %v9759_v2 }
 0x70c   : > { %v4937_v54 = vsub.f32 1.5, %v4936_v17 }
 0x70d   : > { %v9950_v60 = vadd.f32 %v4586_v55, %v9367_v35  ;;  %v6221_v47 = vpop.eup %6220  ;;  %v4804_v36 = vadd.f32 1.1920929e-07, %v4772_v22  ;;  %v5188_v52 = vmul.f32 %v9830_v25, %v5153_v48 }
 0x70e   : > { %v4938_v14 = vmul.f32 %v6219_v16, %v4937_v54  ;;  %v4944_v11 = vmul.f32 %v6221_v47, %v9940_v33  ;;  %vm4950_vm5 = vweird.f32 %v6221_v47 }
 0x70f   : > { %v4658_v5 = vmul.f32 %v9950_v60, %v9950_v60  ;;  %6222 = vrsqrt.f32 %v4804_v36  ;;  %vm4951_vm10 = vmor %vm4949_vm7, %vm4950_vm5  ;;  %vm4959_vm4 = vweird.f32 %v4804_v36 }
 0x710   : > { %v4942_v0 = vsel %vm4941_vm9, %v6219_v16, %v4938_v14  ;;  %v4945_v24 = vmul.f32 %v6221_v47, %v4944_v11 }
 0x711   : > { %v4744_v26 = vsel %vm10451_vm2, %v4658_v5, 0.0  ;;  %v5154_v35 = vmul.f32 %v4942_v0, %v9767_v63 }
 0x712   : > { %v4588_v45 = vpop.f32.mrf.mxu3  ;;  %4745 = vadd.xlane.f32.xlu1 %v4744_v26  ;;  %v4946_v7 = vmul.f32 0.5, %v4945_v24  ;;  %v4707_v62 = vpop.xlane.xlu2 %4706 }
 0x713   : > { %v4589_v42 = vadd.f32 %v9961_v6, %v4588_v45  ;;  %v4773_v2 = vmul.f32 %v4707_v62, %v6692_v56  ;;  %v5189_v49 = vmul.f32 %v9830_v25, %v5154_v35 }
 0x714   : > { %v4947_v59 = vsub.f32 1.5, %v4946_v7 }
 0x715   : > { %v9968_v63 = vadd.f32 %v4589_v42, %v9310_v28  ;;  %v6223_v37 = vpop.eup %6222  ;;  %v4805_v31 = vadd.f32 1.1920929e-07, %v4773_v2  ;;  %v5215_v53 = vpack.c.bf16 %v5189_v49, %v5188_v52 }
 0x716   : > { %v4954_v44 = vmul.f32 %v6223_v37, %v4804_v36  ;;  %v4948_v23 = vmul.f32 %v6221_v47, %v4947_v59  ;;  %vm4960_vm15 = vweird.f32 %v6223_v37 }
 0x717   : > { %v4659_v41 = vmul.f32 %v9968_v63, %v9968_v63  ;;  %6224 = vrsqrt.f32 %v4805_v31  ;;  %5703 = vmatmul.msk.bf16.gmra.mxu0 %vm10455_vm3, %v5215_v53  ;;  %vm4961_vm6 = vmor %vm4959_vm4, %vm4960_vm15  ;;  %vm4969_vm13 = vweird.f32 %v4805_v31 }
 0x718   : > { %v4955_v13 = vmul.f32 %v6223_v37, %v4954_v44  ;;  %v4952_v46 = vsel %vm4951_vm10, %v6221_v47, %v4948_v23  ;;  %vm10459_vm3 = vmmov %vm10456_vm0 }
 0x719   : > { %v4747_v16 = vsel %vm10456_vm0, %v4659_v41, 0.0  ;;  %v5155_v30 = vmul.f32 %v4952_v46, %v9774_v9 }
 0x71a   : > { %v4590_v57 = vpop.f32.mrf.mxu3  ;;  %4748 = vadd.xlane.f32.xlu0 %v4747_v16  ;;  %v4956_v28 = vmul.f32 0.5, %v4955_v13  ;;  %v4710_v27 = vpop.xlane.xlu1 %4709 }
 0x71b   : > { %v4591_v58 = vadd.f32 %v9961_v6, %v4590_v57  ;;  %v4774_v32 = vmul.f32 %v4710_v27, %v6692_v56  ;;  %v5190_v36 = vmul.f32 %v9830_v25, %v5155_v30 }
 0x71c   : > { %v4957_v29 = vsub.f32 1.5, %v4956_v28 }
 0x71d   : > { %v9978_v4 = vadd.f32 %v4591_v58, %v9354_v43  ;;  %v6225_v17 = vpop.eup %6224  ;;  %v4806_v55 = vadd.f32 1.1920929e-07, %v4774_v32 }
 0x71e   : > { %v4958_v3 = vmul.f32 %v6223_v37, %v4957_v29  ;;  %v4964_v22 = vmul.f32 %v6225_v17, %v4805_v31  ;;  %vm4970_vm12 = vweird.f32 %v6225_v17 }
 0x71f   : > { %v4660_v33 = vmul.f32 %v9978_v4, %v9978_v4  ;;  %6226 = vrsqrt.f32 %v4806_v55  ;;  %vm4971_vm14 = vmor %vm4969_vm13, %vm4970_vm12  ;;  %vm4979_vm9 = vweird.f32 %v4806_v55 }
 0x720   : > { %v4962_v54 = vsel %vm4961_vm6, %v6223_v37, %v4958_v3  ;;  %v4965_v14 = vmul.f32 %v6225_v17, %v4964_v22  ;;  %vm10460_vm6 = vmmov %vm10459_vm3 }
 0x721   : > { %v4750_v47 = vsel %vm10457_vm11, %v4660_v33, 0.0  ;;  %v5156_v11 = vmul.f32 %v4962_v54, %v9781_v19 }
 0x722   : > { %4751 = vadd.xlane.f32.xlu2 %v4750_v47  ;;  %v4966_v43 = vmul.f32 0.5, %v4965_v14  ;;  %v4713_v5 = vpop.xlane.xlu0 %4712 }
 0x723   : > { %v4775_v48 = vmul.f32 %v4713_v5, %v6692_v56  ;;  %v5191_v0 = vmul.f32 %v9830_v25, %v5156_v11 }
 0x724   : > { %v4967_v24 = vsub.f32 1.5, %v4966_v43 }
 0x725   : > { %v6227_v26 = vpop.eup %6226  ;;  %v4807_v9 = vadd.f32 1.1920929e-07, %v4775_v48  ;;  %v5216_v35 = vpack.c.bf16 %v5191_v0, %v5190_v36 }
 0x726   : > { %v4974_v45 = vmul.f32 %v6227_v26, %v4806_v55  ;;  %v4968_v7 = vmul.f32 %v6225_v17, %v4967_v24  ;;  %vm4980_vm1 = vweird.f32 %v6227_v26 }
 0x727   : > { %6228 = vrsqrt.f32 %v4807_v9  ;;  %5704 = vmatmul.msk.bf16.gmra.mxu0 %vm10458_vm8, %v5216_v35  ;;  %vm4981_vm2 = vmor %vm4979_vm9, %vm4980_vm1  ;;  %vm4989_vm0 = vweird.f32 %v4807_v9 }
 0x728   : > { %v4975_v19 = vmul.f32 %v6227_v26, %v4974_v45  ;;  %v4972_v52 = vsel %vm4971_vm14, %v6225_v17, %v4968_v7  ;;  %vm10461_vm9 = vmmov %vm10459_vm3 }
 0x729   : > { %v5157_v41 = vmul.f32 %v4972_v52, %v9788_v38 }
 0x72a   : > { %v4976_v42 = vmul.f32 0.5, %v4975_v19  ;;  %v4716_v62 = vpop.xlane.xlu2 %4715 }
 0x72b   : > { %v4776_v2 = vmul.f32 %v4716_v62, %v6692_v56  ;;  %v5192_v58 = vmul.f32 %v9830_v25, %v5157_v41 }
 0x72c   : > { %v4977_v49 = vsub.f32 1.5, %v4976_v42 }
 0x72d   : > { %v6229_v59 = vpop.eup %6228  ;;  %v4808_v37 = vadd.f32 1.1920929e-07, %v4776_v2 }
 0x72e   : > { %v4978_v53 = vmul.f32 %v6227_v26, %v4977_v49  ;;  %v4984_v44 = vmul.f32 %v6229_v59, %v4807_v9  ;;  %vm4990_vm5 = vweird.f32 %v6229_v59 }
 0x72f   : > { %6230 = vrsqrt.f32 %v4808_v37  ;;  %vm4991_vm7 = vmor %vm4989_vm0, %vm4990_vm5  ;;  %vm4999_vm15 = vweird.f32 %v4808_v37 }
 0x730   : > { %v4982_v23 = vsel %vm4981_vm2, %v6227_v26, %v4978_v53  ;;  %v4985_v13 = vmul.f32 %v6229_v59, %v4984_v44 }
 0x731   : > { %v5158_v31 = vmul.f32 %v4982_v23, %v9795_v34 }
 0x732   : > { %v4986_v16 = vmul.f32 0.5, %v4985_v13  ;;  %v4719_v57 = vpop.xlane.xlu1 %4718 }
 0x733   : > { %v4777_v28 = vmul.f32 %v4719_v57, %v6692_v56  ;;  %v5193_v27 = vmul.f32 %v9830_v25, %v5158_v31 }
 0x734   : > { %v4987_v32 = vsub.f32 1.5, %v4986_v16 }
 0x735   : > { %v6231_v46 = vpop.eup %6230  ;;  %v4809_v29 = vadd.f32 1.1920929e-07, %v4777_v28  ;;  %v5217_v17 = vpack.c.bf16 %v5193_v27, %v5192_v58 }
 0x736   : > { %v4994_v55 = vmul.f32 %v6231_v46, %v4808_v37  ;;  %v4988_v38 = vmul.f32 %v6229_v59, %v4987_v32  ;;  %vm5000_vm10 = vweird.f32 %v6231_v46 }
 0x737   : > { %6232 = vrsqrt.f32 %v4809_v29  ;;  %5705 = vmatmul.msk.bf16.gmra.mxu0 %vm10459_vm3, %v5217_v17  ;;  %vm5001_vm4 = vmor %vm4999_vm15, %vm5000_vm10  ;;  %vm5009_vm8 = vweird.f32 %v4809_v29 }
 0x738   : > { %v4995_v3 = vmul.f32 %v6231_v46, %v4994_v55  ;;  %v4992_v30 = vsel %vm4991_vm7, %v6229_v59, %v4988_v38  ;;  %vm10462_vm15 = vmmov %vm10460_vm6 }
 0x739   : > { %v5159_v5 = vmul.f32 %v4992_v30, %v9803_v18 }
 0x73a   : > { %v4996_v34 = vmul.f32 0.5, %v4995_v3  ;;  %v4722_v22 = vpop.xlane.xlu0 %4721 }
 0x73b   : > { %v4778_v33 = vmul.f32 %v4722_v22, %v6692_v56  ;;  %v5194_v45 = vmul.f32 %v9830_v25, %v5159_v5 }
 0x73c   : > { %v4997_v54 = vsub.f32 1.5, %v4996_v34 }
 0x73d   : > { %v6233_v14 = vpop.eup %6232  ;;  %v4810_v47 = vadd.f32 1.1920929e-07, %v4778_v33 }
 0x73e   : > { %v4998_v11 = vmul.f32 %v6231_v46, %v4997_v54  ;;  %v5004_v43 = vmul.f32 %v6233_v14, %v4809_v29  ;;  %vm5010_vm11 = vweird.f32 %v6233_v14 }
 0x73f   : > { %6234 = vrsqrt.f32 %v4810_v47  ;;  %vm5011_vm12 = vmor %vm5009_vm8, %vm5010_vm11  ;;  %vm5019_vm14 = vweird.f32 %v4810_v47 }
 0x740   : > { %v5002_v48 = vsel %vm5001_vm4, %v6231_v46, %v4998_v11  ;;  %v5005_v36 = vmul.f32 %v6233_v14, %v5004_v43 }
 0x741   : > { %v5160_v0 = vmul.f32 %v5002_v48, %v9811_v61 }
 0x742   : > { %v5006_v24 = vmul.f32 0.5, %v5005_v36  ;;  %v4725_v26 = vpop.xlane.xlu2 %4724 }
 0x743   : > { %v4779_v9 = vmul.f32 %v4725_v26, %v6692_v56  ;;  %v5195_v7 = vmul.f32 %v9830_v25, %v5160_v0 }
 0x744   : > { %v5299_v35 = vpop.f32.mrf.mxu0  ;;  %v5007_v19 = vsub.f32 1.5, %v5006_v24 }
 0x745   : > { %5379 = vst [vmem:[%s10004_s21] sm:$0xff] %v5299_v35  ;;  %v6235_v18 = vpop.eup %6234  ;;  %v4811_v42 = vadd.f32 1.1920929e-07, %v4779_v9  ;;  %v5218_v62 = vpack.c.bf16 %v5195_v7, %v5194_v45 }
 0x746   : > { %v5014_v61 = vmul.f32 %v6235_v18, %v4810_v47  ;;  %v5008_v2 = vmul.f32 %v6233_v14, %v5007_v19  ;;  %vm5020_vm13 = vweird.f32 %v6235_v18 }
 0x747   : > { %6236 = vrsqrt.f32 %v4811_v42  ;;  %5706 = vmatmul.msk.bf16.gmra.mxu0 %vm10460_vm6, %v5218_v62  ;;  %vm5021_vm1 = vmor %vm5019_vm14, %vm5020_vm13  ;;  %vm5029_vm3 = vweird.f32 %v4811_v42 }
 0x748   : > { %v5015_v52 = vmul.f32 %v6235_v18, %v5014_v61  ;;  %v5012_v44 = vsel %vm5011_vm12, %v6233_v14, %v5008_v2 }
 0x749   : > { %v5161_v57 = vmul.f32 %v5012_v44, %v9822_v20 }
 0x74a   : > { %v5016_v49 = vmul.f32 0.5, %v5015_v52  ;;  %v4728_v59 = vpop.xlane.xlu1 %4727 }
 0x74b   : > { %v4780_v37 = vmul.f32 %v4728_v59, %v6692_v56  ;;  %v5196_v17 = vmul.f32 %v9830_v25, %v5161_v57 }
 0x74c   : > { %v5301_v53 = vpop.f32.mrf.mxu0  ;;  %v5017_v41 = vsub.f32 1.5, %v5016_v49 }
 0x74d   : > { %5380 = vst [vmem:[%s10004_s21 + $0x8] sm:$0xff] %v5301_v53  ;;  %v6237_v23 = vpop.eup %6236  ;;  %v4812_v13 = vadd.f32 1.1920929e-07, %v4780_v37 }
 0x74e   : > { %v5018_v31 = vmul.f32 %v6235_v18, %v5017_v41  ;;  %v5024_v16 = vmul.f32 %v6237_v23, %v4811_v42  ;;  %vm5030_vm2 = vweird.f32 %v6237_v23 }
 0x74f   : > { %6238 = vrsqrt.f32 %v4812_v13  ;;  %vm5031_vm5 = vmor %vm5029_vm3, %vm5030_vm2  ;;  %vm5039_vm7 = vweird.f32 %v4812_v13 }
 0x750   : > { %v5022_v28 = vsel %vm5021_vm1, %v6235_v18, %v5018_v31  ;;  %v5025_v58 = vmul.f32 %v6237_v23, %v5024_v16  ;;  %vm10463_vm1 = vmmov %vm10460_vm6 }
 0x751   : > { %v5162_v27 = vmul.f32 %v5022_v28, %v9839_v10 }
 0x752   : > { %v5026_v32 = vmul.f32 0.5, %v5025_v58  ;;  %v4731_v46 = vpop.xlane.xlu0 %4730 }
 0x753   : > { %v4781_v29 = vmul.f32 %v4731_v46, %v6692_v56  ;;  %v5197_v55 = vmul.f32 %v9830_v25, %v5162_v27 }
 0x754   : > { %v5027_v38 = vsub.f32 1.5, %v5026_v32  ;;  %v5304_v3 = vpop.f32.mrf.mxu0 }
 0x755   : > { %v6239_v34 = vpop.eup %6238  ;;  %v4813_v22 = vadd.f32 1.1920929e-07, %v4781_v29  ;;  %5381 = vst [vmem:[%s10004_s21 + $0x10] sm:$0xff] %v5304_v3  ;;  %v5219_v20 = vpack.c.bf16 %v5197_v55, %v5196_v17 }
 0x756   : > { %v5034_v33 = vmul.f32 %v6239_v34, %v4812_v13  ;;  %v5028_v10 = vmul.f32 %v6237_v23, %v5027_v38  ;;  %vm5040_vm0 = vweird.f32 %v6239_v34 }
 0x757   : > { %6240 = vrsqrt.f32 %v4813_v22  ;;  %5707 = vmatmul.msk.bf16.gmra.mxu0 %vm10461_vm9, %v5219_v20  ;;  %vm5041_vm10 = vmor %vm5039_vm7, %vm5040_vm0  ;;  %vm5049_vm11 = vweird.f32 %v4813_v22 }
 0x758   : > { %v5035_v30 = vmul.f32 %v6239_v34, %v5034_v33  ;;  %v5032_v11 = vsel %vm5031_vm5, %v6237_v23, %v5028_v10  ;;  %vm10464_vm9 = vmmov %vm10463_vm1 }
 0x759   : > { %v5163_v26 = vmul.f32 %v5032_v11, %v9855_v21 }
 0x75a   : > { %v5036_v54 = vmul.f32 0.5, %v5035_v30  ;;  %v4734_v14 = vpop.xlane.xlu2 %4733 }
 0x75b   : > { %v4782_v47 = vmul.f32 %v4734_v14, %v6692_v56  ;;  %v5198_v61 = vmul.f32 %v9830_v25, %v5163_v26 }
 0x75c   : > { %v5037_v43 = vsub.f32 1.5, %v5036_v54  ;;  %v5306_v5 = vpop.f32.mrf.mxu0 }
 0x75d   : > { %v6241_v48 = vpop.eup %6240  ;;  %v4814_v36 = vadd.f32 1.1920929e-07, %v4782_v47  ;;  %5382 = vst [vmem:[%s10004_s21 + $0x18] sm:$0xff] %v5306_v5 }
 0x75e   : > { %v5038_v0 = vmul.f32 %v6239_v34, %v5037_v43  ;;  %v5044_v24 = vmul.f32 %v6241_v48, %v4813_v22  ;;  %vm5050_vm4 = vweird.f32 %v6241_v48 }
 0x75f   : > { %6242 = vrsqrt.f32 %v4814_v36  ;;  %vm5051_vm8 = vmor %vm5049_vm11, %vm5050_vm4  ;;  %vm5059_vm13 = vweird.f32 %v4814_v36 }
 0x760   : > { %v5042_v9 = vsel %vm5041_vm10, %v6239_v34, %v5038_v0  ;;  %v5045_v35 = vmul.f32 %v6241_v48, %v5044_v24 }
 0x761   : > { %v5164_v45 = vmul.f32 %v5042_v9, %v9870_v15 }
 0x762   : > { %v5046_v7 = vmul.f32 0.5, %v5045_v35  ;;  %v4593_v19 = vpop.f32.mrf.mxu3  ;;  %v4737_v18 = vpop.xlane.xlu1 %4736 }
 0x763   : > { %v4594_v42 = vadd.f32 %v9961_v6, %v4593_v19  ;;  %v4783_v62 = vmul.f32 %v4737_v18, %v6692_v56  ;;  %v5199_v2 = vmul.f32 %v9830_v25, %v5164_v45  ;;  %v10055_v19 = vld [vmem:[%s10146_s8] ss:$0 sm:$0xff] }
 0x764   : > { %v5047_v52 = vsub.f32 1.5, %v5046_v7  ;;  %v5309_v21 = vpop.f32.mrf.mxu0 }
 0x765   : > { %v6243_v49 = vpop.eup %6242  ;;  %v10026_v59 = vadd.f32 %v4594_v42, %v9558_v8  ;;  %v4815_v37 = vadd.f32 1.1920929e-07, %v4783_v62  ;;  %5383 = vst [vmem:[%s10004_s21 + $0x20] sm:$0xff] %v5309_v21  ;;  %v5220_v15 = vpack.c.bf16 %v5199_v2, %v5198_v61 }
 0x766   : > { %v5054_v53 = vmul.f32 %v6243_v49, %v4814_v36  ;;  %v5048_v41 = vmul.f32 %v6241_v48, %v5047_v52  ;;  %vm5060_vm12 = vweird.f32 %v6243_v49 }
 0x767   : > { %6244 = vrsqrt.f32 %v4815_v37  ;;  %5708 = vmatmul.msk.bf16.gmra.mxu0 %vm10462_vm15, %v5220_v15  ;;  %v4661_v44 = vmul.f32 %v10026_v59, %v10026_v59  ;;  %vm5061_vm14 = vmor %vm5059_vm13, %vm5060_vm12  ;;  %vm5069_vm3 = vweird.f32 %v4815_v37 }
 0x768   : > { %v5055_v23 = vmul.f32 %v6243_v49, %v5054_v53  ;;  %v5052_v58 = vsel %vm5051_vm8, %v6241_v48, %v5048_v41  ;;  %vm10465_vm15 = vmmov %vm10463_vm1 }
 0x769   : > { %v4753_v13 = vsel %vm10460_vm6, %v4661_v44, 0.0  ;;  %v5165_v3 = vmul.f32 %v5052_v58, %v9886_v51 }
 0x76a   : > { %v5056_v31 = vmul.f32 0.5, %v5055_v23  ;;  %v4595_v8 = vpop.f32.mrf.mxu3  ;;  %4754 = vadd.xlane.f32.xlu1 %v4753_v13  ;;  %v4740_v16 = vpop.xlane.xlu0 %4739 }
 0x76b   : > { %v4596_v57 = vadd.f32 %v9961_v6, %v4595_v8  ;;  %v4784_v28 = vmul.f32 %v4740_v16, %v6692_v56  ;;  %v5200_v10 = vmul.f32 %v9830_v25, %v5165_v3 }
 0x76c   : > { %v5057_v27 = vsub.f32 1.5, %v5056_v31  ;;  %v5311_v32 = vpop.f32.mrf.mxu0 }
 0x76d   : > { %v6245_v46 = vpop.eup %6244  ;;  %v10036_v29 = vadd.f32 %v4596_v57, %v9582_v39  ;;  %v4816_v17 = vadd.f32 1.1920929e-07, %v4784_v28  ;;  %5384 = vst [vmem:[%s10004_s21 + $0x28] sm:$0xff] %v5311_v32 }
 0x76e   : > { %v5058_v55 = vmul.f32 %v6243_v49, %v5057_v27  ;;  %v5064_v38 = vmul.f32 %v6245_v46, %v4815_v37  ;;  %vm5070_vm2 = vweird.f32 %v6245_v46 }
 0x76f   : > { %6246 = vrsqrt.f32 %v4816_v17  ;;  %v4662_v6 = vmul.f32 %v10036_v29, %v10036_v29  ;;  %vm5071_vm5 = vmor %vm5069_vm3, %vm5070_vm2  ;;  %vm5079_vm7 = vweird.f32 %v4816_v17 }
 0x770   : > { %v5062_v34 = vsel %vm5061_vm14, %v6243_v49, %v5058_v55  ;;  %v5065_v22 = vmul.f32 %v6245_v46, %v5064_v38  ;;  %vm10466_vm14 = vmmov %vm10463_vm1 }
 0x771   : > { %v5166_v20 = vmul.f32 %v5062_v34, %v9899_v50  ;;  %v4756_v39 = vsel %vm10463_vm1, %v4662_v6, 0.0 }
 0x772   : > { %v5066_v33 = vmul.f32 0.5, %v5065_v22  ;;  %4757 = vadd.xlane.f32.xlu0 %v4756_v39 }
 0x773   : > { %v5201_v30 = vmul.f32 %v9830_v25, %v5166_v20 }
 0x774   : > { %v5067_v54 = vsub.f32 1.5, %v5066_v33  ;;  %v5314_v14 = vpop.f32.mrf.mxu0 }
 0x775   : > { %v6247_v51 = vpop.eup %6246  ;;  %5385 = vst [vmem:[%s10004_s21 + $0x30] sm:$0xff] %v5314_v14  ;;  %v5221_v47 = vpack.c.bf16 %v5201_v30, %v5200_v10 }
 0x776   : > { %v5074_v11 = vmul.f32 %v6247_v51, %v4816_v17  ;;  %v5068_v43 = vmul.f32 %v6245_v46, %v5067_v54  ;;  %vm5080_vm0 = vweird.f32 %v6247_v51 }
 0x777   : > { %5709 = vmatmul.msk.bf16.gmra.mxu0 %vm10464_vm9, %v5221_v47  ;;  %vm5081_vm10 = vmor %vm5079_vm7, %vm5080_vm0 }
 0x778   : > { %v5075_v50 = vmul.f32 %v6247_v51, %v5074_v11  ;;  %v5072_v48 = vsel %vm5071_vm5, %v6245_v46, %v5068_v43  ;;  %vm10467_vm7 = vmmov %vm10466_vm14 }
 0x779   : > { %v5167_v9 = vmul.f32 %v5072_v48, %v9911_v1 }
 0x77a   : > { %v5076_v5 = vmul.f32 0.5, %v5075_v50 }
 0x77b   : > { %v5202_v18 = vmul.f32 %v10055_v19, %v5167_v9 }
 0x77c   : > { %v5077_v36 = vsub.f32 1.5, %v5076_v5  ;;  %v5316_v25 = vpop.f32.mrf.mxu0 }
 0x77d   : > { %v4743_v0 = vpop.xlane.xlu2 %4742  ;;  %5386 = vst [vmem:[%s10004_s21 + $0x38] sm:$0xff] %v5316_v25 }
 0x77e   : > { %v4785_v24 = vmul.f32 %v4743_v0, %v6692_v56  ;;  %v5078_v26 = vmul.f32 %v6247_v51, %v5077_v36 }
 0x780   : > { %v4817_v35 = vadd.f32 1.1920929e-07, %v4785_v24  ;;  %v5082_v45 = vsel %vm5081_vm10, %v6247_v51, %v5078_v26 }
 0x781   : > { %v5168_v7 = vmul.f32 %v5082_v45, %v9921_v40 }
 0x782   : > { %6248 = vrsqrt.f32 %v4817_v35  ;;  %vm5089_vm6 = vweird.f32 %v4817_v35 }
 0x783   : > { %v5203_v42 = vmul.f32 %v10055_v19, %v5168_v7 }
 0x784   : > { %v5319_v61 = vpop.f32.mrf.mxu0 }
 0x785   : > { %v4746_v62 = vpop.xlane.xlu1 %4745  ;;  %5387 = vst [vmem:[%s10004_s21 + $0x40] sm:$0xff] %v5319_v61  ;;  %v5222_v2 = vpack.c.bf16 %v5203_v42, %v5202_v18 }
 0x786   : > { %v4786_v1 = vmul.f32 %v4746_v62, %v6692_v56 }
 0x787   : > { %5710 = vmatmul.msk.bf16.gmra.mxu0 %vm10465_vm15, %v5222_v2 }
 0x788   : > { %v6249_v52 = vpop.eup %6248  ;;  %v4818_v21 = vadd.f32 1.1920929e-07, %v4786_v1 }
 0x789   : > { %v5084_v40 = vmul.f32 %v6249_v52, %v4817_v35  ;;  %vm5090_vm4 = vweird.f32 %v6249_v52 }
 0x78a   : > { %6250 = vrsqrt.f32 %v4818_v21  ;;  %vm5091_vm11 = vmor %vm5089_vm6, %vm5090_vm4  ;;  %vm5099_vm12 = vweird.f32 %v4818_v21 }
 0x78b   : > { %v5085_v49 = vmul.f32 %v6249_v52, %v5084_v40 }
 0x78c   : > { %v5321_v15 = vpop.f32.mrf.mxu0 }
 0x78d   : > { %v5086_v37 = vmul.f32 0.5, %v5085_v49  ;;  %v4749_v53 = vpop.xlane.xlu0 %4748  ;;  %5388 = vst [vmem:[%s10004_s21 + $0x48] sm:$0xff] %v5321_v15 }
 0x78e   : > { %v4787_v44 = vmul.f32 %v4749_v53, %v6692_v56 }
 0x78f   : > { %v5087_v41 = vsub.f32 1.5, %v5086_v37 }
 0x790   : > { %v6251_v23 = vpop.eup %6250  ;;  %v4819_v13 = vadd.f32 1.1920929e-07, %v4787_v44 }
 0x791   : > { %v5094_v31 = vmul.f32 %v6251_v23, %v4818_v21  ;;  %v5088_v8 = vmul.f32 %v6249_v52, %v5087_v41  ;;  %vm5100_vm8 = vweird.f32 %v6251_v23 }
 0x792   : > { %6252 = vrsqrt.f32 %v4819_v13  ;;  %vm5101_vm13 = vmor %vm5099_vm12, %vm5100_vm8  ;;  %vm5109_vm9 = vweird.f32 %v4819_v13 }
 0x793   : > { %v5095_v16 = vmul.f32 %v6251_v23, %v5094_v31  ;;  %v5092_v32 = vsel %vm5091_vm11, %v6249_v52, %v5088_v8  ;;  %vm10468_vm12 = vmmov %vm10467_vm7 }
 0x794   : > { %v5324_v58 = vpop.f32.mrf.mxu0  ;;  %v5169_v6 = vmul.f32 %v5092_v32, %v9938_v12 }
 0x795   : > { %v5096_v57 = vmul.f32 0.5, %v5095_v16  ;;  %v4752_v28 = vpop.xlane.xlu2 %4751  ;;  %5389 = vst [vmem:[%s10004_s21 + $0x50] sm:$0xff] %v5324_v58 }
 0x796   : > { %v4788_v27 = vmul.f32 %v4752_v28, %v6692_v56  ;;  %v5204_v10 = vmul.f32 %v10055_v19, %v5169_v6 }
 0x797   : > { %v5097_v46 = vsub.f32 1.5, %v5096_v57 }
 0x798   : > { %v6253_v17 = vpop.eup %6252  ;;  %v4820_v55 = vadd.f32 1.1920929e-07, %v4788_v27 }
 0x799   : > { %v5098_v38 = vmul.f32 %v6251_v23, %v5097_v46  ;;  %v5104_v3 = vmul.f32 %v6253_v17, %v4819_v13  ;;  %vm5110_vm1 = vweird.f32 %v6253_v17 }
 0x79a   : > { %6254 = vrsqrt.f32 %v4820_v55  ;;  %vm5111_vm2 = vmor %vm5109_vm9, %vm5110_vm1  ;;  %vm5119_vm5 = vweird.f32 %v4820_v55 }
 0x79b   : > { %v5102_v34 = vsel %vm5101_vm13, %v6251_v23, %v5098_v38  ;;  %v5105_v22 = vmul.f32 %v6253_v17, %v5104_v3 }
 0x79c   : > { %v5170_v20 = vmul.f32 %v5102_v34, %v9950_v60  ;;  %v5326_v33 = vpop.f32.mrf.mxu0 }
 0x79d   : > { %v5106_v39 = vmul.f32 0.5, %v5105_v22  ;;  %5390 = vst [vmem:[%s10004_s21 + $0x58] sm:$0xff] %v5326_v33 }
 0x79e   : > { %v5205_v30 = vmul.f32 %v10055_v19, %v5170_v20 }
 0x79f   : > { %v5107_v54 = vsub.f32 1.5, %v5106_v39 }
 0x7a0   : > { %v6255_v14 = vpop.eup %6254  ;;  %v5223_v51 = vpack.c.bf16 %v5205_v30, %v5204_v10 }
 0x7a1   : > { %v5114_v47 = vmul.f32 %v6255_v14, %v4820_v55  ;;  %v5108_v12 = vmul.f32 %v6253_v17, %v5107_v54  ;;  %vm5120_vm3 = vweird.f32 %v6255_v14 }
 0x7a2   : > { %5711 = vmatmul.msk.bf16.gmra.mxu0 %vm10466_vm14, %v5223_v51  ;;  %vm5121_vm0 = vmor %vm5119_vm5, %vm5120_vm3 }
 0x7a3   : > { %v5115_v11 = vmul.f32 %v6255_v14, %v5114_v47  ;;  %v5112_v50 = vsel %vm5111_vm2, %v6253_v17, %v5108_v12 }
 0x7a4   : > { %v5329_v43 = vpop.f32.mrf.mxu0  ;;  %v5171_v36 = vmul.f32 %v5112_v50, %v9968_v63 }
 0x7a5   : > { %v5116_v60 = vmul.f32 0.5, %v5115_v11  ;;  %5391 = vst [vmem:[%s10004_s21 + $0x60] sm:$0xff] %v5329_v43 }
 0x7a6   : > { %v5206_v26 = vmul.f32 %v10055_v19, %v5171_v36 }
 0x7a7   : > { %v5117_v5 = vsub.f32 1.5, %v5116_v60 }
 0x7a9   : > { %v5118_v48 = vmul.f32 %v6255_v14, %v5117_v5 }
 0x7ab   : > { %v5122_v0 = vsel %vm5121_vm0, %v6255_v14, %v5118_v48 }
 0x7ac   : > { %v5172_v25 = vmul.f32 %v5122_v0, %v9978_v4  ;;  %v5331_v24 = vpop.f32.mrf.mxu0 }
 0x7ad   : > { %5392 = vst [vmem:[%s10004_s21 + $0x68] sm:$0xff] %v5331_v24 }
 0x7ae   : > { %v5207_v9 = vmul.f32 %v10055_v19, %v5172_v25 }
 0x7b0   : > { %v5224_v35 = vpack.c.bf16 %v5207_v9, %v5206_v26 }
 0x7b2   : > { %5712 = vmatmul.msk.bf16.gmra.mxu0 %vm10467_vm7, %v5224_v35 }
 0x7b4   : > { %v5334_v45 = vpop.f32.mrf.mxu0 }
 0x7b5   : > { %5393 = vst [vmem:[%s10004_s21 + $0x70] sm:$0xff] %v5334_v45 }
 0x7bc   : > { %v5336_v63 = vpop.f32.mrf.mxu0 }
 0x7bd   : > { %5394 = vst [vmem:[%s10004_s21 + $0x78] sm:$0xff] %v5336_v63 }
 0x7c4   : > { %v5339_v7 = vpop.f32.mrf.mxu0 }
 0x7c5   : > { %5395 = vst [vmem:[%s10004_s21 + $0x80] sm:$0xff] %v5339_v7 }
 0x7cc   : > { %v5341_v18 = vpop.f32.mrf.mxu0 }
 0x7cd   : > { %5396 = vst [vmem:[%s10004_s21 + $0x88] sm:$0xff] %v5341_v18 }
 0x7d4   : > { %v5344_v4 = vpop.f32.mrf.mxu0 }
 0x7d5   : > { %5397 = vst [vmem:[%s10004_s21 + $0x90] sm:$0xff] %v5344_v4 }
 0x7dc   : > { %v5346_v42 = vpop.f32.mrf.mxu0 }
 0x7dd   : > { %v4755_v62 = vpop.xlane.xlu1 %4754  ;;  %5398 = vst [vmem:[%s10004_s21 + $0x98] sm:$0xff] %v5346_v42 }
 0x7de   : > { %v4789_v61 = vmul.f32 %v4755_v62, %v6692_v56 }
 0x7e0   : > { %v4821_v1 = vadd.f32 1.1920929e-07, %v4789_v61 }
 0x7e2   : > { %6256 = vrsqrt.f32 %v4821_v1  ;;  %vm5129_vm15 = vweird.f32 %v4821_v1 }
 0x7e4   : > { %v5349_v2 = vpop.f32.mrf.mxu0 }
 0x7e5   : > { %5399 = vst [vmem:[%s10004_s21 + $0xa0] sm:$0xff] %v5349_v2  ;;  %v4758_v52 = vpop.xlane.xlu0 %4757 }
 0x7e6   : > { %v4790_v21 = vmul.f32 %v4758_v52, %v6692_v56 }
 0x7e8   : > { %v6257_v40 = vpop.eup %6256  ;;  %v4822_v49 = vadd.f32 1.1920929e-07, %v4790_v21 }
 0x7e9   : > { %v5124_v37 = vmul.f32 %v6257_v40, %v4821_v1  ;;  %vm5130_vm10 = vweird.f32 %v6257_v40 }
 0x7ea   : > { %6258 = vrsqrt.f32 %v4822_v49  ;;  %vm5131_vm4 = vmor %vm5129_vm15, %vm5130_vm10  ;;  %vm5139_vm11 = vweird.f32 %v4822_v49 }
 0x7eb   : > { %v5125_v15 = vmul.f32 %v6257_v40, %v5124_v37 }
 0x7ec   : > { %v5351_v53 = vpop.f32.mrf.mxu0 }
 0x7ed   : > { %v5126_v44 = vmul.f32 0.5, %v5125_v15  ;;  %5400 = vst [vmem:[%s10004_s21 + $0xa8] sm:$0xff] %v5351_v53 }
 0x7ef   : > { %v5127_v41 = vsub.f32 1.5, %v5126_v44 }
 0x7f0   : > { %v6259_v23 = vpop.eup %6258 }
 0x7f1   : > { %v5134_v13 = vmul.f32 %v6259_v23, %v4822_v49  ;;  %v5128_v31 = vmul.f32 %v6257_v40, %v5127_v41  ;;  %vm5140_vm6 = vweird.f32 %v6259_v23 }
 0x7f2   : > { %vm5141_vm8 = vmor %vm5139_vm11, %vm5140_vm6 }
 0x7f3   : > { %v5135_v8 = vmul.f32 %v6259_v23, %v5134_v13  ;;  %v5132_v56 = vsel %vm5131_vm4, %v6257_v40, %v5128_v31 }
 0x7f4   : > { %v5354_v16 = vpop.f32.mrf.mxu0  ;;  %v5173_v27 = vmul.f32 %v5132_v56, %v10026_v59 }
 0x7f5   : > { %v5136_v57 = vmul.f32 0.5, %v5135_v8  ;;  %5401 = vst [vmem:[%s10004_s21 + $0xb0] sm:$0xff] %v5354_v16 }
 0x7f6   : > { %v5208_v55 = vmul.f32 %v10055_v19, %v5173_v27 }
 0x7f7   : > { %v5137_v28 = vsub.f32 1.5, %v5136_v57 }
 0x7f9   : > { %v5138_v58 = vmul.f32 %v6259_v23, %v5137_v28 }
 0x7fb   : > { %v5142_v32 = vsel %vm5141_vm8, %v6259_v23, %v5138_v58 }
 0x7fc   : > { %v5174_v46 = vmul.f32 %v5142_v32, %v10036_v29  ;;  %v5356_v17 = vpop.f32.mrf.mxu0 }
 0x7fd   : > { %5402 = vst [vmem:[%s10004_s21 + $0xb8] sm:$0xff] %v5356_v17 }
 0x7fe   : > { %v5209_v38 = vmul.f32 %v10055_v19, %v5174_v46 }
 0x800   : > { %v5225_v3 = vpack.c.bf16 %v5209_v38, %v5208_v55 }
 0x802   : > { %5713 = vmatmul.msk.bf16.gmra.mxu0 %vm10468_vm12, %v5225_v3 }
 0x804   : > { %v5359_v6 = vpop.f32.mrf.mxu0 }
 0x805   : > { %5403 = vst [vmem:[%s10004_s21 + $0xc0] sm:$0xff] %v5359_v6 }
 0x80c   : > { %v5361_v59 = vpop.f32.mrf.mxu0 }
 0x80d   : > { %5404 = vst [vmem:[%s10004_s21 + $0xc8] sm:$0xff] %v5361_v59 }
 0x81f   : > { %v5364_v34 = vpop.f32.mrf.mxu0 }
 0x820   : > { %5405 = vst [vmem:[%s10004_s21 + $0xd0] sm:$0xff] %v5364_v34 }
 0x827   : > { %v5366_v29 = vpop.f32.mrf.mxu0 }
 0x828   : > { %5406 = vst [vmem:[%s10004_s21 + $0xd8] sm:$0xff] %v5366_v29 }
 0x82f   : > { %v5369_v22 = vpop.f32.mrf.mxu0 }
 0x830   : > { %5407 = vst [vmem:[%s10004_s21 + $0xe0] sm:$0xff] %v5369_v22 }
 0x837   : > { %v5371_v20 = vpop.f32.mrf.mxu0 }
 0x838   : > { %5408 = vst [vmem:[%s10004_s21 + $0xe8] sm:$0xff] %v5371_v20 }
 0x87f   : > { %v5374_v19 = vpop.f32.mrf.mxu0 }
 0x880   : > { %5409 = vst [vmem:[%s10004_s21 + $0xf0] sm:$0xff] %v5374_v19 }
 0x887   : > { %v5376_v39 = vpop.f32.mrf.mxu0 }
 0x888   : > { %5410 = vst [vmem:[%s10004_s21 + $0xf8] sm:$0xff] %v5376_v39 }
 0x889   : > { %6356 = shalt.err (!%p6353_p4)
}
 0x88a   : > { %s6401_s18 = smov 128   ;;  %s6402_s21 = smov 8  }
 0x88b   : > { %5752 = dma.vmem_to_hbm [thread:$0]  (%p6508_p11), %s5426_s12, 4096, %s5428_s26, %s5412_s28, %s6401_s18, %s6401_s18, %s6402_s21  }
 0x88c PF: > { %s5442_s30 = sand.u32 1, %s6383_s13   ;;  %p10470_p7 = scmp.ge.s32.totalorder %s6395_s16, 2 }
 0x88d   : > { %s5443_s11 = scalar_lea.sflag [#allocation4], %s5442_s30 }
 0x88e   : > { %p5759_p5 = pnand %p10470_p7, %p6512_p12 }
 0x890   : > { %p5760_p8 = pneg %p5759_p5 }
 0x892   : > { %6378 = dma.done.wait (%p5760_p8), %s5443_s11, 4096  }
 0x893   : > { %6380 = vsyncadd (%p5760_p8), %s5443_s11, 4294963200  ;;  %s10471_s16 = sld [smem:[#allocation9_spill]]  ;;  %s10474_s13 = smov %s6387_s14 }
 0x894   : > { %s10472_s27 = sld [smem:[#allocation8_spill]] }
 0x895   : > { %s10473_s15 = sld [smem:[#allocation10_spill]] }
 0x899   : > { %p23_p10 = scmp.ge.s32.totalorder %s10471_s16, 4  }
 0x89a   : > { %s10475_s14 = smov %s10472_s27 }
 0x89b   :  { %25 = sbr.rel (!%p23_p10) target bundleno = 5 (0x5), region = 112 }
 0x8a0   :  { %5449 = vsyncpa [#allocation3], 1 }
 0x8a1   :  { %5451 = vsyncpa [#allocation3 + $0x1], 1 }
 0x8a2   :  { %5452 = vsyncpa [#allocation4], 1 }
 0x8a3   :  { %5454 = vsyncpa [#allocation4 + $0x1], 1 }

</bundles_post_ra>
